<compile_context>
chip_gen: v7x
topology: tpu7x:2x2x1
jax: 0.10.0
libtpu: 0.0.40
codegen_flags: <defaults>
</compile_context>

<pallas_src>
import functools
import math

import jax
import jax.numpy as jnp
import numpy as np
from jax.experimental import pallas as pl
from jax.experimental.pallas import tpu as pltpu

CFG = dict(
    w_dim=32,
    num_ws=6,                 # 1 + 2 + 2 convs + last toRGB  (blocks at res 4, 8, 16)
    test_resolution=8,        # h = w
    num_steps=8,              # samples per ray (coarse == fine count)
    grid_res=16,              # SDF grid resolution
    num_fold=64,              # number of folded sphere points
    mlp_hid=64,
    radius=1.3, fov=30.0, ray_start=0.8, ray_end=1.8,
    cube_scale=0.5,
    clamp_mode='relu',
    use_inf_depth=True,       # cfg.bg_model.type is None
    white_back_end_idx=0,     # cfg.dataset.white_back == False
    last_back=False,
)

LRELU_GAIN = float(np.sqrt(2.0))
PARALLEL_B = pltpu.CompilerParams(dimension_semantics=("parallel",))


# ----------------------------------------------------------------------------- Pallas kernels

def _texdec_kernel(const_ref, st_ref, up1_ref, up2_ref,
                   cw_ref, cb_ref, tw_ref, tb_ref, o_ref):
    """Entire texture decoder (res 4 -> 8 -> 16, skip arch) fused: modulated 1x1 convs,
    nearest 2x upsamples (binary upsample matrices on the MXU) and toRGB skip
    accumulation on VMEM-resident activations.  toRGB weights are zero-padded to 128
    output channels so the final store is lane-dense."""
    st = st_ref[0]                                   # [8, Cin] precomputed affine styles

    def mod(x, si, w, b, demodulate, act):
        s = st[si:si + 1]                            # [1, Cin]
        y = jnp.dot(x * s, w, preferred_element_type=jnp.float32)
        if demodulate:
            d = jnp.dot(s * s, w * w, preferred_element_type=jnp.float32)   # [1, Cout]
            y = y * jax.lax.rsqrt(jnp.maximum(d, 0.0) + 1e-8)
        y = y + b
        if act == 'lrelu':
            y = jnp.where(y >= 0.0, y, 0.2 * y) * LRELU_GAIN
        return y

    up1 = up1_ref[...]                               # [64, 16]   nearest 4 -> 8
    up2 = up2_ref[...]                               # [256, 64]  nearest 8 -> 16

    # res 4
    x = const_ref[...]                               # [16, 32]
    x = mod(x, 0, cw_ref[0], cb_ref[0], True, 'lrelu')
    img = mod(x, 1, tw_ref[0], tb_ref[0], False, 'linear')          # [16, 128]
    # res 8
    x = jnp.dot(up1, x, preferred_element_type=jnp.float32)         # [64, 32]
    x = mod(x, 2, cw_ref[1], cb_ref[1], True, 'lrelu')
    x = mod(x, 3, cw_ref[2], cb_ref[2], True, 'lrelu')
    img = (jnp.dot(up1, img, preferred_element_type=jnp.float32)
           + mod(x, 4, tw_ref[1], tb_ref[1], False, 'linear'))      # [64, 128]
    # res 16
    x = jnp.dot(up2, x, preferred_element_type=jnp.float32)         # [256, 32]
    x = mod(x, 5, cw_ref[3], cb_ref[3], True, 'lrelu')
    x = mod(x, 6, cw_ref[4], cb_ref[4], True, 'lrelu')
    img = (jnp.dot(up2, img, preferred_element_type=jnp.float32)
           + mod(x, 7, tw_ref[2], tb_ref[2], False, 'linear'))      # [256, 128]

    o_ref[0] = img.astype(o_ref.dtype)


def _render_points_kernel(p_ref, fold_ref, feat_ref,
                          w1f_ref, w1x_ref, b1_ref, w2_ref, b2_ref, w3_ref, b3_ref,
                          o_ref):
    """Fused point shading for one [TN]-point tile of one batch element:
      KNN(K=4) inverse-distance feature blend + TextureMLP (36->64->64->3, lrelu)
      + Laplace-CDF sigma.  Output [TN, 8] = [rgb, sigma, 0...].

    p_ref[0]:    [TN, 8]  = [x, y, z, |c|^2, nx, ny, nz, sdf]   (packed host-side)
    fold_ref[0]: [16, Mp] = rows 0-2: -2*f_{x,y,z}; row 3: ones; rows 4-7: 0;
                            row 8: |f|^2; rows 9-15: 0
    feat_ref[0]: [Mp, 32] folding-point triplane features (zero-padded past M).
    """
    K = 4
    p = p_ref[0]                                     # [TN, 8]
    fold = fold_ref[0]                               # [16, Mp]
    feat = feat_ref[0]                               # [Mp, Cf]
    TN = p.shape[0]
    Mp = fold.shape[1]

    # squared distances on the MXU: d2 = |c|^2 - 2 c.f + |f|^2.  Rows 4-7 of `fold`
    # are zero, so the normal/sdf columns of p do not contaminate the product.
    d2 = jnp.dot(p, fold[0:8], precision=jax.lax.Precision.HIGHEST,
                 preferred_element_type=jnp.float32) + fold[8:9]
    d2 = jnp.maximum(d2, 0.0)                        # guard f32 cancellation near zero

    # top-K (K=4) selection: iterated (min, first-argmin); inverse-distance blend weights.
    # TODO(synk): the index-in-mantissa bit-packing trick would halve the lane reductions.
    iota = jax.lax.broadcasted_iota(jnp.int32, (TN, Mp), 1)
    remaining = d2
    W = jnp.zeros((TN, Mp), jnp.float32)
    for _ in range(K):
        dmin = jnp.min(remaining, axis=-1, keepdims=True)
        cand = jnp.where(remaining <= dmin, iota, Mp)
        first = jnp.min(cand, axis=-1, keepdims=True)        # first index attaining min
        hit = (iota == first).astype(jnp.float32)
        wk = 1.0 / (jnp.sqrt(jnp.maximum(dmin, 0.0)) + 1e-7)  # weights = 1/(sqrt(d2)+1e-7)
        W = W + wk * hit
        remaining = jnp.where(hit > 0.0, 1e30, remaining)
    W = W / jnp.maximum(jnp.sum(W, axis=-1, keepdims=True), 1e-12)
    fused = jnp.dot(W, feat, preferred_element_type=jnp.float32)        # [TN, Cf]

    # MLP layer 1: feature part + (normals|sdf) part via one tiny MXU matmul
    # (w1x rows 0-3 are zero so x/y/z/|c|^2 contribute nothing).
    h = (jnp.dot(fused, w1f_ref[...], preferred_element_type=jnp.float32)
         + jnp.dot(p, w1x_ref[...], preferred_element_type=jnp.float32)
         + b1_ref[...])
    h = jnp.where(h >= 0.0, h, 0.2 * h) * LRELU_GAIN
    h = jnp.dot(h, w2_ref[...], preferred_element_type=jnp.float32) + b2_ref[...]
    h = jnp.where(h >= 0.0, h, 0.2 * h) * LRELU_GAIN
    rgbp = jnp.dot(h, w3_ref[...], preferred_element_type=jnp.float32) + b3_ref[...]  # [TN, 8]

    # Laplace-CDF sigma from sdf, written into channel 3.  NOTE: relies on the
    # zero-pad invariant of w3/b3 columns >= 3 (kept explicitly in _prepare_mlp).
    beta = 0.005
    sdf = p[:, 7:8]                                  # [TN, 1]
    sgn = jnp.where(sdf > 0.0, 1.0, jnp.where(sdf < 0.0, -1.0, 0.0))
    sigmas = (1.0 / beta) * (0.5 + 0.5 * sgn * (jnp.exp(-jnp.abs(sdf) / beta) - 1.0))
    col = jax.lax.broadcasted_iota(jnp.int32, rgbp.shape, 1)
    out = rgbp + sigmas * (col == 3).astype(jnp.float32)
    o_ref[0] = out.astype(o_ref.dtype)


def _integrate_kernel(rs_ref, z_ref, o_ref, *, use_inf_depth, clamp_mode,
                      white_back_end_idx, last_back):
    """fancy_integration (noise_std = 0, eval mode), fully vectorized.
    Channel-major input rs[0] = [4, R, S] (row 3 = sigma) avoids lane extraction.
    Output packed into one lane-dense [R, 128] slab:
    [weights(0:S) | rgb(S:S+3) | depth(S+3) | final_T(S+4) | zeros]."""
    rs = rs_ref[0]                                   # [4, R, S]
    z = z_ref[0]                                     # [R, S]
    R, S = z.shape
    P = o_ref.shape[-1]

    sig = rs[3]                                      # [R, S]
    last_delta = 1e10 if use_inf_depth else 1.0 / S
    deltas = jnp.concatenate(
        [z[:, 1:] - z[:, :-1], jnp.full((R, 1), last_delta, jnp.float32)], axis=-1)
    if clamp_mode == 'relu':
        s_act = jnp.maximum(sig, 0.0)
    else:  # 'softplus' (numerically stable form)
        s_act = jnp.maximum(sig, 0.0) + jnp.log1p(jnp.exp(-jnp.abs(sig)))
    expo = jnp.minimum(deltas * s_act, 80.0)         # exp(-80) ~ 0; keeps everything finite
    alphas = 1.0 - jnp.exp(-expo)
    logt = jnp.log(jnp.maximum(1.0 - alphas, 0.0) + 1e-10)

    # exclusive cumulative product along S via a strictly-upper-triangular matmul
    ri = jax.lax.broadcasted_iota(jnp.int32, (S, S), 0)
    ci = jax.lax.broadcasted_iota(jnp.int32, (S, S), 1)
    tri = (ri < ci).astype(jnp.float32)                                   # tri[j, s] = j < s
    t_excl = jnp.exp(jnp.minimum(
        jnp.dot(logt, tri, preferred_element_type=jnp.float32), 0.0))
    w = alphas * t_excl                                                    # [R, S]
    wsum = jnp.sum(w, axis=-1, keepdims=True)
    # TODO(synk): final transmittance = product over ALL samples of (1 - alpha + 1e-10)
    # (used as the 'mask' channel downstream); exact reference convention unverified.
    t_final = jnp.exp(jnp.minimum(jnp.sum(logt, axis=-1, keepdims=True), 0.0))

    r_ch = [jnp.sum(w * rs[ch], axis=-1, keepdims=True) for ch in range(3)]
    if white_back_end_idx > 0:
        for ch in range(white_back_end_idx):
            r_ch[ch] = r_ch[ch] + (1.0 - wsum)
    # TODO(synk): last_back branch of fancy_integration not implemented (disabled here).
    depth = jnp.sum(w * z, axis=-1, keepdims=True)

    pad = jnp.zeros((R, P - (S + 5)), jnp.float32)
    o_ref[0] = jnp.concatenate([w] + r_ch + [depth, t_final, pad], axis=-1)


# ----------------------------------------------------------------------------- Pallas wrappers

def _nearest_up_matrix(src_res):
    """Binary [4*src^2, src^2] matrix implementing nearest 2x upsample of a row-major
    flattened [src, src] grid."""
    tgt = 2 * src_res
    U = np.zeros((tgt * tgt, src_res * src_res), np.float32)
    for pidx in range(tgt * tgt):
        pr, pc = pidx // tgt, pidx % tgt
        U[pidx, (pr // 2) * src_res + (pc // 2)] = 1.0
    return jnp.asarray(U)


def _compute_styles(tex_ws, dec):
    """Affine style vectors, same w-index walk as StyleGAN2 skip arch (toRGB reuses w)."""
    styles = []
    w_idx = 0
    for res in (4, 8, 16):
        if res > 4:
            styles.append(tex_ws[:, w_idx] @ dec[f'aff0_{res}_w'] + dec[f'aff0_{res}_b'])
            w_idx += 1
        styles.append(tex_ws[:, w_idx] @ dec[f'aff1_{res}_w'] + dec[f'aff1_{res}_b'])
        w_idx += 1
        styles.append(tex_ws[:, w_idx] @ dec[f'affrgb_{res}_w'] + dec[f'affrgb_{res}_b'])
    return jnp.stack(styles, axis=1)                 # [B, 8, C]


def texture_decoder_forward(tex_ws, dec):
    """Simplified SynthesisBlocksSequence (skip arch, res 4->8->16, 96-ch toRGB output)
    as ONE fused Pallas kernel per batch element.
    TODO(synk): 3x3 modulated convs, noise injection and FIR resampling of the StyleGAN2
    SynthesisBlock are replaced by 1x1 modulated convs + nearest upsampling."""
    B = tex_ws.shape[0]
    styles = _compute_styles(tex_ws, dec)            # [B, 8, 32]
    up1 = _nearest_up_matrix(4)                      # [64, 16]
    up2 = _nearest_up_matrix(8)                      # [256, 64]
    Cimg = dec['trgb_16_w'].shape[1]                 # 96
    CP = 128                                         # lane-dense padded toRGB width

    conv_w = jnp.stack([dec['conv1_4_w'], dec['conv0_8_w'], dec['conv1_8_w'],
                        dec['conv0_16_w'], dec['conv1_16_w']])              # [5, 32, 32]
    conv_b = jnp.stack([dec['conv1_4_b'], dec['conv0_8_b'], dec['conv1_8_b'],
                        dec['conv0_16_b'], dec['conv1_16_b']])              # [5, 1, 32]
    pad_w = lambda a: jnp.pad(a, ((0, 0), (0, CP - a.shape[1])))
    trgb_w = jnp.stack([pad_w(dec['trgb_4_w']), pad_w(dec['trgb_8_w']),
                        pad_w(dec['trgb_16_w'])])                           # [3, 32, 128]
    trgb_b = jnp.stack([pad_w(dec['trgb_4_b']), pad_w(dec['trgb_8_b']),
                        pad_w(dec['trgb_16_b'])])                           # [3, 1, 128]

    full = lambda a: pl.BlockSpec(a.shape, lambda b: (0,) * a.ndim)
    img = pl.pallas_call(
        _texdec_kernel,
        out_shape=jax.ShapeDtypeStruct((B, 256, CP), jnp.float32),
        grid=(B,),
        in_specs=[full(dec['const']),
                  pl.BlockSpec((1, 8, 32), lambda b: (b, 0, 0)),
                  full(up1), full(up2),
                  full(conv_w), full(conv_b), full(trgb_w), full(trgb_b)],
        out_specs=pl.BlockSpec((1, 256, CP), lambda b: (b, 0, 0)),
        compiler_params=PARALLEL_B,
    )(dec['const'], styles, up1, up2, conv_w, conv_b, trgb_w, trgb_b)
    img = img[:, :, :Cimg]                                          # drop lane padding
    return img.reshape(B, 16, 16, Cimg).transpose(0, 3, 1, 2)       # NCHW: [B, 96, 16, 16]


def _prepare_mlp(mlp):
    """Repack TextureMLP weights: feature part of layer 1, plus an [8, H] auxiliary
    matrix aligned to the packed point layout [x, y, z, |c|^2, nx, ny, nz, sdf]
    (rows 0-3 zero).  w3/b3 are zero-padded to 8 output columns (sigma column stays 0)."""
    w1 = mlp['w1']
    H = w1.shape[1]
    cf = w1.shape[0] - 4                                            # 32 feature rows
    w1x = jnp.concatenate([jnp.zeros((4, H), w1.dtype), w1[cf:cf + 4]], axis=0)  # [8, H]
    w3 = mlp['w3']
    padc = 8 - w3.shape[1]
    return dict(w1f=w1[:cf], w1x=w1x, b1=mlp['b1'],
                w2=mlp['w2'], b2=mlp['b2'],
                w3=jnp.pad(w3, ((0, 0), (0, padc))),
                b3=jnp.pad(mlp['b3'], ((0, 0), (0, padc))))


def _pack_folding(folding_points, sphere_uv_f, pad_coord=100.0):
    """Pad fold points/features to 128 lanes and pack the distance operand
    [−2f | ones | 0 | |f|^2 | 0] as a [B, 16, Mp] array (pads at coord 100 keep |f|^2
    well inside f32 precision and still far outside any real distance)."""
    B, M, _ = folding_points.shape
    Cf = sphere_uv_f.shape[-1]
    Mp = ((M + 127) // 128) * 128
    pad_m = Mp - M
    if pad_m:
        folding_points = jnp.concatenate(
            [folding_points, jnp.full((B, pad_m, 3), pad_coord, folding_points.dtype)], axis=1)
        sphere_uv_f = jnp.concatenate(
            [sphere_uv_f, jnp.zeros((B, pad_m, Cf), sphere_uv_f.dtype)], axis=1)
    fp_t = jnp.transpose(folding_points, (0, 2, 1))                  # [B, 3, Mp]
    f2 = jnp.sum(fp_t * fp_t, axis=1, keepdims=True)                 # [B, 1, Mp]
    fold_pack = jnp.concatenate(
        [-2.0 * fp_t,
         jnp.ones((B, 1, Mp), jnp.float32),
         jnp.zeros((B, 4, Mp), jnp.float32),
         f2,
         jnp.zeros((B, 7, Mp), jnp.float32)], axis=1)                # [B, 16, Mp]
    return fold_pack, sphere_uv_f                                    # feats: [B, Mp, Cf]


def render_points(pts_pack, fold_pack, feat_pad, mp):
    """Fused KNN + TextureMLP + sigma kernel, tiled over the point axis.
    pts_pack [B, N, 8] -> out [B, N, 8]."""
    B, N, _ = pts_pack.shape
    Mp, Cf = feat_pad.shape[1], feat_pad.shape[2]
    tn = 128 if N % 128 == 0 else N
    nt = N // tn
    full = lambda a: pl.BlockSpec(a.shape, lambda b, t: (0,) * a.ndim)
    return pl.pallas_call(
        _render_points_kernel,
        out_shape=jax.ShapeDtypeStruct((B, N, 8), jnp.float32),
        grid=(B, nt),
        in_specs=[pl.BlockSpec((1, tn, 8), lambda b, t: (b, t, 0)),
                  pl.BlockSpec((1, 16, Mp), lambda b, t: (b, 0, 0)),
                  pl.BlockSpec((1, Mp, Cf), lambda b, t: (b, 0, 0)),
                  full(mp['w1f']), full(mp['w1x']), full(mp['b1']),
                  full(mp['w2']), full(mp['b2']), full(mp['w3']), full(mp['b3'])],
        out_specs=pl.BlockSpec((1, tn, 8), lambda b, t: (b, t, 0)),
        compiler_params=pltpu.CompilerParams(
            dimension_semantics=("parallel", "parallel")),
    )(pts_pack, fold_pack, feat_pad,
      mp['w1f'], mp['w1x'], mp['b1'], mp['w2'], mp['b2'], mp['w3'], mp['b3'])


def fancy_integration(rgb_sigma_cm, z_vals, cfg):
    """rgb_sigma_cm: [B, 4, HW, S] channel-major (row 3 = sigma); z_vals: [B, HW, S]."""
    B, C, HW, S = rgb_sigma_cm.shape
    P = 128
    kern = functools.partial(_integrate_kernel,
                             use_inf_depth=cfg['use_inf_depth'],
                             clamp_mode=cfg['clamp_mode'],
                             white_back_end_idx=cfg['white_back_end_idx'],
                             last_back=cfg['last_back'])
    packed = pl.pallas_call(
        kern,
        out_shape=jax.ShapeDtypeStruct((B, HW, P), jnp.float32),
        grid=(B,),
        in_specs=[pl.BlockSpec((1, C, HW, S), lambda b: (b, 0, 0, 0)),
                  pl.BlockSpec((1, HW, S), lambda b: (b, 0, 0))],
        out_specs=pl.BlockSpec((1, HW, P), lambda b: (b, 0, 0)),
        compiler_params=PARALLEL_B,
    )(rgb_sigma_cm, z_vals)
    return dict(weights=packed[:, :, :S],
                rendered_feats=packed[:, :, S:S + 3],
                depth=packed[:, :, S + 3:S + 4],
                final_transmittance=packed[:, :, S + 4])


# ----------------------------------------------------------------------------- plain-JAX glue

def _safe_normalize(v, axis=-1):
    return v / jnp.maximum(jnp.linalg.norm(v, axis=axis, keepdims=True), 1e-12)


def _torch_gradient_1d(a, axis):
    """torch.gradient semantics (spacing 1, edge_order=1)."""
    n = a.shape[axis]

    def sl(s, e):
        idx = [slice(None)] * a.ndim
        idx[axis] = slice(s, e)
        return a[tuple(idx)]

    interior = (sl(2, n) - sl(0, n - 2)) * 0.5
    first = sl(1, 2) - sl(0, 1)
    last = sl(n - 1, n) - sl(n - 2, n - 1)
    return jnp.concatenate([first, interior, last], axis=axis)


def grid_sample_3d(vol, coords):
    """F.grid_sample 3D: trilinear, padding_mode='border', align_corners=False.
    vol: [B, C, D, H, W]; coords: [B, N, 3] with (x, y, z) in [-1, 1]. Returns [B, N, C]."""
    B, C, D, H, W = vol.shape

    def unnorm(c, size):
        return jnp.clip((c + 1.0) * size / 2.0 - 0.5, 0.0, size - 1.0)

    x = unnorm(coords[..., 0], W)
    y = unnorm(coords[..., 1], H)
    z = unnorm(coords[..., 2], D)
    x0 = jnp.floor(x); y0 = jnp.floor(y); z0 = jnp.floor(z)
    x1 = jnp.minimum(x0 + 1.0, W - 1.0)
    y1 = jnp.minimum(y0 + 1.0, H - 1.0)
    z1 = jnp.minimum(z0 + 1.0, D - 1.0)
    wx = x - x0; wy = y - y0; wz = z - z0
    toi = lambda v: v.astype(jnp.int32)

    def per_batch(v, z0i, z1i, y0i, y1i, x0i, x1i, wxb, wyb, wzb):
        flat = v.reshape(C, D * H * W)
        g = lambda zi, yi, xi: jnp.take(flat, (zi * H + yi) * W + xi, axis=1)  # [C, N]
        out = (g(z0i, y0i, x0i) * (1 - wzb) * (1 - wyb) * (1 - wxb)
               + g(z0i, y0i, x1i) * (1 - wzb) * (1 - wyb) * wxb
               + g(z0i, y1i, x0i) * (1 - wzb) * wyb * (1 - wxb)
               + g(z0i, y1i, x1i) * (1 - wzb) * wyb * wxb
               + g(z1i, y0i, x0i) * wzb * (1 - wyb) * (1 - wxb)
               + g(z1i, y0i, x1i) * wzb * (1 - wyb) * wxb
               + g(z1i, y1i, x0i) * wzb * wyb * (1 - wxb)
               + g(z1i, y1i, x1i) * wzb * wyb * wxb)
        return out.T
    return jax.vmap(per_batch)(vol, toi(z0), toi(z1), toi(y0), toi(y1),
                               toi(x0), toi(x1), wx, wy, wz)


def grid_sample_2d(planes, uv):
    """Bilinear grid_sample, padding_mode='border', align_corners=False.
    planes: [B, C, H, W]; uv: [B, M, 2] (x, y) in [-1, 1]. Returns [B, M, C]."""
    def single(plane, uvb):
        C, H, W = plane.shape
        x = jnp.clip((uvb[:, 0] + 1.0) * W / 2.0 - 0.5, 0.0, W - 1.0)
        y = jnp.clip((uvb[:, 1] + 1.0) * H / 2.0 - 0.5, 0.0, H - 1.0)
        x0 = jnp.floor(x); y0 = jnp.floor(y)
        x1 = jnp.minimum(x0 + 1.0, W - 1.0)
        y1 = jnp.minimum(y0 + 1.0, H - 1.0)
        wx = x - x0; wy = y - y0
        flat = plane.reshape(C, H * W)
        g = lambda yi, xi: jnp.take(flat, (yi * W + xi).astype(jnp.int32), axis=1)
        out = (g(y0, x0) * (1 - wy) * (1 - wx) + g(y0, x1) * (1 - wy) * wx
               + g(y1, x0) * wy * (1 - wx) + g(y1, x1) * wy * wx)
        return out.T
    return jax.vmap(single)(planes, uv)


def get_feat_from_triplane(coords, tex_x, scale=1.0):
    # TODO(synk): exact plane-projection / scale convention of get_feat_from_triplane is
    # not provided; using xy / xz / yz projections of coords / scale with border padding.
    B, Ctot, R, _ = tex_x.shape
    Cp = Ctot // 3
    planes = tex_x.reshape(B, 3, Cp, R, R)
    c = coords / scale
    uvs = [c[..., jnp.array([0, 1])], c[..., jnp.array([0, 2])], c[..., jnp.array([1, 2])]]
    feats = [grid_sample_2d(planes[:, i], uv) for i, uv in enumerate(uvs)]
    return jnp.stack(feats, axis=1)   # [B, 3, M, Cp]


def fold_sdf_synthetic(points, grid_res, num_fold):
    # TODO(synk): the real FoldSDF loads a pretrained checkpoint; synthesize deterministic
    # stand-in outputs (folded sphere points / normals, sphere SDF grid) with matching shapes.
    B = points.shape[0]
    k = jnp.arange(num_fold, dtype=jnp.float32)
    phi = jnp.arccos(jnp.clip(1.0 - 2.0 * (k + 0.5) / num_fold, -1.0, 1.0))
    theta = jnp.pi * (1.0 + 5.0 ** 0.5) * k
    sphere = 0.35 * jnp.stack([jnp.sin(phi) * jnp.cos(theta),
                               jnp.sin(phi) * jnp.sin(theta),
                               jnp.cos(phi)], axis=-1)                 # [M, 3]
    offs = 0.02 * jnp.tanh(points.mean(axis=1, keepdims=True))
    folding_points = sphere[None] + offs                               # [B, M, 3]
    folding_normals = _safe_normalize(folding_points)
    batch_p_2d = folding_points                                        # folding_grid
    lin = jnp.linspace(-0.5, 0.5, grid_res)
    zz, yy, xx = jnp.meshgrid(lin, lin, lin, indexing='ij')            # D,H,W <-> z,y,x
    base = jnp.sqrt(xx ** 2 + yy ** 2 + zz ** 2 + 1e-12) - 0.35
    sdf_grid = base[None, None] + 0.01 * jnp.tanh(points.mean(axis=(1, 2)))[:, None, None, None, None]
    return batch_p_2d, folding_points, folding_normals, sdf_grid


def get_rays(camera_angles, cfg):
    # TODO(synk): simplified stand-in for get_initial_rays_trig / compute_cam2world_matrix
    # / transform_points.
    B = camera_angles.shape[0]
    h = w = cfg['test_resolution']
    S = cfg['num_steps']
    radius = cfg['radius']
    fov = math.radians(cfg['fov'])
    yaw, pitch = camera_angles[:, 0], camera_angles[:, 1]
    cam_o = radius * jnp.stack([jnp.sin(yaw) * jnp.cos(pitch),
                                jnp.sin(pitch),
                                jnp.cos(yaw) * jnp.cos(pitch)], axis=-1)      # [B, 3]
    xs = (jnp.arange(w) + 0.5) / w * 2.0 - 1.0
    ys = (jnp.arange(h) + 0.5) / h * 2.0 - 1.0
    gy, gx = jnp.meshgrid(ys, xs, indexing='ij')
    t = math.tan(fov / 2.0)
    dirs = jnp.stack([gx * t, -gy * t, -jnp.ones_like(gx)], axis=-1).reshape(-1, 3)
    dirs = _safe_normalize(dirs)                                              # [h*w, 3]
    fwd = _safe_normalize(-cam_o)
    up_w = jnp.broadcast_to(jnp.array([0.0, 1.0, 0.0]), fwd.shape)
    right = _safe_normalize(jnp.cross(fwd, up_w))
    up = jnp.cross(right, fwd)
    Rmat = jnp.stack([right, up, -fwd], axis=-1)                              # [B, 3, 3]
    ray_d_world = jnp.einsum('bij,nj->bni', Rmat, dirs)                       # [B, h*w, 3]
    ray_o_world = jnp.broadcast_to(cam_o[:, None, :], (B, h * w, 3))
    z_vals = jnp.linspace(cfg['ray_start'], cfg['ray_end'], S)
    z_vals = jnp.broadcast_to(z_vals[None, None, :, None], (B, h * w, S, 1))
    points_world = ray_o_world[:, :, None, :] + ray_d_world[:, :, None, :] * z_vals
    return z_vals, ray_d_world, ray_o_world, points_world.reshape(B, h * w * S, 3)


def sample_pdf(bins, weights, n_samples, key):
    # TODO(synk): NeRF hierarchical inverse-CDF sampling; det=False uses random u
    # (fixed PRNG key here).
    weights = weights + 1e-5
    pdf = weights / jnp.maximum(jnp.sum(weights, axis=-1, keepdims=True), 1e-12)
    cdf = jnp.cumsum(pdf, axis=-1)
    cdf = jnp.concatenate([jnp.zeros_like(cdf[:, :1]), cdf], axis=-1)
    u = jax.random.uniform(key, (bins.shape[0], n_samples))
    inds = jax.vmap(lambda c, uu: jnp.searchsorted(c, uu, side='right'))(cdf, u)
    below = jnp.clip(inds - 1, 0, cdf.shape[-1] - 1)
    above = jnp.clip(inds, 0, cdf.shape[-1] - 1)
    cdf_b = jnp.take_along_axis(cdf, below, axis=-1)
    cdf_a = jnp.take_along_axis(cdf, above, axis=-1)
    bins_b = jnp.take_along_axis(bins, below, axis=-1)
    bins_a = jnp.take_along_axis(bins, above, axis=-1)
    denom = cdf_a - cdf_b
    denom = jnp.where(denom < 1e-5, 1.0, denom)
    t = (u - cdf_b) / denom
    return bins_b + t * (bins_a - bins_b)


# ----------------------------------------------------------------------------- model forward

def synthesis_network_forward(params, geo_ws, tex_ws, camera_angles, points, cfg, key):
    B = geo_ws.shape[0]
    h = w = cfg['test_resolution']
    HW = h * w
    S = cfg['num_steps']

    # texture decoder (one fused Pallas kernel) -> NCHW triplanes
    tex_feats = texture_decoder_forward(tex_ws[:, :cfg['num_ws']], params['decoder'])

    batch_p_2d, folding_points, folding_normals, sdf_grid = fold_sdf_synthetic(
        points, cfg['grid_res'], cfg['num_fold'])
    z_vals, ray_d_world, ray_o_world, points_world = get_rays(camera_angles, cfg)

    # shared per-forward prep for the canonical renderer (hoisted out of coarse/fine calls)
    sphere_uv_f = get_feat_from_triplane(batch_p_2d, tex_feats, scale=0.3).mean(axis=1)  # [B, M, 32]
    fold_pack, feat_pad = _pack_folding(folding_points, sphere_uv_f)
    mlp_prep = _prepare_mlp(params['mlp'])
    # Mirrors the reference: torch.gradient(sdf_grid.squeeze(1)) and stacking the first
    # three gradients (dims 0..2 of [B, D, H, W], i.e. including the batch-dim gradient).
    grads = [_torch_gradient_1d(sdf_grid[:, 0], d) for d in range(3)]
    normal_grid = jnp.stack(grads, axis=1)                                   # [B, 3, D, H, W]

    def shade_cm(pts):                                # pts: [B, N, 3] -> [B, 4, HW, S]
        coords_normed = pts / 0.5
        sdfs = grid_sample_3d(sdf_grid, coords_normed)                       # [B, N, 1]
        normals = grid_sample_3d(normal_grid, coords_normed)                 # [B, N, 3]
        c2 = jnp.sum(pts * pts, axis=-1, keepdims=True)                      # [B, N, 1]
        pts_pack = jnp.concatenate([pts, c2, normals, sdfs], axis=-1)        # [B, N, 8]
        out = render_points(pts_pack, fold_pack, feat_pad, mlp_prep)         # [B, N, 8]
        return out[..., :4].reshape(B, HW, S, 4).transpose(0, 3, 1, 2)       # channel-major

    coarse_cm = shade_cm(points_world)                                       # [B, 4, HW, S]

    c_int = fancy_integration(coarse_cm, z_vals[..., 0], cfg)
    weights = c_int['weights'].reshape(B * HW, S) + 1e-5
    zf = z_vals.reshape(B * HW, S)
    z_mid = 0.5 * (zf[:, :-1] + zf[:, 1:])
    fine_z = sample_pdf(z_mid, weights[:, 1:-1], S, key)
    fine_z = fine_z.reshape(B, HW, S, 1)
    fine_points = (ray_o_world[:, :, None, :] + ray_d_world[:, :, None, :] * fine_z)
    fine_points = fine_points.reshape(B, HW * S, 3)

    fine_cm = shade_cm(fine_points)                                          # [B, 4, HW, S]

    all_cm = jnp.concatenate([fine_cm, coarse_cm], axis=-1)                  # [B, 4, HW, 2S]
    all_z = jnp.concatenate([fine_z, z_vals], axis=2)                        # [B, HW, 2S, 1]
    order = jnp.argsort(all_z[..., 0], axis=2)
    all_z = jnp.take_along_axis(all_z, order[..., None], axis=2)
    all_cm = jnp.take_along_axis(
        all_cm, jnp.broadcast_to(order[:, None, :, :], all_cm.shape), axis=-1)

    int_out = fancy_integration(all_cm, all_z[..., 0], cfg)
    img = int_out['rendered_feats'].reshape(B, h, w, 3).transpose(0, 3, 1, 2)
    mask = int_out['final_transmittance'].reshape(B, h, w, 1).transpose(0, 3, 1, 2)
    return jnp.concatenate([img, mask], axis=1)     # [B, 4, h, w]


# ----------------------------------------------------------------------------- params

def init_params(key, cfg):
    ks = iter(jax.random.split(key, 64))
    nrm = lambda shape, scale: jax.random.normal(next(ks), shape, jnp.float32) * scale
    w_dim = cfg['w_dim']
    C = 32
    Cimg = 3 * 32
    dec = {'const': nrm((16, C), 1.0)}
    for res in (4, 8, 16):
        if res > 4:
            dec[f'conv0_{res}_w'] = nrm((C, C), 1.0 / math.sqrt(C))
            dec[f'conv0_{res}_b'] = jnp.zeros((1, C), jnp.float32)
            dec[f'aff0_{res}_w'] = nrm((w_dim, C), 1.0 / math.sqrt(w_dim))
            dec[f'aff0_{res}_b'] = jnp.ones((C,), jnp.float32)
        dec[f'conv1_{res}_w'] = nrm((C, C), 1.0 / math.sqrt(C))
        dec[f'conv1_{res}_b'] = jnp.zeros((1, C), jnp.float32)
        dec[f'aff1_{res}_w'] = nrm((w_dim, C), 1.0 / math.sqrt(w_dim))
        dec[f'aff1_{res}_b'] = jnp.ones((C,), jnp.float32)
        dec[f'trgb_{res}_w'] = nrm((C, Cimg), 1.0 / math.sqrt(C))
        dec[f'trgb_{res}_b'] = jnp.zeros((1, Cimg), jnp.float32)
        dec[f'affrgb_{res}_w'] = nrm((w_dim, C), 1.0 / math.sqrt(w_dim))
        dec[f'affrgb_{res}_b'] = jnp.ones((C,), jnp.float32)
    H = cfg['mlp_hid']
    mlp = {
        'w1': nrm((36, H), 1.0 / math.sqrt(36)), 'b1': jnp.zeros((1, H), jnp.float32),
        'w2': nrm((H, H), 1.0 / math.sqrt(H)), 'b2': jnp.zeros((1, H), jnp.float32),
        'w3': nrm((H, 3), 1.0 / math.sqrt(H)), 'b3': jnp.zeros((1, 3), jnp.float32),
    }
    return {'decoder': dec, 'mlp': mlp}


# ----------------------------------------------------------------------------- main

if __name__ == "__main__":
    key = jax.random.PRNGKey(0)
    kp, kg, kt, kc, kpts, kfine = jax.random.split(key, 6)
    cfg = CFG
    params = init_params(kp, cfg)
    B = 2
    geo_ws = jax.random.normal(kg, (B, cfg['num_ws'], cfg['w_dim']), jnp.float32)
    tex_ws = jax.random.normal(kt, (B, cfg['num_ws'], cfg['w_dim']), jnp.float32)
    camera_angles = jax.random.uniform(kc, (B, 3), jnp.float32, -0.5, 0.5)
    points = jax.random.uniform(kpts, (B, 128, 3), jnp.float32, -0.5, 0.5)

    fwd = jax.jit(functools.partial(synthesis_network_forward, cfg=cfg))
    img = fwd(params, geo_ws, tex_ws, camera_angles, points, key=kfine)
    img = jax.block_until_ready(img)
    assert img.shape == (B, 4, cfg['test_resolution'], cfg['test_resolution'])
    assert bool(jnp.all(jnp.isfinite(img))), "non-finite values in output"
    print("KERNEL_OK")
</pallas_src>

<mosaic_0001>
module attributes {stable_mosaic.version = 11 : i64} {
  func.func private @main(%arg0: i32) attributes {dimension_semantics = [#tpu.dimension_semantics<core_parallel>], iteration_bounds = array<i64: 2>, tpu.core_type = #tpu.core_type<sc_scalar_subcore>, window_params = []} {
    return
  }
}

module attributes {stable_mosaic.version = 11 : i64} {
  func.func private @main(%arg0: i32) attributes {dimension_semantics = [#tpu.dimension_semantics<core_parallel>], iteration_bounds = array<i64: 2>, tpu.core_type = #tpu.core_type<sc_scalar_subcore>, window_params = []} {
    return
  }
}

module attributes {stable_mosaic.version = 11 : i64} {
  func.func @_texdec_kernel(%arg0: i32, %arg1: memref<16x32xf32, #tpu.memory_space<vmem>>, %arg2: memref<1x8x32xf32, #tpu.memory_space<vmem>>, %arg3: memref<64x16xf32, #tpu.memory_space<vmem>>, %arg4: memref<256x64xf32, #tpu.memory_space<vmem>>, %arg5: memref<5x32x32xf32, #tpu.memory_space<vmem>>, %arg6: memref<5x1x32xf32, #tpu.memory_space<vmem>>, %arg7: memref<3x32x128xf32, #tpu.memory_space<vmem>>, %arg8: memref<3x1x128xf32, #tpu.memory_space<vmem>>, %arg9: memref<1x256x128xf32, #tpu.memory_space<vmem>>) attributes {dimension_semantics = [#tpu.dimension_semantics<parallel>], iteration_bounds = array<i64: 2>, scalar_prefetch = 0 : i64, scratch_operands = 0 : i64, tpu.core_type = #tpu.core_type<tc>, window_params = [{pipeline_mode = #tpu.pipeline_mode<synchronous>, transform_indices = @transform_0, window_bounds = array<i64: 16, 32>}, {transform_indices = @transform_1, window_bounds = array<i64: 1, 8, 32>}, {pipeline_mode = #tpu.pipeline_mode<synchronous>, transform_indices = @transform_2, window_bounds = array<i64: 64, 16>}, {pipeline_mode = #tpu.pipeline_mode<synchronous>, transform_indices = @transform_3, window_bounds = array<i64: 256, 64>}, {pipeline_mode = #tpu.pipeline_mode<synchronous>, transform_indices = @transform_4, window_bounds = array<i64: 5, 32, 32>}, {pipeline_mode = #tpu.pipeline_mode<synchronous>, transform_indices = @transform_5, window_bounds = array<i64: 5, 1, 32>}, {pipeline_mode = #tpu.pipeline_mode<synchronous>, transform_indices = @transform_6, window_bounds = array<i64: 3, 32, 128>}, {pipeline_mode = #tpu.pipeline_mode<synchronous>, transform_indices = @transform_7, window_bounds = array<i64: 3, 1, 128>}, {transform_indices = @transform_8, window_bounds = array<i64: 1, 256, 128>}]} {
    %c0 = arith.constant 0 : index
    %c0_0 = arith.constant 0 : index
    %c0_1 = arith.constant 0 : index
    %0 = vector.load %arg2[%c0, %c0_0, %c0_1] : memref<1x8x32xf32, #tpu.memory_space<vmem>>, vector<1x8x32xf32>
    %1 = vector.shape_cast %0 : vector<1x8x32xf32> to vector<8x32xf32>
    %c0_2 = arith.constant 0 : index
    %c0_3 = arith.constant 0 : index
    %2 = vector.load %arg3[%c0_2, %c0_3] : memref<64x16xf32, #tpu.memory_space<vmem>>, vector<64x16xf32>
    %c0_4 = arith.constant 0 : index
    %c0_5 = arith.constant 0 : index
    %3 = vector.load %arg4[%c0_4, %c0_5] : memref<256x64xf32, #tpu.memory_space<vmem>>, vector<256x64xf32>
    %c0_6 = arith.constant 0 : index
    %c0_7 = arith.constant 0 : index
    %4 = vector.load %arg1[%c0_6, %c0_7] : memref<16x32xf32, #tpu.memory_space<vmem>>, vector<16x32xf32>
    %c0_8 = arith.constant 0 : index
    %c0_9 = arith.constant 0 : index
    %c0_10 = arith.constant 0 : index
    %5 = vector.load %arg5[%c0_8, %c0_9, %c0_10] : memref<5x32x32xf32, #tpu.memory_space<vmem>>, vector<1x32x32xf32>
    %6 = vector.shape_cast %5 : vector<1x32x32xf32> to vector<32x32xf32>
    %c0_11 = arith.constant 0 : index
    %c0_12 = arith.constant 0 : index
    %c0_13 = arith.constant 0 : index
    %7 = vector.load %arg6[%c0_11, %c0_12, %c0_13] : memref<5x1x32xf32, #tpu.memory_space<vmem>>, vector<1x1x32xf32>
    %8 = vector.shape_cast %7 : vector<1x1x32xf32> to vector<1x32xf32>
    %9 = vector.extract_strided_slice %1 {offsets = [0, 0], sizes = [1, 32], strides = [1, 1]} : vector<8x32xf32> to vector<1x32xf32>
    %10 = vector.broadcast %9 : vector<1x32xf32> to vector<16x32xf32>
    %11 = arith.mulf %4, %10 : vector<16x32xf32>
    %cst = arith.constant dense<0.000000e+00> : vector<16x32xf32>
    %12 = tpu.matmul %11, %6, %cst {dimension_numbers = #tpu.dot_dimension_numbers<[1], [0], [0], [1], [0, 0, 1, 1], [], []>} : vector<16x32xf32>, vector<32x32xf32>, vector<16x32xf32> -> vector<16x32xf32>
    %13 = arith.mulf %9, %9 : vector<1x32xf32>
    %14 = arith.mulf %6, %6 : vector<32x32xf32>
    %cst_14 = arith.constant dense<0.000000e+00> : vector<1x32xf32>
    %15 = tpu.matmul %13, %14, %cst_14 {dimension_numbers = #tpu.dot_dimension_numbers<[1], [0], [0], [1], [0, 0, 1, 1], [], []>} : vector<1x32xf32>, vector<32x32xf32>, vector<1x32xf32> -> vector<1x32xf32>
    %cst_15 = arith.constant 0.000000e+00 : f32
    %16 = vector.broadcast %cst_15 : f32 to vector<1x32xf32>
    %17 = arith.maximumf %15, %16 : vector<1x32xf32>
    %cst_16 = arith.constant 9.99999993E-9 : f32
    %18 = vector.broadcast %cst_16 : f32 to vector<1x32xf32>
    %19 = arith.addf %17, %18 : vector<1x32xf32>
    %20 = math.rsqrt %19 : vector<1x32xf32>
    %21 = vector.broadcast %20 : vector<1x32xf32> to vector<16x32xf32>
    %22 = arith.mulf %12, %21 : vector<16x32xf32>
    %23 = vector.broadcast %8 : vector<1x32xf32> to vector<16x32xf32>
    %24 = arith.addf %22, %23 : vector<16x32xf32>
    %cst_17 = arith.constant 0.000000e+00 : f32
    %25 = vector.broadcast %cst_17 : f32 to vector<16x32xf32>
    %26 = arith.cmpf oge, %24, %25 : vector<16x32xf32>
    %cst_18 = arith.constant 2.000000e-01 : f32
    %27 = vector.broadcast %cst_18 : f32 to vector<16x32xf32>
    %28 = arith.mulf %27, %24 : vector<16x32xf32>
    %29 = arith.select %26, %24, %28 : vector<16x32xi1>, vector<16x32xf32>
    %cst_19 = arith.constant 1.41421354 : f32
    %30 = vector.broadcast %cst_19 : f32 to vector<16x32xf32>
    %31 = arith.mulf %29, %30 : vector<16x32xf32>
    %c0_20 = arith.constant 0 : index
    %c0_21 = arith.constant 0 : index
    %c0_22 = arith.constant 0 : index
    %32 = vector.load %arg7[%c0_20, %c0_21, %c0_22] : memref<3x32x128xf32, #tpu.memory_space<vmem>>, vector<1x32x128xf32>
    %33 = vector.shape_cast %32 : vector<1x32x128xf32> to vector<32x128xf32>
    %c0_23 = arith.constant 0 : index
    %c0_24 = arith.constant 0 : index
    %c0_25 = arith.constant 0 : index
    %34 = vector.load %arg8[%c0_23, %c0_24, %c0_25] : memref<3x1x128xf32, #tpu.memory_space<vmem>>, vector<1x1x128xf32>
    %35 = vector.shape_cast %34 : vector<1x1x128xf32> to vector<1x128xf32>
    %36 = vector.extract_strided_slice %1 {offsets = [1, 0], sizes = [1, 32], strides = [1, 1]} : vector<8x32xf32> to vector<1x32xf32>
    %37 = vector.broadcast %36 : vector<1x32xf32> to vector<16x32xf32>
    %38 = arith.mulf %31, %37 : vector<16x32xf32>
    %cst_26 = arith.constant dense<0.000000e+00> : vector<16x128xf32>
    %39 = tpu.matmul %38, %33, %cst_26 {dimension_numbers = #tpu.dot_dimension_numbers<[1], [0], [0], [1], [0, 0, 1, 1], [], []>} : vector<16x32xf32>, vector<32x128xf32>, vector<16x128xf32> -> vector<16x128xf32>
    %40 = vector.broadcast %35 : vector<1x128xf32> to vector<16x128xf32>
    %41 = arith.addf %39, %40 : vector<16x128xf32>
    %cst_27 = arith.constant dense<0.000000e+00> : vector<64x32xf32>
    %42 = tpu.matmul %2, %31, %cst_27 {dimension_numbers = #tpu.dot_dimension_numbers<[1], [0], [0], [1], [0, 0, 1, 1], [], []>} : vector<64x16xf32>, vector<16x32xf32>, vector<64x32xf32> -> vector<64x32xf32>
    %c1 = arith.constant 1 : index
    %c0_28 = arith.constant 0 : index
    %c0_29 = arith.constant 0 : index
    %43 = vector.load %arg5[%c1, %c0_28, %c0_29] : memref<5x32x32xf32, #tpu.memory_space<vmem>>, vector<1x32x32xf32>
    %44 = vector.shape_cast %43 : vector<1x32x32xf32> to vector<32x32xf32>
    %c1_30 = arith.constant 1 : index
    %c0_31 = arith.constant 0 : index
    %c0_32 = arith.constant 0 : index
    %45 = vector.load %arg6[%c1_30, %c0_31, %c0_32] : memref<5x1x32xf32, #tpu.memory_space<vmem>>, vector<1x1x32xf32>
    %46 = vector.shape_cast %45 : vector<1x1x32xf32> to vector<1x32xf32>
    %47 = vector.extract_strided_slice %1 {offsets = [2, 0], sizes = [1, 32], strides = [1, 1]} : vector<8x32xf32> to vector<1x32xf32>
    %48 = vector.broadcast %47 : vector<1x32xf32> to vector<64x32xf32>
    %49 = arith.mulf %42, %48 : vector<64x32xf32>
    %cst_33 = arith.constant dense<0.000000e+00> : vector<64x32xf32>
    %50 = tpu.matmul %49, %44, %cst_33 {dimension_numbers = #tpu.dot_dimension_numbers<[1], [0], [0], [1], [0, 0, 1, 1], [], []>} : vector<64x32xf32>, vector<32x32xf32>, vector<64x32xf32> -> vector<64x32xf32>
    %51 = arith.mulf %47, %47 : vector<1x32xf32>
    %52 = arith.mulf %44, %44 : vector<32x32xf32>
    %cst_34 = arith.constant dense<0.000000e+00> : vector<1x32xf32>
    %53 = tpu.matmul %51, %52, %cst_34 {dimension_numbers = #tpu.dot_dimension_numbers<[1], [0], [0], [1], [0, 0, 1, 1], [], []>} : vector<1x32xf32>, vector<32x32xf32>, vector<1x32xf32> -> vector<1x32xf32>
    %cst_35 = arith.constant 0.000000e+00 : f32
    %54 = vector.broadcast %cst_35 : f32 to vector<1x32xf32>
    %55 = arith.maximumf %53, %54 : vector<1x32xf32>
    %cst_36 = arith.constant 9.99999993E-9 : f32
    %56 = vector.broadcast %cst_36 : f32 to vector<1x32xf32>
    %57 = arith.addf %55, %56 : vector<1x32xf32>
    %58 = math.rsqrt %57 : vector<1x32xf32>
    %59 = vector.broadcast %58 : vector<1x32xf32> to vector<64x32xf32>
    %60 = arith.mulf %50, %59 : vector<64x32xf32>
    %61 = vector.broadcast %46 : vector<1x32xf32> to vector<64x32xf32>
    %62 = arith.addf %60, %61 : vector<64x32xf32>
    %cst_37 = arith.constant 0.000000e+00 : f32
    %63 = vector.broadcast %cst_37 : f32 to vector<64x32xf32>
    %64 = arith.cmpf oge, %62, %63 : vector<64x32xf32>
    %cst_38 = arith.constant 2.000000e-01 : f32
    %65 = vector.broadcast %cst_38 : f32 to vector<64x32xf32>
    %66 = arith.mulf %65, %62 : vector<64x32xf32>
    %67 = arith.select %64, %62, %66 : vector<64x32xi1>, vector<64x32xf32>
    %cst_39 = arith.constant 1.41421354 : f32
    %68 = vector.broadcast %cst_39 : f32 to vector<64x32xf32>
    %69 = arith.mulf %67, %68 : vector<64x32xf32>
    %c2 = arith.constant 2 : index
    %c0_40 = arith.constant 0 : index
    %c0_41 = arith.constant 0 : index
    %70 = vector.load %arg5[%c2, %c0_40, %c0_41] : memref<5x32x32xf32, #tpu.memory_space<vmem>>, vector<1x32x32xf32>
    %71 = vector.shape_cast %70 : vector<1x32x32xf32> to vector<32x32xf32>
    %c2_42 = arith.constant 2 : index
    %c0_43 = arith.constant 0 : index
    %c0_44 = arith.constant 0 : index
    %72 = vector.load %arg6[%c2_42, %c0_43, %c0_44] : memref<5x1x32xf32, #tpu.memory_space<vmem>>, vector<1x1x32xf32>
    %73 = vector.shape_cast %72 : vector<1x1x32xf32> to vector<1x32xf32>
    %74 = vector.extract_strided_slice %1 {offsets = [3, 0], sizes = [1, 32], strides = [1, 1]} : vector<8x32xf32> to vector<1x32xf32>
    %75 = vector.broadcast %74 : vector<1x32xf32> to vector<64x32xf32>
    %76 = arith.mulf %69, %75 : vector<64x32xf32>
    %cst_45 = arith.constant dense<0.000000e+00> : vector<64x32xf32>
    %77 = tpu.matmul %76, %71, %cst_45 {dimension_numbers = #tpu.dot_dimension_numbers<[1], [0], [0], [1], [0, 0, 1, 1], [], []>} : vector<64x32xf32>, vector<32x32xf32>, vector<64x32xf32> -> vector<64x32xf32>
    %78 = arith.mulf %74, %74 : vector<1x32xf32>
    %79 = arith.mulf %71, %71 : vector<32x32xf32>
    %cst_46 = arith.constant dense<0.000000e+00> : vector<1x32xf32>
    %80 = tpu.matmul %78, %79, %cst_46 {dimension_numbers = #tpu.dot_dimension_numbers<[1], [0], [0], [1], [0, 0, 1, 1], [], []>} : vector<1x32xf32>, vector<32x32xf32>, vector<1x32xf32> -> vector<1x32xf32>
    %cst_47 = arith.constant 0.000000e+00 : f32
    %81 = vector.broadcast %cst_47 : f32 to vector<1x32xf32>
    %82 = arith.maximumf %80, %81 : vector<1x32xf32>
    %cst_48 = arith.constant 9.99999993E-9 : f32
    %83 = vector.broadcast %cst_48 : f32 to vector<1x32xf32>
    %84 = arith.addf %82, %83 : vector<1x32xf32>
    %85 = math.rsqrt %84 : vector<1x32xf32>
    %86 = vector.broadcast %85 : vector<1x32xf32> to vector<64x32xf32>
    %87 = arith.mulf %77, %86 : vector<64x32xf32>
    %88 = vector.broadcast %73 : vector<1x32xf32> to vector<64x32xf32>
    %89 = arith.addf %87, %88 : vector<64x32xf32>
    %cst_49 = arith.constant 0.000000e+00 : f32
    %90 = vector.broadcast %cst_49 : f32 to vector<64x32xf32>
    %91 = arith.cmpf oge, %89, %90 : vector<64x32xf32>
    %cst_50 = arith.constant 2.000000e-01 : f32
    %92 = vector.broadcast %cst_50 : f32 to vector<64x32xf32>
    %93 = arith.mulf %92, %89 : vector<64x32xf32>
    %94 = arith.select %91, %89, %93 : vector<64x32xi1>, vector<64x32xf32>
    %cst_51 = arith.constant 1.41421354 : f32
    %95 = vector.broadcast %cst_51 : f32 to vector<64x32xf32>
    %96 = arith.mulf %94, %95 : vector<64x32xf32>
    %cst_52 = arith.constant dense<0.000000e+00> : vector<64x128xf32>
    %97 = tpu.matmul %2, %41, %cst_52 {dimension_numbers = #tpu.dot_dimension_numbers<[1], [0], [0], [1], [0, 0, 1, 1], [], []>} : vector<64x16xf32>, vector<16x128xf32>, vector<64x128xf32> -> vector<64x128xf32>
    %c1_53 = arith.constant 1 : index
    %c0_54 = arith.constant 0 : index
    %c0_55 = arith.constant 0 : index
    %98 = vector.load %arg7[%c1_53, %c0_54, %c0_55] : memref<3x32x128xf32, #tpu.memory_space<vmem>>, vector<1x32x128xf32>
    %99 = vector.shape_cast %98 : vector<1x32x128xf32> to vector<32x128xf32>
    %c1_56 = arith.constant 1 : index
    %c0_57 = arith.constant 0 : index
    %c0_58 = arith.constant 0 : index
    %100 = vector.load %arg8[%c1_56, %c0_57, %c0_58] : memref<3x1x128xf32, #tpu.memory_space<vmem>>, vector<1x1x128xf32>
    %101 = vector.shape_cast %100 : vector<1x1x128xf32> to vector<1x128xf32>
    %102 = vector.extract_strided_slice %1 {offsets = [4, 0], sizes = [1, 32], strides = [1, 1]} : vector<8x32xf32> to vector<1x32xf32>
    %103 = vector.broadcast %102 : vector<1x32xf32> to vector<64x32xf32>
    %104 = arith.mulf %96, %103 : vector<64x32xf32>
    %cst_59 = arith.constant dense<0.000000e+00> : vector<64x128xf32>
    %105 = tpu.matmul %104, %99, %cst_59 {dimension_numbers = #tpu.dot_dimension_numbers<[1], [0], [0], [1], [0, 0, 1, 1], [], []>} : vector<64x32xf32>, vector<32x128xf32>, vector<64x128xf32> -> vector<64x128xf32>
    %106 = vector.broadcast %101 : vector<1x128xf32> to vector<64x128xf32>
    %107 = arith.addf %105, %106 : vector<64x128xf32>
    %108 = arith.addf %97, %107 : vector<64x128xf32>
    %cst_60 = arith.constant dense<0.000000e+00> : vector<256x32xf32>
    %109 = tpu.matmul %3, %96, %cst_60 {dimension_numbers = #tpu.dot_dimension_numbers<[1], [0], [0], [1], [0, 0, 1, 1], [], []>} : vector<256x64xf32>, vector<64x32xf32>, vector<256x32xf32> -> vector<256x32xf32>
    %c3 = arith.constant 3 : index
    %c0_61 = arith.constant 0 : index
    %c0_62 = arith.constant 0 : index
    %110 = vector.load %arg5[%c3, %c0_61, %c0_62] : memref<5x32x32xf32, #tpu.memory_space<vmem>>, vector<1x32x32xf32>
    %111 = vector.shape_cast %110 : vector<1x32x32xf32> to vector<32x32xf32>
    %c3_63 = arith.constant 3 : index
    %c0_64 = arith.constant 0 : index
    %c0_65 = arith.constant 0 : index
    %112 = vector.load %arg6[%c3_63, %c0_64, %c0_65] : memref<5x1x32xf32, #tpu.memory_space<vmem>>, vector<1x1x32xf32>
    %113 = vector.shape_cast %112 : vector<1x1x32xf32> to vector<1x32xf32>
    %114 = vector.extract_strided_slice %1 {offsets = [5, 0], sizes = [1, 32], strides = [1, 1]} : vector<8x32xf32> to vector<1x32xf32>
    %115 = vector.broadcast %114 : vector<1x32xf32> to vector<256x32xf32>
    %116 = arith.mulf %109, %115 : vector<256x32xf32>
    %cst_66 = arith.constant dense<0.000000e+00> : vector<256x32xf32>
    %117 = tpu.matmul %116, %111, %cst_66 {dimension_numbers = #tpu.dot_dimension_numbers<[1], [0], [0], [1], [0, 0, 1, 1], [], []>} : vector<256x32xf32>, vector<32x32xf32>, vector<256x32xf32> -> vector<256x32xf32>
    %118 = arith.mulf %114, %114 : vector<1x32xf32>
    %119 = arith.mulf %111, %111 : vector<32x32xf32>
    %cst_67 = arith.constant dense<0.000000e+00> : vector<1x32xf32>
    %120 = tpu.matmul %118, %119, %cst_67 {dimension_numbers = #tpu.dot_dimension_numbers<[1], [0], [0], [1], [0, 0, 1, 1], [], []>} : vector<1x32xf32>, vector<32x32xf32>, vector<1x32xf32> -> vector<1x32xf32>
    %cst_68 = arith.constant 0.000000e+00 : f32
    %121 = vector.broadcast %cst_68 : f32 to vector<1x32xf32>
    %122 = arith.maximumf %120, %121 : vector<1x32xf32>
    %cst_69 = arith.constant 9.99999993E-9 : f32
    %123 = vector.broadcast %cst_69 : f32 to vector<1x32xf32>
    %124 = arith.addf %122, %123 : vector<1x32xf32>
    %125 = math.rsqrt %124 : vector<1x32xf32>
    %126 = vector.broadcast %125 : vector<1x32xf32> to vector<256x32xf32>
    %127 = arith.mulf %117, %126 : vector<256x32xf32>
    %128 = vector.broadcast %113 : vector<1x32xf32> to vector<256x32xf32>
    %129 = arith.addf %127, %128 : vector<256x32xf32>
    %cst_70 = arith.constant 0.000000e+00 : f32
    %130 = vector.broadcast %cst_70 : f32 to vector<256x32xf32>
    %131 = arith.cmpf oge, %129, %130 : vector<256x32xf32>
    %cst_71 = arith.constant 2.000000e-01 : f32
    %132 = vector.broadcast %cst_71 : f32 to vector<256x32xf32>
    %133 = arith.mulf %132, %129 : vector<256x32xf32>
    %134 = arith.select %131, %129, %133 : vector<256x32xi1>, vector<256x32xf32>
    %cst_72 = arith.constant 1.41421354 : f32
    %135 = vector.broadcast %cst_72 : f32 to vector<256x32xf32>
    %136 = arith.mulf %134, %135 : vector<256x32xf32>
    %c4 = arith.constant 4 : index
    %c0_73 = arith.constant 0 : index
    %c0_74 = arith.constant 0 : index
    %137 = vector.load %arg5[%c4, %c0_73, %c0_74] : memref<5x32x32xf32, #tpu.memory_space<vmem>>, vector<1x32x32xf32>
    %138 = vector.shape_cast %137 : vector<1x32x32xf32> to vector<32x32xf32>
    %c4_75 = arith.constant 4 : index
    %c0_76 = arith.constant 0 : index
    %c0_77 = arith.constant 0 : index
    %139 = vector.load %arg6[%c4_75, %c0_76, %c0_77] : memref<5x1x32xf32, #tpu.memory_space<vmem>>, vector<1x1x32xf32>
    %140 = vector.shape_cast %139 : vector<1x1x32xf32> to vector<1x32xf32>
    %141 = vector.extract_strided_slice %1 {offsets = [6, 0], sizes = [1, 32], strides = [1, 1]} : vector<8x32xf32> to vector<1x32xf32>
    %142 = vector.broadcast %141 : vector<1x32xf32> to vector<256x32xf32>
    %143 = arith.mulf %136, %142 : vector<256x32xf32>
    %cst_78 = arith.constant dense<0.000000e+00> : vector<256x32xf32>
    %144 = tpu.matmul %143, %138, %cst_78 {dimension_numbers = #tpu.dot_dimension_numbers<[1], [0], [0], [1], [0, 0, 1, 1], [], []>} : vector<256x32xf32>, vector<32x32xf32>, vector<256x32xf32> -> vector<256x32xf32>
    %145 = arith.mulf %141, %141 : vector<1x32xf32>
    %146 = arith.mulf %138, %138 : vector<32x32xf32>
    %cst_79 = arith.constant dense<0.000000e+00> : vector<1x32xf32>
    %147 = tpu.matmul %145, %146, %cst_79 {dimension_numbers = #tpu.dot_dimension_numbers<[1], [0], [0], [1], [0, 0, 1, 1], [], []>} : vector<1x32xf32>, vector<32x32xf32>, vector<1x32xf32> -> vector<1x32xf32>
    %cst_80 = arith.constant 0.000000e+00 : f32
    %148 = vector.broadcast %cst_80 : f32 to vector<1x32xf32>
    %149 = arith.maximumf %147, %148 : vector<1x32xf32>
    %cst_81 = arith.constant 9.99999993E-9 : f32
    %150 = vector.broadcast %cst_81 : f32 to vector<1x32xf32>
    %151 = arith.addf %149, %150 : vector<1x32xf32>
    %152 = math.rsqrt %151 : vector<1x32xf32>
    %153 = vector.broadcast %152 : vector<1x32xf32> to vector<256x32xf32>
    %154 = arith.mulf %144, %153 : vector<256x32xf32>
    %155 = vector.broadcast %140 : vector<1x32xf32> to vector<256x32xf32>
    %156 = arith.addf %154, %155 : vector<256x32xf32>
    %cst_82 = arith.constant 0.000000e+00 : f32
    %157 = vector.broadcast %cst_82 : f32 to vector<256x32xf32>
    %158 = arith.cmpf oge, %156, %157 : vector<256x32xf32>
    %cst_83 = arith.constant 2.000000e-01 : f32
    %159 = vector.broadcast %cst_83 : f32 to vector<256x32xf32>
    %160 = arith.mulf %159, %156 : vector<256x32xf32>
    %161 = arith.select %158, %156, %160 : vector<256x32xi1>, vector<256x32xf32>
    %cst_84 = arith.constant 1.41421354 : f32
    %162 = vector.broadcast %cst_84 : f32 to vector<256x32xf32>
    %163 = arith.mulf %161, %162 : vector<256x32xf32>
    %cst_85 = arith.constant dense<0.000000e+00> : vector<256x128xf32>
    %164 = tpu.matmul %3, %108, %cst_85 {dimension_numbers = #tpu.dot_dimension_numbers<[1], [0], [0], [1], [0, 0, 1, 1], [], []>} : vector<256x64xf32>, vector<64x128xf32>, vector<256x128xf32> -> vector<256x128xf32>
    %c2_86 = arith.constant 2 : index
    %c0_87 = arith.constant 0 : index
    %c0_88 = arith.constant 0 : index
    %165 = vector.load %arg7[%c2_86, %c0_87, %c0_88] : memref<3x32x128xf32, #tpu.memory_space<vmem>>, vector<1x32x128xf32>
    %166 = vector.shape_cast %165 : vector<1x32x128xf32> to vector<32x128xf32>
    %c2_89 = arith.constant 2 : index
    %c0_90 = arith.constant 0 : index
    %c0_91 = arith.constant 0 : index
    %167 = vector.load %arg8[%c2_89, %c0_90, %c0_91] : memref<3x1x128xf32, #tpu.memory_space<vmem>>, vector<1x1x128xf32>
    %168 = vector.shape_cast %167 : vector<1x1x128xf32> to vector<1x128xf32>
    %169 = vector.extract_strided_slice %1 {offsets = [7, 0], sizes = [1, 32], strides = [1, 1]} : vector<8x32xf32> to vector<1x32xf32>
    %170 = vector.broadcast %169 : vector<1x32xf32> to vector<256x32xf32>
    %171 = arith.mulf %163, %170 : vector<256x32xf32>
    %cst_92 = arith.constant dense<0.000000e+00> : vector<256x128xf32>
    %172 = tpu.matmul %171, %166, %cst_92 {dimension_numbers = #tpu.dot_dimension_numbers<[1], [0], [0], [1], [0, 0, 1, 1], [], []>} : vector<256x32xf32>, vector<32x128xf32>, vector<256x128xf32> -> vector<256x128xf32>
    %173 = vector.broadcast %168 : vector<1x128xf32> to vector<256x128xf32>
    %174 = arith.addf %172, %173 : vector<256x128xf32>
    %175 = arith.addf %164, %174 : vector<256x128xf32>
    %c0_93 = arith.constant 0 : index
    %c0_94 = arith.constant 0 : index
    %c0_95 = arith.constant 0 : index
    %176 = vector.load %arg9[%c0_93, %c0_94, %c0_95] : memref<1x256x128xf32, #tpu.memory_space<vmem>>, vector<1x256x128xf32>
    %177 = vector.shape_cast %176 : vector<1x256x128xf32> to vector<256x128xf32>
    %178 = vector.shape_cast %175 : vector<256x128xf32> to vector<1x256x128xf32>
    tpu.vector_store %arg9[%c0_93, %c0_94, %c0_95], %178 {strides = array<i32>} : memref<1x256x128xf32, #tpu.memory_space<vmem>>, vector<1x256x128xf32>,
    return
  }
  func.func @transform_0(%arg0: i32) -> (i32, i32) {
    %c0_i32 = arith.constant 0 : i32
    %c0_i32_0 = arith.constant 0 : i32
    %c0_i32_1 = arith.constant 0 : i32
    return %c0_i32, %c0_i32_0 : i32, i32
  }
  func.func @transform_1(%arg0: i32) -> (i32, i32, i32) {
    %c0_i32 = arith.constant 0 : i32
    %c0_i32_0 = arith.constant 0 : i32
    %c0_i32_1 = arith.constant 0 : i32
    return %arg0, %c0_i32, %c0_i32_0 : i32, i32, i32
  }
  func.func @transform_2(%arg0: i32) -> (i32, i32) {
    %c0_i32 = arith.constant 0 : i32
    %c0_i32_0 = arith.constant 0 : i32
    %c0_i32_1 = arith.constant 0 : i32
    return %c0_i32, %c0_i32_0 : i32, i32
  }
  func.func @transform_3(%arg0: i32) -> (i32, i32) {
    %c0_i32 = arith.constant 0 : i32
    %c0_i32_0 = arith.constant 0 : i32
    %c0_i32_1 = arith.constant 0 : i32
    return %c0_i32, %c0_i32_0 : i32, i32
  }
  func.func @transform_4(%arg0: i32) -> (i32, i32, i32) {
    %c0_i32 = arith.constant 0 : i32
    %c0_i32_0 = arith.constant 0 : i32
    %c0_i32_1 = arith.constant 0 : i32
    %c0_i32_2 = arith.constant 0 : i32
    return %c0_i32, %c0_i32_0, %c0_i32_1 : i32, i32, i32
  }
  func.func @transform_5(%arg0: i32) -> (i32, i32, i32) {
    %c0_i32 = arith.constant 0 : i32
    %c0_i32_0 = arith.constant 0 : i32
    %c0_i32_1 = arith.constant 0 : i32
    %c0_i32_2 = arith.constant 0 : i32
    return %c0_i32, %c0_i32_0, %c0_i32_1 : i32, i32, i32
  }
  func.func @transform_6(%arg0: i32) -> (i32, i32, i32) {
    %c0_i32 = arith.constant 0 : i32
    %c0_i32_0 = arith.constant 0 : i32
    %c0_i32_1 = arith.constant 0 : i32
    %c0_i32_2 = arith.constant 0 : i32
    return %c0_i32, %c0_i32_0, %c0_i32_1 : i32, i32, i32
  }
  func.func @transform_7(%arg0: i32) -> (i32, i32, i32) {
    %c0_i32 = arith.constant 0 : i32
    %c0_i32_0 = arith.constant 0 : i32
    %c0_i32_1 = arith.constant 0 : i32
    %c0_i32_2 = arith.constant 0 : i32
    return %c0_i32, %c0_i32_0, %c0_i32_1 : i32, i32, i32
  }
  func.func @transform_8(%arg0: i32) -> (i32, i32, i32) {
    %c0_i32 = arith.constant 0 : i32
    %c0_i32_0 = arith.constant 0 : i32
    %c0_i32_1 = arith.constant 0 : i32
    return %arg0, %c0_i32, %c0_i32_0 : i32, i32, i32
  }
}

module attributes {stable_mosaic.version = 11 : i64} {
  func.func @_render_points_kernel(%arg0: i32, %arg1: i32, %arg2: memref<1x128x8xf32, #tpu.memory_space<vmem>>, %arg3: memref<1x16x128xf32, #tpu.memory_space<vmem>>, %arg4: memref<1x128x32xf32, #tpu.memory_space<vmem>>, %arg5: memref<32x64xf32, #tpu.memory_space<vmem>>, %arg6: memref<8x64xf32, #tpu.memory_space<vmem>>, %arg7: memref<1x64xf32, #tpu.memory_space<vmem>>, %arg8: memref<64x64xf32, #tpu.memory_space<vmem>>, %arg9: memref<1x64xf32, #tpu.memory_space<vmem>>, %arg10: memref<64x8xf32, #tpu.memory_space<vmem>>, %arg11: memref<1x8xf32, #tpu.memory_space<vmem>>, %arg12: memref<1x128x8xf32, #tpu.memory_space<vmem>>) attributes {dimension_semantics = [#tpu.dimension_semantics<parallel>, #tpu.dimension_semantics<parallel>], iteration_bounds = array<i64: 2, 4>, scalar_prefetch = 0 : i64, scratch_operands = 0 : i64, tpu.core_type = #tpu.core_type<tc>, window_params = [{transform_indices = @transform_0, window_bounds = array<i64: 1, 128, 8>}, {transform_indices = @transform_1, window_bounds = array<i64: 1, 16, 128>}, {transform_indices = @transform_2, window_bounds = array<i64: 1, 128, 32>}, {pipeline_mode = #tpu.pipeline_mode<synchronous>, transform_indices = @transform_3, window_bounds = array<i64: 32, 64>}, {pipeline_mode = #tpu.pipeline_mode<synchronous>, transform_indices = @transform_4, window_bounds = array<i64: 8, 64>}, {pipeline_mode = #tpu.pipeline_mode<synchronous>, transform_indices = @transform_5, window_bounds = array<i64: 1, 64>}, {pipeline_mode = #tpu.pipeline_mode<synchronous>, transform_indices = @transform_6, window_bounds = array<i64: 64, 64>}, {pipeline_mode = #tpu.pipeline_mode<synchronous>, transform_indices = @transform_7, window_bounds = array<i64: 1, 64>}, {pipeline_mode = #tpu.pipeline_mode<synchronous>, transform_indices = @transform_8, window_bounds = array<i64: 64, 8>}, {pipeline_mode = #tpu.pipeline_mode<synchronous>, transform_indices = @transform_9, window_bounds = array<i64: 1, 8>}, {transform_indices = @transform_10, window_bounds = array<i64: 1, 128, 8>}]} {
    %c0 = arith.constant 0 : index
    %c0_0 = arith.constant 0 : index
    %c0_1 = arith.constant 0 : index
    %0 = vector.load %arg2[%c0, %c0_0, %c0_1] : memref<1x128x8xf32, #tpu.memory_space<vmem>>, vector<1x128x8xf32>
    %1 = vector.shape_cast %0 : vector<1x128x8xf32> to vector<128x8xf32>
    %c0_2 = arith.constant 0 : index
    %c0_3 = arith.constant 0 : index
    %c0_4 = arith.constant 0 : index
    %2 = vector.load %arg3[%c0_2, %c0_3, %c0_4] : memref<1x16x128xf32, #tpu.memory_space<vmem>>, vector<1x16x128xf32>
    %3 = vector.shape_cast %2 : vector<1x16x128xf32> to vector<16x128xf32>
    %c0_5 = arith.constant 0 : index
    %c0_6 = arith.constant 0 : index
    %c0_7 = arith.constant 0 : index
    %4 = vector.load %arg4[%c0_5, %c0_6, %c0_7] : memref<1x128x32xf32, #tpu.memory_space<vmem>>, vector<1x128x32xf32>
    %5 = vector.shape_cast %4 : vector<1x128x32xf32> to vector<128x32xf32>
    %6 = vector.extract_strided_slice %3 {offsets = [0, 0], sizes = [8, 128], strides = [1, 1]} : vector<16x128xf32> to vector<8x128xf32>
    %cst = arith.constant dense<0.000000e+00> : vector<128x128xf32>
    %7 = tpu.matmul %1, %6, %cst {dimension_numbers = #tpu.dot_dimension_numbers<[1], [0], [0], [1], [0, 0, 1, 1], [], []>, precision = #tpu.contract_precision<fp32>} : vector<128x8xf32>, vector<8x128xf32>, vector<128x128xf32> -> vector<128x128xf32>
    %8 = vector.extract_strided_slice %3 {offsets = [8, 0], sizes = [1, 128], strides = [1, 1]} : vector<16x128xf32> to vector<1x128xf32>
    %9 = vector.broadcast %8 : vector<1x128xf32> to vector<128x128xf32>
    %10 = arith.addf %7, %9 : vector<128x128xf32>
    %cst_8 = arith.constant 0.000000e+00 : f32
    %11 = vector.broadcast %cst_8 : f32 to vector<128x128xf32>
    %12 = arith.maximumf %10, %11 : vector<128x128xf32>
    %13 = tpu.iota {dimensions = array<i32: 1>} : vector<128x128xi32>
    %cst_9 = arith.constant 0.000000e+00 : f32
    %14 = vector.broadcast %cst_9 : f32 to vector<128x128xf32>
    %cst_10 = arith.constant dense<0x7F800000> : vector<128xf32>
    %15 = vector.multi_reduction <minimumf>, %12, %cst_10 [1] : vector<128x128xf32> to vector<128xf32>
    %16 = vector.shape_cast %15 : vector<128xf32> to vector<128x1xf32>
    %17 = vector.broadcast %16 : vector<128x1xf32> to vector<128x128xf32>
    %18 = arith.cmpf ole, %12, %17 : vector<128x128xf32>
    %c128_i32 = arith.constant 128 : i32
    %19 = vector.broadcast %c128_i32 : i32 to vector<128x128xi32>
    %20 = arith.select %18, %13, %19 : vector<128x128xi1>, vector<128x128xi32>
    %cst_11 = arith.constant dense<2147483647> : vector<128xi32>
    %21 = vector.multi_reduction <minsi>, %20, %cst_11 [1] : vector<128x128xi32> to vector<128xi32>
    %22 = vector.shape_cast %21 : vector<128xi32> to vector<128x1xi32>
    %23 = vector.broadcast %22 : vector<128x1xi32> to vector<128x128xi32>
    %24 = arith.cmpi eq, %13, %23 : vector<128x128xi32>
    %25 = arith.extui %24 : vector<128x128xi1> to vector<128x128xi32>
    %26 = arith.sitofp %25 : vector<128x128xi32> to vector<128x128xf32>
    %cst_12 = arith.constant 0.000000e+00 : f32
    %27 = vector.broadcast %cst_12 : f32 to vector<128x1xf32>
    %28 = arith.maximumf %16, %27 : vector<128x1xf32>
    %29 = math.sqrt %28 : vector<128x1xf32>
    %cst_13 = arith.constant 1.000000e-07 : f32
    %30 = vector.broadcast %cst_13 : f32 to vector<128x1xf32>
    %31 = arith.addf %29, %30 : vector<128x1xf32>
    %cst_14 = arith.constant 1.000000e+00 : f32
    %32 = vector.broadcast %cst_14 : f32 to vector<128x1xf32>
    %33 = arith.divf %32, %31 : vector<128x1xf32>
    %34 = vector.broadcast %33 : vector<128x1xf32> to vector<128x128xf32>
    %35 = arith.mulf %34, %26 : vector<128x128xf32>
    %36 = arith.addf %14, %35 : vector<128x128xf32>
    %cst_15 = arith.constant 0.000000e+00 : f32
    %37 = vector.broadcast %cst_15 : f32 to vector<128x128xf32>
    %38 = arith.cmpf ogt, %26, %37 : vector<128x128xf32>
    %cst_16 = arith.constant 1.000000e+30 : f32
    %39 = vector.broadcast %cst_16 : f32 to vector<128x128xf32>
    %40 = arith.select %38, %39, %12 : vector<128x128xi1>, vector<128x128xf32>
    %cst_17 = arith.constant dense<0x7F800000> : vector<128xf32>
    %41 = vector.multi_reduction <minimumf>, %40, %cst_17 [1] : vector<128x128xf32> to vector<128xf32>
    %42 = vector.shape_cast %41 : vector<128xf32> to vector<128x1xf32>
    %43 = vector.broadcast %42 : vector<128x1xf32> to vector<128x128xf32>
    %44 = arith.cmpf ole, %40, %43 : vector<128x128xf32>
    %c128_i32_18 = arith.constant 128 : i32
    %45 = vector.broadcast %c128_i32_18 : i32 to vector<128x128xi32>
    %46 = arith.select %44, %13, %45 : vector<128x128xi1>, vector<128x128xi32>
    %cst_19 = arith.constant dense<2147483647> : vector<128xi32>
    %47 = vector.multi_reduction <minsi>, %46, %cst_19 [1] : vector<128x128xi32> to vector<128xi32>
    %48 = vector.shape_cast %47 : vector<128xi32> to vector<128x1xi32>
    %49 = vector.broadcast %48 : vector<128x1xi32> to vector<128x128xi32>
    %50 = arith.cmpi eq, %13, %49 : vector<128x128xi32>
    %51 = arith.extui %50 : vector<128x128xi1> to vector<128x128xi32>
    %52 = arith.sitofp %51 : vector<128x128xi32> to vector<128x128xf32>
    %cst_20 = arith.constant 0.000000e+00 : f32
    %53 = vector.broadcast %cst_20 : f32 to vector<128x1xf32>
    %54 = arith.maximumf %42, %53 : vector<128x1xf32>
    %55 = math.sqrt %54 : vector<128x1xf32>
    %cst_21 = arith.constant 1.000000e-07 : f32
    %56 = vector.broadcast %cst_21 : f32 to vector<128x1xf32>
    %57 = arith.addf %55, %56 : vector<128x1xf32>
    %cst_22 = arith.constant 1.000000e+00 : f32
    %58 = vector.broadcast %cst_22 : f32 to vector<128x1xf32>
    %59 = arith.divf %58, %57 : vector<128x1xf32>
    %60 = vector.broadcast %59 : vector<128x1xf32> to vector<128x128xf32>
    %61 = arith.mulf %60, %52 : vector<128x128xf32>
    %62 = arith.addf %36, %61 : vector<128x128xf32>
    %cst_23 = arith.constant 0.000000e+00 : f32
    %63 = vector.broadcast %cst_23 : f32 to vector<128x128xf32>
    %64 = arith.cmpf ogt, %52, %63 : vector<128x128xf32>
    %cst_24 = arith.constant 1.000000e+30 : f32
    %65 = vector.broadcast %cst_24 : f32 to vector<128x128xf32>
    %66 = arith.select %64, %65, %40 : vector<128x128xi1>, vector<128x128xf32>
    %cst_25 = arith.constant dense<0x7F800000> : vector<128xf32>
    %67 = vector.multi_reduction <minimumf>, %66, %cst_25 [1] : vector<128x128xf32> to vector<128xf32>
    %68 = vector.shape_cast %67 : vector<128xf32> to vector<128x1xf32>
    %69 = vector.broadcast %68 : vector<128x1xf32> to vector<128x128xf32>
    %70 = arith.cmpf ole, %66, %69 : vector<128x128xf32>
    %c128_i32_26 = arith.constant 128 : i32
    %71 = vector.broadcast %c128_i32_26 : i32 to vector<128x128xi32>
    %72 = arith.select %70, %13, %71 : vector<128x128xi1>, vector<128x128xi32>
    %cst_27 = arith.constant dense<2147483647> : vector<128xi32>
    %73 = vector.multi_reduction <minsi>, %72, %cst_27 [1] : vector<128x128xi32> to vector<128xi32>
    %74 = vector.shape_cast %73 : vector<128xi32> to vector<128x1xi32>
    %75 = vector.broadcast %74 : vector<128x1xi32> to vector<128x128xi32>
    %76 = arith.cmpi eq, %13, %75 : vector<128x128xi32>
    %77 = arith.extui %76 : vector<128x128xi1> to vector<128x128xi32>
    %78 = arith.sitofp %77 : vector<128x128xi32> to vector<128x128xf32>
    %cst_28 = arith.constant 0.000000e+00 : f32
    %79 = vector.broadcast %cst_28 : f32 to vector<128x1xf32>
    %80 = arith.maximumf %68, %79 : vector<128x1xf32>
    %81 = math.sqrt %80 : vector<128x1xf32>
    %cst_29 = arith.constant 1.000000e-07 : f32
    %82 = vector.broadcast %cst_29 : f32 to vector<128x1xf32>
    %83 = arith.addf %81, %82 : vector<128x1xf32>
    %cst_30 = arith.constant 1.000000e+00 : f32
    %84 = vector.broadcast %cst_30 : f32 to vector<128x1xf32>
    %85 = arith.divf %84, %83 : vector<128x1xf32>
    %86 = vector.broadcast %85 : vector<128x1xf32> to vector<128x128xf32>
    %87 = arith.mulf %86, %78 : vector<128x128xf32>
    %88 = arith.addf %62, %87 : vector<128x128xf32>
    %cst_31 = arith.constant 0.000000e+00 : f32
    %89 = vector.broadcast %cst_31 : f32 to vector<128x128xf32>
    %90 = arith.cmpf ogt, %78, %89 : vector<128x128xf32>
    %cst_32 = arith.constant 1.000000e+30 : f32
    %91 = vector.broadcast %cst_32 : f32 to vector<128x128xf32>
    %92 = arith.select %90, %91, %66 : vector<128x128xi1>, vector<128x128xf32>
    %cst_33 = arith.constant dense<0x7F800000> : vector<128xf32>
    %93 = vector.multi_reduction <minimumf>, %92, %cst_33 [1] : vector<128x128xf32> to vector<128xf32>
    %94 = vector.shape_cast %93 : vector<128xf32> to vector<128x1xf32>
    %95 = vector.broadcast %94 : vector<128x1xf32> to vector<128x128xf32>
    %96 = arith.cmpf ole, %92, %95 : vector<128x128xf32>
    %c128_i32_34 = arith.constant 128 : i32
    %97 = vector.broadcast %c128_i32_34 : i32 to vector<128x128xi32>
    %98 = arith.select %96, %13, %97 : vector<128x128xi1>, vector<128x128xi32>
    %cst_35 = arith.constant dense<2147483647> : vector<128xi32>
    %99 = vector.multi_reduction <minsi>, %98, %cst_35 [1] : vector<128x128xi32> to vector<128xi32>
    %100 = vector.shape_cast %99 : vector<128xi32> to vector<128x1xi32>
    %101 = vector.broadcast %100 : vector<128x1xi32> to vector<128x128xi32>
    %102 = arith.cmpi eq, %13, %101 : vector<128x128xi32>
    %103 = arith.extui %102 : vector<128x128xi1> to vector<128x128xi32>
    %104 = arith.sitofp %103 : vector<128x128xi32> to vector<128x128xf32>
    %cst_36 = arith.constant 0.000000e+00 : f32
    %105 = vector.broadcast %cst_36 : f32 to vector<128x1xf32>
    %106 = arith.maximumf %94, %105 : vector<128x1xf32>
    %107 = math.sqrt %106 : vector<128x1xf32>
    %cst_37 = arith.constant 1.000000e-07 : f32
    %108 = vector.broadcast %cst_37 : f32 to vector<128x1xf32>
    %109 = arith.addf %107, %108 : vector<128x1xf32>
    %cst_38 = arith.constant 1.000000e+00 : f32
    %110 = vector.broadcast %cst_38 : f32 to vector<128x1xf32>
    %111 = arith.divf %110, %109 : vector<128x1xf32>
    %112 = vector.broadcast %111 : vector<128x1xf32> to vector<128x128xf32>
    %113 = arith.mulf %112, %104 : vector<128x128xf32>
    %114 = arith.addf %88, %113 : vector<128x128xf32>
    %cst_39 = arith.constant dense<0.000000e+00> : vector<128xf32>
    %115 = vector.multi_reduction <add>, %114, %cst_39 [1] : vector<128x128xf32> to vector<128xf32>
    %116 = vector.shape_cast %115 : vector<128xf32> to vector<128x1xf32>
    %cst_40 = arith.constant 9.99999996E-13 : f32
    %117 = vector.broadcast %cst_40 : f32 to vector<128x1xf32>
    %118 = arith.maximumf %116, %117 : vector<128x1xf32>
    %119 = vector.broadcast %118 : vector<128x1xf32> to vector<128x128xf32>
    %120 = arith.divf %114, %119 : vector<128x128xf32>
    %cst_41 = arith.constant dense<0.000000e+00> : vector<128x32xf32>
    %121 = tpu.matmul %120, %5, %cst_41 {dimension_numbers = #tpu.dot_dimension_numbers<[1], [0], [0], [1], [0, 0, 1, 1], [], []>} : vector<128x128xf32>, vector<128x32xf32>, vector<128x32xf32> -> vector<128x32xf32>
    %c0_42 = arith.constant 0 : index
    %c0_43 = arith.constant 0 : index
    %122 = vector.load %arg5[%c0_42, %c0_43] : memref<32x64xf32, #tpu.memory_space<vmem>>, vector<32x64xf32>
    %cst_44 = arith.constant dense<0.000000e+00> : vector<128x64xf32>
    %123 = tpu.matmul %121, %122, %cst_44 {dimension_numbers = #tpu.dot_dimension_numbers<[1], [0], [0], [1], [0, 0, 1, 1], [], []>} : vector<128x32xf32>, vector<32x64xf32>, vector<128x64xf32> -> vector<128x64xf32>
    %c0_45 = arith.constant 0 : index
    %c0_46 = arith.constant 0 : index
    %124 = vector.load %arg6[%c0_45, %c0_46] : memref<8x64xf32, #tpu.memory_space<vmem>>, vector<8x64xf32>
    %cst_47 = arith.constant dense<0.000000e+00> : vector<128x64xf32>
    %125 = tpu.matmul %1, %124, %cst_47 {dimension_numbers = #tpu.dot_dimension_numbers<[1], [0], [0], [1], [0, 0, 1, 1], [], []>} : vector<128x8xf32>, vector<8x64xf32>, vector<128x64xf32> -> vector<128x64xf32>
    %126 = arith.addf %123, %125 : vector<128x64xf32>
    %c0_48 = arith.constant 0 : index
    %c0_49 = arith.constant 0 : index
    %127 = vector.load %arg7[%c0_48, %c0_49] : memref<1x64xf32, #tpu.memory_space<vmem>>, vector<1x64xf32>
    %128 = vector.broadcast %127 : vector<1x64xf32> to vector<128x64xf32>
    %129 = arith.addf %126, %128 : vector<128x64xf32>
    %cst_50 = arith.constant 0.000000e+00 : f32
    %130 = vector.broadcast %cst_50 : f32 to vector<128x64xf32>
    %131 = arith.cmpf oge, %129, %130 : vector<128x64xf32>
    %cst_51 = arith.constant 2.000000e-01 : f32
    %132 = vector.broadcast %cst_51 : f32 to vector<128x64xf32>
    %133 = arith.mulf %132, %129 : vector<128x64xf32>
    %134 = arith.select %131, %129, %133 : vector<128x64xi1>, vector<128x64xf32>
    %cst_52 = arith.constant 1.41421354 : f32
    %135 = vector.broadcast %cst_52 : f32 to vector<128x64xf32>
    %136 = arith.mulf %134, %135 : vector<128x64xf32>
    %c0_53 = arith.constant 0 : index
    %c0_54 = arith.constant 0 : index
    %137 = vector.load %arg8[%c0_53, %c0_54] : memref<64x64xf32, #tpu.memory_space<vmem>>, vector<64x64xf32>
    %cst_55 = arith.constant dense<0.000000e+00> : vector<128x64xf32>
    %138 = tpu.matmul %136, %137, %cst_55 {dimension_numbers = #tpu.dot_dimension_numbers<[1], [0], [0], [1], [0, 0, 1, 1], [], []>} : vector<128x64xf32>, vector<64x64xf32>, vector<128x64xf32> -> vector<128x64xf32>
    %c0_56 = arith.constant 0 : index
    %c0_57 = arith.constant 0 : index
    %139 = vector.load %arg9[%c0_56, %c0_57] : memref<1x64xf32, #tpu.memory_space<vmem>>, vector<1x64xf32>
    %140 = vector.broadcast %139 : vector<1x64xf32> to vector<128x64xf32>
    %141 = arith.addf %138, %140 : vector<128x64xf32>
    %cst_58 = arith.constant 0.000000e+00 : f32
    %142 = vector.broadcast %cst_58 : f32 to vector<128x64xf32>
    %143 = arith.cmpf oge, %141, %142 : vector<128x64xf32>
    %cst_59 = arith.constant 2.000000e-01 : f32
    %144 = vector.broadcast %cst_59 : f32 to vector<128x64xf32>
    %145 = arith.mulf %144, %141 : vector<128x64xf32>
    %146 = arith.select %143, %141, %145 : vector<128x64xi1>, vector<128x64xf32>
    %cst_60 = arith.constant 1.41421354 : f32
    %147 = vector.broadcast %cst_60 : f32 to vector<128x64xf32>
    %148 = arith.mulf %146, %147 : vector<128x64xf32>
    %c0_61 = arith.constant 0 : index
    %c0_62 = arith.constant 0 : index
    %149 = vector.load %arg10[%c0_61, %c0_62] : memref<64x8xf32, #tpu.memory_space<vmem>>, vector<64x8xf32>
    %cst_63 = arith.constant dense<0.000000e+00> : vector<128x8xf32>
    %150 = tpu.matmul %148, %149, %cst_63 {dimension_numbers = #tpu.dot_dimension_numbers<[1], [0], [0], [1], [0, 0, 1, 1], [], []>} : vector<128x64xf32>, vector<64x8xf32>, vector<128x8xf32> -> vector<128x8xf32>
    %c0_64 = arith.constant 0 : index
    %c0_65 = arith.constant 0 : index
    %151 = vector.load %arg11[%c0_64, %c0_65] : memref<1x8xf32, #tpu.memory_space<vmem>>, vector<1x8xf32>
    %152 = vector.broadcast %151 : vector<1x8xf32> to vector<128x8xf32>
    %153 = arith.addf %150, %152 : vector<128x8xf32>
    %154 = vector.extract_strided_slice %1 {offsets = [0, 7], sizes = [128, 1], strides = [1, 1]} : vector<128x8xf32> to vector<128x1xf32>
    %cst_66 = arith.constant 0.000000e+00 : f32
    %155 = vector.broadcast %cst_66 : f32 to vector<128x1xf32>
    %156 = arith.cmpf ogt, %154, %155 : vector<128x1xf32>
    %cst_67 = arith.constant 0.000000e+00 : f32
    %157 = vector.broadcast %cst_67 : f32 to vector<128x1xf32>
    %158 = arith.cmpf olt, %154, %157 : vector<128x1xf32>
    %cst_68 = arith.constant -1.000000e+00 : f32
    %cst_69 = arith.constant 0.000000e+00 : f32
    %159 = vector.broadcast %cst_68 : f32 to vector<128x1xf32>
    %160 = vector.broadcast %cst_69 : f32 to vector<128x1xf32>
    %161 = arith.select %158, %159, %160 : vector<128x1xi1>, vector<128x1xf32>
    %cst_70 = arith.constant 1.000000e+00 : f32
    %162 = vector.broadcast %cst_70 : f32 to vector<128x1xf32>
    %163 = arith.select %156, %162, %161 : vector<128x1xi1>, vector<128x1xf32>
    %cst_71 = arith.constant 5.000000e-01 : f32
    %164 = vector.broadcast %cst_71 : f32 to vector<128x1xf32>
    %165 = arith.mulf %164, %163 : vector<128x1xf32>
    %166 = math.absf %154 : vector<128x1xf32>
    %cst_72 = arith.constant 0.000000e+00 : f32
    %167 = vector.broadcast %cst_72 : f32 to vector<128x1xf32>
    %168 = arith.subf %167, %166 : vector<128x1xf32>
    %cst_73 = arith.constant 5.000000e-03 : f32
    %169 = vector.broadcast %cst_73 : f32 to vector<128x1xf32>
    %170 = arith.divf %168, %169 : vector<128x1xf32>
    %171 = math.exp %170 : vector<128x1xf32>
    %cst_74 = arith.constant 1.000000e+00 : f32
    %172 = vector.broadcast %cst_74 : f32 to vector<128x1xf32>
    %173 = arith.subf %171, %172 : vector<128x1xf32>
    %174 = arith.mulf %165, %173 : vector<128x1xf32>
    %cst_75 = arith.constant 5.000000e-01 : f32
    %175 = vector.broadcast %cst_75 : f32 to vector<128x1xf32>
    %176 = arith.addf %175, %174 : vector<128x1xf32>
    %cst_76 = arith.constant 2.000000e+02 : f32
    %177 = vector.broadcast %cst_76 : f32 to vector<128x1xf32>
    %178 = arith.mulf %177, %176 : vector<128x1xf32>
    %179 = tpu.iota {dimensions = array<i32: 1>} : vector<128x8xi32>
    %c3_i32 = arith.constant 3 : i32
    %180 = vector.broadcast %c3_i32 : i32 to vector<128x8xi32>
    %181 = arith.cmpi eq, %179, %180 : vector<128x8xi32>
    %182 = arith.extui %181 : vector<128x8xi1> to vector<128x8xi32>
    %183 = arith.sitofp %182 : vector<128x8xi32> to vector<128x8xf32>
    %184 = vector.broadcast %178 : vector<128x1xf32> to vector<128x8xf32>
    %185 = arith.mulf %184, %183 : vector<128x8xf32>
    %186 = arith.addf %153, %185 : vector<128x8xf32>
    %c0_77 = arith.constant 0 : index
    %c0_78 = arith.constant 0 : index
    %c0_79 = arith.constant 0 : index
    %187 = vector.load %arg12[%c0_77, %c0_78, %c0_79] : memref<1x128x8xf32, #tpu.memory_space<vmem>>, vector<1x128x8xf32>
    %188 = vector.shape_cast %187 : vector<1x128x8xf32> to vector<128x8xf32>
    %189 = vector.shape_cast %186 : vector<128x8xf32> to vector<1x128x8xf32>
    tpu.vector_store %arg12[%c0_77, %c0_78, %c0_79], %189 {strides = array<i32>} : memref<1x128x8xf32, #tpu.memory_space<vmem>>, vector<1x128x8xf32>,
    return
  }
  func.func @transform_0(%arg0: i32, %arg1: i32) -> (i32, i32, i32) {
    %c0_i32 = arith.constant 0 : i32
    %c0_i32_0 = arith.constant 0 : i32
    return %arg0, %arg1, %c0_i32 : i32, i32, i32
  }
  func.func @transform_1(%arg0: i32, %arg1: i32) -> (i32, i32, i32) {
    %c0_i32 = arith.constant 0 : i32
    %c0_i32_0 = arith.constant 0 : i32
    %c0_i32_1 = arith.constant 0 : i32
    return %arg0, %c0_i32, %c0_i32_0 : i32, i32, i32
  }
  func.func @transform_2(%arg0: i32, %arg1: i32) -> (i32, i32, i32) {
    %c0_i32 = arith.constant 0 : i32
    %c0_i32_0 = arith.constant 0 : i32
    %c0_i32_1 = arith.constant 0 : i32
    return %arg0, %c0_i32, %c0_i32_0 : i32, i32, i32
  }
  func.func @transform_3(%arg0: i32, %arg1: i32) -> (i32, i32) {
    %c0_i32 = arith.constant 0 : i32
    %c0_i32_0 = arith.constant 0 : i32
    %c0_i32_1 = arith.constant 0 : i32
    return %c0_i32, %c0_i32_0 : i32, i32
  }
  func.func @transform_4(%arg0: i32, %arg1: i32) -> (i32, i32) {
    %c0_i32 = arith.constant 0 : i32
    %c0_i32_0 = arith.constant 0 : i32
    %c0_i32_1 = arith.constant 0 : i32
    return %c0_i32, %c0_i32_0 : i32, i32
  }
  func.func @transform_5(%arg0: i32, %arg1: i32) -> (i32, i32) {
    %c0_i32 = arith.constant 0 : i32
    %c0_i32_0 = arith.constant 0 : i32
    %c0_i32_1 = arith.constant 0 : i32
    return %c0_i32, %c0_i32_0 : i32, i32
  }
  func.func @transform_6(%arg0: i32, %arg1: i32) -> (i32, i32) {
    %c0_i32 = arith.constant 0 : i32
    %c0_i32_0 = arith.constant 0 : i32
    %c0_i32_1 = arith.constant 0 : i32
    return %c0_i32, %c0_i32_0 : i32, i32
  }
  func.func @transform_7(%arg0: i32, %arg1: i32) -> (i32, i32) {
    %c0_i32 = arith.constant 0 : i32
    %c0_i32_0 = arith.constant 0 : i32
    %c0_i32_1 = arith.constant 0 : i32
    return %c0_i32, %c0_i32_0 : i32, i32
  }
  func.func @transform_8(%arg0: i32, %arg1: i32) -> (i32, i32) {
    %c0_i32 = arith.constant 0 : i32
    %c0_i32_0 = arith.constant 0 : i32
    %c0_i32_1 = arith.constant 0 : i32
    return %c0_i32, %c0_i32_0 : i32, i32
  }
  func.func @transform_9(%arg0: i32, %arg1: i32) -> (i32, i32) {
    %c0_i32 = arith.constant 0 : i32
    %c0_i32_0 = arith.constant 0 : i32
    %c0_i32_1 = arith.constant 0 : i32
    return %c0_i32, %c0_i32_0 : i32, i32
  }
  func.func @transform_10(%arg0: i32, %arg1: i32) -> (i32, i32, i32) {
    %c0_i32 = arith.constant 0 : i32
    %c0_i32_0 = arith.constant 0 : i32
    return %arg0, %arg1, %c0_i32 : i32, i32, i32
  }
}

module attributes {stable_mosaic.version = 11 : i64} {
  func.func @_integrate_kernel(%arg0: i32, %arg1: memref<1x4x64x8xf32, #tpu.memory_space<vmem>>, %arg2: memref<1x64x8xf32, #tpu.memory_space<vmem>>, %arg3: memref<1x64x128xf32, #tpu.memory_space<vmem>>) attributes {dimension_semantics = [#tpu.dimension_semantics<parallel>], iteration_bounds = array<i64: 2>, scalar_prefetch = 0 : i64, scratch_operands = 0 : i64, tpu.core_type = #tpu.core_type<tc>, window_params = [{transform_indices = @transform_0, window_bounds = array<i64: 1, 4, 64, 8>}, {transform_indices = @transform_1, window_bounds = array<i64: 1, 64, 8>}, {transform_indices = @transform_2, window_bounds = array<i64: 1, 64, 128>}]} {
    %c0 = arith.constant 0 : index
    %c0_0 = arith.constant 0 : index
    %c0_1 = arith.constant 0 : index
    %c0_2 = arith.constant 0 : index
    %0 = vector.load %arg1[%c0, %c0_0, %c0_1, %c0_2] : memref<1x4x64x8xf32, #tpu.memory_space<vmem>>, vector<1x4x64x8xf32>
    %1 = vector.shape_cast %0 : vector<1x4x64x8xf32> to vector<4x64x8xf32>
    %c0_3 = arith.constant 0 : index
    %c0_4 = arith.constant 0 : index
    %c0_5 = arith.constant 0 : index
    %2 = vector.load %arg2[%c0_3, %c0_4, %c0_5] : memref<1x64x8xf32, #tpu.memory_space<vmem>>, vector<1x64x8xf32>
    %3 = vector.shape_cast %2 : vector<1x64x8xf32> to vector<64x8xf32>
    %4 = vector.extract_strided_slice %1 {offsets = [3, 0, 0], sizes = [1, 64, 8], strides = [1, 1, 1]} : vector<4x64x8xf32> to vector<1x64x8xf32>
    %5 = vector.shape_cast %4 : vector<1x64x8xf32> to vector<64x8xf32>
    %6 = vector.extract_strided_slice %3 {offsets = [0, 1], sizes = [64, 7], strides = [1, 1]} : vector<64x8xf32> to vector<64x7xf32>
    %7 = vector.extract_strided_slice %3 {offsets = [0, 0], sizes = [64, 7], strides = [1, 1]} : vector<64x8xf32> to vector<64x7xf32>
    %8 = arith.subf %6, %7 : vector<64x7xf32>
    %cst = arith.constant 1.000000e+10 : f32
    %9 = vector.broadcast %cst : f32 to vector<64x1xf32>
    %10 = tpu.concatenate %8, %9 in 1 : vector<64x7xf32>, vector<64x1xf32> -> vector<64x8xf32>
    %cst_6 = arith.constant 0.000000e+00 : f32
    %11 = vector.broadcast %cst_6 : f32 to vector<64x8xf32>
    %12 = arith.maximumf %5, %11 : vector<64x8xf32>
    %13 = arith.mulf %10, %12 : vector<64x8xf32>
    %cst_7 = arith.constant 8.000000e+01 : f32
    %14 = vector.broadcast %cst_7 : f32 to vector<64x8xf32>
    %15 = arith.minimumf %13, %14 : vector<64x8xf32>
    %cst_8 = arith.constant 0.000000e+00 : f32
    %16 = vector.broadcast %cst_8 : f32 to vector<64x8xf32>
    %17 = arith.subf %16, %15 : vector<64x8xf32>
    %18 = math.exp %17 : vector<64x8xf32>
    %cst_9 = arith.constant 1.000000e+00 : f32
    %19 = vector.broadcast %cst_9 : f32 to vector<64x8xf32>
    %20 = arith.subf %19, %18 : vector<64x8xf32>
    %cst_10 = arith.constant 1.000000e+00 : f32
    %21 = vector.broadcast %cst_10 : f32 to vector<64x8xf32>
    %22 = arith.subf %21, %20 : vector<64x8xf32>
    %cst_11 = arith.constant 0.000000e+00 : f32
    %23 = vector.broadcast %cst_11 : f32 to vector<64x8xf32>
    %24 = arith.maximumf %22, %23 : vector<64x8xf32>
    %cst_12 = arith.constant 1.000000e-10 : f32
    %25 = vector.broadcast %cst_12 : f32 to vector<64x8xf32>
    %26 = arith.addf %24, %25 : vector<64x8xf32>
    %27 = math.log %26 : vector<64x8xf32>
    %28 = tpu.iota {dimensions = array<i32: 0>} : vector<8x8xi32>
    %29 = tpu.iota {dimensions = array<i32: 1>} : vector<8x8xi32>
    %30 = arith.cmpi slt, %28, %29 : vector<8x8xi32>
    %31 = arith.extui %30 : vector<8x8xi1> to vector<8x8xi32>
    %32 = arith.sitofp %31 : vector<8x8xi32> to vector<8x8xf32>
    %cst_13 = arith.constant dense<0.000000e+00> : vector<64x8xf32>
    %33 = tpu.matmul %27, %32, %cst_13 {dimension_numbers = #tpu.dot_dimension_numbers<[1], [0], [0], [1], [0, 0, 1, 1], [], []>} : vector<64x8xf32>, vector<8x8xf32>, vector<64x8xf32> -> vector<64x8xf32>
    %cst_14 = arith.constant 0.000000e+00 : f32
    %34 = vector.broadcast %cst_14 : f32 to vector<64x8xf32>
    %35 = arith.minimumf %33, %34 : vector<64x8xf32>
    %36 = math.exp %35 : vector<64x8xf32>
    %37 = arith.mulf %20, %36 : vector<64x8xf32>
    %cst_15 = arith.constant dense<0.000000e+00> : vector<64xf32>
    %38 = vector.multi_reduction <add>, %27, %cst_15 [1] : vector<64x8xf32> to vector<64xf32>
    %39 = vector.shape_cast %38 : vector<64xf32> to vector<64x1xf32>
    %cst_16 = arith.constant 0.000000e+00 : f32
    %40 = vector.broadcast %cst_16 : f32 to vector<64x1xf32>
    %41 = arith.minimumf %39, %40 : vector<64x1xf32>
    %42 = math.exp %41 : vector<64x1xf32>
    %43 = vector.extract_strided_slice %1 {offsets = [0, 0, 0], sizes = [1, 64, 8], strides = [1, 1, 1]} : vector<4x64x8xf32> to vector<1x64x8xf32>
    %44 = vector.shape_cast %43 : vector<1x64x8xf32> to vector<64x8xf32>
    %45 = arith.mulf %37, %44 : vector<64x8xf32>
    %cst_17 = arith.constant dense<0.000000e+00> : vector<64xf32>
    %46 = vector.multi_reduction <add>, %45, %cst_17 [1] : vector<64x8xf32> to vector<64xf32>
    %47 = vector.shape_cast %46 : vector<64xf32> to vector<64x1xf32>
    %48 = vector.extract_strided_slice %1 {offsets = [1, 0, 0], sizes = [1, 64, 8], strides = [1, 1, 1]} : vector<4x64x8xf32> to vector<1x64x8xf32>
    %49 = vector.shape_cast %48 : vector<1x64x8xf32> to vector<64x8xf32>
    %50 = arith.mulf %37, %49 : vector<64x8xf32>
    %cst_18 = arith.constant dense<0.000000e+00> : vector<64xf32>
    %51 = vector.multi_reduction <add>, %50, %cst_18 [1] : vector<64x8xf32> to vector<64xf32>
    %52 = vector.shape_cast %51 : vector<64xf32> to vector<64x1xf32>
    %53 = vector.extract_strided_slice %1 {offsets = [2, 0, 0], sizes = [1, 64, 8], strides = [1, 1, 1]} : vector<4x64x8xf32> to vector<1x64x8xf32>
    %54 = vector.shape_cast %53 : vector<1x64x8xf32> to vector<64x8xf32>
    %55 = arith.mulf %37, %54 : vector<64x8xf32>
    %cst_19 = arith.constant dense<0.000000e+00> : vector<64xf32>
    %56 = vector.multi_reduction <add>, %55, %cst_19 [1] : vector<64x8xf32> to vector<64xf32>
    %57 = vector.shape_cast %56 : vector<64xf32> to vector<64x1xf32>
    %58 = arith.mulf %37, %3 : vector<64x8xf32>
    %cst_20 = arith.constant dense<0.000000e+00> : vector<64xf32>
    %59 = vector.multi_reduction <add>, %58, %cst_20 [1] : vector<64x8xf32> to vector<64xf32>
    %60 = vector.shape_cast %59 : vector<64xf32> to vector<64x1xf32>
    %cst_21 = arith.constant 0.000000e+00 : f32
    %61 = vector.broadcast %cst_21 : f32 to vector<64x115xf32>
    %62 = tpu.concatenate %37, %47, %52, %57, %60, %42, %61 in 1 : vector<64x8xf32>, vector<64x1xf32>, vector<64x1xf32>, vector<64x1xf32>, vector<64x1xf32>, vector<64x1xf32>, vector<64x115xf32> -> vector<64x128xf32>
    %c0_22 = arith.constant 0 : index
    %c0_23 = arith.constant 0 : index
    %c0_24 = arith.constant 0 : index
    %63 = vector.load %arg3[%c0_22, %c0_23, %c0_24] : memref<1x64x128xf32, #tpu.memory_space<vmem>>, vector<1x64x128xf32>
    %64 = vector.shape_cast %63 : vector<1x64x128xf32> to vector<64x128xf32>
    %65 = vector.shape_cast %62 : vector<64x128xf32> to vector<1x64x128xf32>
    tpu.vector_store %arg3[%c0_22, %c0_23, %c0_24], %65 {strides = array<i32>} : memref<1x64x128xf32, #tpu.memory_space<vmem>>, vector<1x64x128xf32>,
    return
  }
  func.func @transform_0(%arg0: i32) -> (i32, i32, i32, i32) {
    %c0_i32 = arith.constant 0 : i32
    %c0_i32_0 = arith.constant 0 : i32
    %c0_i32_1 = arith.constant 0 : i32
    %c0_i32_2 = arith.constant 0 : i32
    return %arg0, %c0_i32, %c0_i32_0, %c0_i32_1 : i32, i32, i32, i32
  }
  func.func @transform_1(%arg0: i32) -> (i32, i32, i32) {
    %c0_i32 = arith.constant 0 : i32
    %c0_i32_0 = arith.constant 0 : i32
    %c0_i32_1 = arith.constant 0 : i32
    return %arg0, %c0_i32, %c0_i32_0 : i32, i32, i32
  }
  func.func @transform_2(%arg0: i32) -> (i32, i32, i32) {
    %c0_i32 = arith.constant 0 : i32
    %c0_i32_0 = arith.constant 0 : i32
    %c0_i32_1 = arith.constant 0 : i32
    return %arg0, %c0_i32, %c0_i32_0 : i32, i32, i32
  }
}

module attributes {stable_mosaic.version = 11 : i64} {
  func.func @_integrate_kernel(%arg0: i32, %arg1: memref<1x4x64x16xf32, #tpu.memory_space<vmem>>, %arg2: memref<1x64x16xf32, #tpu.memory_space<vmem>>, %arg3: memref<1x64x128xf32, #tpu.memory_space<vmem>>) attributes {dimension_semantics = [#tpu.dimension_semantics<parallel>], iteration_bounds = array<i64: 2>, scalar_prefetch = 0 : i64, scratch_operands = 0 : i64, tpu.core_type = #tpu.core_type<tc>, window_params = [{transform_indices = @transform_0, window_bounds = array<i64: 1, 4, 64, 16>}, {transform_indices = @transform_1, window_bounds = array<i64: 1, 64, 16>}, {transform_indices = @transform_2, window_bounds = array<i64: 1, 64, 128>}]} {
    %c0 = arith.constant 0 : index
    %c0_0 = arith.constant 0 : index
    %c0_1 = arith.constant 0 : index
    %c0_2 = arith.constant 0 : index
    %0 = vector.load %arg1[%c0, %c0_0, %c0_1, %c0_2] : memref<1x4x64x16xf32, #tpu.memory_space<vmem>>, vector<1x4x64x16xf32>
    %1 = vector.shape_cast %0 : vector<1x4x64x16xf32> to vector<4x64x16xf32>
    %c0_3 = arith.constant 0 : index
    %c0_4 = arith.constant 0 : index
    %c0_5 = arith.constant 0 : index
    %2 = vector.load %arg2[%c0_3, %c0_4, %c0_5] : memref<1x64x16xf32, #tpu.memory_space<vmem>>, vector<1x64x16xf32>
    %3 = vector.shape_cast %2 : vector<1x64x16xf32> to vector<64x16xf32>
    %4 = vector.extract_strided_slice %1 {offsets = [3, 0, 0], sizes = [1, 64, 16], strides = [1, 1, 1]} : vector<4x64x16xf32> to vector<1x64x16xf32>
    %5 = vector.shape_cast %4 : vector<1x64x16xf32> to vector<64x16xf32>
    %6 = vector.extract_strided_slice %3 {offsets = [0, 1], sizes = [64, 15], strides = [1, 1]} : vector<64x16xf32> to vector<64x15xf32>
    %7 = vector.extract_strided_slice %3 {offsets = [0, 0], sizes = [64, 15], strides = [1, 1]} : vector<64x16xf32> to vector<64x15xf32>
    %8 = arith.subf %6, %7 : vector<64x15xf32>
    %cst = arith.constant 1.000000e+10 : f32
    %9 = vector.broadcast %cst : f32 to vector<64x1xf32>
    %10 = tpu.concatenate %8, %9 in 1 : vector<64x15xf32>, vector<64x1xf32> -> vector<64x16xf32>
    %cst_6 = arith.constant 0.000000e+00 : f32
    %11 = vector.broadcast %cst_6 : f32 to vector<64x16xf32>
    %12 = arith.maximumf %5, %11 : vector<64x16xf32>
    %13 = arith.mulf %10, %12 : vector<64x16xf32>
    %cst_7 = arith.constant 8.000000e+01 : f32
    %14 = vector.broadcast %cst_7 : f32 to vector<64x16xf32>
    %15 = arith.minimumf %13, %14 : vector<64x16xf32>
    %cst_8 = arith.constant 0.000000e+00 : f32
    %16 = vector.broadcast %cst_8 : f32 to vector<64x16xf32>
    %17 = arith.subf %16, %15 : vector<64x16xf32>
    %18 = math.exp %17 : vector<64x16xf32>
    %cst_9 = arith.constant 1.000000e+00 : f32
    %19 = vector.broadcast %cst_9 : f32 to vector<64x16xf32>
    %20 = arith.subf %19, %18 : vector<64x16xf32>
    %cst_10 = arith.constant 1.000000e+00 : f32
    %21 = vector.broadcast %cst_10 : f32 to vector<64x16xf32>
    %22 = arith.subf %21, %20 : vector<64x16xf32>
    %cst_11 = arith.constant 0.000000e+00 : f32
    %23 = vector.broadcast %cst_11 : f32 to vector<64x16xf32>
    %24 = arith.maximumf %22, %23 : vector<64x16xf32>
    %cst_12 = arith.constant 1.000000e-10 : f32
    %25 = vector.broadcast %cst_12 : f32 to vector<64x16xf32>
    %26 = arith.addf %24, %25 : vector<64x16xf32>
    %27 = math.log %26 : vector<64x16xf32>
    %28 = tpu.iota {dimensions = array<i32: 0>} : vector<16x16xi32>
    %29 = tpu.iota {dimensions = array<i32: 1>} : vector<16x16xi32>
    %30 = arith.cmpi slt, %28, %29 : vector<16x16xi32>
    %31 = arith.extui %30 : vector<16x16xi1> to vector<16x16xi32>
    %32 = arith.sitofp %31 : vector<16x16xi32> to vector<16x16xf32>
    %cst_13 = arith.constant dense<0.000000e+00> : vector<64x16xf32>
    %33 = tpu.matmul %27, %32, %cst_13 {dimension_numbers = #tpu.dot_dimension_numbers<[1], [0], [0], [1], [0, 0, 1, 1], [], []>} : vector<64x16xf32>, vector<16x16xf32>, vector<64x16xf32> -> vector<64x16xf32>
    %cst_14 = arith.constant 0.000000e+00 : f32
    %34 = vector.broadcast %cst_14 : f32 to vector<64x16xf32>
    %35 = arith.minimumf %33, %34 : vector<64x16xf32>
    %36 = math.exp %35 : vector<64x16xf32>
    %37 = arith.mulf %20, %36 : vector<64x16xf32>
    %cst_15 = arith.constant dense<0.000000e+00> : vector<64xf32>
    %38 = vector.multi_reduction <add>, %27, %cst_15 [1] : vector<64x16xf32> to vector<64xf32>
    %39 = vector.shape_cast %38 : vector<64xf32> to vector<64x1xf32>
    %cst_16 = arith.constant 0.000000e+00 : f32
    %40 = vector.broadcast %cst_16 : f32 to vector<64x1xf32>
    %41 = arith.minimumf %39, %40 : vector<64x1xf32>
    %42 = math.exp %41 : vector<64x1xf32>
    %43 = vector.extract_strided_slice %1 {offsets = [0, 0, 0], sizes = [1, 64, 16], strides = [1, 1, 1]} : vector<4x64x16xf32> to vector<1x64x16xf32>
    %44 = vector.shape_cast %43 : vector<1x64x16xf32> to vector<64x16xf32>
    %45 = arith.mulf %37, %44 : vector<64x16xf32>
    %cst_17 = arith.constant dense<0.000000e+00> : vector<64xf32>
    %46 = vector.multi_reduction <add>, %45, %cst_17 [1] : vector<64x16xf32> to vector<64xf32>
    %47 = vector.shape_cast %46 : vector<64xf32> to vector<64x1xf32>
    %48 = vector.extract_strided_slice %1 {offsets = [1, 0, 0], sizes = [1, 64, 16], strides = [1, 1, 1]} : vector<4x64x16xf32> to vector<1x64x16xf32>
    %49 = vector.shape_cast %48 : vector<1x64x16xf32> to vector<64x16xf32>
    %50 = arith.mulf %37, %49 : vector<64x16xf32>
    %cst_18 = arith.constant dense<0.000000e+00> : vector<64xf32>
    %51 = vector.multi_reduction <add>, %50, %cst_18 [1] : vector<64x16xf32> to vector<64xf32>
    %52 = vector.shape_cast %51 : vector<64xf32> to vector<64x1xf32>
    %53 = vector.extract_strided_slice %1 {offsets = [2, 0, 0], sizes = [1, 64, 16], strides = [1, 1, 1]} : vector<4x64x16xf32> to vector<1x64x16xf32>
    %54 = vector.shape_cast %53 : vector<1x64x16xf32> to vector<64x16xf32>
    %55 = arith.mulf %37, %54 : vector<64x16xf32>
    %cst_19 = arith.constant dense<0.000000e+00> : vector<64xf32>
    %56 = vector.multi_reduction <add>, %55, %cst_19 [1] : vector<64x16xf32> to vector<64xf32>
    %57 = vector.shape_cast %56 : vector<64xf32> to vector<64x1xf32>
    %58 = arith.mulf %37, %3 : vector<64x16xf32>
    %cst_20 = arith.constant dense<0.000000e+00> : vector<64xf32>
    %59 = vector.multi_reduction <add>, %58, %cst_20 [1] : vector<64x16xf32> to vector<64xf32>
    %60 = vector.shape_cast %59 : vector<64xf32> to vector<64x1xf32>
    %cst_21 = arith.constant 0.000000e+00 : f32
    %61 = vector.broadcast %cst_21 : f32 to vector<64x107xf32>
    %62 = tpu.concatenate %37, %47, %52, %57, %60, %42, %61 in 1 : vector<64x16xf32>, vector<64x1xf32>, vector<64x1xf32>, vector<64x1xf32>, vector<64x1xf32>, vector<64x1xf32>, vector<64x107xf32> -> vector<64x128xf32>
    %c0_22 = arith.constant 0 : index
    %c0_23 = arith.constant 0 : index
    %c0_24 = arith.constant 0 : index
    %63 = vector.load %arg3[%c0_22, %c0_23, %c0_24] : memref<1x64x128xf32, #tpu.memory_space<vmem>>, vector<1x64x128xf32>
    %64 = vector.shape_cast %63 : vector<1x64x128xf32> to vector<64x128xf32>
    %65 = vector.shape_cast %62 : vector<64x128xf32> to vector<1x64x128xf32>
    tpu.vector_store %arg3[%c0_22, %c0_23, %c0_24], %65 {strides = array<i32>} : memref<1x64x128xf32, #tpu.memory_space<vmem>>, vector<1x64x128xf32>,
    return
  }
  func.func @transform_0(%arg0: i32) -> (i32, i32, i32, i32) {
    %c0_i32 = arith.constant 0 : i32
    %c0_i32_0 = arith.constant 0 : i32
    %c0_i32_1 = arith.constant 0 : i32
    %c0_i32_2 = arith.constant 0 : i32
    return %arg0, %c0_i32, %c0_i32_0, %c0_i32_1 : i32, i32, i32, i32
  }
  func.func @transform_1(%arg0: i32) -> (i32, i32, i32) {
    %c0_i32 = arith.constant 0 : i32
    %c0_i32_0 = arith.constant 0 : i32
    %c0_i32_1 = arith.constant 0 : i32
    return %arg0, %c0_i32, %c0_i32_0 : i32, i32, i32
  }
  func.func @transform_2(%arg0: i32) -> (i32, i32, i32) {
    %c0_i32 = arith.constant 0 : i32
    %c0_i32_0 = arith.constant 0 : i32
    %c0_i32_1 = arith.constant 0 : i32
    return %arg0, %c0_i32, %c0_i32_0 : i32, i32, i32
  }
}

</mosaic_0001>

<bundles_post_ra>
// kernel: custom-call.102
= control target key start
LH: loop header
LB: loop body
LE: loop exit
PB: predicated region body
PF: predicated region fallthrough
CT: control target
= control target key end

     0   :  { %s6_s0 = inlined_call_operand.vmem [shape: u32[128,8], index: 0, kind: output, shape index: {}]  }

// kernel: synthesis_network_forward.5
= control target key start
LH: loop header
LB: loop body
LE: loop exit
PB: predicated region body
PF: predicated region fallthrough
CT: control target
= control target key end

     0   :  { %s5229_s27 = smov 0   ;;  %s6313_s0 = inlined_call_operand.vmem [shape: f32[16,32], index: 0, kind: input, shape index: {}]   ;;  %s6314_s1 = inlined_call_operand.vmem [shape: f32[2,8,32], index: 1, kind: input, shape index: {}]   ;;  %s6315_s2 = inlined_call_operand.vmem [shape: f32[64,16], index: 2, kind: input, shape index: {}]   ;;  %s6316_s3 = inlined_call_operand.vmem [shape: f32[256,64], index: 3, kind: input, shape index: {}]   ;;  %s6317_s4 = inlined_call_operand.vmem [shape: f32[5,32,32], index: 4, kind: input, shape index: {}]   ;;  %s6318_s5 = inlined_call_operand.vmem [shape: f32[5,1,32], index: 5, kind: input, shape index: {}]   ;;  %s6319_s6 = inlined_call_operand.vmem [shape: f32[3,32,128], index: 6, kind: input, shape index: {}]   ;;  %s6320_s7 = inlined_call_operand.vmem [shape: f32[3,1,128], index: 7, kind: input, shape index: {}]   ;;  %s6321_s8 = inlined_call_operand.vmem [shape: f32[2,256,128], index: 8, kind: output, shape index: {}]  }
   0x1 LB: > { %s3897_s28 = sadd.s32 4294967295, %s5179_s27   ;;  %p3901_p0 = scmp.ge.s32.totalorder %s5179_s27, 1  ;;  %s5179_s27 = sphi %s5229_s27, %s18_s27  }
   0x2   : > { %p261_p1 = scmp.lt.s32.totalorder %s5179_s27, 3 }
   0x4   : > { %p262_p2 = pnand %p3901_p0, %p261_p1 }
   0x5   : > { %v346_v0 = vld [vmem:[%s6317_s4] sm:$0xff] (!%p262_p2)  ;;  %v347_v1 = vld [vmem:[%s6317_s4 + $0x8] sm:$0xff] (!%p262_p2)  ;;  %v348_v2 = vld [vmem:[%s6317_s4 + $0x10] sm:$0xff] (!%p262_p2)  ;;  %v351_v3 = vlaneseq (!%p262_p2)  ;;  %v5181_v4 = vmov (!%p262_p2), 0.0|0.0   ;;  %vm5182_vm0 = vmmov (!%p262_p2), 0   ;;  %v5183_v9 = vmov (!%p262_p2), 0.0  }
   0x6   : > { %265 = sbr.rel (%p262_p2) target bundleno = 2037 (0x7f5), region = 52  ;;  %4909 = vmatprep.subr.bf16.mxu1 (!%p262_p2), %v5181_v4  ;;  %v440_v5 = vmul.f32 (!%p262_p2), %v346_v0, %v346_v0  ;;  %v441_v6 = vmul.f32 (!%p262_p2), %v347_v1, %v347_v1  ;;  %v349_v7 = vld [vmem:[%s6317_s4 + $0x18] sm:$0xff] (!%p262_p2)  ;;  %v442_v8 = vmul.f32 (!%p262_p2), %v348_v2, %v348_v2  ;;  %4455 = vmatprep.mubr.msk.f32.mxu1 (!%p262_p2), %vm5182_vm0, %v5183_v9  ;;  %p294_p3 = scmp.lt.s32.totalorder (!%p262_p2), %s3897_s28, 1  ;;  %v344_v19 = vld [vmem:[%s6313_s0] sm:$0xff] (!%p262_p2)  ;;  %v345_v20 = vld [vmem:[%s6313_s0 + $0x8] sm:$0xff] (!%p262_p2)  ;;  %vm357_vm1 = vcmask (!%p262_p2), 261120  }
   0x7   : > { %v443_v10 = vmul.f32 (!%p262_p2), %v349_v7, %v349_v7  ;;  %v5252_v11 = vshrl.u32 (!%p262_p2), %v351_v3, 7  ;;  %v4901_v12 = vpack.c.bf16 (!%p262_p2), %v347_v1, %v346_v0  ;;  %v4905_v13 = vpack.c.bf16 (!%p262_p2), %v349_v7, %v348_v2  ;;  %v542_v24 = vld [vmem:[%s6319_s6] sm:$0xff] (!%p262_p2)  ;;  %v543_v25 = vld [vmem:[%s6319_s6 + $0x8] sm:$0xff] (!%p262_p2)  ;;  %v544_v27 = vld [vmem:[%s6319_s6 + $0x10] sm:$0xff] (!%p262_p2) }
   0x8   : > { %v4910_v14 = vpack.c.bf16 (!%p262_p2), %v441_v6, %v440_v5  ;;  %v4915_v26 = vpack.c.bf16 (!%p262_p2), %v543_v25, %v542_v24  ;;  %v545_v28 = vld [vmem:[%s6319_s6 + $0x18] sm:$0xff] (!%p262_p2)  ;;  %v5300_v30 = vld [vmem:[%s6315_s2] sm:$0xff] (!%p262_p2)  ;;  %vm640_vm2 = vcmask (!%p262_p2), 130048   ;;  %v3921_v49 = vld [vmem:[%s6317_s4 + $0x28] sm:$0xff] (!%p262_p2)  ;;  %vm1601_vm13 = vcmask (!%p262_p2), 523264  }
   0x9   : > { %4902 = vmatprep.subr.bf16.mxu0 (!%p262_p2), %v4901_v12  ;;  %v4913_v15 = vpack.c.bf16 (!%p262_p2), %v443_v10, %v442_v8  ;;  %v5258_v16 = vsub.s32 (!%p262_p2), 0, %v5252_v11  ;;  %v4919_v29 = vpack.c.bf16 (!%p262_p2), %v545_v28, %v544_v27  ;;  %v3908_v39 = vld [vmem:[%s6318_s5] ss:$0 sm:$0xff] (!%p262_p2)  ;;  %v549_v42 = vsub.s32 (!%p262_p2), 1, %v5252_v11  ;;  %v3922_v59 = vld [vmem:[%s6317_s4 + $0x30] sm:$0xff] (!%p262_p2)  ;;  %v3923_v60 = vld [vmem:[%s6317_s4 + $0x38] sm:$0xff] (!%p262_p2) }
   0xa   : > { %4911 = vmatpush3.bf16.msra.mxu1 (!%p262_p2), %v4910_v14  ;;  %4904 = vmatpush3.bf16.msra.mxu0 (!%p262_p2), %v4901_v12  ;;  %v3920_v48 = vld [vmem:[%s6317_s4 + $0x20] sm:$0xff] (!%p262_p2)  ;;  %v919_v55 = vmul.f32 (!%p262_p2), %v3921_v49, %v3921_v49  ;;  %v5327_v61 = vld [vmem:[%s6315_s2 + $0x8] sm:$0xff] (!%p262_p2)  ;;  %v920_v63 = vmul.f32 (!%p262_p2), %v3922_v59, %v3922_v59  ;;  %v921_v0 = vmul.f32 (!%p262_p2), %v3923_v60, %v3923_v60  ;;  %v5332_v1 = vld [vmem:[%s6315_s2 + $0x10] sm:$0xff] (!%p262_p2)  ;;  %v779_v14 = vsub.s32 (!%p262_p2), 2, %v5252_v11 }
   0xb   : > { %4912 = vmatprep.subr.bf16.mxu1 (!%p262_p2), %v5181_v4  ;;  %4906 = vmatprep.subr.bf16.mxu0 (!%p262_p2), %v4905_v13  ;;  %v918_v54 = vmul.f32 (!%p262_p2), %v3920_v48, %v3920_v48  ;;  %v5342_v2 = vld [vmem:[%s6315_s2 + $0x18] sm:$0xff] (!%p262_p2)  ;;  %v5347_v5 = vld [vmem:[%s6315_s2 + $0x20] sm:$0xff] (!%p262_p2)  ;;  %v5357_v6 = vld [vmem:[%s6315_s2 + $0x28] sm:$0xff] (!%p262_p2)  ;;  %v4927_v12 = vpack.c.bf16 (!%p262_p2), %v3921_v49, %v3920_v48 }
   0xc   : > { %v4939_v3 = vpack.c.bf16 (!%p262_p2), %v921_v0, %v920_v63  ;;  %v5362_v7 = vld [vmem:[%s6315_s2 + $0x30] sm:$0xff] (!%p262_p2)  ;;  %v5371_v8 = vld [vmem:[%s6315_s2 + $0x38] sm:$0xff] (!%p262_p2) }
   0xd   : > { %s6323_s28 = smov (!%p294_p3, %s3897_s28), 1  ;;  %v4936_v62 = vpack.c.bf16 %v919_v55, %v918_v54  ;;  %v3937_v28 = vld [vmem:[%s6317_s4 + $0x50] sm:$0xff] }
   0xe   : > { %s3902_s15 = sshll.u32 %s6323_s28, 3  ;;  %4914 = vmatpush3.bf16.msra.mxu1 %v4913_v15  ;;  %4908 = vmatpush3.bf16.msra.mxu0 %v4905_v13  ;;  %v4931_v13 = vpack.c.bf16 %v3923_v60, %v3922_v59  ;;  %v3909_v15 = vld [vmem:[%s6320_s7] ss:$0 sm:$0xff]  ;;  %v3952_v55 = vld [vmem:[%s6319_s6 + $0x30] sm:$0xff]  ;;  %s4154_s24 = sshll.u32 %s6323_s28, 8 }
   0xf   : > { %s5264_s18 = scalar_lea.vmem %s6314_s1, %s3902_s15  ;;  %4916 = vmatprep.subr.bf16.mxu0 %v4915_v26  ;;  %s6244_s9 = scalar_lea.vmem %s6321_s8, %s4154_s24 }
  0x10   : > { %v5267_v17 = vld [vmem:[%s5264_s18] sm:$0xff] }
  0x11   : > { %v5271_v18 = vmul.f32 %v5267_v17, %v5267_v17  ;;  %v354_v21 = vrot.slane %v5267_v17, %v5258_v16  ;;  %v550_v47 = vrot.slane %v5267_v17, %v549_v42  ;;  %v780_v24 = vrot.slane %v5267_v17, %v779_v14 }
  0x13   : > { %v355_v22 = vmul.f32 %v354_v21, %v344_v19  ;;  %v356_v23 = vmul.f32 %v354_v21, %v345_v20  ;;  %4456 = vmatmul.mubr.msk.f32.vlgmr.msra.gmra.mrb[0].mxu1 %vm357_vm1, %v5271_v18  ;;  %v922_v10 = vrot.slane %v5271_v18, 2  ;;  %v3935_v19 = vld [vmem:[%s6317_s4 + $0x40] sm:$0xff]  ;;  %v3936_v20 = vld [vmem:[%s6317_s4 + $0x48] sm:$0xff] }
  0x14   : > { %4473 = vmatprep.mubr.msk.f32.mxu1 %vm640_vm2, %v5300_v30  ;;  %v1204_v25 = vmul.f32 %v3935_v19, %v3935_v19 }
  0x15   : > { %4444 = vmatprep.mubr.msk.f32.mxu0 %vm357_vm1, %v355_v22 }
  0x16   : > { %4445 = vmatmul.mubr.msk.f32.vlgmr.msra.gmra.mrb[0].mxu0 %vm357_vm1, %v356_v23 }
  0x17   : > { %4918 = vmatpush3.bf16.msra.mxu0 %v4915_v26  ;;  %v1205_v26 = vmul.f32 %v3936_v20, %v3936_v20 }
  0x18   : > { %4920 = vmatprep.subr.bf16.mxu0 %v4919_v29 }
  0x1b   : > { %4922 = vmatpush3.bf16.msra.mxu0 %v4919_v29  ;;  %v3938_v29 = vld [vmem:[%s6317_s4 + $0x58] sm:$0xff] }
  0x1c   : > { %4928 = vmatprep.subr.bf16.mxu0 %v4927_v12  ;;  %v4945_v63 = vpack.c.bf16 %v3938_v29, %v3937_v28 }
  0xe6   : > { %v513_v31 = vpop.f32.mrb[0].mxu1 }
  0xe7   : > { %v517_v32 = vmax.f32 %v513_v31, 0.0  ;;  %v4457_v33 = vpop.f32.mrb[1].mxu1 }
  0xe9   : > { %v4446_v34 = vpop.f32.mrb[0].mxu0  ;;  %v518_v35 = vadd.f32 1e-08, %v517_v32 }
  0xea   : > { %v430_v36 = vpop.f32.mrb[1].mxu0 }
  0xeb   : > { %5130 = vrsqrt.f32 %v518_v35  ;;  %v4950_v35 = vpack.c.bf16 %v1205_v26, %v1204_v25 }
  0xf5   : > { %v5131_v37 = vpop.eup %5130 }
  0xf6   : > { %v523_v38 = vrot.slane %v5131_v37, %v5258_v16  ;;  %v1207_v37 = vmul.f32 %v3938_v29, %v3938_v29 }
  0xf8   : > { %v525_v40 = vmul.f32 %v4446_v34, %v523_v38  ;;  %v524_v41 = vmul.f32 %v523_v38, %v430_v36  ;;  %v1206_v36 = vmul.f32 %v3937_v28, %v3937_v28 }
  0xfa   : > { %v533_v43 = vadd.f32 %v3908_v39, %v525_v40  ;;  %v532_v44 = vadd.f32 %v3908_v39, %v524_v41  ;;  %v3950_v40 = vld [vmem:[%s6319_s6 + $0x20] sm:$0xff]  ;;  %v3951_v41 = vld [vmem:[%s6319_s6 + $0x28] sm:$0xff] }
  0xfc   : > { %vm535_vm3 = vcmp.ge.f32.partialorder %v533_v43, 0.0  ;;  %v537_v45 = vmul.f32 0.2, %v533_v43  ;;  %vm534_vm4 = vcmp.ge.f32.partialorder %v532_v44, 0.0  ;;  %v536_v46 = vmul.f32 0.2, %v532_v44 }
  0xfe   : > { %v538_v50 = vsel %vm534_vm4, %v532_v44, %v536_v46  ;;  %v539_v51 = vsel %vm535_vm3, %v533_v43, %v537_v45  ;;  %v4953_v44 = vpack.c.bf16 %v1207_v37, %v1206_v36  ;;  %v4955_v46 = vpack.c.bf16 %v3951_v41, %v3950_v40 }
  0xff   : > { %v540_v52 = vmul.f32 1.4142135, %v538_v50  ;;  %v541_v53 = vmul.f32 1.4142135, %v539_v51 }
 0x101   : > { %v551_v56 = vmul.f32 %v550_v47, %v540_v52  ;;  %v552_v57 = vmul.f32 %v550_v47, %v541_v53  ;;  %v4923_v58 = vpack.c.bf16 %v541_v53, %v540_v52 }
 0x103   : > { %4466 = vmatprep.mubr.msk.f32.mxu0 %vm357_vm1, %v551_v56  ;;  %4924 = vmatprep.subr.bf16.mxu1 %v4923_v58  ;;  %v3953_v56 = vld [vmem:[%s6319_s6 + $0x38] sm:$0xff] }
 0x104   : > { %4467 = vmatmul.mubr.msk.f32.vlgmr.msra.gmra.mrb[2].mxu0 %vm357_vm1, %v552_v57  ;;  %4926 = vmatpush3.bf16.msra.mxu1 %v4923_v58  ;;  %v1208_v58 = vrot.slane %v5271_v18, 3  ;;  %v4959_v60 = vpack.c.bf16 %v3953_v56, %v3952_v55 }
 0x105   : > { %4935 = vmatprep.subr.bf16.mxu1 %v5181_v4  ;;  %4930 = vmatpush3.bf16.msra.mxu0 %v4927_v12 }
 0x106   : > { %4932 = vmatprep.subr.bf16.mxu0 %v4931_v13 }
 0x107   : > { %4474 = vmatmul.mubr.msk.f32.vlgmr.msra.gmra.mrb[2].mxu1 %vm640_vm2, %v5327_v61 }
 0x108   : > { %4476 = vmatprep.mubr.msk.f32.mxu1 %vm640_vm2, %v5332_v1  ;;  %4937 = vmatpush3.bf16.msra.mxu1 %v4936_v62  ;;  %v4941_v62 = vpack.c.bf16 %v3936_v20, %v3935_v19  ;;  %v1065_v20 = vsub.s32 3, %v5252_v11 }
 0x109   : > { %4938 = vmatprep.subr.bf16.mxu1 %v5181_v4  ;;  %4934 = vmatpush3.bf16.msra.mxu0 %v4931_v13  ;;  %v3934_v13 = vld [vmem:[%s6318_s5 + $0x1] ss:$0 sm:$0xff] }
 0x10a   : > { %4949 = vmatprep.subr.bf16.mxu0 %v5181_v4 }
 0x10b   : > { %4477 = vmatmul.mubr.msk.f32.gmra.mrb[4].mxu1 %vm640_vm2, %v5342_v2 }
 0x10c   : > { %4479 = vmatprep.mubr.msk.f32.mxu1 %vm640_vm2, %v5347_v5  ;;  %4940 = vmatpush3.bf16.msra.mxu1 %v4939_v3 }
 0x10d   : > { %4942 = vmatprep.subr.bf16.mxu1 %v4941_v62 }
 0x10f   : > { %4480 = vmatmul.mubr.msk.f32.gmra.mrb[6].mxu1 %vm640_vm2, %v5357_v6 }
 0x110   : > { %4482 = vmatprep.mubr.msk.f32.mxu1 %vm640_vm2, %v5362_v7 }
 0x113   : > { %4483 = vmatmul.mubr.msk.f32.gmra.mrb[8].mxu1 %vm640_vm2, %v5371_v8 }
 0x114   : > { %4513 = vmatprep.mubr.msk.f32.mxu1 %vm5182_vm0, %v5183_v9 }
 0x117   : > { %4514 = vmatmul.mubr.msk.f32.vlgmr.msra.gmra.mrb[10].mxu1 %vm357_vm1, %v922_v10 }
 0x118   : > { %4944 = vmatpush3.bf16.msra.mxu1 %v4941_v62 }
 0x119   : > { %4946 = vmatprep.subr.bf16.mxu1 %v4945_v63 }
 0x11c   : > { %4948 = vmatpush3.bf16.msra.mxu1 %v4945_v63 }
 0x1d7   : > { %v4468_v21 = vpop.f32.mrb[2].mxu0 }
 0x1d8   : > { %v637_v22 = vadd.f32 %v4468_v21, %v3909_v15  ;;  %v631_v23 = vpop.f32.mrb[3].mxu0 }
 0x1d9   : > { %v632_v27 = vadd.f32 %v3909_v15, %v631_v23 }
 0x1da   : > { %v4475_v31 = vpop.f32.mrb[2].mxu1 }
 0x1db   : > { %v5397_v32 = vpack.c.bf16 %v637_v22, %v632_v27  ;;  %v731_v33 = vpop.f32.mrb[3].mxu1  ;;  %v782_v38 = vmul.f32 %v4475_v31, %v780_v24 }
 0x1dc   : > { %v781_v34 = vmul.f32 %v780_v24, %v731_v33  ;;  %v1066_v33 = vrot.slane %v5267_v17, %v1065_v20 }
 0x1de   : > { %v4478_v39 = vpop.f32.mrb[4].mxu1  ;;  %4493 = vmatprep.mubr.msk.f32.mxu0 %vm357_vm1, %v781_v34 }
 0x1df   : > { %v741_v42 = vpop.f32.mrb[5].mxu1  ;;  %4494 = vmatmul.mubr.msk.f32.vlgmr.msra.gmra.mrb[4].mxu0 %vm357_vm1, %v782_v38  ;;  %v784_v45 = vmul.f32 %v4478_v39, %v780_v24 }
 0x1e0   : > { %v783_v43 = vmul.f32 %v780_v24, %v741_v42  ;;  %4951 = vmatpush3.bf16.msra.mxu0 %v4950_v35 }
 0x1e1   : > { %4952 = vmatprep.subr.bf16.mxu0 %v5181_v4 }
 0x1e2   : > { %v4481_v47 = vpop.f32.mrb[6].mxu1  ;;  %4496 = vmatprep.mubr.msk.f32.mxu0 %vm357_vm1, %v783_v43 }
 0x1e3   : > { %v751_v48 = vpop.f32.mrb[7].mxu1  ;;  %4497 = vmatmul.mubr.msk.f32.gmra.mrb[6].mxu0 %vm357_vm1, %v784_v45  ;;  %v786_v50 = vmul.f32 %v4481_v47, %v780_v24 }
 0x1e4   : > { %v785_v49 = vmul.f32 %v780_v24, %v751_v48  ;;  %4954 = vmatpush3.bf16.msra.mxu0 %v4953_v44 }
 0x1e5   : > { %4956 = vmatprep.subr.bf16.mxu0 %v4955_v46 }
 0x1e6   : > { %v4484_v51 = vpop.f32.mrb[8].mxu1  ;;  %4499 = vmatprep.mubr.msk.f32.mxu0 %vm357_vm1, %v785_v49 }
 0x1e7   : > { %v761_v52 = vpop.f32.mrb[9].mxu1  ;;  %4500 = vmatmul.mubr.msk.f32.gmra.mrb[8].mxu0 %vm357_vm1, %v786_v50  ;;  %v788_v54 = vmul.f32 %v4484_v51, %v780_v24 }
 0x1e8   : > { %v787_v53 = vmul.f32 %v780_v24, %v761_v52 }
 0x1ea   : > { %4502 = vmatprep.mubr.msk.f32.mxu0 %vm357_vm1, %v787_v53  ;;  %v991_v57 = vpop.f32.mrb[10].mxu1 }
 0x1eb   : > { %4503 = vmatmul.mubr.msk.f32.gmra.mrb[10].mxu0 %vm357_vm1, %v788_v54  ;;  %v4515_v59 = vpop.f32.mrb[11].mxu1  ;;  %v995_v0 = vmax.f32 %v991_v57, 0.0 }
 0x1ec   : > { %4544 = vmatprep.mubr.msk.f32.mxu0 %vm5182_vm0, %v5183_v9 }
 0x1ed   : > { %v996_v3 = vadd.f32 1e-08, %v995_v0 }
 0x1ef   : > { %4545 = vmatmul.mubr.msk.f32.vlgmr.msra.gmra.mrb[12].mxu0 %vm357_vm1, %v1208_v58  ;;  %5132 = vrsqrt.f32 %v996_v3 }
 0x1f0   : > { %4958 = vmatpush3.bf16.msra.mxu0 %v4955_v46 }
 0x1f1   : > { %4960 = vmatprep.subr.bf16.mxu0 %v4959_v60 }
 0x1f4   : > { %4962 = vmatpush3.bf16.msra.mxu0 %v4959_v60 }
 0x1f5   : > { %4964 = vmatprep.subr.bf16.mxu0 %v5397_v32 }
 0x1f9   : > { %v5133_v10 = vpop.eup %5132 }
 0x1fa   : > { %v1001_v12 = vrot.slane %v5133_v10, %v5258_v16 }
 0x2b2   : > { %v4495_v14 = vpop.f32.mrb[4].mxu0 }
 0x2b3   : > { %v1003_v15 = vmul.f32 %v4495_v14, %v1001_v12  ;;  %v879_v21 = vpop.f32.mrb[5].mxu0 }
 0x2b4   : > { %v1002_v22 = vmul.f32 %v1001_v12, %v879_v21 }
 0x2b5   : > { %v1017_v19 = vadd.f32 %v3934_v13, %v1003_v15 }
 0x2b6   : > { %v1016_v23 = vadd.f32 %v3934_v13, %v1002_v22  ;;  %v4498_v24 = vpop.f32.mrb[6].mxu0 }
 0x2b7   : > { %vm1025_vm5 = vcmp.ge.f32.partialorder %v1017_v19, 0.0  ;;  %v1033_v25 = vmul.f32 0.2, %v1017_v19  ;;  %v1005_v26 = vmul.f32 %v4498_v24, %v1001_v12  ;;  %v889_v27 = vpop.f32.mrb[7].mxu0 }
 0x2b8   : > { %vm1024_vm6 = vcmp.ge.f32.partialorder %v1016_v23, 0.0  ;;  %v1032_v28 = vmul.f32 0.2, %v1016_v23  ;;  %v1004_v29 = vmul.f32 %v1001_v12, %v889_v27 }
 0x2b9   : > { %v1041_v31 = vsel %vm1025_vm5, %v1017_v19, %v1033_v25  ;;  %v1019_v34 = vadd.f32 %v3934_v13, %v1005_v26 }
 0x2ba   : > { %v1049_v35 = vmul.f32 1.4142135, %v1041_v31  ;;  %v1040_v36 = vsel %vm1024_vm6, %v1016_v23, %v1032_v28  ;;  %v1018_v37 = vadd.f32 %v3934_v13, %v1004_v29  ;;  %v4501_v38 = vpop.f32.mrb[8].mxu0  ;;  %v312_v28 = vld [vmem:[%s6316_s3] sm:$0xff] }
 0x2bb   : > { %v1048_v39 = vmul.f32 1.4142135, %v1040_v36  ;;  %vm1027_vm7 = vcmp.ge.f32.partialorder %v1019_v34, 0.0  ;;  %v1035_v40 = vmul.f32 0.2, %v1019_v34  ;;  %v1007_v41 = vmul.f32 %v4501_v38, %v1001_v12  ;;  %v899_v42 = vpop.f32.mrb[9].mxu0 }
 0x2bc   : > { %vm1026_vm8 = vcmp.ge.f32.partialorder %v1018_v37, 0.0  ;;  %v1034_v43 = vmul.f32 0.2, %v1018_v37  ;;  %v1006_v44 = vmul.f32 %v1001_v12, %v899_v42  ;;  %v1068_v48 = vmul.f32 %v1066_v33, %v1049_v35 }
 0x2bd   : > { %v1043_v45 = vsel %vm1027_vm7, %v1019_v34, %v1035_v40  ;;  %v1021_v46 = vadd.f32 %v3934_v13, %v1007_v41  ;;  %v1067_v47 = vmul.f32 %v1066_v33, %v1048_v39  ;;  %v1351_v41 = vsub.s32 4, %v5252_v11 }
 0x2be   : > { %v1051_v49 = vmul.f32 1.4142135, %v1043_v45  ;;  %v1042_v50 = vsel %vm1026_vm8, %v1018_v37, %v1034_v43  ;;  %v1020_v51 = vadd.f32 %v3934_v13, %v1006_v44  ;;  %v4504_v52 = vpop.f32.mrb[10].mxu0 }
 0x2bf   : > { %v1050_v53 = vmul.f32 1.4142135, %v1042_v50  ;;  %vm1029_vm9 = vcmp.ge.f32.partialorder %v1021_v46, 0.0  ;;  %v1037_v54 = vmul.f32 0.2, %v1021_v46  ;;  %v1009_v55 = vmul.f32 %v4504_v52, %v1001_v12  ;;  %v909_v56 = vpop.f32.mrb[11].mxu0  ;;  %4524 = vmatprep.mubr.msk.f32.mxu1 %vm357_vm1, %v1067_v47 }
 0x2c0   : > { %vm1028_vm10 = vcmp.ge.f32.partialorder %v1020_v51, 0.0  ;;  %v1036_v57 = vmul.f32 0.2, %v1020_v51  ;;  %v1008_v58 = vmul.f32 %v1001_v12, %v909_v56  ;;  %4525 = vmatmul.mubr.msk.f32.vlgmr.msra.gmra.mrb[12].mxu1 %vm357_vm1, %v1068_v48  ;;  %v1070_v10 = vmul.f32 %v1066_v33, %v1051_v49  ;;  %v5454_v52 = vld [vmem:[%s6317_s4 + $0x60] sm:$0xff] }
 0x2c1   : > { %v1045_v59 = vsel %vm1029_vm9, %v1021_v46, %v1037_v54  ;;  %v1023_v60 = vadd.f32 %v3934_v13, %v1009_v55  ;;  %v1069_v62 = vmul.f32 %v1066_v33, %v1050_v53  ;;  %v5449_v50 = vrot.slane %v5267_v17, %v1351_v41  ;;  %v5459_v53 = vld [vmem:[%s6317_s4 + $0x68] sm:$0xff] }
 0x2c2   : > { %v1053_v63 = vmul.f32 1.4142135, %v1045_v59  ;;  %v1044_v0 = vsel %vm1028_vm10, %v1020_v51, %v1036_v57  ;;  %v1022_v3 = vadd.f32 %v3934_v13, %v1008_v58  ;;  %v1277_v14 = vpop.f32.mrb[12].mxu0 }
 0x2c3   : > { %v1052_v15 = vmul.f32 1.4142135, %v1044_v0  ;;  %vm1031_vm11 = vcmp.ge.f32.partialorder %v1023_v60, 0.0  ;;  %v1039_v21 = vmul.f32 0.2, %v1023_v60  ;;  %4527 = vmatprep.mubr.msk.f32.mxu1 %vm357_vm1, %v1069_v62  ;;  %v4546_v12 = vpop.f32.mrb[13].mxu0 }
 0x2c4   : > { %vm1030_vm12 = vcmp.ge.f32.partialorder %v1022_v3, 0.0  ;;  %v1038_v22 = vmul.f32 0.2, %v1022_v3  ;;  %4528 = vmatmul.mubr.msk.f32.gmra.mrb[14].mxu1 %vm357_vm1, %v1070_v10  ;;  %v1072_v25 = vmul.f32 %v1066_v33, %v1053_v63  ;;  %v1281_v29 = vmax.f32 %v1277_v14, 0.0 }
 0x2c5   : > { %v1047_v19 = vsel %vm1031_vm11, %v1023_v60, %v1039_v21  ;;  %v1071_v20 = vmul.f32 %v1066_v33, %v1052_v15 }
 0x2c6   : > { %v1055_v23 = vmul.f32 1.4142135, %v1047_v19  ;;  %v1046_v24 = vsel %vm1030_vm12, %v1022_v3, %v1038_v22  ;;  %v1282_v31 = vadd.f32 1e-08, %v1281_v29  ;;  %v5463_v3 = vpack.c.bf16 %v5459_v53, %v5454_v52 }
 0x2c7   : > { %v1054_v26 = vmul.f32 1.4142135, %v1046_v24  ;;  %4530 = vmatprep.mubr.msk.f32.mxu1 %vm357_vm1, %v1071_v20 }
 0x2c8   : > { %4531 = vmatmul.mubr.msk.f32.gmra.mrb[16].mxu1 %vm357_vm1, %v1072_v25  ;;  %v1074_v27 = vmul.f32 %v1066_v33, %v1055_v23  ;;  %5134 = vrsqrt.f32 %v1282_v31 }
 0x2c9   : > { %v1073_v13 = vmul.f32 %v1066_v33, %v1054_v26  ;;  %v3949_v33 = vld [vmem:[%s6318_s5 + $0x2] ss:$0 sm:$0xff] }
 0x2cb   : > { %4533 = vmatprep.mubr.msk.f32.mxu1 %vm357_vm1, %v1073_v13 }
 0x2cc   : > { %4534 = vmatmul.mubr.msk.f32.gmra.mrb[18].mxu1 %vm357_vm1, %v1074_v27 }
 0x2cd   : > { %4599 = vmatprep.mubr.msk.f32.mxu1 %vm1601_vm13, %v312_v28 }
 0x2d2   : > { %v5135_v34 = vpop.eup %5134 }
 0x2d3   : > { %v1287_v35 = vrot.slane %v5135_v34, %v5258_v16 }
 0x393   : > { %v4526_v36 = vpop.f32.mrb[12].mxu1 }
 0x394   : > { %v1289_v37 = vmul.f32 %v4526_v36, %v1287_v35  ;;  %v1165_v38 = vpop.f32.mrb[13].mxu1 }
 0x395   : > { %v1288_v39 = vmul.f32 %v1287_v35, %v1165_v38 }
 0x396   : > { %v1303_v40 = vadd.f32 %v3949_v33, %v1289_v37 }
 0x397   : > { %v1302_v42 = vadd.f32 %v3949_v33, %v1288_v39  ;;  %v4529_v43 = vpop.f32.mrb[14].mxu1 }
 0x398   : > { %vm1311_vm14 = vcmp.ge.f32.partialorder %v1303_v40, 0.0  ;;  %v1319_v44 = vmul.f32 0.2, %v1303_v40  ;;  %v1291_v45 = vmul.f32 %v4529_v43, %v1287_v35  ;;  %v1175_v46 = vpop.f32.mrb[15].mxu1 }
 0x399   : > { %vm1310_vm15 = vcmp.ge.f32.partialorder %v1302_v42, 0.0  ;;  %v1318_v47 = vmul.f32 0.2, %v1302_v42  ;;  %v1290_v48 = vmul.f32 %v1287_v35, %v1175_v46 }
 0x39a   : > { %v1305_v49 = vadd.f32 %v3949_v33, %v1291_v45  ;;  %v1327_v51 = vsel %vm1311_vm14, %v1303_v40, %v1319_v44 }
 0x39b   : > { %v1326_v54 = vsel %vm1310_vm15, %v1302_v42, %v1318_v47  ;;  %v1304_v55 = vadd.f32 %v3949_v33, %v1290_v48  ;;  %v4532_v56 = vpop.f32.mrb[16].mxu1  ;;  %v1335_v57 = vmul.f32 1.4142135, %v1327_v51 }
 0x39c   : > { %v1334_v58 = vmul.f32 1.4142135, %v1326_v54  ;;  %vm1313_vm3 = vcmp.ge.f32.partialorder %v1305_v49, 0.0  ;;  %v1321_v59 = vmul.f32 0.2, %v1305_v49  ;;  %v1293_v60 = vmul.f32 %v4532_v56, %v1287_v35  ;;  %v1185_v62 = vpop.f32.mrb[17].mxu1 }
 0x39d   : > { %vm1312_vm4 = vcmp.ge.f32.partialorder %v1304_v55, 0.0  ;;  %v1320_v63 = vmul.f32 0.2, %v1304_v55  ;;  %v1292_v0 = vmul.f32 %v1287_v35, %v1185_v62  ;;  %v1354_v20 = vmul.f32 %v5449_v50, %v1335_v57  ;;  %v313_v54 = vld [vmem:[%s6316_s3 + $0x8] sm:$0xff]  ;;  %v5494_v56 = vld [vmem:[%s6317_s4 + $0x78] sm:$0xff]  ;;  %v326_v62 = vld [vmem:[%s6316_s3 + $0x70] sm:$0xff] }
 0x39e   : > { %v1307_v10 = vadd.f32 %v3949_v33, %v1293_v60  ;;  %v1353_v14 = vmul.f32 %v5449_v50, %v1334_v58  ;;  %v4967_v15 = vpack.c.bf16 %v1335_v57, %v1334_v58  ;;  %v1329_v21 = vsel %vm1313_vm3, %v1305_v49, %v1321_v59  ;;  %v316_v58 = vld [vmem:[%s6316_s3 + $0x20] sm:$0xff]  ;;  %v322_v59 = vld [vmem:[%s6316_s3 + $0x50] sm:$0xff]  ;;  %v325_v60 = vld [vmem:[%s6316_s3 + $0x68] sm:$0xff] }
 0x39f   : > { %v1328_v22 = vsel %vm1312_vm4, %v1304_v55, %v1320_v63  ;;  %v1306_v12 = vadd.f32 %v3949_v33, %v1292_v0  ;;  %v4535_v19 = vpop.f32.mrb[18].mxu1  ;;  %v1337_v23 = vmul.f32 1.4142135, %v1329_v21  ;;  %v5489_v55 = vld [vmem:[%s6317_s4 + $0x70] sm:$0xff]  ;;  %v327_v63 = vld [vmem:[%s6316_s3 + $0x78] sm:$0xff]  ;;  %v328_v0 = vld [vmem:[%s6316_s3 + $0x80] sm:$0xff] }
 0x3a0   : > { %v1336_v24 = vmul.f32 1.4142135, %v1328_v22  ;;  %vm1315_vm5 = vcmp.ge.f32.partialorder %v1307_v10, 0.0  ;;  %v1323_v25 = vmul.f32 0.2, %v1307_v10  ;;  %v1295_v26 = vmul.f32 %v4535_v19, %v1287_v35  ;;  %v1195_v13 = vpop.f32.mrb[19].mxu1  ;;  %4555 = vmatprep.mubr.msk.f32.mxu0 %vm357_vm1, %v1353_v14  ;;  %4968 = vmatprep.subr.bf16.mxu1 %v4967_v15 }
 0x3a1   : > { %vm1314_vm6 = vcmp.ge.f32.partialorder %v1306_v12, 0.0  ;;  %v1322_v27 = vmul.f32 0.2, %v1306_v12  ;;  %v1294_v28 = vmul.f32 %v1287_v35, %v1195_v13  ;;  %4556 = vmatmul.mubr.msk.f32.vlgmr.msra.gmra.mrb[14].mxu0 %vm357_vm1, %v1354_v20  ;;  %4970 = vmatpush3.bf16.msra.mxu1 %v4967_v15  ;;  %v1356_v39 = vmul.f32 %v5449_v50, %v1337_v23  ;;  %v331_v14 = vld [vmem:[%s6316_s3 + $0x98] sm:$0xff]  ;;  %v332_v15 = vld [vmem:[%s6316_s3 + $0xa0] sm:$0xff]  ;;  %v333_v21 = vld [vmem:[%s6316_s3 + $0xa8] sm:$0xff] }
 0x3a2   : > { %v1309_v29 = vadd.f32 %v3949_v33, %v1295_v26  ;;  %4966 = vmatpush3.bf16.msra.mxu0 %v5397_v32  ;;  %v1355_v31 = vmul.f32 %v5449_v50, %v1336_v24  ;;  %v4971_v34 = vpack.c.bf16 %v1337_v23, %v1336_v24  ;;  %v1331_v36 = vsel %vm1315_vm5, %v1307_v10, %v1323_v25  ;;  %v330_v10 = vld [vmem:[%s6316_s3 + $0x90] sm:$0xff]  ;;  %v336_v19 = vld [vmem:[%s6316_s3 + $0xc0] sm:$0xff]  ;;  %v337_v20 = vld [vmem:[%s6316_s3 + $0xc8] sm:$0xff] }
 0x3a3   : > { %v1330_v37 = vsel %vm1314_vm6, %v1306_v12, %v1322_v27  ;;  %v1308_v38 = vadd.f32 %v3949_v33, %v1294_v28  ;;  %v1339_v40 = vmul.f32 1.4142135, %v1331_v36  ;;  %4984 = vmatprep.subr.bf16.mxu0 %v5463_v3  ;;  %v4987_v57 = vpack.c.bf16 %v5494_v56, %v5489_v55  ;;  %v334_v22 = vld [vmem:[%s6316_s3 + $0xb0] sm:$0xff]  ;;  %v335_v12 = vld [vmem:[%s6316_s3 + $0xb8] sm:$0xff]  ;;  %v340_v25 = vld [vmem:[%s6316_s3 + $0xe0] sm:$0xff] }
 0x3a4   : > { %v1338_v41 = vmul.f32 1.4142135, %v1330_v37  ;;  %vm1317_vm7 = vcmp.ge.f32.partialorder %v1309_v29, 0.0  ;;  %v1325_v35 = vmul.f32 0.2, %v1309_v29  ;;  %4558 = vmatprep.mubr.msk.f32.mxu0 %vm357_vm1, %v1355_v31  ;;  %4972 = vmatprep.subr.bf16.mxu1 %v4971_v34  ;;  %v338_v23 = vld [vmem:[%s6316_s3 + $0xd0] sm:$0xff] }
 0x3a5   : > { %vm1316_vm8 = vcmp.ge.f32.partialorder %v1308_v38, 0.0  ;;  %v1324_v42 = vmul.f32 0.2, %v1308_v38  ;;  %4559 = vmatmul.mubr.msk.f32.gmra.mrb[16].mxu0 %vm357_vm1, %v1356_v39  ;;  %4974 = vmatpush3.bf16.msra.mxu1 %v4971_v34  ;;  %v1358_v45 = vmul.f32 %v5449_v50, %v1339_v40  ;;  %v339_v24 = vld [vmem:[%s6316_s3 + $0xd8] sm:$0xff]  ;;  %v341_v26 = vld [vmem:[%s6316_s3 + $0xe8] sm:$0xff]  ;;  %v342_v13 = vld [vmem:[%s6316_s3 + $0xf0] sm:$0xff] }
 0x3a6   : > { %v1357_v32 = vmul.f32 %v5449_v50, %v1338_v41  ;;  %v4975_v43 = vpack.c.bf16 %v1339_v40, %v1338_v41  ;;  %v1333_v33 = vsel %vm1317_vm7, %v1309_v29, %v1325_v35  ;;  %v343_v27 = vld [vmem:[%s6316_s3 + $0xf8] sm:$0xff]  ;;  %v1932_v28 = vsub.s32 5, %v5252_v11  ;;  %v5644_v29 = vld [vmem:[%s6317_s4 + $0x80] sm:$0xff]  ;;  %v5649_v31 = vld [vmem:[%s6317_s4 + $0x88] sm:$0xff] }
 0x3a7   : > { %v1332_v44 = vsel %vm1316_vm8, %v1308_v38, %v1324_v42  ;;  %v1341_v46 = vmul.f32 1.4142135, %v1333_v33  ;;  %v2933_v34 = vmul.f32 %v5644_v29, %v5644_v29  ;;  %v2934_v36 = vmul.f32 %v5649_v31, %v5649_v31  ;;  %v3955_v38 = vld [vmem:[%s6320_s7 + $0x1] ss:$0 sm:$0xff]  ;;  %v5664_v39 = vld [vmem:[%s6317_s4 + $0x90] sm:$0xff]  ;;  %v5669_v40 = vld [vmem:[%s6317_s4 + $0x98] sm:$0xff] }
 0x3a8   : > { %v1340_v47 = vmul.f32 1.4142135, %v1332_v44  ;;  %4561 = vmatprep.mubr.msk.f32.mxu0 %vm357_vm1, %v1357_v32  ;;  %4976 = vmatprep.subr.bf16.mxu1 %v4975_v43  ;;  %v5656_v37 = vrot.slane %v5267_v17, %v1932_v28  ;;  %v2935_v44 = vmul.f32 %v5664_v39, %v5664_v39  ;;  %v2287_v28 = vmul.f32 %v5454_v52, %v5454_v52 }
 0x3a9   : > { %4562 = vmatmul.mubr.msk.f32.gmra.mrb[18].mxu0 %vm357_vm1, %v1358_v45  ;;  %4978 = vmatpush3.bf16.msra.mxu1 %v4975_v43  ;;  %v1360_v51 = vmul.f32 %v5449_v50, %v1341_v46  ;;  %v5006_v32 = vpack.c.bf16 %v2934_v36, %v2933_v34  ;;  %v2936_v45 = vmul.f32 %v5669_v40, %v5669_v40  ;;  %v2937_v52 = vrot.slane %v5271_v18, 6 }
 0x3aa   : > { %v1359_v48 = vmul.f32 %v5449_v50, %v1340_v47  ;;  %v4979_v49 = vpack.c.bf16 %v1341_v46, %v1340_v47  ;;  %v314_v50 = vld [vmem:[%s6316_s3 + $0x10] sm:$0xff]  ;;  %v2288_v34 = vmul.f32 %v5459_v53, %v5459_v53 }
 0x3ac   : > { %4564 = vmatprep.mubr.msk.f32.mxu0 %vm357_vm1, %v1359_v48  ;;  %4980 = vmatprep.subr.bf16.mxu1 %v4979_v49 }
 0x3ad   : > { %4565 = vmatmul.mubr.msk.f32.gmra.mrb[20].mxu0 %vm357_vm1, %v1360_v51  ;;  %4982 = vmatpush3.bf16.msra.mxu1 %v4979_v49  ;;  %v4082_v49 = vld [vmem:[%s6319_s6 + $0x40] sm:$0xff]  ;;  %v4083_v51 = vld [vmem:[%s6319_s6 + $0x48] sm:$0xff] }
 0x3ae   : > { %4571 = vmatprep.mubr.msk.f32.mxu0 %vm640_vm2, %v5300_v30  ;;  %5035 = vmatprep.subr.bf16.mxu1 %v5463_v3  ;;  %v315_v30 = vld [vmem:[%s6316_s3 + $0x18] sm:$0xff] }
 0x3b0   : > { %4600 = vmatmul.mubr.msk.f32.vlgmr.msra.gmra.mrb[20].mxu1 %vm1601_vm13, %v313_v54 }
 0x3b1   : > { %4572 = vmatmul.mubr.msk.f32.vlgmr.msra.gmra.mrb[14].mxu0 %vm640_vm2, %v5327_v61  ;;  %4602 = vmatprep.mubr.msk.f32.mxu1 %vm1601_vm13, %v314_v50  ;;  %v317_v61 = vld [vmem:[%s6316_s3 + $0x28] sm:$0xff] }
 0x3b2   : > { %4574 = vmatprep.mubr.msk.f32.mxu0 %vm640_vm2, %v5332_v1  ;;  %5037 = vmatpush3.bf16.msra.mxu1 %v5463_v3  ;;  %v318_v1 = vld [vmem:[%s6316_s3 + $0x30] sm:$0xff] }
 0x3b3   : > { %5036 = vmatprep.subr.bf16.mxu1 %v4987_v57  ;;  %4986 = vmatpush3.bf16.msra.mxu0 %v5463_v3  ;;  %v329_v3 = vld [vmem:[%s6316_s3 + $0x88] sm:$0xff] }
 0x3b4   : > { %4603 = vmatmul.mubr.msk.f32.gmra.mrb[22].mxu1 %vm1601_vm13, %v315_v30  ;;  %4988 = vmatprep.subr.bf16.mxu0 %v4987_v57 }
 0x3b5   : > { %4575 = vmatmul.mubr.msk.f32.gmra.mrb[16].mxu0 %vm640_vm2, %v5342_v2  ;;  %4605 = vmatprep.mubr.msk.f32.mxu1 %vm1601_vm13, %v316_v58  ;;  %v319_v2 = vld [vmem:[%s6316_s3 + $0x38] sm:$0xff] }
 0x3b6   : > { %4577 = vmatprep.mubr.msk.f32.mxu0 %vm640_vm2, %v5347_v5  ;;  %5038 = vmatpush3.bf16.msra.mxu1 %v4987_v57  ;;  %v320_v5 = vld [vmem:[%s6316_s3 + $0x40] sm:$0xff] }
 0x3b7   : > { %4990 = vmatpush3.bf16.msra.mxu0 %v4987_v57  ;;  %4991 = vmatprep.subr.bf16.mxu1 %v5181_v4 }
 0x3b8   : > { %4606 = vmatmul.mubr.msk.f32.gmra.mrb[24].mxu1 %vm1601_vm13, %v317_v61  ;;  %5005 = vmatprep.subr.bf16.mxu0 %v5181_v4 }
 0x3b9   : > { %4578 = vmatmul.mubr.msk.f32.gmra.mrb[18].mxu0 %vm640_vm2, %v5357_v6  ;;  %4608 = vmatprep.mubr.msk.f32.mxu1 %vm1601_vm13, %v318_v1  ;;  %v321_v6 = vld [vmem:[%s6316_s3 + $0x48] sm:$0xff]  ;;  %v5009_v1 = vpack.c.bf16 %v2936_v45, %v2935_v44 }
 0x3ba   : > { %4580 = vmatprep.mubr.msk.f32.mxu0 %vm640_vm2, %v5362_v7  ;;  %v323_v7 = vld [vmem:[%s6316_s3 + $0x58] sm:$0xff] }
 0x3bc   : > { %4609 = vmatmul.mubr.msk.f32.gmra.mrb[26].mxu1 %vm1601_vm13, %v319_v2 }
 0x3bd   : > { %4581 = vmatmul.mubr.msk.f32.gmra.mrb[20].mxu0 %vm640_vm2, %v5371_v8  ;;  %4611 = vmatprep.mubr.msk.f32.mxu1 %vm1601_vm13, %v320_v5  ;;  %v324_v8 = vld [vmem:[%s6316_s3 + $0x60] sm:$0xff] }
 0x3c0   : > { %4612 = vmatmul.mubr.msk.f32.gmra.mrb[28].mxu1 %vm1601_vm13, %v321_v6  ;;  %v5011_v6 = vpack.c.bf16 %v4083_v51, %v4082_v49 }
 0x3c1   : > { %4614 = vmatprep.mubr.msk.f32.mxu1 %vm1601_vm13, %v322_v59 }
 0x3c4   : > { %4615 = vmatmul.mubr.msk.f32.gmra.mrb[30].mxu1 %vm1601_vm13, %v323_v7 }
 0x3c5   : > { %4617 = vmatprep.mubr.msk.f32.mxu1 %vm1601_vm13, %v324_v8 }
 0x3c8   : > { %4618 = vmatmul.mubr.msk.f32.gmra.mrb[32].mxu1 %vm1601_vm13, %v325_v60 }
 0x3c9   : > { %4620 = vmatprep.mubr.msk.f32.mxu1 %vm1601_vm13, %v326_v62 }
 0x3cc   : > { %4621 = vmatmul.mubr.msk.f32.gmra.mrb[34].mxu1 %vm1601_vm13, %v327_v63 }
 0x3cd   : > { %4623 = vmatprep.mubr.msk.f32.mxu1 %vm1601_vm13, %v328_v0 }
 0x3d0   : > { %4624 = vmatmul.mubr.msk.f32.gmra.mrb[36].mxu1 %vm1601_vm13, %v329_v3 }
 0x3d1   : > { %4626 = vmatprep.mubr.msk.f32.mxu1 %vm1601_vm13, %v330_v10 }
 0x3d4   : > { %4627 = vmatmul.mubr.msk.f32.gmra.mrb[38].mxu1 %vm1601_vm13, %v331_v14 }
 0x3d5   : > { %4629 = vmatprep.mubr.msk.f32.mxu1 %vm1601_vm13, %v332_v15 }
 0x3d8   : > { %4630 = vmatmul.mubr.msk.f32.gmra.mrb[40].mxu1 %vm1601_vm13, %v333_v21 }
 0x3d9   : > { %4632 = vmatprep.mubr.msk.f32.mxu1 %vm1601_vm13, %v334_v22 }
 0x3dc   : > { %4633 = vmatmul.mubr.msk.f32.gmra.mrb[42].mxu1 %vm1601_vm13, %v335_v12 }
 0x3dd   : > { %4635 = vmatprep.mubr.msk.f32.mxu1 %vm1601_vm13, %v336_v19 }
 0x3e0   : > { %4636 = vmatmul.mubr.msk.f32.gmra.mrb[44].mxu1 %vm1601_vm13, %v337_v20 }
 0x3e1   : > { %4638 = vmatprep.mubr.msk.f32.mxu1 %vm1601_vm13, %v338_v23 }
 0x3e4   : > { %4639 = vmatmul.mubr.msk.f32.gmra.mrb[46].mxu1 %vm1601_vm13, %v339_v24 }
 0x3e5   : > { %4641 = vmatprep.mubr.msk.f32.mxu1 %vm1601_vm13, %v340_v25 }
 0x3e8   : > { %4642 = vmatmul.mubr.msk.f32.gmra.mrb[48].mxu1 %vm1601_vm13, %v341_v26 }
 0x3e9   : > { %4644 = vmatprep.mubr.msk.f32.mxu1 %vm1601_vm13, %v342_v13 }
 0x3ec   : > { %4645 = vmatmul.mubr.msk.f32.gmra.mrb[50].mxu1 %vm1601_vm13, %v343_v27 }
 0x483   : > { %v4601_v41 = vpop.f32.mrb[20].mxu1 }
 0x484   : > { %v4573_v35 = vpop.f32.mrb[14].mxu0  ;;  %v1764_v42 = vpop.f32.mrb[21].mxu1  ;;  %v1935_v46 = vmul.f32 %v4601_v41, %v5656_v37 }
 0x485   : > { %v5039_v17 = vadd.f32 %v4573_v35, %v3955_v38  ;;  %v1934_v43 = vmul.f32 %v5656_v37, %v1764_v42  ;;  %v1562_v33 = vpop.f32.mrb[15].mxu0  ;;  %v4085_v35 = vld [vmem:[%s6319_s6 + $0x58] sm:$0xff] }
 0x486   : > { %v5040_v47 = vadd.f32 %v3955_v38, %v1562_v33 }
 0x487   : > { %v4604_v48 = vpop.f32.mrb[22].mxu1  ;;  %4655 = vmatprep.mubr.msk.f32.mxu0 %vm357_vm1, %v1934_v43  ;;  %v2290_v43 = vmul.f32 %v5494_v56, %v5494_v56 }
 0x488   : > { %v5684_v54 = vpack.c.bf16 %v5039_v17, %v5040_v47  ;;  %v4576_v50 = vpop.f32.mrb[16].mxu0  ;;  %v1774_v57 = vpop.f32.mrb[23].mxu1  ;;  %4656 = vmatmul.mubr.msk.f32.vlgmr.msra.gmra.mrb[22].mxu0 %vm357_vm1, %v1935_v46  ;;  %v1937_v2 = vmul.f32 %v4604_v48, %v5656_v37  ;;  %v2289_v17 = vmul.f32 %v5489_v55, %v5489_v55 }
 0x489   : > { %v5041_v30 = vadd.f32 %v4576_v50, %v3955_v38  ;;  %v1936_v58 = vmul.f32 %v5656_v37, %v1774_v57  ;;  %v1572_v61 = vpop.f32.mrb[17].mxu0  ;;  %5007 = vmatpush3.bf16.msra.mxu0 %v5006_v32  ;;  %v4992_v32 = vpack.c.bf16 %v2288_v34, %v2287_v28 }
 0x48a   : > { %v5042_v5 = vadd.f32 %v3955_v38, %v1572_v61  ;;  %5008 = vmatprep.subr.bf16.mxu0 %v5181_v4  ;;  %v4995_v48 = vpack.c.bf16 %v2290_v43, %v2289_v17 }
 0x48b   : > { %v4607_v59 = vpop.f32.mrb[24].mxu1  ;;  %4658 = vmatprep.mubr.msk.f32.mxu0 %vm357_vm1, %v1936_v58 }
 0x48c   : > { %v5691_v7 = vpack.c.bf16 %v5041_v30, %v5042_v5  ;;  %v4579_v8 = vpop.f32.mrb[18].mxu0  ;;  %v1784_v60 = vpop.f32.mrb[25].mxu1  ;;  %4659 = vmatmul.mubr.msk.f32.gmra.mrb[24].mxu0 %vm357_vm1, %v1937_v2  ;;  %v1939_v3 = vmul.f32 %v4607_v59, %v5656_v37 }
 0x48d   : > { %v5043_v62 = vadd.f32 %v4579_v8, %v3955_v38  ;;  %v1938_v63 = vmul.f32 %v5656_v37, %v1784_v60  ;;  %v1582_v0 = vpop.f32.mrb[19].mxu0  ;;  %5010 = vmatpush3.bf16.msra.mxu0 %v5009_v1 }
 0x48e   : > { %v5044_v10 = vadd.f32 %v3955_v38, %v1582_v0  ;;  %5012 = vmatprep.subr.bf16.mxu0 %v5011_v6 }
 0x48f   : > { %v4610_v14 = vpop.f32.mrb[26].mxu1  ;;  %4661 = vmatprep.mubr.msk.f32.mxu0 %vm357_vm1, %v1938_v63 }
 0x490   : > { %v5697_v15 = vpack.c.bf16 %v5043_v62, %v5044_v10  ;;  %v4582_v21 = vpop.f32.mrb[20].mxu0  ;;  %v1794_v22 = vpop.f32.mrb[27].mxu1  ;;  %4662 = vmatmul.mubr.msk.f32.gmra.mrb[26].mxu0 %vm357_vm1, %v1939_v3  ;;  %v1941_v23 = vmul.f32 %v4610_v14, %v5656_v37 }
 0x491   : > { %v5045_v12 = vadd.f32 %v4582_v21, %v3955_v38  ;;  %v1940_v19 = vmul.f32 %v5656_v37, %v1794_v22  ;;  %v1592_v20 = vpop.f32.mrb[21].mxu0 }
 0x492   : > { %v5046_v24 = vadd.f32 %v3955_v38, %v1592_v20  ;;  %v4084_v38 = vld [vmem:[%s6319_s6 + $0x50] sm:$0xff] }
 0x493   : > { %v4613_v25 = vpop.f32.mrb[28].mxu1  ;;  %4664 = vmatprep.mubr.msk.f32.mxu0 %vm357_vm1, %v1940_v19  ;;  %v5015_v44 = vpack.c.bf16 %v4085_v35, %v4084_v38  ;;  %v2291_v38 = vrot.slane %v5271_v18, 5  ;;  %v4997_v35 = vpack.c.bf16 %v5649_v31, %v5644_v29 }
 0x494   : > { %v5703_v26 = vpack.c.bf16 %v5045_v12, %v5046_v24  ;;  %v1804_v13 = vpop.f32.mrb[29].mxu1  ;;  %4665 = vmatmul.mubr.msk.f32.gmra.mrb[28].mxu0 %vm357_vm1, %v1941_v23  ;;  %v1943_v36 = vmul.f32 %v4613_v25, %v5656_v37 }
 0x495   : > { %v1942_v27 = vmul.f32 %v5656_v37, %v1804_v13 }
 0x497   : > { %v4616_v41 = vpop.f32.mrb[30].mxu1  ;;  %4667 = vmatprep.mubr.msk.f32.mxu0 %vm357_vm1, %v1942_v27 }
 0x498   : > { %v1814_v42 = vpop.f32.mrb[31].mxu1  ;;  %4668 = vmatmul.mubr.msk.f32.gmra.mrb[30].mxu0 %vm357_vm1, %v1943_v36  ;;  %v1945_v33 = vmul.f32 %v4616_v41, %v5656_v37 }
 0x499   : > { %v1944_v53 = vmul.f32 %v5656_v37, %v1814_v42  ;;  %4778 = vmatprep.mubr.msk.f32.mxu0 %vm5182_vm0, %v5183_v9 }
 0x49b   : > { %v4619_v45 = vpop.f32.mrb[32].mxu1  ;;  %4670 = vmatprep.mubr.msk.f32.mxu1 %vm357_vm1, %v1944_v53 }
 0x49c   : > { %v1824_v46 = vpop.f32.mrb[33].mxu1  ;;  %4671 = vmatmul.mubr.msk.f32.vlgmr.msra.gmra.mrb[52].mxu1 %vm357_vm1, %v1945_v33  ;;  %4779 = vmatmul.mubr.msk.f32.vlgmr.msra.gmra.mrb[32].mxu0 %vm357_vm1, %v2937_v52  ;;  %v1947_v55 = vmul.f32 %v4619_v45, %v5656_v37 }
 0x49d   : > { %v1946_v47 = vmul.f32 %v5656_v37, %v1824_v46  ;;  %5014 = vmatpush3.bf16.msra.mxu0 %v5011_v6  ;;  %4993 = vmatpush3.bf16.msra.mxu1 %v4992_v32 }
 0x49e   : > { %5016 = vmatprep.subr.bf16.mxu0 %v5015_v44  ;;  %4994 = vmatprep.subr.bf16.mxu1 %v5181_v4 }
 0x49f   : > { %v4622_v56 = vpop.f32.mrb[34].mxu1  ;;  %4673 = vmatprep.mubr.msk.f32.mxu1 %vm357_vm1, %v1946_v47 }
 0x4a0   : > { %v1834_v49 = vpop.f32.mrb[35].mxu1  ;;  %4674 = vmatmul.mubr.msk.f32.gmra.mrb[54].mxu1 %vm357_vm1, %v1947_v55  ;;  %v1949_v50 = vmul.f32 %v4622_v56, %v5656_v37 }
 0x4a1   : > { %v1948_v51 = vmul.f32 %v5656_v37, %v1834_v49  ;;  %5018 = vmatpush3.bf16.msra.mxu0 %v5015_v44  ;;  %4996 = vmatpush3.bf16.msra.mxu1 %v4995_v48 }
 0x4a2   : > { %5020 = vmatprep.subr.bf16.mxu0 %v5684_v54  ;;  %4998 = vmatprep.subr.bf16.mxu1 %v4997_v35 }
 0x4a3   : > { %v4625_v57 = vpop.f32.mrb[36].mxu1  ;;  %4676 = vmatprep.mubr.msk.f32.mxu1 %vm357_vm1, %v1948_v51 }
 0x4a4   : > { %v1844_v30 = vpop.f32.mrb[37].mxu1  ;;  %4677 = vmatmul.mubr.msk.f32.gmra.mrb[56].mxu1 %vm357_vm1, %v1949_v50  ;;  %v1951_v58 = vmul.f32 %v4625_v57, %v5656_v37 }
 0x4a5   : > { %v1950_v4 = vmul.f32 %v5656_v37, %v1844_v30 }
 0x4a7   : > { %v4628_v61 = vpop.f32.mrb[38].mxu1  ;;  %4679 = vmatprep.mubr.msk.f32.mxu1 %vm357_vm1, %v1950_v4 }
 0x4a8   : > { %v1854_v1 = vpop.f32.mrb[39].mxu1  ;;  %4680 = vmatmul.mubr.msk.f32.gmra.mrb[58].mxu1 %vm357_vm1, %v1951_v58  ;;  %v1953_v5 = vmul.f32 %v4628_v61, %v5656_v37 }
 0x4a9   : > { %v1952_v2 = vmul.f32 %v5656_v37, %v1854_v1 }
 0x4ab   : > { %v4631_v6 = vpop.f32.mrb[40].mxu1  ;;  %4682 = vmatprep.mubr.msk.f32.mxu1 %vm357_vm1, %v1952_v2 }
 0x4ac   : > { %v1864_v59 = vpop.f32.mrb[41].mxu1  ;;  %4683 = vmatmul.mubr.msk.f32.gmra.mrb[60].mxu1 %vm357_vm1, %v1953_v5  ;;  %v1955_v60 = vmul.f32 %v4631_v6, %v5656_v37 }
 0x4ad   : > { %v1954_v8 = vmul.f32 %v5656_v37, %v1864_v59 }
 0x4af   : > { %v4634_v62 = vpop.f32.mrb[42].mxu1  ;;  %4685 = vmatprep.mubr.msk.f32.mxu1 %vm357_vm1, %v1954_v8 }
 0x4b0   : > { %v1874_v63 = vpop.f32.mrb[43].mxu1  ;;  %4686 = vmatmul.mubr.msk.f32.gmra.mrb[62].mxu1 %vm357_vm1, %v1955_v60  ;;  %v1957_v3 = vmul.f32 %v4634_v62, %v5656_v37 }
 0x4b1   : > { %v1956_v0 = vmul.f32 %v5656_v37, %v1874_v63 }
 0x4b3   : > { %v4637_v10 = vpop.f32.mrb[44].mxu1  ;;  %4688 = vmatprep.mubr.msk.f32.mxu1 %vm357_vm1, %v1956_v0 }
 0x4b4   : > { %v1884_v14 = vpop.f32.mrb[45].mxu1  ;;  %4689 = vmatmul.mubr.msk.f32.gmra.mrb[64].mxu1 %vm357_vm1, %v1957_v3  ;;  %v1959_v22 = vmul.f32 %v4637_v10, %v5656_v37 }
 0x4b5   : > { %v1958_v21 = vmul.f32 %v5656_v37, %v1884_v14 }
 0x4b7   : > { %v4640_v12 = vpop.f32.mrb[46].mxu1  ;;  %4691 = vmatprep.mubr.msk.f32.mxu1 %vm357_vm1, %v1958_v21 }
 0x4b8   : > { %v1894_v19 = vpop.f32.mrb[47].mxu1  ;;  %4692 = vmatmul.mubr.msk.f32.gmra.mrb[66].mxu1 %vm357_vm1, %v1959_v22  ;;  %v1961_v23 = vmul.f32 %v4640_v12, %v5656_v37 }
 0x4b9   : > { %v1960_v20 = vmul.f32 %v5656_v37, %v1894_v19 }
 0x4bb   : > { %v4643_v24 = vpop.f32.mrb[48].mxu1  ;;  %4694 = vmatprep.mubr.msk.f32.mxu1 %vm357_vm1, %v1960_v20 }
 0x4bc   : > { %v1904_v25 = vpop.f32.mrb[49].mxu1  ;;  %4695 = vmatmul.mubr.msk.f32.gmra.mrb[68].mxu1 %vm357_vm1, %v1961_v23  ;;  %v1963_v27 = vmul.f32 %v4643_v24, %v5656_v37 }
 0x4bd   : > { %v1962_v13 = vmul.f32 %v5656_v37, %v1904_v25 }
 0x4bf   : > { %v4646_v28 = vpop.f32.mrb[50].mxu1  ;;  %4697 = vmatprep.mubr.msk.f32.mxu1 %vm357_vm1, %v1962_v13 }
 0x4c0   : > { %v1914_v34 = vpop.f32.mrb[51].mxu1  ;;  %4698 = vmatmul.mubr.msk.f32.gmra.mrb[70].mxu1 %vm357_vm1, %v1963_v27  ;;  %v1965_v41 = vmul.f32 %v4646_v28, %v5656_v37 }
 0x4c1   : > { %v1964_v36 = vmul.f32 %v5656_v37, %v1914_v34  ;;  %v5001_v37 = vpack.c.bf16 %v5669_v40, %v5664_v39 }
 0x4c3   : > { %4700 = vmatprep.mubr.msk.f32.mxu1 %vm357_vm1, %v1964_v36 }
 0x4c4   : > { %4701 = vmatmul.mubr.msk.f32.gmra.mrb[72].mxu1 %vm357_vm1, %v1965_v41 }
 0x4c5   : > { %4711 = vmatprep.mubr.msk.f32.mxu1 %vm5182_vm0, %v5183_v9 }
 0x4c8   : > { %4712 = vmatmul.mubr.msk.f32.vlgmr.msra.gmra.mrb[74].mxu1 %vm357_vm1, %v2291_v38 }
 0x4c9   : > { %5000 = vmatpush3.bf16.msra.mxu1 %v4997_v35 }
 0x4ca   : > { %5002 = vmatprep.subr.bf16.mxu1 %v5001_v37 }
 0x4cd   : > { %5004 = vmatpush3.bf16.msra.mxu1 %v5001_v37 }
 0x55b   : > { %v4657_v42 = vpop.f32.mrb[22].mxu0 }
 0x55c   : > { %v2128_v52 = vpop.f32.mrb[23].mxu0 }
 0x55f   : > { %v4660_v53 = vpop.f32.mrb[24].mxu0 }
 0x560   : > { %v2138_v32 = vpop.f32.mrb[25].mxu0 }
 0x563   : > { %v4663_v18 = vpop.f32.mrb[26].mxu0 }
 0x564   : > { %v2148_v17 = vpop.f32.mrb[27].mxu0 }
 0x567   : > { %v4666_v43 = vpop.f32.mrb[28].mxu0 }
 0x568   : > { %v2158_v9 = vpop.f32.mrb[29].mxu0 }
 0x56b   : > { %v4669_v33 = vpop.f32.mrb[30].mxu0 }
 0x56c   : > { %v2168_v44 = vpop.f32.mrb[31].mxu0 }
 0x56f   : > { %v4672_v45 = vpop.f32.mrb[52].mxu1  ;;  %v5782_v6 = vpop.f32.mrb[32].mxu0 }
 0x570   : > { %v2178_v46 = vpop.f32.mrb[53].mxu1  ;;  %v4780_v8 = vpop.f32.mrb[33].mxu0 }
 0x573   : > { %v4675_v29 = vpop.f32.mrb[54].mxu1 }
 0x574   : > { %v2188_v31 = vpop.f32.mrb[55].mxu1 }
 0x577   : > { %v4678_v47 = vpop.f32.mrb[56].mxu1 }
 0x578   : > { %v2198_v48 = vpop.f32.mrb[57].mxu1 }
 0x57b   : > { %v4681_v55 = vpop.f32.mrb[58].mxu1 }
 0x57c   : > { %v2208_v56 = vpop.f32.mrb[59].mxu1 }
 0x57f   : > { %v4684_v49 = vpop.f32.mrb[60].mxu1 }
 0x580   : > { %v2218_v39 = vpop.f32.mrb[61].mxu1 }
 0x583   : > { %v4687_v40 = vpop.f32.mrb[62].mxu1 }
 0x584   : > { %v2228_v51 = vpop.f32.mrb[63].mxu1 }
 0x587   : > { %v4690_v50 = vpop.f32.mrb[64].mxu1 }
 0x588   : > { %v2238_v57 = vpop.f32.mrb[65].mxu1 }
 0x58b   : > { %v4693_v30 = vpop.f32.mrb[66].mxu1 }
 0x58c   : > { %v2248_v4 = vpop.f32.mrb[67].mxu1 }
 0x58f   : > { %v4696_v58 = vpop.f32.mrb[68].mxu1 }
 0x590   : > { %v2258_v61 = vpop.f32.mrb[69].mxu1 }
 0x593   : > { %v4699_v1 = vpop.f32.mrb[70].mxu1 }
 0x594   : > { %v2268_v2 = vpop.f32.mrb[71].mxu1 }
 0x597   : > { %v4702_v5 = vpop.f32.mrb[72].mxu1 }
 0x598   : > { %v2278_v59 = vpop.f32.mrb[73].mxu1 }
 0x59b   : > { %v2360_v60 = vpop.f32.mrb[74].mxu1 }
 0x59c   : > { %v2364_v62 = vmax.f32 %v2360_v60, 0.0  ;;  %v4713_v63 = vpop.f32.mrb[75].mxu1 }
 0x59e   : > { %v2365_v0 = vadd.f32 1e-08, %v2364_v62 }
 0x5a0   : > { %5136 = vrsqrt.f32 %v2365_v0 }
 0x5aa   : > { %v5137_v3 = vpop.eup %5136 }
 0x5ab   : > { %v2370_v10 = vrot.slane %v5137_v3, %v5258_v16 }
 0x5ad   : > { %v2371_v14 = vmul.f32 %v2370_v10, %v2128_v52  ;;  %v2372_v21 = vmul.f32 %v4657_v42, %v2370_v10  ;;  %v2373_v22 = vmul.f32 %v2370_v10, %v2138_v32  ;;  %v2374_v12 = vmul.f32 %v4660_v53, %v2370_v10 }
 0x5ae   : > { %v2375_v19 = vmul.f32 %v2370_v10, %v2148_v17  ;;  %v2376_v20 = vmul.f32 %v4663_v18, %v2370_v10  ;;  %v2377_v23 = vmul.f32 %v2370_v10, %v2158_v9  ;;  %v2378_v24 = vmul.f32 %v4666_v43, %v2370_v10 }
 0x5af   : > { %v2379_v25 = vmul.f32 %v2370_v10, %v2168_v44  ;;  %v2380_v13 = vmul.f32 %v4669_v33, %v2370_v10  ;;  %v5785_v27 = vmul.f32 %v2370_v10, %v2178_v46  ;;  %v5787_v28 = vmul.f32 %v4672_v45, %v2370_v10 }
 0x5b0   : > { %v5789_v34 = vmul.f32 %v2370_v10, %v2188_v31  ;;  %v5791_v36 = vmul.f32 %v4675_v29, %v2370_v10  ;;  %v5793_v41 = vmul.f32 %v2370_v10, %v2198_v48  ;;  %v5795_v38 = vmul.f32 %v4678_v47, %v2370_v10  ;;  %v5832_v47 = vld [vmem:[%s6318_s5 + $0x3] ss:$0 sm:$0xff] }
 0x5b1   : > { %v5797_v35 = vmul.f32 %v2370_v10, %v2208_v56  ;;  %v5799_v42 = vmul.f32 %v4681_v55, %v2370_v10  ;;  %v5801_v52 = vmul.f32 %v2370_v10, %v2218_v39  ;;  %v5803_v37 = vmul.f32 %v4684_v49, %v2370_v10 }
 0x5b2   : > { %v5805_v53 = vmul.f32 %v2370_v10, %v2228_v51  ;;  %v5807_v32 = vmul.f32 %v4687_v40, %v2370_v10  ;;  %v5809_v18 = vmul.f32 %v2370_v10, %v2238_v57  ;;  %v5811_v17 = vmul.f32 %v4690_v50, %v2370_v10 }
 0x5b3   : > { %v5813_v43 = vmul.f32 %v2370_v10, %v2248_v4  ;;  %v5815_v9 = vmul.f32 %v4693_v30, %v2370_v10  ;;  %v5817_v33 = vmul.f32 %v2370_v10, %v2258_v61  ;;  %v5819_v44 = vmul.f32 %v4696_v58, %v2370_v10  ;;  %v5841_v30 = vld [vmem:[%s5264_s18] sm:$0xff] }
 0x5b4   : > { %v5821_v45 = vmul.f32 %v2370_v10, %v2268_v2  ;;  %v5823_v46 = vmul.f32 %v4699_v1, %v2370_v10  ;;  %v5825_v29 = vmul.f32 %v2370_v10, %v2278_v59  ;;  %v5827_v31 = vmul.f32 %v4702_v5, %v2370_v10 }
 0x5b5   : > { %v2409_v48 = vadd.f32 %v5832_v47, %v2371_v14  ;;  %v2410_v55 = vadd.f32 %v5832_v47, %v2372_v21  ;;  %v2411_v56 = vadd.f32 %v5832_v47, %v2373_v22  ;;  %v2578_v49 = vsub.s32 6, %v5252_v11 }
 0x5b6   : > { %v2412_v39 = vadd.f32 %v5832_v47, %v2374_v12  ;;  %v2413_v50 = vadd.f32 %v5832_v47, %v2375_v19  ;;  %v2414_v58 = vadd.f32 %v5832_v47, %v2376_v20  ;;  %v2415_v5 = vadd.f32 %v5832_v47, %v2377_v23 }
 0x5b7   : > { %v2473_v40 = vmul.f32 0.2, %v2409_v48  ;;  %v2474_v51 = vmul.f32 0.2, %v2410_v55  ;;  %vm2441_vm0 = vcmp.ge.f32.partialorder %v2409_v48, 0.0  ;;  %vm2442_vm2 = vcmp.ge.f32.partialorder %v2410_v55, 0.0 }
 0x5b8   : > { %v2475_v57 = vmul.f32 0.2, %v2411_v56  ;;  %vm2443_vm9 = vcmp.ge.f32.partialorder %v2411_v56, 0.0  ;;  %v5844_v4 = vrot.slane %v5841_v30, %v2578_v49  ;;  %v2476_v61 = vmul.f32 0.2, %v2412_v39 }
 0x5b9   : > { %v2505_v1 = vsel %vm2441_vm0, %v2409_v48, %v2473_v40  ;;  %v2506_v2 = vsel %vm2442_vm2, %v2410_v55, %v2474_v51  ;;  %vm2444_vm10 = vcmp.ge.f32.partialorder %v2412_v39, 0.0  ;;  %v2477_v59 = vmul.f32 0.2, %v2413_v50 }
 0x5ba   : > { %v2507_v8 = vsel %vm2443_vm9, %v2411_v56, %v2475_v57  ;;  %vm2445_vm11 = vcmp.ge.f32.partialorder %v2413_v50, 0.0  ;;  %v2416_v60 = vadd.f32 %v5832_v47, %v2378_v24  ;;  %v2537_v62 = vmul.f32 1.4142135, %v2505_v1 }
 0x5bb   : > { %v2538_v63 = vmul.f32 1.4142135, %v2506_v2  ;;  %v2417_v0 = vadd.f32 %v5832_v47, %v2379_v25  ;;  %v2478_v3 = vmul.f32 0.2, %v2414_v58  ;;  %v2508_v10 = vsel %vm2444_vm10, %v2412_v39, %v2476_v61 }
 0x5bc   : > { %v2539_v14 = vmul.f32 1.4142135, %v2507_v8  ;;  %vm2446_vm12 = vcmp.ge.f32.partialorder %v2414_v58, 0.0  ;;  %v2479_v21 = vmul.f32 0.2, %v2415_v5  ;;  %v2509_v22 = vsel %vm2445_vm11, %v2413_v50, %v2477_v59 }
 0x5bd   : > { %v2581_v12 = vmul.f32 %v5844_v4, %v2538_v63  ;;  %vm2447_vm14 = vcmp.ge.f32.partialorder %v2415_v5, 0.0  ;;  %v2580_v19 = vmul.f32 %v5844_v4, %v2537_v62  ;;  %v2418_v20 = vadd.f32 %v5832_v47, %v2380_v13 }
 0x5be   : > { %v2540_v23 = vmul.f32 1.4142135, %v2508_v10  ;;  %v2480_v48 = vmul.f32 0.2, %v2416_v60  ;;  %v2510_v24 = vsel %vm2446_vm12, %v2414_v58, %v2478_v3  ;;  %v2541_v55 = vmul.f32 1.4142135, %v2509_v22 }
 0x5bf   : > { %4722 = vmatprep.mubr.msk.f32.mxu1 %vm357_vm1, %v2580_v19  ;;  %v2582_v25 = vmul.f32 %v5844_v4, %v2539_v14  ;;  %v2419_v56 = vadd.f32 %v5832_v47, %v5785_v27  ;;  %vm2448_vm15 = vcmp.ge.f32.partialorder %v2416_v60, 0.0  ;;  %v2481_v49 = vmul.f32 0.2, %v2417_v0 }
 0x5c0   : > { %v2511_v39 = vsel %vm2447_vm14, %v2415_v5, %v2479_v21  ;;  %4723 = vmatmul.mubr.msk.f32.vlgmr.msra.gmra.mrb[76].mxu1 %vm357_vm1, %v2581_v12  ;;  %vm2449_vm3 = vcmp.ge.f32.partialorder %v2417_v0, 0.0  ;;  %v2420_v13 = vadd.f32 %v5832_v47, %v5787_v28  ;;  %v2542_v40 = vmul.f32 1.4142135, %v2510_v24 }
 0x5c1   : > { %4725 = vmatprep.mubr.msk.f32.mxu1 %vm357_vm1, %v2582_v25  ;;  %v2583_v51 = vmul.f32 %v5844_v4, %v2540_v23  ;;  %v2482_v50 = vmul.f32 0.2, %v2418_v20  ;;  %v2512_v57 = vsel %vm2448_vm15, %v2416_v60, %v2480_v48  ;;  %v2543_v58 = vmul.f32 1.4142135, %v2511_v39 }
 0x5c2   : > { %v2584_v61 = vmul.f32 %v5844_v4, %v2541_v55  ;;  %v2421_v27 = vadd.f32 %v5832_v47, %v5789_v34  ;;  %vm2450_vm4 = vcmp.ge.f32.partialorder %v2418_v20, 0.0  ;;  %v2483_v1 = vmul.f32 0.2, %v2419_v56 }
 0x5c3   : > { %v2513_v2 = vsel %vm2449_vm3, %v2417_v0, %v2481_v49  ;;  %vm2451_vm5 = vcmp.ge.f32.partialorder %v2419_v56, 0.0  ;;  %v2422_v28 = vadd.f32 %v5832_v47, %v5791_v36  ;;  %v2544_v5 = vmul.f32 1.4142135, %v2512_v57 }
 0x5c4   : > { %4726 = vmatmul.mubr.msk.f32.gmra.mrb[78].mxu1 %vm357_vm1, %v2583_v51  ;;  %v2585_v59 = vmul.f32 %v5844_v4, %v2542_v40  ;;  %v2484_v8 = vmul.f32 0.2, %v2420_v13  ;;  %v2514_v60 = vsel %vm2450_vm4, %v2418_v20, %v2482_v50  ;;  %v2545_v62 = vmul.f32 1.4142135, %v2513_v2 }
 0x5c5   : > { %4728 = vmatprep.mubr.msk.f32.mxu1 %vm357_vm1, %v2584_v61  ;;  %v2586_v63 = vmul.f32 %v5844_v4, %v2543_v58  ;;  %v2423_v34 = vadd.f32 %v5832_v47, %v5793_v41  ;;  %vm2452_vm6 = vcmp.ge.f32.partialorder %v2420_v13, 0.0  ;;  %v2485_v0 = vmul.f32 0.2, %v2421_v27 }
 0x5c6   : > { %v2515_v3 = vsel %vm2451_vm5, %v2419_v56, %v2483_v1  ;;  %vm2453_vm7 = vcmp.ge.f32.partialorder %v2421_v27, 0.0  ;;  %v2424_v36 = vadd.f32 %v5832_v47, %v5795_v38  ;;  %v2546_v10 = vmul.f32 1.4142135, %v2514_v60 }
 0x5c7   : > { %v2587_v14 = vmul.f32 %v5844_v4, %v2544_v5  ;;  %v2486_v21 = vmul.f32 0.2, %v2422_v28  ;;  %v2516_v22 = vsel %vm2452_vm6, %v2420_v13, %v2484_v8  ;;  %v2547_v12 = vmul.f32 1.4142135, %v2515_v3 }
 0x5c8   : > { %4729 = vmatmul.mubr.msk.f32.gmra.mrb[80].mxu1 %vm357_vm1, %v2585_v59  ;;  %v2588_v19 = vmul.f32 %v5844_v4, %v2545_v62  ;;  %v2425_v41 = vadd.f32 %v5832_v47, %v5797_v35  ;;  %vm2454_vm8 = vcmp.ge.f32.partialorder %v2422_v28, 0.0  ;;  %v2487_v20 = vmul.f32 0.2, %v2423_v34 }
 0x5c9   : > { %4731 = vmatprep.mubr.msk.f32.mxu1 %vm357_vm1, %v2586_v63  ;;  %v2517_v23 = vsel %vm2453_vm7, %v2421_v27, %v2485_v0  ;;  %vm2455_vm0 = vcmp.ge.f32.partialorder %v2423_v34, 0.0  ;;  %v2426_v38 = vadd.f32 %v5832_v47, %v5799_v42  ;;  %v2548_v48 = vmul.f32 1.4142135, %v2516_v22 }
 0x5ca   : > { %v2589_v24 = vmul.f32 %v5844_v4, %v2546_v10  ;;  %v2488_v55 = vmul.f32 0.2, %v2424_v36  ;;  %v2518_v25 = vsel %vm2454_vm8, %v2422_v28, %v2486_v21  ;;  %v2549_v56 = vmul.f32 1.4142135, %v2517_v23 }
 0x5cb   : > { %v2590_v49 = vmul.f32 %v5844_v4, %v2547_v12  ;;  %v2427_v35 = vadd.f32 %v5832_v47, %v5801_v52  ;;  %vm2456_vm2 = vcmp.ge.f32.partialorder %v2424_v36, 0.0  ;;  %v2489_v39 = vmul.f32 0.2, %v2425_v41 }
 0x5cc   : > { %4732 = vmatmul.mubr.msk.f32.gmra.mrb[82].mxu1 %vm357_vm1, %v2587_v14  ;;  %v2519_v13 = vsel %vm2455_vm0, %v2423_v34, %v2487_v20  ;;  %vm2457_vm9 = vcmp.ge.f32.partialorder %v2425_v41, 0.0  ;;  %v2428_v42 = vadd.f32 %v5832_v47, %v5803_v37  ;;  %v2550_v40 = vmul.f32 1.4142135, %v2518_v25 }
 0x5cd   : > { %4734 = vmatprep.mubr.msk.f32.mxu1 %vm357_vm1, %v2588_v19  ;;  %v2591_v51 = vmul.f32 %v5844_v4, %v2548_v48  ;;  %v2490_v50 = vmul.f32 0.2, %v2426_v38  ;;  %v2520_v57 = vsel %vm2456_vm2, %v2424_v36, %v2488_v55  ;;  %v2551_v58 = vmul.f32 1.4142135, %v2519_v13 }
 0x5ce   : > { %v2592_v61 = vmul.f32 %v5844_v4, %v2549_v56  ;;  %v2429_v52 = vadd.f32 %v5832_v47, %v5805_v53  ;;  %vm2458_vm10 = vcmp.ge.f32.partialorder %v2426_v38, 0.0  ;;  %v2491_v27 = vmul.f32 0.2, %v2427_v35 }
 0x5cf   : > { %v2521_v1 = vsel %vm2457_vm9, %v2425_v41, %v2489_v39  ;;  %vm2459_vm11 = vcmp.ge.f32.partialorder %v2427_v35, 0.0  ;;  %v2430_v37 = vadd.f32 %v5832_v47, %v5807_v32  ;;  %v2552_v2 = vmul.f32 1.4142135, %v2520_v57 }
 0x5d0   : > { %4735 = vmatmul.mubr.msk.f32.gmra.mrb[84].mxu1 %vm357_vm1, %v2589_v24  ;;  %v2593_v28 = vmul.f32 %v5844_v4, %v2550_v40  ;;  %v2492_v5 = vmul.f32 0.2, %v2428_v42  ;;  %v2522_v59 = vsel %vm2458_vm10, %v2426_v38, %v2490_v50  ;;  %v2553_v8 = vmul.f32 1.4142135, %v2521_v1 }
 0x5d1   : > { %4737 = vmatprep.mubr.msk.f32.mxu1 %vm357_vm1, %v2590_v49  ;;  %v2594_v60 = vmul.f32 %v5844_v4, %v2551_v58  ;;  %v2431_v53 = vadd.f32 %v5832_v47, %v5809_v18  ;;  %vm2460_vm12 = vcmp.ge.f32.partialorder %v2428_v42, 0.0  ;;  %v2493_v62 = vmul.f32 0.2, %v2429_v52 }
 0x5d2   : > { %v2523_v63 = vsel %vm2459_vm11, %v2427_v35, %v2491_v27  ;;  %vm2461_vm14 = vcmp.ge.f32.partialorder %v2429_v52, 0.0  ;;  %v2432_v32 = vadd.f32 %v5832_v47, %v5811_v17  ;;  %v2554_v34 = vmul.f32 1.4142135, %v2522_v59 }
 0x5d3   : > { %v2595_v0 = vmul.f32 %v5844_v4, %v2552_v2  ;;  %v2494_v3 = vmul.f32 0.2, %v2430_v37  ;;  %v2524_v36 = vsel %vm2460_vm12, %v2428_v42, %v2492_v5  ;;  %v2555_v10 = vmul.f32 1.4142135, %v2523_v63 }
 0x5d4   : > { %4738 = vmatmul.mubr.msk.f32.gmra.mrb[86].mxu1 %vm357_vm1, %v2591_v51  ;;  %v2596_v14 = vmul.f32 %v5844_v4, %v2553_v8  ;;  %v2433_v18 = vadd.f32 %v5832_v47, %v5813_v43  ;;  %vm2462_vm15 = vcmp.ge.f32.partialorder %v2430_v37, 0.0  ;;  %v2495_v21 = vmul.f32 0.2, %v2431_v53 }
 0x5d5   : > { %4740 = vmatprep.mubr.msk.f32.mxu1 %vm357_vm1, %v2592_v61  ;;  %v2525_v22 = vsel %vm2461_vm14, %v2429_v52, %v2493_v62  ;;  %vm2463_vm3 = vcmp.ge.f32.partialorder %v2431_v53, 0.0  ;;  %v2434_v17 = vadd.f32 %v5832_v47, %v5815_v9  ;;  %v2556_v12 = vmul.f32 1.4142135, %v2524_v36 }
 0x5d6   : > { %v2597_v19 = vmul.f32 %v5844_v4, %v2554_v34  ;;  %v2496_v41 = vmul.f32 0.2, %v2432_v32  ;;  %v2526_v20 = vsel %vm2462_vm15, %v2430_v37, %v2494_v3  ;;  %v2557_v23 = vmul.f32 1.4142135, %v2525_v22 }
 0x5d7   : > { %v2598_v38 = vmul.f32 %v5844_v4, %v2555_v10  ;;  %v2435_v43 = vadd.f32 %v5832_v47, %v5817_v33  ;;  %vm2464_vm4 = vcmp.ge.f32.partialorder %v2432_v32, 0.0  ;;  %v2497_v48 = vmul.f32 0.2, %v2433_v18 }
 0x5d8   : > { %4741 = vmatmul.mubr.msk.f32.gmra.mrb[88].mxu1 %vm357_vm1, %v2593_v28  ;;  %v2527_v24 = vsel %vm2463_vm3, %v2431_v53, %v2495_v21  ;;  %vm2465_vm5 = vcmp.ge.f32.partialorder %v2433_v18, 0.0  ;;  %v2436_v9 = vadd.f32 %v5832_v47, %v5819_v44  ;;  %v2558_v55 = vmul.f32 1.4142135, %v2526_v20  ;;  %v5966_v20 = vld [vmem:[%s6318_s5 + $0x4] ss:$0 sm:$0xff] }
 0x5d9   : > { %4743 = vmatprep.mubr.msk.f32.mxu1 %vm357_vm1, %v2594_v60  ;;  %v2599_v25 = vmul.f32 %v5844_v4, %v2556_v12  ;;  %v2498_v56 = vmul.f32 0.2, %v2434_v17  ;;  %v2528_v49 = vsel %vm2464_vm4, %v2432_v32, %v2496_v41  ;;  %v2559_v35 = vmul.f32 1.4142135, %v2527_v24 }
 0x5da   : > { %v2600_v39 = vmul.f32 %v5844_v4, %v2557_v23  ;;  %v2437_v33 = vadd.f32 %v5832_v47, %v5821_v45  ;;  %vm2466_vm6 = vcmp.ge.f32.partialorder %v2434_v17, 0.0  ;;  %v2499_v13 = vmul.f32 0.2, %v2435_v43 }
 0x5db   : > { %v2529_v42 = vsel %vm2465_vm5, %v2433_v18, %v2497_v48  ;;  %vm2467_vm7 = vcmp.ge.f32.partialorder %v2435_v43, 0.0  ;;  %v2438_v44 = vadd.f32 %v5832_v47, %v5823_v46  ;;  %v2560_v40 = vmul.f32 1.4142135, %v2528_v49 }
 0x5dc   : > { %4744 = vmatmul.mubr.msk.f32.gmra.mrb[90].mxu1 %vm357_vm1, %v2595_v0  ;;  %v2601_v51 = vmul.f32 %v5844_v4, %v2558_v55  ;;  %v2500_v50 = vmul.f32 0.2, %v2436_v9  ;;  %v2530_v57 = vsel %vm2466_vm6, %v2434_v17, %v2498_v56  ;;  %v2561_v58 = vmul.f32 1.4142135, %v2529_v42 }
 0x5dd   : > { %4746 = vmatprep.mubr.msk.f32.mxu1 %vm357_vm1, %v2596_v14  ;;  %v2602_v61 = vmul.f32 %v5844_v4, %v2559_v35  ;;  %v2439_v45 = vadd.f32 %v5832_v47, %v5825_v29  ;;  %vm2468_vm8 = vcmp.ge.f32.partialorder %v2436_v9, 0.0  ;;  %v2501_v52 = vmul.f32 0.2, %v2437_v33 }
 0x5de   : > { %v2531_v27 = vsel %vm2467_vm7, %v2435_v43, %v2499_v13  ;;  %vm2469_vm0 = vcmp.ge.f32.partialorder %v2437_v33, 0.0  ;;  %v2440_v46 = vadd.f32 %v5832_v47, %v5827_v31  ;;  %v2562_v1 = vmul.f32 1.4142135, %v2530_v57 }
 0x5df   : > { %v2603_v37 = vmul.f32 %v5844_v4, %v2560_v40  ;;  %v2502_v2 = vmul.f32 0.2, %v2438_v44  ;;  %v2532_v28 = vsel %vm2468_vm8, %v2436_v9, %v2500_v50  ;;  %v2563_v5 = vmul.f32 1.4142135, %v2531_v27 }
 0x5e0   : > { %4747 = vmatmul.mubr.msk.f32.gmra.mrb[92].mxu1 %vm357_vm1, %v2597_v19  ;;  %v2604_v59 = vmul.f32 %v5844_v4, %v2561_v58  ;;  %vm2470_vm2 = vcmp.ge.f32.partialorder %v2438_v44, 0.0  ;;  %v2503_v29 = vmul.f32 0.2, %v2439_v45  ;;  %v2533_v8 = vsel %vm2469_vm0, %v2437_v33, %v2501_v52 }
 0x5e1   : > { %4749 = vmatprep.mubr.msk.f32.mxu1 %vm357_vm1, %v2598_v38  ;;  %vm2471_vm9 = vcmp.ge.f32.partialorder %v2439_v45, 0.0  ;;  %v2564_v60 = vmul.f32 1.4142135, %v2532_v28  ;;  %v2605_v53 = vmul.f32 %v5844_v4, %v2562_v1  ;;  %v2504_v31 = vmul.f32 0.2, %v2440_v46 }
 0x5e2   : > { %v2534_v47 = vsel %vm2470_vm2, %v2438_v44, %v2502_v2  ;;  %v2565_v62 = vmul.f32 1.4142135, %v2533_v8  ;;  %v2606_v63 = vmul.f32 %v5844_v4, %v2563_v5  ;;  %vm2472_vm10 = vcmp.ge.f32.partialorder %v2440_v46, 0.0 }
 0x5e3   : > { %v2535_v32 = vsel %vm2471_vm9, %v2439_v45, %v2503_v29  ;;  %v2566_v34 = vmul.f32 1.4142135, %v2534_v47  ;;  %v2607_v0 = vmul.f32 %v5844_v4, %v2564_v60  ;;  %v2536_v3 = vsel %vm2472_vm10, %v2440_v46, %v2504_v31 }
 0x5e4   : > { %4750 = vmatmul.mubr.msk.f32.gmra.mrb[94].mxu1 %vm357_vm1, %v2599_v25  ;;  %v2567_v36 = vmul.f32 1.4142135, %v2535_v32  ;;  %v2608_v10 = vmul.f32 %v5844_v4, %v2565_v62  ;;  %v2568_v14 = vmul.f32 1.4142135, %v2536_v3  ;;  %v3010_v17 = vmax.f32 %v5782_v6, 0.0 }
 0x5e5   : > { %4752 = vmatprep.mubr.msk.f32.mxu1 %vm357_vm1, %v2600_v39  ;;  %v2609_v18 = vmul.f32 %v5844_v4, %v2566_v34  ;;  %v3224_v48 = vsub.s32 7, %v5252_v11 }
 0x5e6   : > { %v2610_v21 = vmul.f32 %v5844_v4, %v2567_v36  ;;  %v2611_v22 = vmul.f32 %v5844_v4, %v2568_v14  ;;  %v3011_v12 = vadd.f32 1e-08, %v3010_v17 }
 0x5e7   : > { %v5976_v35 = vrot.slane %v5841_v30, %v3224_v48 }
 0x5e8   : > { %4753 = vmatmul.mubr.msk.f32.gmra.mrb[96].mxu1 %vm357_vm1, %v2601_v51  ;;  %5138 = vrsqrt.f32 %v3011_v12 }
 0x5e9   : > { %4755 = vmatprep.mubr.msk.f32.mxu1 %vm357_vm1, %v2602_v61 }
 0x5ec   : > { %4756 = vmatmul.mubr.msk.f32.gmra.mrb[98].mxu1 %vm357_vm1, %v2603_v37 }
 0x5ed   : > { %4758 = vmatprep.mubr.msk.f32.mxu1 %vm357_vm1, %v2604_v59 }
 0x5f0   : > { %4759 = vmatmul.mubr.msk.f32.gmra.mrb[100].mxu1 %vm357_vm1, %v2605_v53 }
 0x5f1   : > { %4761 = vmatprep.mubr.msk.f32.mxu1 %vm357_vm1, %v2606_v63 }
 0x5f2   : > { %v5139_v19 = vpop.eup %5138 }
 0x5f3   : > { %v5961_v41 = vrot.slane %v5139_v19, %v5258_v16 }
 0x5f4   : > { %4762 = vmatmul.mubr.msk.f32.gmra.mrb[102].mxu1 %vm357_vm1, %v2607_v0 }
 0x5f5   : > { %4764 = vmatprep.mubr.msk.f32.mxu1 %vm357_vm1, %v2608_v10 }
 0x5f8   : > { %4765 = vmatmul.mubr.msk.f32.gmra.mrb[104].mxu1 %vm357_vm1, %v2609_v18 }
 0x5f9   : > { %4767 = vmatprep.mubr.msk.f32.mxu1 %vm357_vm1, %v2610_v21 }
 0x5fc   : > { %4768 = vmatmul.mubr.msk.f32.gmra.mrb[106].mxu1 %vm357_vm1, %v2611_v22 }
 0x693   : > { %v4724_v23 = vpop.f32.mrb[76].mxu1 }
 0x694   : > { %v3018_v38 = vmul.f32 %v4724_v23, %v5961_v41  ;;  %v2774_v43 = vpop.f32.mrb[77].mxu1 }
 0x695   : > { %v3017_v4 = vmul.f32 %v5961_v41, %v2774_v43 }
 0x696   : > { %v3056_v6 = vadd.f32 %v5966_v20, %v3018_v38 }
 0x697   : > { %v3055_v24 = vadd.f32 %v5966_v20, %v3017_v4  ;;  %v4727_v9 = vpop.f32.mrb[78].mxu1 }
 0x698   : > { %vm3088_vm11 = vcmp.ge.f32.partialorder %v3056_v6, 0.0  ;;  %v3120_v16 = vmul.f32 0.2, %v3056_v6  ;;  %v3020_v55 = vmul.f32 %v4727_v9, %v5961_v41  ;;  %v2784_v25 = vpop.f32.mrb[79].mxu1 }
 0x699   : > { %vm3087_vm12 = vcmp.ge.f32.partialorder %v3055_v24, 0.0  ;;  %v3119_v56 = vmul.f32 0.2, %v3055_v24  ;;  %v3019_v49 = vmul.f32 %v5961_v41, %v2784_v25 }
 0x69a   : > { %v3152_v39 = vsel %vm3088_vm11, %v3056_v6, %v3120_v16  ;;  %v3058_v11 = vadd.f32 %v5966_v20, %v3020_v55 }
 0x69b   : > { %v3184_v33 = vmul.f32 1.4142135, %v3152_v39  ;;  %v3151_v13 = vsel %vm3087_vm12, %v3055_v24, %v3119_v56  ;;  %v3057_v42 = vadd.f32 %v5966_v20, %v3019_v49  ;;  %v4730_v44 = vpop.f32.mrb[80].mxu1 }
 0x69c   : > { %v3183_v40 = vmul.f32 1.4142135, %v3151_v13  ;;  %vm3090_vm14 = vcmp.ge.f32.partialorder %v3058_v11, 0.0  ;;  %v3122_v51 = vmul.f32 0.2, %v3058_v11  ;;  %v3022_v50 = vmul.f32 %v4730_v44, %v5961_v41  ;;  %v2794_v57 = vpop.f32.mrb[81].mxu1 }
 0x69d   : > { %vm3089_vm15 = vcmp.ge.f32.partialorder %v3057_v42, 0.0  ;;  %v3121_v58 = vmul.f32 0.2, %v3057_v42  ;;  %v3021_v61 = vmul.f32 %v5961_v41, %v2794_v57  ;;  %v3227_v27 = vmul.f32 %v5976_v35, %v3184_v33 }
 0x69e   : > { %v3154_v30 = vsel %vm3090_vm14, %v3058_v11, %v3122_v51  ;;  %v3060_v45 = vadd.f32 %v5966_v20, %v3022_v50  ;;  %v3226_v52 = vmul.f32 %v5976_v35, %v3183_v40 }
 0x69f   : > { %v3186_v46 = vmul.f32 1.4142135, %v3154_v30  ;;  %v3153_v1 = vsel %vm3089_vm15, %v3057_v42, %v3121_v58  ;;  %v3059_v37 = vadd.f32 %v5966_v20, %v3021_v61  ;;  %v4733_v2 = vpop.f32.mrb[82].mxu1 }
 0x6a0   : > { %v3185_v28 = vmul.f32 1.4142135, %v3153_v1  ;;  %vm3092_vm3 = vcmp.ge.f32.partialorder %v3060_v45, 0.0  ;;  %v3124_v5 = vmul.f32 0.2, %v3060_v45  ;;  %v3024_v59 = vmul.f32 %v4733_v2, %v5961_v41  ;;  %v2804_v29 = vpop.f32.mrb[83].mxu1  ;;  %4789 = vmatprep.mubr.msk.f32.mxu0 %vm357_vm1, %v3226_v52 }
 0x6a1   : > { %vm3091_vm4 = vcmp.ge.f32.partialorder %v3059_v37, 0.0  ;;  %v3123_v8 = vmul.f32 0.2, %v3059_v37  ;;  %v3023_v60 = vmul.f32 %v5961_v41, %v2804_v29  ;;  %4790 = vmatmul.mubr.msk.f32.vlgmr.msra.gmra.mrb[34].mxu0 %vm357_vm1, %v3227_v27  ;;  %v3229_v0 = vmul.f32 %v5976_v35, %v3186_v46 }
 0x6a2   : > { %v3156_v53 = vsel %vm3092_vm3, %v3060_v45, %v3124_v5  ;;  %v3062_v31 = vadd.f32 %v5966_v20, %v3024_v59  ;;  %5022 = vmatpush3.bf16.msra.mxu0 %v5684_v54  ;;  %v3228_v47 = vmul.f32 %v5976_v35, %v3185_v28 }
 0x6a3   : > { %v3188_v62 = vmul.f32 1.4142135, %v3156_v53  ;;  %v3155_v63 = vsel %vm3091_vm4, %v3059_v37, %v3123_v8  ;;  %v3061_v32 = vadd.f32 %v5966_v20, %v3023_v60  ;;  %5024 = vmatprep.subr.bf16.mxu0 %v5691_v7  ;;  %v4736_v34 = vpop.f32.mrb[84].mxu1 }
 0x6a4   : > { %v3187_v3 = vmul.f32 1.4142135, %v3155_v63  ;;  %vm3094_vm5 = vcmp.ge.f32.partialorder %v3062_v31, 0.0  ;;  %v3126_v36 = vmul.f32 0.2, %v3062_v31  ;;  %v3026_v10 = vmul.f32 %v4736_v34, %v5961_v41  ;;  %v2814_v14 = vpop.f32.mrb[85].mxu1  ;;  %4792 = vmatprep.mubr.msk.f32.mxu0 %vm357_vm1, %v3228_v47 }
 0x6a5   : > { %vm3093_vm6 = vcmp.ge.f32.partialorder %v3061_v32, 0.0  ;;  %v3125_v54 = vmul.f32 0.2, %v3061_v32  ;;  %v3025_v18 = vmul.f32 %v5961_v41, %v2814_v14  ;;  %4793 = vmatmul.mubr.msk.f32.gmra.mrb[36].mxu0 %vm357_vm1, %v3229_v0  ;;  %v3231_v43 = vmul.f32 %v5976_v35, %v3188_v62 }
 0x6a6   : > { %v3158_v21 = vsel %vm3094_vm5, %v3062_v31, %v3126_v36  ;;  %v3064_v22 = vadd.f32 %v5966_v20, %v3026_v10  ;;  %5026 = vmatpush3.bf16.msra.mxu0 %v5691_v7  ;;  %v3230_v17 = vmul.f32 %v5976_v35, %v3187_v3 }
 0x6a7   : > { %v3190_v12 = vmul.f32 1.4142135, %v3158_v21  ;;  %v3157_v19 = vsel %vm3093_vm6, %v3061_v32, %v3125_v54  ;;  %v3063_v23 = vadd.f32 %v5966_v20, %v3025_v18  ;;  %5028 = vmatprep.subr.bf16.mxu0 %v5697_v15  ;;  %v4739_v38 = vpop.f32.mrb[86].mxu1 }
 0x6a8   : > { %v3189_v4 = vmul.f32 1.4142135, %v3157_v19  ;;  %vm3096_vm7 = vcmp.ge.f32.partialorder %v3064_v22, 0.0  ;;  %v3128_v48 = vmul.f32 0.2, %v3064_v22  ;;  %v3028_v6 = vmul.f32 %v4739_v38, %v5961_v41  ;;  %v2824_v24 = vpop.f32.mrb[87].mxu1  ;;  %4795 = vmatprep.mubr.msk.f32.mxu0 %vm357_vm1, %v3230_v17 }
 0x6a9   : > { %vm3095_vm8 = vcmp.ge.f32.partialorder %v3063_v23, 0.0  ;;  %v3127_v7 = vmul.f32 0.2, %v3063_v23  ;;  %v3027_v9 = vmul.f32 %v5961_v41, %v2824_v24  ;;  %4796 = vmatmul.mubr.msk.f32.gmra.mrb[38].mxu0 %vm357_vm1, %v3231_v43  ;;  %v3233_v33 = vmul.f32 %v5976_v35, %v3190_v12 }
 0x6aa   : > { %v3160_v16 = vsel %vm3096_vm7, %v3064_v22, %v3128_v48  ;;  %v3066_v55 = vadd.f32 %v5966_v20, %v3028_v6  ;;  %5030 = vmatpush3.bf16.msra.mxu0 %v5697_v15  ;;  %v3232_v25 = vmul.f32 %v5976_v35, %v3189_v4 }
 0x6ab   : > { %v3192_v56 = vmul.f32 1.4142135, %v3160_v16  ;;  %v3159_v49 = vsel %vm3095_vm8, %v3063_v23, %v3127_v7  ;;  %v3065_v39 = vadd.f32 %v5966_v20, %v3027_v9  ;;  %5032 = vmatprep.subr.bf16.mxu0 %v5703_v26  ;;  %v4742_v11 = vpop.f32.mrb[88].mxu1 }
 0x6ac   : > { %v3191_v13 = vmul.f32 1.4142135, %v3159_v49  ;;  %vm3098_vm0 = vcmp.ge.f32.partialorder %v3066_v55, 0.0  ;;  %v3130_v42 = vmul.f32 0.2, %v3066_v55  ;;  %v3030_v44 = vmul.f32 %v4742_v11, %v5961_v41  ;;  %v2834_v40 = vpop.f32.mrb[89].mxu1  ;;  %4798 = vmatprep.mubr.msk.f32.mxu0 %vm357_vm1, %v3232_v25 }
 0x6ad   : > { %vm3097_vm2 = vcmp.ge.f32.partialorder %v3065_v39, 0.0  ;;  %v3129_v15 = vmul.f32 0.2, %v3065_v39  ;;  %v3029_v51 = vmul.f32 %v5961_v41, %v2834_v40  ;;  %4799 = vmatmul.mubr.msk.f32.gmra.mrb[40].mxu0 %vm357_vm1, %v3233_v33  ;;  %v3235_v27 = vmul.f32 %v5976_v35, %v3192_v56 }
 0x6ae   : > { %v3162_v50 = vsel %vm3098_vm0, %v3066_v55, %v3130_v42  ;;  %v3068_v57 = vadd.f32 %v5966_v20, %v3030_v44  ;;  %5034 = vmatpush3.bf16.msra.mxu0 %v5703_v26  ;;  %v3234_v58 = vmul.f32 %v5976_v35, %v3191_v13 }
 0x6af   : > { %v3194_v61 = vmul.f32 1.4142135, %v3162_v50  ;;  %v3161_v30 = vsel %vm3097_vm2, %v3065_v39, %v3129_v15  ;;  %v3067_v45 = vadd.f32 %v5966_v20, %v3029_v51  ;;  %v4745_v52 = vpop.f32.mrb[90].mxu1 }
 0x6b0   : > { %v3193_v46 = vmul.f32 1.4142135, %v3161_v30  ;;  %vm3100_vm9 = vcmp.ge.f32.partialorder %v3068_v57, 0.0  ;;  %v3132_v1 = vmul.f32 0.2, %v3068_v57  ;;  %v3032_v37 = vmul.f32 %v4745_v52, %v5961_v41  ;;  %v2844_v2 = vpop.f32.mrb[91].mxu1  ;;  %4801 = vmatprep.mubr.msk.f32.mxu0 %vm357_vm1, %v3234_v58 }
 0x6b1   : > { %vm3099_vm10 = vcmp.ge.f32.partialorder %v3067_v45, 0.0  ;;  %v3131_v28 = vmul.f32 0.2, %v3067_v45  ;;  %v3031_v26 = vmul.f32 %v5961_v41, %v2844_v2  ;;  %4802 = vmatmul.mubr.msk.f32.gmra.mrb[42].mxu0 %vm357_vm1, %v3235_v27  ;;  %v3237_v47 = vmul.f32 %v5976_v35, %v3194_v61 }
 0x6b2   : > { %v3164_v5 = vsel %vm3100_vm9, %v3068_v57, %v3132_v1  ;;  %v3070_v59 = vadd.f32 %v5966_v20, %v3032_v37  ;;  %v3236_v29 = vmul.f32 %v5976_v35, %v3193_v46 }
 0x6b3   : > { %v3196_v8 = vmul.f32 1.4142135, %v3164_v5  ;;  %v3163_v60 = vsel %vm3099_vm10, %v3067_v45, %v3131_v28  ;;  %v3069_v53 = vadd.f32 %v5966_v20, %v3031_v26  ;;  %v4748_v31 = vpop.f32.mrb[92].mxu1 }
 0x6b4   : > { %v3195_v62 = vmul.f32 1.4142135, %v3163_v60  ;;  %vm3102_vm11 = vcmp.ge.f32.partialorder %v3070_v59, 0.0  ;;  %v3134_v63 = vmul.f32 0.2, %v3070_v59  ;;  %v3034_v32 = vmul.f32 %v4748_v31, %v5961_v41  ;;  %v2854_v34 = vpop.f32.mrb[93].mxu1  ;;  %4804 = vmatprep.mubr.msk.f32.mxu0 %vm357_vm1, %v3236_v29 }
 0x6b5   : > { %vm3101_vm12 = vcmp.ge.f32.partialorder %v3069_v53, 0.0  ;;  %v3133_v0 = vmul.f32 0.2, %v3069_v53  ;;  %v3033_v3 = vmul.f32 %v5961_v41, %v2854_v34  ;;  %4805 = vmatmul.mubr.msk.f32.gmra.mrb[44].mxu0 %vm357_vm1, %v3237_v47  ;;  %v3239_v17 = vmul.f32 %v5976_v35, %v3196_v8 }
 0x6b6   : > { %v3166_v36 = vsel %vm3102_vm11, %v3070_v59, %v3134_v63  ;;  %v3072_v10 = vadd.f32 %v5966_v20, %v3034_v32  ;;  %v3238_v14 = vmul.f32 %v5976_v35, %v3195_v62 }
 0x6b7   : > { %v3198_v54 = vmul.f32 1.4142135, %v3166_v36  ;;  %v3165_v18 = vsel %vm3101_vm12, %v3069_v53, %v3133_v0  ;;  %v3071_v21 = vadd.f32 %v5966_v20, %v3033_v3  ;;  %v4751_v22 = vpop.f32.mrb[94].mxu1 }
 0x6b8   : > { %v3197_v12 = vmul.f32 1.4142135, %v3165_v18  ;;  %vm3104_vm14 = vcmp.ge.f32.partialorder %v3072_v10, 0.0  ;;  %v3136_v19 = vmul.f32 0.2, %v3072_v10  ;;  %v3036_v23 = vmul.f32 %v4751_v22, %v5961_v41  ;;  %v2864_v38 = vpop.f32.mrb[95].mxu1  ;;  %4807 = vmatprep.mubr.msk.f32.mxu0 %vm357_vm1, %v3238_v14 }
 0x6b9   : > { %vm3103_vm15 = vcmp.ge.f32.partialorder %v3071_v21, 0.0  ;;  %v3135_v43 = vmul.f32 0.2, %v3071_v21  ;;  %v3035_v4 = vmul.f32 %v5961_v41, %v2864_v38  ;;  %4808 = vmatmul.mubr.msk.f32.gmra.mrb[46].mxu0 %vm357_vm1, %v3239_v17  ;;  %v3241_v25 = vmul.f32 %v5976_v35, %v3198_v54 }
 0x6ba   : > { %v3168_v48 = vsel %vm3104_vm14, %v3072_v10, %v3136_v19  ;;  %v3074_v6 = vadd.f32 %v5966_v20, %v3036_v23  ;;  %v3240_v24 = vmul.f32 %v5976_v35, %v3197_v12 }
 0x6bb   : > { %v3200_v7 = vmul.f32 1.4142135, %v3168_v48  ;;  %v3167_v9 = vsel %vm3103_vm15, %v3071_v21, %v3135_v43  ;;  %v3073_v16 = vadd.f32 %v5966_v20, %v3035_v4  ;;  %v4754_v55 = vpop.f32.mrb[96].mxu1 }
 0x6bc   : > { %v3199_v56 = vmul.f32 1.4142135, %v3167_v9  ;;  %vm3106_vm3 = vcmp.ge.f32.partialorder %v3074_v6, 0.0  ;;  %v3138_v49 = vmul.f32 0.2, %v3074_v6  ;;  %v3038_v39 = vmul.f32 %v4754_v55, %v5961_v41  ;;  %v2874_v11 = vpop.f32.mrb[97].mxu1  ;;  %4810 = vmatprep.mubr.msk.f32.mxu0 %vm357_vm1, %v3240_v24 }
 0x6bd   : > { %vm3105_vm4 = vcmp.ge.f32.partialorder %v3073_v16, 0.0  ;;  %v3137_v33 = vmul.f32 0.2, %v3073_v16  ;;  %v3037_v13 = vmul.f32 %v5961_v41, %v2874_v11  ;;  %4811 = vmatmul.mubr.msk.f32.gmra.mrb[48].mxu0 %vm357_vm1, %v3241_v25  ;;  %v3243_v58 = vmul.f32 %v5976_v35, %v3200_v7 }
 0x6be   : > { %v3170_v42 = vsel %vm3106_vm3, %v3074_v6, %v3138_v49  ;;  %v3076_v44 = vadd.f32 %v5966_v20, %v3038_v39  ;;  %v3242_v40 = vmul.f32 %v5976_v35, %v3199_v56 }
 0x6bf   : > { %v3202_v15 = vmul.f32 1.4142135, %v3170_v42  ;;  %v3169_v51 = vsel %vm3105_vm4, %v3073_v16, %v3137_v33  ;;  %v3075_v50 = vadd.f32 %v5966_v20, %v3037_v13  ;;  %v4757_v57 = vpop.f32.mrb[98].mxu1 }
 0x6c0   : > { %v3201_v61 = vmul.f32 1.4142135, %v3169_v51  ;;  %vm3108_vm5 = vcmp.ge.f32.partialorder %v3076_v44, 0.0  ;;  %v3140_v30 = vmul.f32 0.2, %v3076_v44  ;;  %v3040_v45 = vmul.f32 %v4757_v57, %v5961_v41  ;;  %v2884_v52 = vpop.f32.mrb[99].mxu1  ;;  %4813 = vmatprep.mubr.msk.f32.mxu0 %vm357_vm1, %v3242_v40 }
 0x6c1   : > { %vm3107_vm6 = vcmp.ge.f32.partialorder %v3075_v50, 0.0  ;;  %v3139_v27 = vmul.f32 0.2, %v3075_v50  ;;  %v3039_v46 = vmul.f32 %v5961_v41, %v2884_v52  ;;  %4814 = vmatmul.mubr.msk.f32.gmra.mrb[50].mxu0 %vm357_vm1, %v3243_v58  ;;  %v3245_v29 = vmul.f32 %v5976_v35, %v3202_v15 }
 0x6c2   : > { %v3172_v1 = vsel %vm3108_vm5, %v3076_v44, %v3140_v30  ;;  %v3078_v37 = vadd.f32 %v5966_v20, %v3040_v45  ;;  %v3244_v2 = vmul.f32 %v5976_v35, %v3201_v61 }
 0x6c3   : > { %v3204_v28 = vmul.f32 1.4142135, %v3172_v1  ;;  %v3171_v26 = vsel %vm3107_vm6, %v3075_v50, %v3139_v27  ;;  %v3077_v5 = vadd.f32 %v5966_v20, %v3039_v46  ;;  %v4760_v59 = vpop.f32.mrb[100].mxu1 }
 0x6c4   : > { %v3203_v8 = vmul.f32 1.4142135, %v3171_v26  ;;  %vm3110_vm7 = vcmp.ge.f32.partialorder %v3078_v37, 0.0  ;;  %v3142_v60 = vmul.f32 0.2, %v3078_v37  ;;  %v3042_v53 = vmul.f32 %v4760_v59, %v5961_v41  ;;  %v2894_v31 = vpop.f32.mrb[101].mxu1  ;;  %4816 = vmatprep.mubr.msk.f32.mxu0 %vm357_vm1, %v3244_v2 }
 0x6c5   : > { %vm3109_vm8 = vcmp.ge.f32.partialorder %v3077_v5, 0.0  ;;  %v3141_v47 = vmul.f32 0.2, %v3077_v5  ;;  %v3041_v62 = vmul.f32 %v5961_v41, %v2894_v31  ;;  %4817 = vmatmul.mubr.msk.f32.gmra.mrb[52].mxu0 %vm357_vm1, %v3245_v29  ;;  %v3247_v14 = vmul.f32 %v5976_v35, %v3204_v28  ;;  %v5141_v31 = vld [vmem:[%s6316_s3] sm:$0xff] }
 0x6c6   : > { %v3174_v63 = vsel %vm3110_vm7, %v3078_v37, %v3142_v60  ;;  %v3080_v32 = vadd.f32 %v5966_v20, %v3042_v53  ;;  %v3246_v34 = vmul.f32 %v5976_v35, %v3203_v8 }
 0x6c7   : > { %v3206_v0 = vmul.f32 1.4142135, %v3174_v63  ;;  %v3173_v3 = vsel %vm3109_vm8, %v3077_v5, %v3141_v47  ;;  %v3079_v36 = vadd.f32 %v5966_v20, %v3041_v62  ;;  %v4763_v10 = vpop.f32.mrb[102].mxu1  ;;  %v5142_v47 = vld [vmem:[%s6316_s3 + $0x8] sm:$0xff]  ;;  %v5144_v62 = vld [vmem:[%s6316_s3 + $0x18] sm:$0xff]  ;;  %v5145_v63 = vld [vmem:[%s6316_s3 + $0x20] sm:$0xff] }
 0x6c8   : > { %v3205_v54 = vmul.f32 1.4142135, %v3173_v3  ;;  %vm3112_vm0 = vcmp.ge.f32.partialorder %v3080_v32, 0.0  ;;  %v3144_v18 = vmul.f32 0.2, %v3080_v32  ;;  %v3044_v21 = vmul.f32 %v4763_v10, %v5961_v41  ;;  %v2904_v22 = vpop.f32.mrb[103].mxu1  ;;  %4819 = vmatprep.mubr.msk.f32.mxu0 %vm357_vm1, %v3246_v34 }
 0x6c9   : > { %vm3111_vm2 = vcmp.ge.f32.partialorder %v3079_v36, 0.0  ;;  %v3143_v17 = vmul.f32 0.2, %v3079_v36  ;;  %v3043_v12 = vmul.f32 %v5961_v41, %v2904_v22  ;;  %4820 = vmatmul.mubr.msk.f32.gmra.mrb[54].mxu0 %vm357_vm1, %v3247_v14  ;;  %v3249_v24 = vmul.f32 %v5976_v35, %v3206_v0  ;;  %v5147_v34 = vld [vmem:[%s6316_s3 + $0x30] sm:$0xff]  ;;  %v5148_v0 = vld [vmem:[%s6316_s3 + $0x38] sm:$0xff]  ;;  %v5149_v3 = vld [vmem:[%s6316_s3 + $0x40] sm:$0xff] }
 0x6ca   : > { %v3176_v19 = vsel %vm3112_vm0, %v3080_v32, %v3144_v18  ;;  %v3082_v23 = vadd.f32 %v5966_v20, %v3044_v21  ;;  %v3248_v38 = vmul.f32 %v5976_v35, %v3205_v54  ;;  %v5146_v32 = vld [vmem:[%s6316_s3 + $0x28] sm:$0xff]  ;;  %v5151_v10 = vld [vmem:[%s6316_s3 + $0x50] sm:$0xff]  ;;  %v5152_v14 = vld [vmem:[%s6316_s3 + $0x58] sm:$0xff] }
 0x6cb   : > { %v3208_v43 = vmul.f32 1.4142135, %v3176_v19  ;;  %v3175_v4 = vsel %vm3111_vm2, %v3079_v36, %v3143_v17  ;;  %v3081_v48 = vadd.f32 %v5966_v20, %v3043_v12  ;;  %v4766_v6 = vpop.f32.mrb[104].mxu1  ;;  %v5150_v36 = vld [vmem:[%s6316_s3 + $0x48] sm:$0xff]  ;;  %v5153_v54 = vld [vmem:[%s6316_s3 + $0x60] sm:$0xff]  ;;  %v5155_v21 = vld [vmem:[%s6316_s3 + $0x70] sm:$0xff] }
 0x6cc   : > { %v3207_v7 = vmul.f32 1.4142135, %v3175_v4  ;;  %vm3114_vm9 = vcmp.ge.f32.partialorder %v3082_v23, 0.0  ;;  %v3146_v9 = vmul.f32 0.2, %v3082_v23  ;;  %v3046_v16 = vmul.f32 %v4766_v6, %v5961_v41  ;;  %v2914_v55 = vpop.f32.mrb[105].mxu1  ;;  %4822 = vmatprep.mubr.msk.f32.mxu0 %vm357_vm1, %v3248_v38 }
 0x6cd   : > { %vm3113_vm10 = vcmp.ge.f32.partialorder %v3081_v48, 0.0  ;;  %v3145_v25 = vmul.f32 0.2, %v3081_v48  ;;  %v3045_v56 = vmul.f32 %v5961_v41, %v2914_v55  ;;  %4823 = vmatmul.mubr.msk.f32.gmra.mrb[56].mxu0 %vm357_vm1, %v3249_v24  ;;  %v3251_v40 = vmul.f32 %v5976_v35, %v3208_v43  ;;  %v5154_v18 = vld [vmem:[%s6316_s3 + $0x68] sm:$0xff]  ;;  %v5156_v22 = vld [vmem:[%s6316_s3 + $0x78] sm:$0xff]  ;;  %v5157_v17 = vld [vmem:[%s6316_s3 + $0x80] sm:$0xff] }
 0x6ce   : > { %v3178_v49 = vsel %vm3114_vm9, %v3082_v23, %v3146_v9  ;;  %v3084_v39 = vadd.f32 %v5966_v20, %v3046_v16  ;;  %v3250_v11 = vmul.f32 %v5976_v35, %v3207_v7  ;;  %v5158_v12 = vld [vmem:[%s6316_s3 + $0x88] sm:$0xff]  ;;  %v5159_v19 = vld [vmem:[%s6316_s3 + $0x90] sm:$0xff]  ;;  %v5160_v23 = vld [vmem:[%s6316_s3 + $0x98] sm:$0xff] }
 0x6cf   : > { %v3210_v33 = vmul.f32 1.4142135, %v3178_v49  ;;  %v3177_v13 = vsel %vm3113_vm10, %v3081_v48, %v3145_v25  ;;  %v3083_v42 = vadd.f32 %v5966_v20, %v3045_v56  ;;  %v4769_v44 = vpop.f32.mrb[106].mxu1  ;;  %v5161_v38 = vld [vmem:[%s6316_s3 + $0xa0] sm:$0xff]  ;;  %v5162_v43 = vld [vmem:[%s6316_s3 + $0xa8] sm:$0xff]  ;;  %v5163_v4 = vld [vmem:[%s6316_s3 + $0xb0] sm:$0xff] }
 0x6d0   : > { %v3209_v15 = vmul.f32 1.4142135, %v3177_v13  ;;  %vm3116_vm11 = vcmp.ge.f32.partialorder %v3084_v39, 0.0  ;;  %v3148_v51 = vmul.f32 0.2, %v3084_v39  ;;  %v3048_v50 = vmul.f32 %v4769_v44, %v5961_v41  ;;  %v2924_v57 = vpop.f32.mrb[107].mxu1  ;;  %4825 = vmatprep.mubr.msk.f32.mxu0 %vm357_vm1, %v3250_v11 }
 0x6d1   : > { %vm3115_vm12 = vcmp.ge.f32.partialorder %v3083_v42, 0.0  ;;  %v3147_v58 = vmul.f32 0.2, %v3083_v42  ;;  %v3047_v61 = vmul.f32 %v5961_v41, %v2924_v57  ;;  %4826 = vmatmul.mubr.msk.f32.gmra.mrb[58].mxu0 %vm357_vm1, %v3251_v40  ;;  %v3253_v37 = vmul.f32 %v5976_v35, %v3210_v33  ;;  %v5164_v48 = vld [vmem:[%s6316_s3 + $0xb8] sm:$0xff]  ;;  %v5165_v6 = vld [vmem:[%s6316_s3 + $0xc0] sm:$0xff]  ;;  %v5166_v24 = vld [vmem:[%s6316_s3 + $0xc8] sm:$0xff] }
 0x6d2   : > { %v3180_v30 = vsel %vm3116_vm11, %v3084_v39, %v3148_v51  ;;  %v3086_v45 = vadd.f32 %v5966_v20, %v3048_v50  ;;  %v3252_v52 = vmul.f32 %v5976_v35, %v3209_v15  ;;  %v5167_v7 = vld [vmem:[%s6316_s3 + $0xd0] sm:$0xff]  ;;  %v5168_v9 = vld [vmem:[%s6316_s3 + $0xd8] sm:$0xff]  ;;  %v5169_v16 = vld [vmem:[%s6316_s3 + $0xe0] sm:$0xff] }
 0x6d3   : > { %v3212_v27 = vmul.f32 1.4142135, %v3180_v30  ;;  %v3179_v46 = vsel %vm3115_vm12, %v3083_v42, %v3147_v58  ;;  %v3085_v1 = vadd.f32 %v5966_v20, %v3047_v61  ;;  %v5170_v55 = vld [vmem:[%s6316_s3 + $0xe8] sm:$0xff]  ;;  %v5171_v25 = vld [vmem:[%s6316_s3 + $0xf0] sm:$0xff]  ;;  %v5172_v56 = vld [vmem:[%s6316_s3 + $0xf8] sm:$0xff] }
 0x6d4   : > { %v3211_v2 = vmul.f32 1.4142135, %v3179_v46  ;;  %vm3118_vm14 = vcmp.ge.f32.partialorder %v3086_v45, 0.0  ;;  %v3150_v28 = vmul.f32 0.2, %v3086_v45  ;;  %4828 = vmatprep.mubr.msk.f32.mxu0 %vm357_vm1, %v3252_v52 }
 0x6d5   : > { %vm3117_vm15 = vcmp.ge.f32.partialorder %v3085_v1, 0.0  ;;  %v3149_v41 = vmul.f32 0.2, %v3085_v1  ;;  %4829 = vmatmul.mubr.msk.f32.gmra.mrb[60].mxu0 %vm357_vm1, %v3253_v37  ;;  %v3255_v8 = vmul.f32 %v5976_v35, %v3212_v27  ;;  %v6239_v49 = vld [vmem:[%s6320_s7 + $0x2] ss:$0 sm:$0xff] }
 0x6d6   : > { %v3182_v26 = vsel %vm3118_vm14, %v3086_v45, %v3150_v28  ;;  %v3254_v5 = vmul.f32 %v5976_v35, %v3211_v2 }
 0x6d7   : > { %v3214_v59 = vmul.f32 1.4142135, %v3182_v26  ;;  %v3181_v29 = vsel %vm3117_vm15, %v3085_v1, %v3149_v41 }
 0x6d8   : > { %v3213_v60 = vmul.f32 1.4142135, %v3181_v29  ;;  %4831 = vmatprep.mubr.msk.f32.mxu0 %vm357_vm1, %v3254_v5 }
 0x6d9   : > { %4832 = vmatmul.mubr.msk.f32.gmra.mrb[62].mxu0 %vm357_vm1, %v3255_v8  ;;  %v3257_v53 = vmul.f32 %v5976_v35, %v3214_v59 }
 0x6da   : > { %v3256_v20 = vmul.f32 %v5976_v35, %v3213_v60  ;;  %v5143_v35 = vld [vmem:[%s6316_s3 + $0x10] sm:$0xff] }
 0x6dc   : > { %4834 = vmatprep.mubr.msk.f32.mxu0 %vm357_vm1, %v3256_v20 }
 0x6dd   : > { %4835 = vmatmul.mubr.msk.f32.gmra.mrb[64].mxu0 %vm357_vm1, %v3257_v53 }
 0x6de   : > { %4853 = vmatprep.mubr.msk.f32.mxu0 %vm1601_vm13, %v5141_v31 }
 0x6e1   : > { %4854 = vmatmul.mubr.msk.f32.vlgmr.msra.gmra.mrb[34].mxu0 %vm1601_vm13, %v5142_v47 }
 0x6e2   : > { %4856 = vmatprep.mubr.msk.f32.mxu0 %vm1601_vm13, %v5143_v35 }
 0x6e5   : > { %4857 = vmatmul.mubr.msk.f32.gmra.mrb[36].mxu0 %vm1601_vm13, %v5144_v62 }
 0x6e6   : > { %4859 = vmatprep.mubr.msk.f32.mxu0 %vm1601_vm13, %v5145_v63 }
 0x6e9   : > { %4860 = vmatmul.mubr.msk.f32.gmra.mrb[38].mxu0 %vm1601_vm13, %v5146_v32 }
 0x6ea   : > { %4862 = vmatprep.mubr.msk.f32.mxu0 %vm1601_vm13, %v5147_v34 }
 0x6ed   : > { %4863 = vmatmul.mubr.msk.f32.gmra.mrb[40].mxu0 %vm1601_vm13, %v5148_v0 }
 0x6ee   : > { %4865 = vmatprep.mubr.msk.f32.mxu0 %vm1601_vm13, %v5149_v3 }
 0x6f1   : > { %4866 = vmatmul.mubr.msk.f32.gmra.mrb[42].mxu0 %vm1601_vm13, %v5150_v36 }
 0x6f2   : > { %4868 = vmatprep.mubr.msk.f32.mxu0 %vm1601_vm13, %v5151_v10 }
 0x6f5   : > { %4869 = vmatmul.mubr.msk.f32.gmra.mrb[44].mxu0 %vm1601_vm13, %v5152_v14 }
 0x6f6   : > { %4871 = vmatprep.mubr.msk.f32.mxu0 %vm1601_vm13, %v5153_v54 }
 0x6f9   : > { %4872 = vmatmul.mubr.msk.f32.gmra.mrb[46].mxu0 %vm1601_vm13, %v5154_v18 }
 0x6fa   : > { %4874 = vmatprep.mubr.msk.f32.mxu0 %vm1601_vm13, %v5155_v21 }
 0x6fd   : > { %4875 = vmatmul.mubr.msk.f32.gmra.mrb[48].mxu0 %vm1601_vm13, %v5156_v22 }
 0x6fe   : > { %4877 = vmatprep.mubr.msk.f32.mxu0 %vm1601_vm13, %v5157_v17 }
 0x701   : > { %4878 = vmatmul.mubr.msk.f32.gmra.mrb[50].mxu0 %vm1601_vm13, %v5158_v12 }
 0x702   : > { %4880 = vmatprep.mubr.msk.f32.mxu0 %vm1601_vm13, %v5159_v19 }
 0x705   : > { %4881 = vmatmul.mubr.msk.f32.gmra.mrb[52].mxu0 %vm1601_vm13, %v5160_v23 }
 0x706   : > { %4883 = vmatprep.mubr.msk.f32.mxu0 %vm1601_vm13, %v5161_v38 }
 0x709   : > { %4884 = vmatmul.mubr.msk.f32.gmra.mrb[54].mxu0 %vm1601_vm13, %v5162_v43 }
 0x70a   : > { %4886 = vmatprep.mubr.msk.f32.mxu0 %vm1601_vm13, %v5163_v4 }
 0x70d   : > { %4887 = vmatmul.mubr.msk.f32.gmra.mrb[56].mxu0 %vm1601_vm13, %v5164_v48 }
 0x70e   : > { %4889 = vmatprep.mubr.msk.f32.mxu0 %vm1601_vm13, %v5165_v6 }
 0x711   : > { %4890 = vmatmul.mubr.msk.f32.gmra.mrb[58].mxu0 %vm1601_vm13, %v5166_v24 }
 0x712   : > { %4892 = vmatprep.mubr.msk.f32.mxu0 %vm1601_vm13, %v5167_v7 }
 0x715   : > { %4893 = vmatmul.mubr.msk.f32.gmra.mrb[60].mxu0 %vm1601_vm13, %v5168_v9 }
 0x716   : > { %4895 = vmatprep.mubr.msk.f32.mxu0 %vm1601_vm13, %v5169_v16 }
 0x719   : > { %4896 = vmatmul.mubr.msk.f32.gmra.mrb[62].mxu0 %vm1601_vm13, %v5170_v55 }
 0x71a   : > { %4898 = vmatprep.mubr.msk.f32.mxu0 %vm1601_vm13, %v5171_v25 }
 0x71d   : > { %4899 = vmatmul.mubr.msk.f32.gmra.mrb[64].mxu0 %vm1601_vm13, %v5172_v56 }
 0x7b4   : > { %v4855_v39 = vpop.f32.mrb[34].mxu0 }
 0x7b5   : > { %v5047_v11 = vadd.f32 %v4855_v39, %v6239_v49  ;;  %v3651_v33 = vpop.f32.mrb[35].mxu0 }
 0x7b6   : > { %v5048_v13 = vadd.f32 %v6239_v49, %v3651_v33 }
 0x7b7   : > { %3811 = vst [vmem:[%s6244_s9 + $0x8] sm:$0xff] %v5047_v11 }
 0x7b8   : > { %3810 = vst [vmem:[%s6244_s9] sm:$0xff] %v5048_v13  ;;  %v4858_v42 = vpop.f32.mrb[36].mxu0 }
 0x7b9   : > { %v5049_v44 = vadd.f32 %v4858_v42, %v6239_v49  ;;  %v3661_v40 = vpop.f32.mrb[37].mxu0 }
 0x7ba   : > { %v5050_v15 = vadd.f32 %v6239_v49, %v3661_v40 }
 0x7bb   : > { %3813 = vst [vmem:[%s6244_s9 + $0x18] sm:$0xff] %v5049_v44 }
 0x7bc   : > { %3812 = vst [vmem:[%s6244_s9 + $0x10] sm:$0xff] %v5050_v15  ;;  %v4861_v51 = vpop.f32.mrb[38].mxu0 }
 0x7bd   : > { %v5051_v50 = vadd.f32 %v4861_v51, %v6239_v49  ;;  %v3671_v57 = vpop.f32.mrb[39].mxu0 }
 0x7be   : > { %v5052_v58 = vadd.f32 %v6239_v49, %v3671_v57 }
 0x7bf   : > { %3815 = vst [vmem:[%s6244_s9 + $0x28] sm:$0xff] %v5051_v50 }
 0x7c0   : > { %3814 = vst [vmem:[%s6244_s9 + $0x20] sm:$0xff] %v5052_v58  ;;  %v4864_v61 = vpop.f32.mrb[40].mxu0 }
 0x7c1   : > { %v5053_v30 = vadd.f32 %v4864_v61, %v6239_v49  ;;  %v3681_v45 = vpop.f32.mrb[41].mxu0 }
 0x7c2   : > { %v5054_v52 = vadd.f32 %v6239_v49, %v3681_v45 }
 0x7c3   : > { %3817 = vst [vmem:[%s6244_s9 + $0x38] sm:$0xff] %v5053_v30 }
 0x7c4   : > { %3816 = vst [vmem:[%s6244_s9 + $0x30] sm:$0xff] %v5054_v52  ;;  %v4867_v27 = vpop.f32.mrb[42].mxu0 }
 0x7c5   : > { %v5055_v46 = vadd.f32 %v4867_v27, %v6239_v49  ;;  %v3691_v1 = vpop.f32.mrb[43].mxu0 }
 0x7c6   : > { %v5056_v37 = vadd.f32 %v6239_v49, %v3691_v1 }
 0x7c7   : > { %3819 = vst [vmem:[%s6244_s9 + $0x48] sm:$0xff] %v5055_v46 }
 0x7c8   : > { %3818 = vst [vmem:[%s6244_s9 + $0x40] sm:$0xff] %v5056_v37  ;;  %v4870_v2 = vpop.f32.mrb[44].mxu0 }
 0x7c9   : > { %v5057_v28 = vadd.f32 %v4870_v2, %v6239_v49  ;;  %v3701_v41 = vpop.f32.mrb[45].mxu0 }
 0x7ca   : > { %v5058_v26 = vadd.f32 %v6239_v49, %v3701_v41 }
 0x7cb   : > { %3821 = vst [vmem:[%s6244_s9 + $0x58] sm:$0xff] %v5057_v28 }
 0x7cc   : > { %3820 = vst [vmem:[%s6244_s9 + $0x50] sm:$0xff] %v5058_v26  ;;  %v4873_v5 = vpop.f32.mrb[46].mxu0 }
 0x7cd   : > { %v5059_v59 = vadd.f32 %v4873_v5, %v6239_v49  ;;  %v3711_v29 = vpop.f32.mrb[47].mxu0 }
 0x7ce   : > { %v5060_v8 = vadd.f32 %v6239_v49, %v3711_v29 }
 0x7cf   : > { %3823 = vst [vmem:[%s6244_s9 + $0x68] sm:$0xff] %v5059_v59 }
 0x7d0   : > { %3822 = vst [vmem:[%s6244_s9 + $0x60] sm:$0xff] %v5060_v8  ;;  %v4876_v60 = vpop.f32.mrb[48].mxu0 }
 0x7d1   : > { %v5061_v20 = vadd.f32 %v4876_v60, %v6239_v49  ;;  %v3721_v53 = vpop.f32.mrb[49].mxu0 }
 0x7d2   : > { %v5062_v31 = vadd.f32 %v6239_v49, %v3721_v53 }
 0x7d3   : > { %3825 = vst [vmem:[%s6244_s9 + $0x78] sm:$0xff] %v5061_v20 }
 0x7d4   : > { %3824 = vst [vmem:[%s6244_s9 + $0x70] sm:$0xff] %v5062_v31  ;;  %v4879_v47 = vpop.f32.mrb[50].mxu0 }
 0x7d5   : > { %v5063_v35 = vadd.f32 %v4879_v47, %v6239_v49  ;;  %v3731_v62 = vpop.f32.mrb[51].mxu0 }
 0x7d6   : > { %v5064_v63 = vadd.f32 %v6239_v49, %v3731_v62 }
 0x7d7   : > { %3827 = vst [vmem:[%s6244_s9 + $0x88] sm:$0xff] %v5063_v35 }
 0x7d8   : > { %3826 = vst [vmem:[%s6244_s9 + $0x80] sm:$0xff] %v5064_v63  ;;  %v4882_v32 = vpop.f32.mrb[52].mxu0 }
 0x7d9   : > { %v5065_v34 = vadd.f32 %v4882_v32, %v6239_v49  ;;  %v3741_v0 = vpop.f32.mrb[53].mxu0 }
 0x7da   : > { %v5066_v3 = vadd.f32 %v6239_v49, %v3741_v0 }
 0x7db   : > { %3829 = vst [vmem:[%s6244_s9 + $0x98] sm:$0xff] %v5065_v34 }
 0x7dc   : > { %3828 = vst [vmem:[%s6244_s9 + $0x90] sm:$0xff] %v5066_v3  ;;  %v4885_v36 = vpop.f32.mrb[54].mxu0 }
 0x7dd   : > { %v5067_v10 = vadd.f32 %v4885_v36, %v6239_v49  ;;  %v3751_v14 = vpop.f32.mrb[55].mxu0 }
 0x7de   : > { %v5068_v54 = vadd.f32 %v6239_v49, %v3751_v14 }
 0x7df   : > { %3831 = vst [vmem:[%s6244_s9 + $0xa8] sm:$0xff] %v5067_v10 }
 0x7e0   : > { %3830 = vst [vmem:[%s6244_s9 + $0xa0] sm:$0xff] %v5068_v54  ;;  %v4888_v18 = vpop.f32.mrb[56].mxu0 }
 0x7e1   : > { %v5069_v21 = vadd.f32 %v4888_v18, %v6239_v49  ;;  %v3761_v22 = vpop.f32.mrb[57].mxu0 }
 0x7e2   : > { %v5070_v17 = vadd.f32 %v6239_v49, %v3761_v22 }
 0x7e3   : > { %3833 = vst [vmem:[%s6244_s9 + $0xb8] sm:$0xff] %v5069_v21 }
 0x7e4   : > { %3832 = vst [vmem:[%s6244_s9 + $0xb0] sm:$0xff] %v5070_v17  ;;  %v4891_v12 = vpop.f32.mrb[58].mxu0 }
 0x7e5   : > { %v5071_v19 = vadd.f32 %v4891_v12, %v6239_v49  ;;  %v3771_v23 = vpop.f32.mrb[59].mxu0 }
 0x7e6   : > { %v5072_v38 = vadd.f32 %v6239_v49, %v3771_v23 }
 0x7e7   : > { %3835 = vst [vmem:[%s6244_s9 + $0xc8] sm:$0xff] %v5071_v19 }
 0x7e8   : > { %3834 = vst [vmem:[%s6244_s9 + $0xc0] sm:$0xff] %v5072_v38  ;;  %v4894_v43 = vpop.f32.mrb[60].mxu0 }
 0x7e9   : > { %v5073_v4 = vadd.f32 %v4894_v43, %v6239_v49  ;;  %v3781_v48 = vpop.f32.mrb[61].mxu0 }
 0x7ea   : > { %v5074_v6 = vadd.f32 %v6239_v49, %v3781_v48 }
 0x7eb   : > { %3837 = vst [vmem:[%s6244_s9 + $0xd8] sm:$0xff] %v5073_v4 }
 0x7ec   : > { %3836 = vst [vmem:[%s6244_s9 + $0xd0] sm:$0xff] %v5074_v6  ;;  %v4897_v24 = vpop.f32.mrb[62].mxu0 }
 0x7ed   : > { %v5075_v7 = vadd.f32 %v4897_v24, %v6239_v49  ;;  %v3791_v9 = vpop.f32.mrb[63].mxu0 }
 0x7ee   : > { %v5076_v16 = vadd.f32 %v6239_v49, %v3791_v9 }
 0x7ef   : > { %3839 = vst [vmem:[%s6244_s9 + $0xe8] sm:$0xff] %v5075_v7 }
 0x7f0   : > { %3838 = vst [vmem:[%s6244_s9 + $0xe0] sm:$0xff] %v5076_v16  ;;  %v4900_v55 = vpop.f32.mrb[64].mxu0 }
 0x7f1   : > { %v5077_v25 = vadd.f32 %v4900_v55, %v6239_v49  ;;  %v3801_v56 = vpop.f32.mrb[65].mxu0 }
 0x7f2   : > { %v5078_v39 = vadd.f32 %v6239_v49, %v3801_v56 }
 0x7f3   : > { %3841 = vst [vmem:[%s6244_s9 + $0xf8] sm:$0xff] %v5077_v25 }
 0x7f4   : > { %3840 = vst [vmem:[%s6244_s9 + $0xf0] sm:$0xff] %v5078_v39 }
 0x7f5 PF: > { %s18_s27 = sadd.s32 1, %s5179_s27  }
 0x7f6   : > { %p15_p4 = scmp.ge.s32.totalorder %s18_s27, 4  }
 0x7f8   :  { %17 = sbr.rel (!%p15_p4) target bundleno = 1 (0x1), region = 94 }

// kernel: synthesis_network_forward.6
= control target key start
LH: loop header
LB: loop body
LE: loop exit
PB: predicated region body
PF: predicated region fallthrough
CT: control target
= control target key end

     0   :  { %s6911_s13 = smov 0   ;;  %s6913_s14 = smov 0   ;;  %s10228_s0 = inlined_call_operand.vmem [shape: f32[2,512,8], index: 0, kind: input, shape index: {}]   ;;  %s10229_s1 = inlined_call_operand.vmem [shape: f32[2,16,128], index: 1, kind: input, shape index: {}]   ;;  %s10230_s2 = inlined_call_operand.vmem [shape: f32[2,128,32], index: 2, kind: input, shape index: {}]   ;;  %s10231_s3 = inlined_call_operand.vmem [shape: f32[32,64], index: 3, kind: input, shape index: {}]   ;;  %s10232_s4 = inlined_call_operand.vmem [shape: f32[8,64], index: 4, kind: input, shape index: {}]   ;;  %s10233_s5 = inlined_call_operand.vmem [shape: f32[1,64], index: 5, kind: input, shape index: {}]   ;;  %s10234_s6 = inlined_call_operand.vmem [shape: f32[64,64], index: 6, kind: input, shape index: {}]   ;;  %s10235_s7 = inlined_call_operand.vmem [shape: f32[1,64], index: 7, kind: input, shape index: {}]   ;;  %s10236_s8 = inlined_call_operand.vmem [shape: f32[64,8], index: 8, kind: input, shape index: {}]   ;;  %s10237_s9 = inlined_call_operand.vmem [shape: f32[1,8], index: 9, kind: input, shape index: {}]   ;;  %s10238_s10 = inlined_call_operand.vmem [shape: f32[2,512,8], index: 10, kind: output, shape index: {}]  }
   0x1   :  { %s6915_s15 = smov 0   ;;  %s6917_s16 = smov 0  }
   0x2   :  { %s6919_s17 = smov 0  }
   0x3 LB: > { %s29_s18 = sadd.s32 1, %s6844_s15  ;;  %s32_s19 = sadd.s32 1, %s6848_s16  ;;  %s6852_s17 = sphi %s6919_s17, %s20_s17   ;;  %s6848_s16 = sphi %s6917_s16, %s10480_s16   ;;  %s6844_s15 = sphi %s6915_s15, %s10479_s15   ;;  %s6840_s14 = sphi %s6913_s14, %s10478_s14   ;;  %s6836_s13 = sphi %s6911_s13, %s10477_s13  }
   0x4   : > { %p30_p0 = scmp.ge.s32.totalorder %s29_s18, 4  ;;  %p5518_p1 = scmp.ge.s32.totalorder %s6852_s17, 1 }
   0x5   : > { %p353_p2 = scmp.lt.s32.totalorder %s6852_s17, 9 }
   0x6   : > { %s10482_s18 = smov (%p30_p0, %s29_s18), 0  ;;  %s10484_s19 = smov (!%p30_p0, %s32_s19), %s6848_s16 }
   0x7   : > { %p354_p3 = pnand %p5518_p1, %p353_p2  ;;  %p34_p4 = scmp.ge.s32.totalorder %s10484_s19, 2 }
   0x9   : > { %s10486_s19 = smov (%p34_p4, %s10484_s19), 0  ;;  %357 = sbr.rel (%p354_p3) target bundleno = 3257 (0xcb9), region = 60 }
  0x10   : > { %s5519_s20 = sshll.u32 %s6836_s13, 4  ;;  %p410_p5 = scmp.lt.s32.totalorder %s6840_s14, 1  ;;  %vm477_vm0 = vcmask 64512  }
  0x11   : > { %p412_p6 = scmp.lt.s32.totalorder %s5519_s20, 63 }
  0x12   : > { %s10488_s14 = smov (!%p410_p5, %s6840_s14), 1 }
  0x13   : > { %s10490_s20 = smov (!%p412_p6, %s5519_s20), 63  ;;  %s5520_s21 = sshll.u32 %s10488_s14, 6 }
  0x14   : > { %s5679_s22 = sshll.u32 %s10488_s14, 4  ;;  %s6945_s23 = sadd.s32 %s5520_s21, %s10490_s20 }
  0x15   : > { %s6950_s26 = scalar_lea.vmem %s10229_s1, %s5679_s22  ;;  %s5521_s27 = sshll.u32 %s6945_s23, 3 }
  0x16   : > { %v455_v0 = vld [vmem:[%s6950_s26] sm:$0xff]  ;;  %s6959_s30 = scalar_lea.vmem %s10228_s0, %s5521_s27  ;;  %s5680_s11 = sshll.u32 %s10488_s14, 7 }
  0x17   : > { %v6961_v1 = vand.u32 4294901760, %v455_v0  ;;  %v439_v2 = vld [vmem:[%s6959_s30] sm:$0xff]  ;;  %v440_v3 = vld [vmem:[%s6959_s30 + $0x8] sm:$0xff]  ;;  %v441_v4 = vld [vmem:[%s6959_s30 + $0x10] sm:$0xff]  ;;  %s9457_s20 = scalar_lea.vmem %s10230_s2, %s5680_s11 }
  0x18   : > { %v479_v5 = vsel %vm477_vm0, %v439_v2, 0  ;;  %v482_v7 = vsel %vm477_vm0, %v440_v3, 0  ;;  %v485_v8 = vsel %vm477_vm0, %v441_v4, 0  ;;  %v442_v9 = vld [vmem:[%s6959_s30 + $0x18] sm:$0xff]  ;;  %v443_v10 = vld [vmem:[%s6959_s30 + $0x20] sm:$0xff]  ;;  %v444_v11 = vld [vmem:[%s6959_s30 + $0x28] sm:$0xff] }
  0x19   : > { %5900 = vmatprep.subr.mxu0 %v6961_v1  ;;  %v6969_v6 = vsub.f32 %v455_v0, %v6961_v1  ;;  %v6977_v12 = vand.u32 4294901760, %v479_v5  ;;  %v6979_v13 = vand.u32 4294901760, %v482_v7  ;;  %v6981_v14 = vand.u32 4294901760, %v485_v8  ;;  %v445_v16 = vld [vmem:[%s6959_s30 + $0x30] sm:$0xff]  ;;  %v446_v33 = vld [vmem:[%s6959_s30 + $0x38] sm:$0xff]  ;;  %v447_v46 = vld [vmem:[%s6959_s30 + $0x40] sm:$0xff] }
  0x1a   : > { %5901 = vmatpush3.msra.mxu0 %v6961_v1  ;;  %v488_v15 = vsel %vm477_vm0, %v442_v9, 0  ;;  %v491_v19 = vsel %vm477_vm0, %v443_v10, 0  ;;  %v494_v20 = vsel %vm477_vm0, %v444_v11, 0  ;;  %v497_v28 = vsel %vm477_vm0, %v445_v16, 0  ;;  %v448_v47 = vld [vmem:[%s6959_s30 + $0x48] sm:$0xff]  ;;  %v449_v48 = vld [vmem:[%s6959_s30 + $0x50] sm:$0xff] }
  0x1b   : > { %v6986_v17 = vand.u32 4294901760, %v6969_v6  ;;  %v6988_v18 = vand.u32 4294901760, %v488_v15  ;;  %v6993_v21 = vsub.f32 %v479_v5, %v6977_v12  ;;  %v6996_v22 = vsub.f32 %v482_v7, %v6979_v13  ;;  %v450_v57 = vld [vmem:[%s6959_s30 + $0x58] sm:$0xff]  ;;  %v451_v58 = vld [vmem:[%s6959_s30 + $0x60] sm:$0xff]  ;;  %v452_v4 = vld [vmem:[%s6959_s30 + $0x68] sm:$0xff] }
  0x1c   : > { %v6999_v23 = vsub.f32 %v485_v8, %v6981_v14  ;;  %v7001_v24 = vand.u32 4294901760, %v491_v19  ;;  %v7008_v27 = vand.u32 4294901760, %v494_v20  ;;  %v7022_v37 = vand.u32 4294901760, %v497_v28 }
  0x1d   : > { %v756_v25 = vsub.f32 %v6969_v6, %v6986_v17  ;;  %v7006_v26 = vsub.f32 %v488_v15, %v6988_v18  ;;  %v594_v29 = vand.u32 4294901760, %v6993_v21  ;;  %v604_v30 = vand.u32 4294901760, %v6996_v22 }
  0x1e   : > { %v614_v31 = vand.u32 4294901760, %v6999_v23  ;;  %v7015_v32 = vsub.f32 %v491_v19, %v7001_v24  ;;  %v7020_v36 = vsub.f32 %v494_v20, %v7008_v27  ;;  %v7039_v44 = vsub.f32 %v497_v28, %v7022_v37  ;;  %v453_v19 = vld [vmem:[%s6959_s30 + $0x70] sm:$0xff] }
  0x1f   : > { %v757_v34 = vand.u32 4294901760, %v756_v25  ;;  %v624_v35 = vand.u32 4294901760, %v7006_v26  ;;  %v595_v38 = vsub.f32 %v6993_v21, %v594_v29  ;;  %v605_v39 = vsub.f32 %v6996_v22, %v604_v30 }
  0x20   : > { %v615_v40 = vsub.f32 %v6999_v23, %v614_v31  ;;  %v634_v41 = vand.u32 4294901760, %v7015_v32  ;;  %v644_v43 = vand.u32 4294901760, %v7020_v36  ;;  %v500_v45 = vsel %vm477_vm0, %v446_v33, 0 }
  0x21   : > { %5926 = vmatprep.subr.mxu0 %v757_v34  ;;  %v625_v42 = vsub.f32 %v7006_v26, %v624_v35  ;;  %v596_v49 = vand.u32 4294901760, %v595_v38  ;;  %v606_v50 = vand.u32 4294901760, %v605_v39  ;;  %v654_v55 = vand.u32 4294901760, %v7039_v44 }
  0x22   : > { %v616_v51 = vand.u32 4294901760, %v615_v40  ;;  %v635_v52 = vsub.f32 %v7015_v32, %v634_v41  ;;  %v645_v54 = vsub.f32 %v7020_v36, %v644_v43  ;;  %v7052_v56 = vand.u32 4294901760, %v500_v45 }
  0x23   : > { %v626_v53 = vand.u32 4294901760, %v625_v42  ;;  %5902 = vmatprep.mubr.f32.mxu0 %v596_v49  ;;  %v503_v60 = vsel %vm477_vm0, %v447_v46, 0  ;;  %v506_v61 = vsel %vm477_vm0, %v448_v47, 0  ;;  %v509_v62 = vsel %vm477_vm0, %v449_v48, 0  ;;  %v454_v48 = vld [vmem:[%s6959_s30 + $0x78] sm:$0xff] }
  0x24   : > { %v636_v59 = vand.u32 4294901760, %v635_v52  ;;  %5903 = vmatmul.mubr.f32.vlgmr.msra.gmra.mrb[0].mxu0 %v606_v50  ;;  %v646_v63 = vand.u32 4294901760, %v645_v54  ;;  %v655_v0 = vsub.f32 %v7039_v44, %v654_v55  ;;  %v7063_v2 = vsub.f32 %v500_v45, %v7052_v56 }
  0x25   : > { %v7065_v3 = vand.u32 4294901760, %v503_v60  ;;  %5927 = vmatpush3.msra.mxu0 %v757_v34  ;;  %5905 = vmatprep.mubr.f32.mxu0 %v616_v51  ;;  %v7068_v5 = vand.u32 4294901760, %v506_v61  ;;  %v7070_v7 = vand.u32 4294901760, %v509_v62  ;;  %v512_v8 = vsel %vm477_vm0, %v450_v57, 0 }
  0x26   : > { %v515_v9 = vsel %vm477_vm0, %v451_v58, 0  ;;  %v656_v10 = vand.u32 4294901760, %v655_v0  ;;  %v664_v11 = vand.u32 4294901760, %v7063_v2  ;;  %v7078_v16 = vand.u32 4294901760, %v512_v8  ;;  %5952 = vmatprep.subr.mxu0 %v6969_v6 }
  0x27   : > { %v7076_v15 = vsub.f32 %v503_v60, %v7065_v3  ;;  %v7083_v20 = vsub.f32 %v506_v61, %v7068_v5  ;;  %v7086_v25 = vsub.f32 %v509_v62, %v7070_v7  ;;  %v7088_v28 = vand.u32 4294901760, %v515_v9 }
  0x28   : > { %v518_v33 = vsel %vm477_vm0, %v452_v4, 0  ;;  %5906 = vmatmul.mubr.f32.gmra.mrb[2].mxu0 %v626_v53  ;;  %v665_v34 = vsub.f32 %v7063_v2, %v664_v11  ;;  %v7096_v39 = vsub.f32 %v512_v8, %v7078_v16  ;;  %v521_v47 = vsel %vm477_vm0, %v453_v19, 0 }
  0x29   : > { %v674_v38 = vand.u32 4294901760, %v7076_v15  ;;  %v7098_v40 = vand.u32 4294901760, %v518_v33  ;;  %5908 = vmatprep.mubr.f32.mxu0 %v636_v59  ;;  %v684_v42 = vand.u32 4294901760, %v7083_v20  ;;  %v694_v45 = vand.u32 4294901760, %v7086_v25 }
  0x2a   : > { %v7103_v46 = vsub.f32 %v515_v9, %v7088_v28  ;;  %v666_v50 = vand.u32 4294901760, %v665_v34  ;;  %v7110_v51 = vand.u32 4294901760, %v521_v47  ;;  %v704_v53 = vand.u32 4294901760, %v7096_v39 }
  0x2b   : > { %v675_v49 = vsub.f32 %v7076_v15, %v674_v38  ;;  %v685_v52 = vsub.f32 %v7083_v20, %v684_v42  ;;  %v7117_v54 = vsub.f32 %v518_v33, %v7098_v40  ;;  %v524_v57 = vsel %vm477_vm0, %v454_v48, 0 }
  0x2c   : > { %5909 = vmatmul.mubr.f32.gmra.mrb[4].mxu0 %v646_v63  ;;  %v695_v59 = vsub.f32 %v7086_v25, %v694_v45  ;;  %v714_v60 = vand.u32 4294901760, %v7103_v46  ;;  %v7125_v61 = vsub.f32 %v521_v47, %v7110_v51  ;;  %v7127_v62 = vand.u32 4294901760, %v524_v57 }
  0x2d   : > { %5911 = vmatprep.mubr.f32.mxu0 %v656_v10  ;;  %v676_v58 = vand.u32 4294901760, %v675_v49  ;;  %v686_v63 = vand.u32 4294901760, %v685_v52  ;;  %v705_v0 = vsub.f32 %v7096_v39, %v704_v53  ;;  %v724_v4 = vand.u32 4294901760, %v7117_v54 }
  0x2e   : > { %v7134_v8 = vsub.f32 %v524_v57, %v7127_v62  ;;  %v696_v9 = vand.u32 4294901760, %v695_v59  ;;  %v715_v10 = vsub.f32 %v7103_v46, %v714_v60  ;;  %v734_v19 = vand.u32 4294901760, %v7125_v61 }
  0x2f   : > { %v706_v33 = vand.u32 4294901760, %v705_v0  ;;  %v725_v34 = vsub.f32 %v7117_v54, %v724_v4 }
  0x30   : > { %5912 = vmatmul.mubr.f32.gmra.mrb[6].mxu0 %v666_v50  ;;  %v744_v47 = vand.u32 4294901760, %v7134_v8  ;;  %v716_v48 = vand.u32 4294901760, %v715_v10  ;;  %v735_v49 = vsub.f32 %v7125_v61, %v734_v19 }
  0x31   : > { %5914 = vmatprep.mubr.f32.mxu0 %v676_v58  ;;  %v726_v50 = vand.u32 4294901760, %v725_v34 }
  0x32   : > { %v745_v52 = vsub.f32 %v7134_v8, %v744_v47  ;;  %v736_v57 = vand.u32 4294901760, %v735_v49 }
  0x34   : > { %5915 = vmatmul.mubr.f32.gmra.mrb[8].mxu0 %v686_v63  ;;  %v746_v58 = vand.u32 4294901760, %v745_v52 }
  0x35   : > { %5917 = vmatprep.mubr.f32.mxu0 %v696_v9 }
  0x38   : > { %5918 = vmatmul.mubr.f32.gmra.mrb[10].mxu0 %v706_v33 }
  0x39   : > { %5920 = vmatprep.mubr.f32.mxu0 %v716_v48 }
  0x3c   : > { %5921 = vmatmul.mubr.f32.gmra.mrb[12].mxu0 %v726_v50 }
  0x3d   : > { %5923 = vmatprep.mubr.f32.mxu0 %v736_v57 }
  0x40   : > { %5924 = vmatmul.mubr.f32.gmra.mrb[14].mxu0 %v746_v58 }
  0x41   : > { %5928 = vmatprep.mubr.f32.mxu0 %v6977_v12 }
  0x44   : > { %5929 = vmatmul.mubr.f32.vlgmr.msra.gmra.mrb[0].mxu0 %v6979_v13 }
  0x45   : > { %5953 = vmatpush3.msra.mxu0 %v6969_v6  ;;  %5931 = vmatprep.mubr.f32.mxu0 %v6981_v14 }
  0x46   : > { %5978 = vmatprep.subr.mxu0 %v6961_v1 }
  0x48   : > { %5932 = vmatmul.mubr.f32.gmra.mrb[2].mxu0 %v6988_v18 }
  0x49   : > { %5934 = vmatprep.mubr.f32.mxu0 %v7001_v24 }
  0x4c   : > { %5935 = vmatmul.mubr.f32.gmra.mrb[4].mxu0 %v7008_v27 }
  0x4d   : > { %5937 = vmatprep.mubr.f32.mxu0 %v7022_v37 }
  0x50   : > { %5938 = vmatmul.mubr.f32.gmra.mrb[6].mxu0 %v7052_v56 }
  0x51   : > { %5940 = vmatprep.mubr.f32.mxu0 %v7065_v3 }
  0x54   : > { %5941 = vmatmul.mubr.f32.gmra.mrb[8].mxu0 %v7068_v5 }
  0x55   : > { %5943 = vmatprep.mubr.f32.mxu0 %v7070_v7 }
  0x58   : > { %5944 = vmatmul.mubr.f32.gmra.mrb[10].mxu0 %v7078_v16 }
  0x59   : > { %5946 = vmatprep.mubr.f32.mxu0 %v7088_v28 }
  0x5c   : > { %5947 = vmatmul.mubr.f32.gmra.mrb[12].mxu0 %v7098_v40 }
  0x5d   : > { %5949 = vmatprep.mubr.f32.mxu0 %v7110_v51 }
  0x60   : > { %5950 = vmatmul.mubr.f32.gmra.mrb[14].mxu0 %v7127_v62 }
  0x61   : > { %5954 = vmatprep.mubr.f32.mxu0 %v6993_v21 }
  0x64   : > { %5955 = vmatmul.mubr.f32.vlgmr.msra.gmra.mrb[0].mxu0 %v6996_v22 }
  0x65   : > { %5979 = vmatpush3.msra.mxu0 %v6961_v1  ;;  %5957 = vmatprep.mubr.f32.mxu0 %v6999_v23 }
  0x66   : > { %6004 = vmatprep.subr.mxu0 %v6986_v17 }
  0x68   : > { %5958 = vmatmul.mubr.f32.gmra.mrb[2].mxu0 %v7006_v26 }
  0x69   : > { %5960 = vmatprep.mubr.f32.mxu0 %v7015_v32 }
  0x6c   : > { %5961 = vmatmul.mubr.f32.gmra.mrb[4].mxu0 %v7020_v36 }
  0x6d   : > { %5963 = vmatprep.mubr.f32.mxu0 %v7039_v44 }
  0x70   : > { %5964 = vmatmul.mubr.f32.gmra.mrb[6].mxu0 %v7063_v2 }
  0x71   : > { %5966 = vmatprep.mubr.f32.mxu0 %v7076_v15 }
  0x74   : > { %5967 = vmatmul.mubr.f32.gmra.mrb[8].mxu0 %v7083_v20 }
  0x75   : > { %5969 = vmatprep.mubr.f32.mxu0 %v7086_v25 }
  0x78   : > { %5970 = vmatmul.mubr.f32.gmra.mrb[10].mxu0 %v7096_v39 }
  0x79   : > { %5972 = vmatprep.mubr.f32.mxu0 %v7103_v46 }
  0x7c   : > { %5973 = vmatmul.mubr.f32.gmra.mrb[12].mxu0 %v7117_v54 }
  0x7d   : > { %5975 = vmatprep.mubr.f32.mxu0 %v7125_v61 }
  0x80   : > { %5976 = vmatmul.mubr.f32.gmra.mrb[14].mxu0 %v7134_v8 }
  0x81   : > { %5980 = vmatprep.mubr.f32.mxu0 %v594_v29 }
  0x84   : > { %5981 = vmatmul.mubr.f32.vlgmr.msra.gmra.mrb[0].mxu0 %v604_v30 }
  0x85   : > { %6005 = vmatpush3.msra.mxu0 %v6986_v17  ;;  %5983 = vmatprep.mubr.f32.mxu0 %v614_v31 }
  0x86   : > { %6030 = vmatprep.subr.mxu0 %v6961_v1 }
  0x88   : > { %5984 = vmatmul.mubr.f32.gmra.mrb[2].mxu0 %v624_v35 }
  0x89   : > { %5986 = vmatprep.mubr.f32.mxu0 %v634_v41 }
  0x8c   : > { %5987 = vmatmul.mubr.f32.gmra.mrb[4].mxu0 %v644_v43 }
  0x8d   : > { %5989 = vmatprep.mubr.f32.mxu0 %v654_v55 }
  0x90   : > { %5990 = vmatmul.mubr.f32.gmra.mrb[6].mxu0 %v664_v11 }
  0x91   : > { %5992 = vmatprep.mubr.f32.mxu0 %v674_v38 }
  0x94   : > { %5993 = vmatmul.mubr.f32.gmra.mrb[8].mxu0 %v684_v42 }
  0x95   : > { %5995 = vmatprep.mubr.f32.mxu0 %v694_v45 }
  0x98   : > { %5996 = vmatmul.mubr.f32.gmra.mrb[10].mxu0 %v704_v53 }
  0x99   : > { %5998 = vmatprep.mubr.f32.mxu0 %v714_v60 }
  0x9c   : > { %5999 = vmatmul.mubr.f32.gmra.mrb[12].mxu0 %v724_v4 }
  0x9d   : > { %6001 = vmatprep.mubr.f32.mxu0 %v734_v19 }
  0xa0   : > { %6002 = vmatmul.mubr.f32.gmra.mrb[14].mxu0 %v744_v47 }
  0xa1   : > { %6006 = vmatprep.mubr.f32.mxu0 %v6977_v12 }
  0xa4   : > { %6007 = vmatmul.mubr.f32.vlgmr.msra.gmra.mrb[0].mxu0 %v6979_v13 }
  0xa5   : > { %6031 = vmatpush3.msra.mxu0 %v6961_v1  ;;  %6009 = vmatprep.mubr.f32.mxu0 %v6981_v14  ;;  %v473_v1 = vlaneseq }
  0xa7   : > { %v474_v6 = vshrl.u32 %v473_v1, 7  ;;  %v7304_v10 = vand.u32 127, %v473_v1 }
  0xa8   : > { %6010 = vmatmul.mubr.f32.gmra.mrb[2].mxu0 %v6988_v18 }
  0xa9   : > { %6012 = vmatprep.mubr.f32.mxu0 %v7001_v24  ;;  %10303 = vst [vmem:[#allocation2_spill] sm:$0xff] %v7304_v10 }
  0xac   : > { %6013 = vmatmul.mubr.f32.gmra.mrb[4].mxu0 %v7008_v27 }
  0xad   : > { %6015 = vmatprep.mubr.f32.mxu0 %v7022_v37 }
  0xb0   : > { %6016 = vmatmul.mubr.f32.gmra.mrb[6].mxu0 %v7052_v56 }
  0xb1   : > { %6018 = vmatprep.mubr.f32.mxu0 %v7065_v3 }
  0xb4   : > { %6019 = vmatmul.mubr.f32.gmra.mrb[8].mxu0 %v7068_v5 }
  0xb5   : > { %6021 = vmatprep.mubr.f32.mxu0 %v7070_v7 }
  0xb8   : > { %6022 = vmatmul.mubr.f32.gmra.mrb[10].mxu0 %v7078_v16 }
  0xb9   : > { %6024 = vmatprep.mubr.f32.mxu0 %v7088_v28 }
  0xbc   : > { %6025 = vmatmul.mubr.f32.gmra.mrb[12].mxu0 %v7098_v40 }
  0xbd   : > { %6027 = vmatprep.mubr.f32.mxu0 %v7110_v51 }
  0xc0   : > { %6028 = vmatmul.mubr.f32.gmra.mrb[14].mxu0 %v7127_v62 }
  0xc1   : > { %6032 = vmatprep.mubr.f32.mxu0 %v6977_v12  ;;  %v475_v12 = vsub.s32 0, %v474_v6 }
  0xc4   : > { %6033 = vmatmul.mubr.f32.vlgmr.msra.gmra.mrb[0].mxu0 %v6979_v13  ;;  %v456_v13 = vld [vmem:[%s6950_s26 + $0x8] sm:$0xff] }
  0xc5   : > { %6035 = vmatprep.mubr.f32.mxu0 %v6981_v14  ;;  %v476_v14 = vrot.slane %v456_v13, %v475_v12 }
  0xc8   : > { %6036 = vmatmul.mubr.f32.gmra.mrb[2].mxu0 %v6988_v18 }
  0xc9   : > { %6038 = vmatprep.mubr.f32.mxu0 %v7001_v24 }
  0xcc   : > { %6039 = vmatmul.mubr.f32.gmra.mrb[4].mxu0 %v7008_v27 }
  0xcd   : > { %6041 = vmatprep.mubr.f32.mxu0 %v7022_v37 }
  0xd0   : > { %6042 = vmatmul.mubr.f32.gmra.mrb[6].mxu0 %v7052_v56 }
  0xd1   : > { %6044 = vmatprep.mubr.f32.mxu0 %v7065_v3 }
  0xd4   : > { %6045 = vmatmul.mubr.f32.gmra.mrb[8].mxu0 %v7068_v5 }
  0xd5   : > { %6047 = vmatprep.mubr.f32.mxu0 %v7070_v7 }
  0xd8   : > { %6048 = vmatmul.mubr.f32.gmra.mrb[10].mxu0 %v7078_v16 }
  0xd9   : > { %6050 = vmatprep.mubr.f32.mxu0 %v7088_v28 }
  0xdc   : > { %6051 = vmatmul.mubr.f32.gmra.mrb[12].mxu0 %v7098_v40 }
  0xdd   : > { %6053 = vmatprep.mubr.f32.mxu0 %v7110_v51 }
  0xe0   : > { %6054 = vmatmul.mubr.f32.gmra.mrb[14].mxu0 %v7127_v62 }
 0x197   : > { %v6034_v17 = vpop.f32.mrb[0].mxu0 }
 0x198   : > { %v6322_v18 = vadd.f32 %v6034_v17, %v476_v14  ;;  %v1523_v21 = vpop.f32.mrb[1].mxu0 }
 0x199   : > { %v6323_v22 = vadd.f32 %v1523_v21, %v476_v14 }
 0x19a   : > { %v7258_v30 = vmax.f32 %v6322_v18, 0.0 }
 0x19b   : > { %v7255_v23 = vmax.f32 %v6323_v22, 0.0  ;;  %v6037_v24 = vpop.f32.mrb[2].mxu0 }
 0x19c   : > { %v6324_v26 = vadd.f32 %v6037_v24, %v476_v14  ;;  %v1535_v27 = vpop.f32.mrb[3].mxu0 }
 0x19d   : > { %v6325_v29 = vadd.f32 %v1535_v27, %v476_v14  ;;  %1635 = vmin.xlane.f32.xlu0 %v7255_v23 }
 0x19e   : > { %v7264_v41 = vmax.f32 %v6324_v26, 0.0 }
 0x19f   : > { %v7260_v31 = vmax.f32 %v6325_v29, 0.0  ;;  %v6040_v32 = vpop.f32.mrb[4].mxu0 }
 0x1a0   : > { %v6326_v35 = vadd.f32 %v6040_v32, %v476_v14  ;;  %v1547_v36 = vpop.f32.mrb[5].mxu0 }
 0x1a1   : > { %v6327_v37 = vadd.f32 %v1547_v36, %v476_v14  ;;  %1639 = vmin.xlane.f32.xlu1 %v7260_v31  ;;  %1637 = vmin.xlane.f32.xlu0 %v7258_v30 }
 0x1a2   : > { %v7270_v3 = vmax.f32 %v6326_v35, 0.0 }
 0x1a3   : > { %v7266_v43 = vmax.f32 %v6327_v37, 0.0  ;;  %v6043_v44 = vpop.f32.mrb[6].mxu0 }
 0x1a4   : > { %v6328_v55 = vadd.f32 %v6043_v44, %v476_v14  ;;  %v1559_v56 = vpop.f32.mrb[7].mxu0 }
 0x1a5   : > { %v6329_v2 = vadd.f32 %v1559_v56, %v476_v14  ;;  %1641 = vmin.xlane.f32.xlu1 %v7264_v41  ;;  %1643 = vmin.xlane.f32.xlu0 %v7266_v43 }
 0x1a6   : > { %v7276_v20 = vmax.f32 %v6328_v55, 0.0 }
 0x1a7   : > { %v7272_v5 = vmax.f32 %v6329_v2, 0.0  ;;  %v6046_v7 = vpop.f32.mrb[8].mxu0 }
 0x1a8   : > { %v6330_v11 = vadd.f32 %v6046_v7, %v476_v14  ;;  %v1571_v15 = vpop.f32.mrb[9].mxu0 }
 0x1a9   : > { %v6331_v16 = vadd.f32 %v1571_v15, %v476_v14  ;;  %1645 = vmin.xlane.f32.xlu1 %v7270_v3  ;;  %1647 = vmin.xlane.f32.xlu0 %v7272_v5 }
 0x1aa   : > { %v7282_v42 = vmax.f32 %v6330_v11, 0.0 }
 0x1ab   : > { %v7278_v25 = vmax.f32 %v6331_v16, 0.0  ;;  %v6049_v28 = vpop.f32.mrb[10].mxu0 }
 0x1ac   : > { %v6332_v38 = vadd.f32 %v6049_v28, %v476_v14  ;;  %v1583_v39 = vpop.f32.mrb[11].mxu0 }
 0x1ad   : > { %v6333_v40 = vadd.f32 %v1583_v39, %v476_v14  ;;  %1649 = vmin.xlane.f32.xlu1 %v7276_v20  ;;  %1651 = vmin.xlane.f32.xlu0 %v7278_v25 }
 0x1ae   : > { %v7288_v59 = vmax.f32 %v6332_v38, 0.0 }
 0x1af   : > { %v7284_v45 = vmax.f32 %v6333_v40, 0.0  ;;  %v6052_v46 = vpop.f32.mrb[12].mxu0 }
 0x1b0   : > { %v6334_v51 = vadd.f32 %v6052_v46, %v476_v14  ;;  %v1595_v53 = vpop.f32.mrb[13].mxu0 }
 0x1b1   : > { %v6335_v54 = vadd.f32 %v1595_v53, %v476_v14  ;;  %1653 = vmin.xlane.f32.xlu1 %v7282_v42  ;;  %1655 = vmin.xlane.f32.xlu0 %v7284_v45 }
 0x1b2   : > { %v7294_v4 = vmax.f32 %v6334_v51, 0.0 }
 0x1b3   : > { %v7290_v60 = vmax.f32 %v6335_v54, 0.0  ;;  %v6055_v61 = vpop.f32.mrb[14].mxu0 }
 0x1b4   : > { %v6336_v62 = vadd.f32 %v6055_v61, %v476_v14  ;;  %v1607_v63 = vpop.f32.mrb[15].mxu0 }
 0x1b5   : > { %v6337_v0 = vadd.f32 %v1607_v63, %v476_v14  ;;  %1657 = vmin.xlane.f32.xlu1 %v7288_v59  ;;  %1659 = vmin.xlane.f32.xlu0 %v7290_v60 }
 0x1b6   : > { %v7300_v9 = vmax.f32 %v6336_v62, 0.0 }
 0x1b7   : > { %v7296_v8 = vmax.f32 %v6337_v0, 0.0 }
 0x1b9   : > { %1661 = vmin.xlane.f32.xlu1 %v7294_v4  ;;  %1663 = vmin.xlane.f32.xlu0 %v7296_v8 }
 0x1bd   : > { %1665 = vmin.xlane.f32.xlu1 %v7300_v9 }
 0x22a   : > { %v7306_v19 = vpop.xlane.xlu0 %1635 }
 0x22b   : > { %vm1667_vm1 = vcmp.le.f32.partialorder %v7255_v23, %v7306_v19 }
 0x22c   : > { %v7311_v33 = vsel %vm1667_vm1, %v7304_v10, 128 }
 0x22d   : > { %v1700_v34 = vshra.s32 %v7311_v33, 16 }
 0x22e   : > { %v7314_v47 = vpop.xlane.xlu1 %1639  ;;  %v7316_v48 = vpop.xlane.xlu0 %1637 }
 0x22f   : > { %vm1669_vm2 = vcmp.le.f32.partialorder %v7260_v31, %v7314_v47  ;;  %vm1668_vm3 = vcmp.le.f32.partialorder %v7258_v30, %v7316_v48  ;;  %v7322_v49 = vcvt.s32.f32 %v1700_v34 }
 0x230   : > { %v7325_v50 = vsel %vm1669_vm2, %v7304_v10, 128  ;;  %v7328_v52 = vsel %vm1668_vm3, %v7304_v10, 128 }
 0x231   : > { %v1728_v57 = vshra.s32 %v7325_v50, 16  ;;  %v1714_v58 = vshra.s32 %v7328_v52, 16  ;;  %1703 = vmin.xlane.f32.xlu0 %v7322_v49 }
 0x232   : > { %v7333_v1 = vpop.xlane.xlu1 %1641  ;;  %v7335_v6 = vpop.xlane.xlu0 %1643 }
 0x233   : > { %10304 = vst [vmem:[#allocation3_spill] sm:$0xff] %v7335_v6  ;;  %vm1670_vm4 = vcmp.le.f32.partialorder %v7264_v41, %v7333_v1  ;;  %vm1671_vm5 = vcmp.le.f32.partialorder %v7266_v43, %v7335_v6  ;;  %v7341_v12 = vcvt.s32.f32 %v1728_v57  ;;  %v7343_v13 = vcvt.s32.f32 %v1714_v58 }
 0x234   : > { %v7346_v14 = vsel %vm1670_vm4, %v7304_v10, 128  ;;  %v7349_v17 = vsel %vm1671_vm5, %v7304_v10, 128 }
 0x235   : > { %v1742_v18 = vshra.s32 %v7346_v14, 16  ;;  %v1756_v21 = vshra.s32 %v7349_v17, 16  ;;  %1731 = vmin.xlane.f32.xlu0 %v7341_v12  ;;  %1717 = vmin.xlane.f32.xlu1 %v7343_v13  ;;  %v1755_v6 = vand.u32 65535, %v7349_v17 }
 0x236   : > { %v7355_v22 = vpop.xlane.xlu1 %1645  ;;  %v7357_v24 = vpop.xlane.xlu0 %1647 }
 0x237   : > { %10305 = vst [vmem:[#allocation4_spill] sm:$0xff] %v7355_v22  ;;  %10306 = vst [vmem:[#allocation5_spill] sm:$0xff] %v7357_v24  ;;  %vm1672_vm6 = vcmp.le.f32.partialorder %v7270_v3, %v7355_v22  ;;  %vm1673_vm7 = vcmp.le.f32.partialorder %v7272_v5, %v7357_v24  ;;  %v7363_v26 = vcvt.s32.f32 %v1742_v18  ;;  %v7365_v27 = vcvt.s32.f32 %v1756_v21 }
 0x238   : > { %v7368_v29 = vsel %vm1672_vm6, %v7304_v10, 128  ;;  %v7372_v35 = vsel %vm1673_vm7, %v7304_v10, 128 }
 0x239   : > { %v1770_v32 = vshra.s32 %v7368_v29, 16  ;;  %1745 = vmin.xlane.f32.xlu1 %v7363_v26  ;;  %1759 = vmin.xlane.f32.xlu0 %v7365_v27  ;;  %v1784_v44 = vshra.s32 %v7372_v35, 16  ;;  %v1783_v17 = vand.u32 65535, %v7372_v35 }
 0x23a   : > { %v7376_v36 = vpop.xlane.xlu1 %1649  ;;  %v7378_v37 = vpop.xlane.xlu0 %1651 }
 0x23b   : > { %10307 = vst [vmem:[#allocation6_spill] sm:$0xff] %v7376_v36  ;;  %10308 = vst [vmem:[#allocation7_spill] sm:$0xff] %v7378_v37  ;;  %vm1674_vm8 = vcmp.le.f32.partialorder %v7276_v20, %v7376_v36  ;;  %vm1675_vm9 = vcmp.le.f32.partialorder %v7278_v25, %v7378_v37  ;;  %v7385_v55 = vcvt.s32.f32 %v1770_v32  ;;  %v7387_v56 = vcvt.s32.f32 %v1784_v44 }
 0x23c   : > { %v7390_v2 = vsel %vm1674_vm8, %v7304_v10, 128  ;;  %v7394_v11 = vsel %vm1675_vm9, %v7304_v10, 128 }
 0x23d   : > { %v1798_v7 = vshra.s32 %v7390_v2, 16  ;;  %1773 = vmin.xlane.f32.xlu1 %v7385_v55  ;;  %1787 = vmin.xlane.f32.xlu0 %v7387_v56  ;;  %v1812_v28 = vshra.s32 %v7394_v11, 16  ;;  %v1811_v35 = vand.u32 65535, %v7394_v11 }
 0x23e   : > { %v7398_v15 = vpop.xlane.xlu1 %1653  ;;  %v7400_v16 = vpop.xlane.xlu0 %1655 }
 0x23f   : > { %10309 = vst [vmem:[#allocation8_spill] sm:$0xff] %v7398_v15  ;;  %10310 = vst [vmem:[#allocation9_spill] sm:$0xff] %v7400_v16  ;;  %vm1676_vm10 = vcmp.le.f32.partialorder %v7282_v42, %v7398_v15  ;;  %vm1677_vm11 = vcmp.le.f32.partialorder %v7284_v45, %v7400_v16  ;;  %v7407_v38 = vcvt.s32.f32 %v1798_v7  ;;  %v7409_v39 = vcvt.s32.f32 %v1812_v28 }
 0x240   : > { %v7412_v40 = vsel %vm1676_vm10, %v7304_v10, 128  ;;  %v7416_v51 = vsel %vm1677_vm11, %v7304_v10, 128  ;;  %v1699_v16 = vand.u32 65535, %v7311_v33  ;;  %v1727_v15 = vand.u32 65535, %v7325_v50 }
 0x241   : > { %v1826_v46 = vshra.s32 %v7412_v40, 16  ;;  %1801 = vmin.xlane.f32.xlu1 %v7407_v38  ;;  %1815 = vmin.xlane.f32.xlu0 %v7409_v39  ;;  %v1840_v61 = vshra.s32 %v7416_v51, 16  ;;  %v1741_v33 = vand.u32 65535, %v7346_v14  ;;  %v1769_v14 = vand.u32 65535, %v7368_v29 }
 0x242   : > { %v7420_v53 = vpop.xlane.xlu1 %1657  ;;  %v7422_v54 = vpop.xlane.xlu0 %1659  ;;  %v1729_v22 = vcvt.s32.f32 %v1727_v15  ;;  %v1757_v15 = vcvt.s32.f32 %v1755_v6  ;;  %v1785_v6 = vcvt.s32.f32 %v1783_v17  ;;  %v1797_v29 = vand.u32 65535, %v7390_v2 }
 0x243   : > { %10311 = vst [vmem:[#allocation10_spill] sm:$0xff] %v7420_v53  ;;  %10312 = vst [vmem:[#allocation11_spill] sm:$0xff] %v7422_v54  ;;  %vm1678_vm12 = vcmp.le.f32.partialorder %v7288_v59, %v7420_v53  ;;  %vm1679_vm13 = vcmp.le.f32.partialorder %v7290_v60, %v7422_v54  ;;  %v7429_v62 = vcvt.s32.f32 %v1826_v46  ;;  %v7431_v63 = vcvt.s32.f32 %v1840_v61 }
 0x244   : > { %v7434_v0 = vsel %vm1678_vm12, %v7304_v10, 128  ;;  %v7438_v57 = vsel %vm1679_vm13, %v7304_v10, 128  ;;  %v1825_v2 = vand.u32 65535, %v7412_v40  ;;  %v1839_v11 = vand.u32 65535, %v7416_v51 }
 0x245   : > { %v1854_v34 = vshra.s32 %v7434_v0, 16  ;;  %1829 = vmin.xlane.f32.xlu1 %v7429_v62  ;;  %1843 = vmin.xlane.f32.xlu0 %v7431_v63  ;;  %v1868_v21 = vshra.s32 %v7438_v57, 16  ;;  %v1853_v40 = vand.u32 65535, %v7434_v0  ;;  %v1867_v51 = vand.u32 65535, %v7438_v57 }
 0x246   : > { %v7442_v58 = vpop.xlane.xlu1 %1661  ;;  %v7444_v18 = vpop.xlane.xlu0 %1663  ;;  %v1841_v17 = vcvt.s32.f32 %v1839_v11 }
 0x247   : > { %10313 = vst [vmem:[#allocation12_spill] sm:$0xff] %v7442_v58  ;;  %10314 = vst [vmem:[#allocation13_spill] sm:$0xff] %v7444_v18  ;;  %vm1680_vm14 = vcmp.le.f32.partialorder %v7294_v4, %v7442_v58  ;;  %vm1681_vm15 = vcmp.le.f32.partialorder %v7296_v8, %v7444_v18  ;;  %v7451_v32 = vcvt.s32.f32 %v1854_v34  ;;  %v7453_v44 = vcvt.s32.f32 %v1868_v21 }
 0x248   : > { %v7456_v7 = vsel %vm1680_vm14, %v7304_v10, 128  ;;  %v7460_v46 = vsel %vm1681_vm15, %v7304_v10, 128 }
 0x249   : > { %v1882_v28 = vshra.s32 %v7456_v7, 16  ;;  %1857 = vmin.xlane.f32.xlu1 %v7451_v32  ;;  %1871 = vmin.xlane.f32.xlu0 %v7453_v44  ;;  %v1896_v18 = vshra.s32 %v7460_v46, 16  ;;  %v1881_v0 = vand.u32 65535, %v7456_v7  ;;  %v1895_v57 = vand.u32 65535, %v7460_v46 }
 0x24a   : > { %v7464_v61 = vpop.xlane.xlu1 %1665 }
 0x24b   : > { %10315 = vst [vmem:[#allocation14_spill] sm:$0xff] %v7464_v61  ;;  %vm1682_vm1 = vcmp.le.f32.partialorder %v7300_v9, %v7464_v61  ;;  %v7469_v34 = vcvt.s32.f32 %v1882_v28  ;;  %v7471_v21 = vcvt.s32.f32 %v1896_v18  ;;  %v1701_v28 = vcvt.s32.f32 %v1699_v16 }
 0x24c   : > { %v7474_v58 = vsel %vm1682_vm1, %v7304_v10, 128  ;;  %v1713_v18 = vand.u32 65535, %v7328_v52  ;;  %v1743_v16 = vcvt.s32.f32 %v1741_v33 }
 0x24d   : > { %v1910_v54 = vshra.s32 %v7474_v58, 16  ;;  %1885 = vmin.xlane.f32.xlu1 %v7469_v34  ;;  %1899 = vmin.xlane.f32.xlu0 %v7471_v21  ;;  %v1909_v7 = vand.u32 65535, %v7474_v58 }
 0x24e   : > { %v1715_v24 = vcvt.s32.f32 %v1713_v18 }
 0x24f   : > { %v7479_v53 = vcvt.s32.f32 %v1910_v54 }
 0x251   : > { %1913 = vmin.xlane.f32.xlu1 %v7479_v53 }
 0x2be   : > { %v7483_v61 = vpop.xlane.xlu0 %1703 }
 0x2bf   : > { %vm1705_vm2 = vcmp.eq.f32.partialorder %v7322_v49, %v7483_v61  ;;  %v1710_v58 = vcvt.f32.s32 %v7483_v61 }
 0x2c0   : > { %v1706_v37 = vsel %vm1705_vm2, %v1701_v28, inf  ;;  %v1771_v28 = vcvt.s32.f32 %v1769_v14  ;;  %v1827_v14 = vcvt.s32.f32 %v1825_v2 }
 0x2c1   : > { %1707 = vmin.xlane.f32.xlu0 %v1706_v37  ;;  %v1711_v11 = vshll.u32 %v1710_v58, 16 }
 0x2c2   : > { %v7489_v36 = vpop.xlane.xlu1 %1717  ;;  %v7491_v54 = vpop.xlane.xlu0 %1731 }
 0x2c3   : > { %vm1719_vm3 = vcmp.eq.f32.partialorder %v7343_v13, %v7489_v36  ;;  %vm1733_vm4 = vcmp.eq.f32.partialorder %v7341_v12, %v7491_v54  ;;  %v1724_v2 = vcvt.f32.s32 %v7489_v36 }
 0x2c4   : > { %v1720_v50 = vsel %vm1719_vm3, %v1715_v24, inf  ;;  %v1734_v49 = vsel %vm1733_vm4, %v1729_v22, inf }
 0x2c5   : > { %1721 = vmin.xlane.f32.xlu1 %v1720_v50  ;;  %1735 = vmin.xlane.f32.xlu0 %v1734_v49  ;;  %v1799_v50 = vcvt.s32.f32 %v1797_v29  ;;  %v1813_v49 = vcvt.s32.f32 %v1811_v35 }
 0x2c6   : > { %v7499_v52 = vpop.xlane.xlu1 %1745  ;;  %v7501_v37 = vpop.xlane.xlu0 %1759 }
 0x2c7   : > { %vm1747_vm5 = vcmp.eq.f32.partialorder %v7363_v26, %v7499_v52  ;;  %vm1761_vm6 = vcmp.eq.f32.partialorder %v7365_v27, %v7501_v37 }
 0x2c8   : > { %v1748_v12 = vsel %vm1747_vm5, %v1743_v16, inf  ;;  %v1762_v13 = vsel %vm1761_vm6, %v1757_v15, inf }
 0x2c9   : > { %1749 = vmin.xlane.f32.xlu1 %v1748_v12  ;;  %1763 = vmin.xlane.f32.xlu0 %v1762_v13 }
 0x2ca   : > { %v7509_v22 = vpop.xlane.xlu1 %1773  ;;  %v7511_v24 = vpop.xlane.xlu0 %1787 }
 0x2cb   : > { %vm1775_vm7 = vcmp.eq.f32.partialorder %v7385_v55, %v7509_v22  ;;  %vm1789_vm8 = vcmp.eq.f32.partialorder %v7387_v56, %v7511_v24  ;;  %v1780_v36 = vcvt.f32.s32 %v7509_v22  ;;  %v1794_v61 = vcvt.f32.s32 %v7511_v24 }
 0x2cc   : > { %v1776_v26 = vsel %vm1775_vm7, %v1771_v28, inf  ;;  %v1790_v27 = vsel %vm1789_vm8, %v1785_v6, inf  ;;  %v1855_v28 = vcvt.s32.f32 %v1853_v40  ;;  %v1869_v6 = vcvt.s32.f32 %v1867_v51 }
 0x2cd   : > { %1777 = vmin.xlane.f32.xlu1 %v1776_v26  ;;  %1791 = vmin.xlane.f32.xlu0 %v1790_v27  ;;  %v1883_v26 = vcvt.s32.f32 %v1881_v0  ;;  %v1897_v27 = vcvt.s32.f32 %v1895_v57  ;;  %v1766_v40 = vcvt.f32.s32 %v7501_v37  ;;  %v1781_v22 = vshll.u32 %v1780_v36, 16 }
 0x2ce   : > { %v7519_v18 = vpop.xlane.xlu1 %1801  ;;  %v7521_v33 = vpop.xlane.xlu0 %1815  ;;  %v1795_v24 = vshll.u32 %v1794_v61, 16 }
 0x2cf   : > { %vm1803_vm9 = vcmp.eq.f32.partialorder %v7407_v38, %v7519_v18  ;;  %vm1817_vm10 = vcmp.eq.f32.partialorder %v7409_v39, %v7521_v33  ;;  %v1767_v37 = vshll.u32 %v1766_v40, 16  ;;  %v1822_v58 = vcvt.f32.s32 %v7521_v33 }
 0x2d0   : > { %v1804_v55 = vsel %vm1803_vm9, %v1799_v50, inf  ;;  %v1818_v56 = vsel %vm1817_vm10, %v1813_v49, inf  ;;  %v1911_v50 = vcvt.s32.f32 %v1909_v7 }
 0x2d1   : > { %1805 = vmin.xlane.f32.xlu1 %v1804_v55  ;;  %1819 = vmin.xlane.f32.xlu0 %v1818_v56 }
 0x2d2   : > { %v7529_v16 = vpop.xlane.xlu1 %1829  ;;  %v7531_v15 = vpop.xlane.xlu0 %1843 }
 0x2d3   : > { %vm1831_vm11 = vcmp.eq.f32.partialorder %v7429_v62, %v7529_v16  ;;  %vm1845_vm12 = vcmp.eq.f32.partialorder %v7431_v63, %v7531_v15  ;;  %v1850_v40 = vcvt.f32.s32 %v7531_v15 }
 0x2d4   : > { %v1832_v38 = vsel %vm1831_vm11, %v1827_v14, inf  ;;  %v1846_v39 = vsel %vm1845_vm12, %v1841_v17, inf  ;;  %v1725_v14 = vshll.u32 %v1724_v2, 16  ;;  %v1752_v17 = vcvt.f32.s32 %v7499_v52 }
 0x2d5   : > { %1833 = vmin.xlane.f32.xlu1 %v1832_v38  ;;  %1847 = vmin.xlane.f32.xlu0 %v1846_v39  ;;  %v1836_v2 = vcvt.f32.s32 %v7529_v16 }
 0x2d6   : > { %v7539_v12 = vpop.xlane.xlu1 %1857  ;;  %v7541_v13 = vpop.xlane.xlu0 %1871  ;;  %v1753_v52 = vshll.u32 %v1752_v17, 16  ;;  %v1823_v17 = vshll.u32 %v1822_v58, 16 }
 0x2d7   : > { %vm1859_vm13 = vcmp.eq.f32.partialorder %v7451_v32, %v7539_v12  ;;  %vm1873_vm14 = vcmp.eq.f32.partialorder %v7453_v44, %v7541_v13  ;;  %v1864_v61 = vcvt.f32.s32 %v7539_v12  ;;  %v1878_v12 = vcvt.f32.s32 %v7541_v13 }
 0x2d8   : > { %v1860_v62 = vsel %vm1859_vm13, %v1855_v28, inf  ;;  %v1874_v63 = vsel %vm1873_vm14, %v1869_v6, inf  ;;  %v10251_v6 = vmov 0.0  }
 0x2d9   : > { %1861 = vmin.xlane.f32.xlu1 %v1860_v62  ;;  %1875 = vmin.xlane.f32.xlu0 %v1874_v63 }
 0x2da   : > { %v7549_v29 = vpop.xlane.xlu1 %1885  ;;  %v7551_v35 = vpop.xlane.xlu0 %1899 }
 0x2db   : > { %vm1887_vm15 = vcmp.eq.f32.partialorder %v7469_v34, %v7549_v29  ;;  %vm1901_vm1 = vcmp.eq.f32.partialorder %v7471_v21, %v7551_v35  ;;  %v1738_v21 = vcvt.f32.s32 %v7491_v54  ;;  %v1906_v58 = vcvt.f32.s32 %v7551_v35 }
 0x2dc   : > { %v1888_v32 = vsel %vm1887_vm15, %v1883_v26, inf  ;;  %v1902_v44 = vsel %vm1901_vm1, %v1897_v27, inf }
 0x2dd   : > { %1889 = vmin.xlane.f32.xlu1 %v1888_v32  ;;  %1903 = vmin.xlane.f32.xlu0 %v1902_v44 }
 0x2de   : > { %v7558_v46 = vpop.xlane.xlu1 %1913 }
 0x2df   : > { %vm1915_vm2 = vcmp.eq.f32.partialorder %v7479_v53, %v7558_v46  ;;  %v1739_v53 = vshll.u32 %v1738_v21, 16 }
 0x2e0   : > { %v1916_v49 = vsel %vm1915_vm2, %v1911_v50, inf  ;;  %v1808_v50 = vcvt.f32.s32 %v7519_v18 }
 0x2e1   : > { %1917 = vmin.xlane.f32.xlu1 %v1916_v49 }
 0x34e   : > { %v1708_v34 = vpop.xlane.xlu0 %1707 }
 0x34f   : > { %v1709_v55 = vcvt.f32.s32 %v1708_v34 }
 0x351   : > { %v1712_v56 = vadd.s32 %v1711_v11, %v1709_v55 }
 0x352   : > { %v1722_v51 = vpop.xlane.xlu1 %1721  ;;  %v1736_v38 = vpop.xlane.xlu0 %1735 }
 0x353   : > { %v1723_v39 = vcvt.f32.s32 %v1722_v51  ;;  %v1737_v28 = vcvt.f32.s32 %v1736_v38  ;;  %vm1923_vm3 = vcmp.eq.s32.totalorder %v7304_v10, %v1712_v56 }
 0x354   : > { %v7571_v54 = vsel %vm1923_vm3, 1.0, %v10251_v6 }
 0x355   : > { %v1726_v0 = vadd.s32 %v1725_v14, %v1723_v39  ;;  %v1740_v57 = vadd.s32 %v1739_v53, %v1737_v28  ;;  %vm2179_vm4 = vcmp.gt.f32.partialorder %v7571_v54, 0.0  ;;  %v1837_v39 = vshll.u32 %v1836_v2, 16 }
 0x356   : > { %v1750_v62 = vpop.xlane.xlu1 %1749  ;;  %v1764_v63 = vpop.xlane.xlu0 %1763  ;;  %v7575_v26 = vsel %vm2179_vm4, 1e+30, %v7255_v23 }
 0x357   : > { %10316 = vst [vmem:[#allocation15_spill] sm:$0xff] %v7575_v26  ;;  %v1751_v27 = vcvt.f32.s32 %v1750_v62  ;;  %v1765_v7 = vcvt.f32.s32 %v1764_v63  ;;  %2211 = vmin.xlane.f32.xlu0 %v7575_v26  ;;  %vm1924_vm5 = vcmp.eq.s32.totalorder %v7304_v10, %v1726_v0  ;;  %vm1925_vm6 = vcmp.eq.s32.totalorder %v7304_v10, %v1740_v57 }
 0x358   : > { %v7581_v32 = vsel %vm1924_vm5, 1.0, %v10251_v6  ;;  %v7584_v44 = vsel %vm1925_vm6, 1.0, %v10251_v6 }
 0x359   : > { %v1754_v23 = vadd.s32 %v1753_v52, %v1751_v27  ;;  %v1768_v49 = vadd.s32 %v1767_v37, %v1765_v7  ;;  %vm2180_vm7 = vcmp.gt.f32.partialorder %v7581_v32, 0.0  ;;  %vm2181_vm8 = vcmp.gt.f32.partialorder %v7584_v44, 0.0 }
 0x35a   : > { %v1778_v34 = vpop.xlane.xlu1 %1777  ;;  %v1792_v11 = vpop.xlane.xlu0 %1791  ;;  %v7591_v21 = vsel %vm2180_vm7, 1e+30, %v7258_v30  ;;  %v7596_v18 = vsel %vm2181_vm8, 1e+30, %v7260_v31  ;;  %v1809_v30 = vshll.u32 %v1808_v50, 16  ;;  %v1851_v37 = vshll.u32 %v1850_v40, 16 }
 0x35b   : > { %10317 = vst [vmem:[#allocation16_spill] sm:$0xff] %v7591_v21  ;;  %v1779_v55 = vcvt.f32.s32 %v1778_v34  ;;  %v1793_v56 = vcvt.f32.s32 %v1792_v11  ;;  %2213 = vmin.xlane.f32.xlu1 %v7591_v21  ;;  %10318 = vst [vmem:[#allocation17_spill] sm:$0xff] %v7596_v18  ;;  %vm1926_vm9 = vcmp.eq.s32.totalorder %v7304_v10, %v1754_v23  ;;  %2215 = vmin.xlane.f32.xlu0 %v7596_v18  ;;  %v1892_v50 = vcvt.f32.s32 %v7549_v29 }
 0x35c   : > { %v7601_v33 = vsel %vm1926_vm9, 1.0, %v10251_v6  ;;  %vm1927_vm10 = vcmp.eq.s32.totalorder %v7304_v10, %v1768_v49 }
 0x35d   : > { %10319 = vst [vmem:[#allocation18_spill] sm:$0xff] %v7601_v33  ;;  %v1782_v16 = vadd.s32 %v1781_v22, %v1779_v55  ;;  %v1796_v14 = vadd.s32 %v1795_v24, %v1793_v56  ;;  %vm2182_vm11 = vcmp.gt.f32.partialorder %v7601_v33, 0.0  ;;  %v7610_v53 = vsel %vm1927_vm10, 1.0, %v10251_v6 }
 0x35e   : > { %v1806_v51 = vpop.xlane.xlu1 %1805  ;;  %v1820_v31 = vpop.xlane.xlu0 %1819  ;;  %v7607_v38 = vsel %vm2182_vm11, 1e+30, %v7264_v41  ;;  %10321 = vst [vmem:[#allocation20_spill] sm:$0xff] %v7610_v53  ;;  %vm2183_vm12 = vcmp.gt.f32.partialorder %v7610_v53, 0.0  ;;  %v1865_v24 = vshll.u32 %v1864_v61, 16 }
 0x35f   : > { %10320 = vst [vmem:[#allocation19_spill] sm:$0xff] %v7607_v38  ;;  %v1807_v28 = vcvt.f32.s32 %v1806_v51  ;;  %v1821_v36 = vcvt.f32.s32 %v1820_v31  ;;  %2217 = vmin.xlane.f32.xlu1 %v7607_v38  ;;  %v7616_v0 = vsel %vm2183_vm12, 1e+30, %v7266_v43  ;;  %vm1928_vm13 = vcmp.eq.s32.totalorder %v7304_v10, %v1782_v16 }
 0x360   : > { %10322 = vst [vmem:[#allocation21_spill] sm:$0xff] %v7616_v0  ;;  %vm1929_vm14 = vcmp.eq.s32.totalorder %v7304_v10, %v1796_v14  ;;  %2219 = vmin.xlane.f32.xlu0 %v7616_v0  ;;  %v7622_v57 = vsel %vm1928_vm13, 1.0, %v10251_v6 }
 0x361   : > { %v1810_v41 = vadd.s32 %v1809_v30, %v1807_v28  ;;  %v1824_v15 = vadd.s32 %v1823_v17, %v1821_v36  ;;  %10323 = vst [vmem:[#allocation22_spill] sm:$0xff] %v7622_v57  ;;  %v7625_v52 = vsel %vm1929_vm14, 1.0, %v10251_v6  ;;  %vm2184_vm15 = vcmp.gt.f32.partialorder %v7622_v57, 0.0 }
 0x362   : > { %10324 = vst [vmem:[#allocation23_spill] sm:$0xff] %v7625_v52  ;;  %v1834_v62 = vpop.xlane.xlu1 %1833  ;;  %v1848_v43 = vpop.xlane.xlu0 %1847  ;;  %vm2185_vm1 = vcmp.gt.f32.partialorder %v7625_v52, 0.0  ;;  %v7631_v7 = vsel %vm2184_vm15, 1e+30, %v7270_v3  ;;  %v1893_v30 = vshll.u32 %v1892_v50, 16  ;;  %v1907_v17 = vshll.u32 %v1906_v58, 16 }
 0x363   : > { %v1835_v63 = vcvt.f32.s32 %v1834_v62  ;;  %v1849_v27 = vcvt.f32.s32 %v1848_v43  ;;  %10325 = vst [vmem:[#allocation24_spill] sm:$0xff] %v7631_v7  ;;  %v7634_v22 = vsel %vm2185_vm1, 1e+30, %v7272_v5  ;;  %2221 = vmin.xlane.f32.xlu1 %v7631_v7  ;;  %vm1930_vm2 = vcmp.eq.s32.totalorder %v7304_v10, %v1810_v41 }
 0x364   : > { %10326 = vst [vmem:[#allocation25_spill] sm:$0xff] %v7634_v22  ;;  %vm1931_vm3 = vcmp.eq.s32.totalorder %v7304_v10, %v1824_v15  ;;  %2223 = vmin.xlane.f32.xlu0 %v7634_v22  ;;  %v7642_v49 = vsel %vm1930_vm2, 1.0, %v10251_v6  ;;  %v1879_v5 = vshll.u32 %v1878_v12, 16 }
 0x365   : > { %v1838_v13 = vadd.s32 %v1837_v39, %v1835_v63  ;;  %v1852_v23 = vadd.s32 %v1851_v37, %v1849_v27  ;;  %10327 = vst [vmem:[#allocation26_spill] sm:$0xff] %v7642_v49  ;;  %v7645_v3 = vsel %vm1931_vm3, 1.0, %v10251_v6  ;;  %vm2186_vm4 = vcmp.gt.f32.partialorder %v7642_v49, 0.0 }
 0x366   : > { %10328 = vst [vmem:[#allocation27_spill] sm:$0xff] %v7645_v3  ;;  %v1862_v29 = vpop.xlane.xlu1 %1861  ;;  %v1876_v2 = vpop.xlane.xlu0 %1875  ;;  %vm2187_vm5 = vcmp.gt.f32.partialorder %v7645_v3, 0.0  ;;  %v7651_v55 = vsel %vm2186_vm4, 1e+30, %v7276_v20 }
 0x367   : > { %v1863_v34 = vcvt.f32.s32 %v1862_v29  ;;  %v1877_v11 = vcvt.f32.s32 %v1876_v2  ;;  %10329 = vst [vmem:[#allocation28_spill] sm:$0xff] %v7651_v55  ;;  %v7654_v56 = vsel %vm2187_vm5, 1e+30, %v7278_v25  ;;  %2225 = vmin.xlane.f32.xlu1 %v7651_v55  ;;  %vm1932_vm6 = vcmp.eq.s32.totalorder %v7304_v10, %v1838_v13 }
 0x368   : > { %10330 = vst [vmem:[#allocation29_spill] sm:$0xff] %v7654_v56  ;;  %vm1933_vm7 = vcmp.eq.s32.totalorder %v7304_v10, %v1852_v23  ;;  %2227 = vmin.xlane.f32.xlu0 %v7654_v56  ;;  %v7661_v14 = vsel %vm1932_vm6, 1.0, %v10251_v6  ;;  %v1920_v25 = vcvt.f32.s32 %v7558_v46 }
 0x369   : > { %v1866_v35 = vadd.s32 %v1865_v24, %v1863_v34  ;;  %v1880_v16 = vadd.s32 %v1879_v5, %v1877_v11  ;;  %10331 = vst [vmem:[#allocation30_spill] sm:$0xff] %v7661_v14  ;;  %v7664_v20 = vsel %vm1933_vm7, 1.0, %v10251_v6  ;;  %vm2188_vm8 = vcmp.gt.f32.partialorder %v7661_v14, 0.0 }
 0x36a   : > { %10332 = vst [vmem:[#allocation31_spill] sm:$0xff] %v7664_v20  ;;  %v1890_v40 = vpop.xlane.xlu1 %1889  ;;  %v1904_v51 = vpop.xlane.xlu0 %1903  ;;  %vm2189_vm9 = vcmp.gt.f32.partialorder %v7664_v20, 0.0  ;;  %v7670_v28 = vsel %vm2188_vm8, 1e+30, %v7282_v42  ;;  %v1921_v42 = vshll.u32 %v1920_v25, 16 }
 0x36b   : > { %v1891_v31 = vcvt.f32.s32 %v1890_v40  ;;  %v1905_v39 = vcvt.f32.s32 %v1904_v51  ;;  %10333 = vst [vmem:[#allocation32_spill] sm:$0xff] %v7670_v28  ;;  %v7673_v36 = vsel %vm2189_vm9, 1e+30, %v7284_v45  ;;  %2229 = vmin.xlane.f32.xlu1 %v7670_v28  ;;  %vm1934_vm10 = vcmp.eq.s32.totalorder %v7304_v10, %v1866_v35 }
 0x36c   : > { %10334 = vst [vmem:[#allocation33_spill] sm:$0xff] %v7673_v36  ;;  %vm1935_vm11 = vcmp.eq.s32.totalorder %v7304_v10, %v1880_v16  ;;  %2231 = vmin.xlane.f32.xlu0 %v7673_v36  ;;  %v7680_v41 = vsel %vm1934_vm10, 1.0, %v10251_v6 }
 0x36d   : > { %v1894_v46 = vadd.s32 %v1893_v30, %v1891_v31  ;;  %v1908_v61 = vadd.s32 %v1907_v17, %v1905_v39  ;;  %10335 = vst [vmem:[#allocation34_spill] sm:$0xff] %v7680_v41  ;;  %v7683_v15 = vsel %vm1935_vm11, 1.0, %v10251_v6  ;;  %vm2190_vm12 = vcmp.gt.f32.partialorder %v7680_v41, 0.0 }
 0x36e   : > { %10336 = vst [vmem:[#allocation35_spill] sm:$0xff] %v7683_v15  ;;  %v1918_v37 = vpop.xlane.xlu1 %1917  ;;  %vm2191_vm13 = vcmp.gt.f32.partialorder %v7683_v15, 0.0  ;;  %v7688_v12 = vsel %vm2190_vm12, 1e+30, %v7288_v59 }
 0x36f   : > { %v1919_v45 = vcvt.f32.s32 %v1918_v37  ;;  %10337 = vst [vmem:[#allocation36_spill] sm:$0xff] %v7688_v12  ;;  %v7691_v62 = vsel %vm2191_vm13, 1e+30, %v7290_v60  ;;  %vm1936_vm14 = vcmp.eq.s32.totalorder %v7304_v10, %v1894_v46  ;;  %2233 = vmin.xlane.f32.xlu1 %v7688_v12  ;;  %vm1937_vm15 = vcmp.eq.s32.totalorder %v7304_v10, %v1908_v61 }
 0x370   : > { %10338 = vst [vmem:[#allocation37_spill] sm:$0xff] %v7691_v62  ;;  %v7696_v43 = vsel %vm1936_vm14, 1.0, %v10251_v6  ;;  %2235 = vmin.xlane.f32.xlu0 %v7691_v62  ;;  %v7702_v59 = vsel %vm1937_vm15, 1.0, %v10251_v6 }
 0x371   : > { %10339 = vst [vmem:[#allocation38_spill] sm:$0xff] %v7696_v43  ;;  %v1922_v63 = vadd.s32 %v1921_v42, %v1919_v45  ;;  %vm2192_vm1 = vcmp.gt.f32.partialorder %v7696_v43, 0.0  ;;  %10340 = vst [vmem:[#allocation39_spill] sm:$0xff] %v7702_v59  ;;  %vm2193_vm2 = vcmp.gt.f32.partialorder %v7702_v59, 0.0 }
 0x372   : > { %v7705_v60 = vsel %vm2192_vm1, 1e+30, %v7294_v4  ;;  %v7709_v27 = vsel %vm2193_vm2, 1e+30, %v7296_v8 }
 0x373   : > { %10341 = vst [vmem:[#allocation40_spill] sm:$0xff] %v7705_v60  ;;  %10342 = vst [vmem:[#allocation41_spill] sm:$0xff] %v7709_v27  ;;  %vm1938_vm3 = vcmp.eq.s32.totalorder %v7304_v10, %v1922_v63  ;;  %2237 = vmin.xlane.f32.xlu1 %v7705_v60 }
 0x374   : > { %v7714_v24 = vsel %vm1938_vm3, 1.0, %v10251_v6  ;;  %2239 = vmin.xlane.f32.xlu0 %v7709_v27 }
 0x375   : > { %10343 = vst [vmem:[#allocation42_spill] sm:$0xff] %v7714_v24  ;;  %vm2194_vm4 = vcmp.gt.f32.partialorder %v7714_v24, 0.0 }
 0x376   : > { %v7719_v50 = vsel %vm2194_vm4, 1e+30, %v7300_v9 }
 0x377   : > { %10344 = vst [vmem:[#allocation43_spill] sm:$0xff] %v7719_v50  ;;  %2241 = vmin.xlane.f32.xlu1 %v7719_v50 }
 0x3e4   : > { %v7722_v4 = vpop.xlane.xlu0 %2211 }
 0x3e5   : > { %vm2243_vm5 = vcmp.le.f32.partialorder %v7575_v26, %v7722_v4 }
 0x3e6   : > { %v7727_v8 = vsel %vm2243_vm5, %v7304_v10, 128 }
 0x3e7   : > { %v2276_v13 = vshra.s32 %v7727_v8, 16 }
 0x3e8   : > { %v7730_v23 = vpop.xlane.xlu1 %2213  ;;  %v7734_v5 = vpop.xlane.xlu0 %2215 }
 0x3e9   : > { %vm2244_vm6 = vcmp.le.f32.partialorder %v7591_v21, %v7730_v23  ;;  %v7736_v9 = vcvt.s32.f32 %v2276_v13  ;;  %vm2245_vm7 = vcmp.le.f32.partialorder %v7596_v18, %v7734_v5 }
 0x3ea   : > { %v7741_v58 = vsel %vm2244_vm6, %v7304_v10, 128  ;;  %v7746_v2 = vsel %vm2245_vm7, %v7304_v10, 128 }
 0x3eb   : > { %2279 = vmin.xlane.f32.xlu0 %v7736_v9  ;;  %v2290_v29 = vshra.s32 %v7741_v58, 16  ;;  %v2304_v11 = vshra.s32 %v7746_v2, 16 }
 0x3ec   : > { %v7748_v34 = vpop.xlane.xlu1 %2217 }
 0x3ed   : > { %vm2246_vm8 = vcmp.le.f32.partialorder %v7607_v38, %v7748_v34  ;;  %v7753_v30 = vcvt.s32.f32 %v2290_v29  ;;  %v7755_v35 = vpop.xlane.xlu0 %2219  ;;  %v7757_v16 = vcvt.s32.f32 %v2304_v11 }
 0x3ee   : > { %v7760_v17 = vsel %vm2246_vm8, %v7304_v10, 128  ;;  %vm2247_vm9 = vcmp.le.f32.partialorder %v7616_v0, %v7755_v35 }
 0x3ef   : > { %2293 = vmin.xlane.f32.xlu1 %v7753_v30  ;;  %v2318_v25 = vshra.s32 %v7760_v17, 16  ;;  %2307 = vmin.xlane.f32.xlu0 %v7757_v16  ;;  %v7768_v40 = vsel %vm2247_vm9, %v7304_v10, 128  ;;  %v2317_v33 = vand.u32 65535, %v7760_v17 }
 0x3f0   : > { %v7770_v51 = vpop.xlane.xlu1 %2221  ;;  %v2332_v39 = vshra.s32 %v7768_v40, 16 }
 0x3f1   : > { %v7772_v31 = vcvt.s32.f32 %v2318_v25  ;;  %vm2248_vm10 = vcmp.le.f32.partialorder %v7631_v7, %v7770_v51  ;;  %v7777_v46 = vpop.xlane.xlu0 %2223 }
 0x3f2   : > { %vm2249_vm11 = vcmp.le.f32.partialorder %v7634_v22, %v7777_v46  ;;  %v7782_v61 = vcvt.s32.f32 %v2332_v39  ;;  %v7785_v42 = vsel %vm2248_vm10, %v7304_v10, 128 }
 0x3f3   : > { %2321 = vmin.xlane.f32.xlu1 %v7772_v31  ;;  %v2346_v37 = vshra.s32 %v7785_v42, 16  ;;  %v7789_v45 = vsel %vm2249_vm11, %v7304_v10, 128 }
 0x3f4   : > { %2335 = vmin.xlane.f32.xlu0 %v7782_v61  ;;  %v7792_v63 = vpop.xlane.xlu1 %2225  ;;  %v2360_v13 = vshra.s32 %v7789_v45, 16 }
 0x3f5   : > { %vm2250_vm12 = vcmp.le.f32.partialorder %v7651_v55, %v7792_v63  ;;  %v7797_v29 = vpop.xlane.xlu0 %2227  ;;  %v7799_v11 = vcvt.s32.f32 %v2346_v37 }
 0x3f6   : > { %vm2251_vm13 = vcmp.le.f32.partialorder %v7654_v56, %v7797_v29  ;;  %v7803_v25 = vcvt.s32.f32 %v2360_v13  ;;  %v7807_v39 = vsel %vm2250_vm12, %v7304_v10, 128 }
 0x3f7   : > { %2349 = vmin.xlane.f32.xlu1 %v7799_v11  ;;  %v7810_v6 = vsel %vm2251_vm13, %v7304_v10, 128  ;;  %v2374_v37 = vshra.s32 %v7807_v39, 16 }
 0x3f8   : > { %2363 = vmin.xlane.f32.xlu0 %v7803_v25  ;;  %v7813_v24 = vpop.xlane.xlu1 %2229  ;;  %v2388_v59 = vshra.s32 %v7810_v6, 16 }
 0x3f9   : > { %vm2252_vm14 = vcmp.le.f32.partialorder %v7670_v28, %v7813_v24  ;;  %v7819_v13 = vpop.xlane.xlu0 %2231  ;;  %v7823_v43 = vcvt.s32.f32 %v2374_v37 }
 0x3fa   : > { %vm2253_vm15 = vcmp.le.f32.partialorder %v7673_v36, %v7819_v13  ;;  %v7825_v56 = vcvt.s32.f32 %v2388_v59  ;;  %v7828_v55 = vsel %vm2252_vm14, %v7304_v10, 128 }
 0x3fb   : > { %v7831_v22 = vsel %vm2253_vm15, %v7304_v10, 128  ;;  %2377 = vmin.xlane.f32.xlu1 %v7823_v43  ;;  %v2402_v7 = vshra.s32 %v7828_v55, 16 }
 0x3fc   : > { %2391 = vmin.xlane.f32.xlu0 %v7825_v56  ;;  %v7835_v28 = vpop.xlane.xlu1 %2233  ;;  %v2416_v36 = vshra.s32 %v7831_v22, 16 }
 0x3fd   : > { %vm2254_vm1 = vcmp.le.f32.partialorder %v7688_v12, %v7835_v28  ;;  %v7841_v59 = vpop.xlane.xlu0 %2235  ;;  %v7845_v37 = vcvt.s32.f32 %v2402_v7 }
 0x3fe   : > { %vm2255_vm2 = vcmp.le.f32.partialorder %v7691_v62, %v7841_v59  ;;  %v7847_v0 = vcvt.s32.f32 %v2416_v36  ;;  %v7850_v38 = vsel %vm2254_vm1, %v7304_v10, 128 }
 0x3ff   : > { %2405 = vmin.xlane.f32.xlu1 %v7845_v37  ;;  %v2430_v21 = vshra.s32 %v7850_v38, 16  ;;  %v7857_v12 = vsel %vm2255_vm2, %v7304_v10, 128 }
 0x400   : > { %v7853_v18 = vpop.xlane.xlu1 %2237  ;;  %2419 = vmin.xlane.f32.xlu0 %v7847_v0  ;;  %v2444_v36 = vshra.s32 %v7857_v12, 16 }
 0x401   : > { %vm2256_vm3 = vcmp.le.f32.partialorder %v7705_v60, %v7853_v18  ;;  %v7862_v7 = vpop.xlane.xlu0 %2239  ;;  %v7867_v62 = vcvt.s32.f32 %v2430_v21 }
 0x402   : > { %vm2257_vm4 = vcmp.le.f32.partialorder %v7709_v27, %v7862_v7  ;;  %v7869_v26 = vcvt.s32.f32 %v2444_v36  ;;  %v7872_v15 = vsel %vm2256_vm3, %v7304_v10, 128 }
 0x403   : > { %2433 = vmin.xlane.f32.xlu1 %v7867_v62  ;;  %v2458_v60 = vshra.s32 %v7872_v15, 16  ;;  %v7879_v20 = vsel %vm2257_vm4, %v7304_v10, 128 }
 0x404   : > { %v7875_v41 = vpop.xlane.xlu1 %2241  ;;  %2447 = vmin.xlane.f32.xlu0 %v7869_v26  ;;  %v2472_v21 = vshra.s32 %v7879_v20, 16 }
 0x405   : > { %10345 = vst [vmem:[#allocation44_spill] sm:$0xff] %v7875_v41  ;;  %vm2258_vm5 = vcmp.le.f32.partialorder %v7719_v50, %v7875_v41  ;;  %v7885_v36 = vcvt.s32.f32 %v2458_v60  ;;  %v2275_v50 = vand.u32 65535, %v7727_v8 }
 0x406   : > { %v7888_v27 = vsel %vm2258_vm5, %v7304_v10, 128  ;;  %v7890_v14 = vcvt.s32.f32 %v2472_v21  ;;  %v2289_v10 = vand.u32 65535, %v7741_v58  ;;  %v2303_v21 = vand.u32 65535, %v7746_v2 }
 0x407   : > { %v2486_v3 = vshra.s32 %v7888_v27, 16  ;;  %2461 = vmin.xlane.f32.xlu1 %v7885_v36  ;;  %v2277_v60 = vcvt.s32.f32 %v2275_v50  ;;  %v2345_v2 = vand.u32 65535, %v7785_v42  ;;  %v2373_v42 = vand.u32 65535, %v7807_v39 }
 0x408   : > { %2475 = vmin.xlane.f32.xlu0 %v7890_v14  ;;  %v2305_v50 = vcvt.s32.f32 %v2303_v21  ;;  %v2359_v21 = vand.u32 65535, %v7789_v45 }
 0x409   : > { %v7895_v49 = vcvt.s32.f32 %v2486_v3  ;;  %v2291_v3 = vcvt.s32.f32 %v2289_v10  ;;  %v2319_v10 = vcvt.s32.f32 %v2317_v33  ;;  %v2347_v33 = vcvt.s32.f32 %v2345_v2 }
 0x40b   : > { %2489 = vmin.xlane.f32.xlu1 %v7895_v49 }
 0x478   : > { %v7899_v52 = vpop.xlane.xlu0 %2279 }
 0x479   : > { %vm2281_vm6 = vcmp.eq.f32.partialorder %v7736_v9, %v7899_v52  ;;  %v2331_v9 = vand.u32 65535, %v7768_v40 }
 0x47a   : > { %v2282_v57 = vsel %vm2281_vm6, %v2277_v60, inf }
 0x47b   : > { %2283 = vmin.xlane.f32.xlu0 %v2282_v57  ;;  %v2333_v60 = vcvt.s32.f32 %v2331_v9 }
 0x47c   : > { %v7905_v53 = vpop.xlane.xlu1 %2293  ;;  %v7908_v41 = vpop.xlane.xlu0 %2307 }
 0x47d   : > { %vm2295_vm7 = vcmp.eq.f32.partialorder %v7753_v30, %v7905_v53  ;;  %vm2309_vm8 = vcmp.eq.f32.partialorder %v7757_v16, %v7908_v41 }
 0x47e   : > { %v2296_v8 = vsel %vm2295_vm7, %v2291_v3, inf  ;;  %v2310_v58 = vsel %vm2309_vm8, %v2305_v50, inf  ;;  %v2387_v50 = vand.u32 65535, %v7810_v6  ;;  %v2415_v6 = vand.u32 65535, %v7831_v22 }
 0x47f   : > { %2297 = vmin.xlane.f32.xlu1 %v2296_v8  ;;  %2311 = vmin.xlane.f32.xlu0 %v2310_v58  ;;  %v2375_v58 = vcvt.s32.f32 %v2373_v42 }
 0x480   : > { %v7915_v57 = vpop.xlane.xlu1 %2321 }
 0x481   : > { %vm2323_vm9 = vcmp.eq.f32.partialorder %v7772_v31, %v7915_v57  ;;  %v7920_v17 = vpop.xlane.xlu0 %2335  ;;  %v2361_v31 = vcvt.s32.f32 %v2359_v21 }
 0x482   : > { %v2324_v30 = vsel %vm2323_vm9, %v2319_v10, inf  ;;  %vm2337_vm10 = vcmp.eq.f32.partialorder %v7782_v61, %v7920_v17  ;;  %v2389_v10 = vcvt.s32.f32 %v2387_v50 }
 0x483   : > { %2325 = vmin.xlane.f32.xlu1 %v2324_v30  ;;  %v2338_v16 = vsel %vm2337_vm10, %v2333_v60, inf  ;;  %v2429_v60 = vand.u32 65535, %v7850_v38  ;;  %v2457_v38 = vand.u32 65535, %v7872_v15  ;;  %v2485_v15 = vand.u32 65535, %v7888_v27 }
 0x484   : > { %2339 = vmin.xlane.f32.xlu0 %v2338_v16  ;;  %v7925_v40 = vpop.xlane.xlu1 %2349 }
 0x485   : > { %v7927_v3 = vpop.xlane.xlu0 %2363  ;;  %vm2351_vm11 = vcmp.eq.f32.partialorder %v7799_v11, %v7925_v40  ;;  %v2401_v11 = vand.u32 65535, %v7828_v55  ;;  %v2417_v55 = vcvt.s32.f32 %v2415_v6  ;;  %v7981_v6 = vmax.f32 %v7314_v47, 0.0  ;;  %v10353_v47 = vld [vmem:[#allocation6_spill] sm:$0xff] }
 0x486   : > { %v2352_v45 = vsel %vm2351_vm11, %v2347_v33, inf  ;;  %vm2365_vm12 = vcmp.eq.f32.partialorder %v7803_v25, %v7927_v3  ;;  %v2431_v33 = vcvt.s32.f32 %v2429_v60  ;;  %v10352_v60 = vld [vmem:[#allocation5_spill] sm:$0xff] }
 0x487   : > { %2353 = vmin.xlane.f32.xlu1 %v2352_v45  ;;  %v2366_v61 = vsel %vm2365_vm12, %v2361_v31, inf  ;;  %v2403_v30 = vcvt.s32.f32 %v2401_v11  ;;  %v2459_v45 = vcvt.s32.f32 %v2457_v38  ;;  %v1971_v11 = vmax.f32 %v7306_v19, 0.0  ;;  %v10356_v38 = vld [vmem:[#allocation9_spill] sm:$0xff] }
 0x488   : > { %2367 = vmin.xlane.f32.xlu0 %v2366_v61  ;;  %v7935_v8 = vpop.xlane.xlu1 %2377  ;;  %v7994_v19 = vmax.f32 %v10352_v60, 0.0  ;;  %v10359_v60 = vld [vmem:[#allocation12_spill] sm:$0xff]  ;;  %vm2003_vm11 = vcmp.eq.f32.partialorder %v7981_v6, inf  ;;  %vm2005_vm12 = vcmp.eq.f32.partialorder %v7981_v6, 0.0 }
 0x489   : > { %v7937_v9 = vpop.xlane.xlu0 %2391  ;;  %vm2379_vm13 = vcmp.eq.f32.partialorder %v7823_v43, %v7935_v8  ;;  %v2443_v43 = vand.u32 65535, %v7857_v12  ;;  %v2471_v12 = vand.u32 65535, %v7879_v20  ;;  %6478 = vrsqrt.f32 %v1971_v11 }
 0x48a   : > { %vm2393_vm14 = vcmp.eq.f32.partialorder %v7825_v56, %v7937_v9  ;;  %v2380_v25 = vsel %vm2379_vm13, %v2375_v58, inf  ;;  %vm1989_vm7 = vcmp.eq.f32.partialorder %v1971_v11, inf  ;;  %vm1991_vm8 = vcmp.eq.f32.partialorder %v1971_v11, 0.0 }
 0x48b   : > { %v2394_v39 = vsel %vm2393_vm14, %v2389_v10, inf  ;;  %2381 = vmin.xlane.f32.xlu1 %v2380_v25  ;;  %v2487_v10 = vcvt.s32.f32 %v2485_v15  ;;  %v10350_v25 = vld [vmem:[#allocation3_spill] sm:$0xff] }
 0x48c   : > { %2395 = vmin.xlane.f32.xlu0 %v2394_v39  ;;  %v7945_v2 = vpop.xlane.xlu1 %2405  ;;  %v7988_v39 = vmax.f32 %v10350_v25, 0.0 }
 0x48d   : > { %v7948_v21 = vpop.xlane.xlu0 %2419  ;;  %vm2407_vm15 = vcmp.eq.f32.partialorder %v7845_v37, %v7945_v2  ;;  %v2445_v37 = vcvt.s32.f32 %v2443_v43 }
 0x48e   : > { %v2408_v56 = vsel %vm2407_vm15, %v2403_v30, inf  ;;  %vm2421_vm1 = vcmp.eq.f32.partialorder %v7847_v0, %v7948_v21  ;;  %vm2017_vm14 = vcmp.eq.f32.partialorder %v7988_v39, inf }
 0x48f   : > { %2409 = vmin.xlane.f32.xlu1 %v2408_v56  ;;  %v2422_v22 = vsel %vm2421_vm1, %v2417_v55, inf  ;;  %v10355_v56 = vld [vmem:[#allocation8_spill] sm:$0xff] }
 0x490   : > { %2423 = vmin.xlane.f32.xlu0 %v2422_v22  ;;  %v7955_v16 = vpop.xlane.xlu1 %2433  ;;  %v8009_v22 = vmax.f32 %v10355_v56, 0.0 }
 0x491   : > { %v7958_v31 = vpop.xlane.xlu0 %2447  ;;  %vm2435_vm2 = vcmp.eq.f32.partialorder %v7867_v62, %v7955_v16  ;;  %v2473_v62 = vcvt.s32.f32 %v2471_v12 }
 0x492   : > { %10346 = vst [vmem:[#allocation45_spill] sm:$0xff] %v7958_v31  ;;  %v2436_v42 = vsel %vm2435_vm2, %v2431_v33, inf  ;;  %vm2449_vm3 = vcmp.eq.f32.partialorder %v7869_v26, %v7958_v31  ;;  %vm2019_vm2 = vcmp.eq.f32.partialorder %v7988_v39, 0.0 }
 0x493   : > { %2437 = vmin.xlane.f32.xlu1 %v2436_v42  ;;  %v2450_v0 = vsel %vm2449_vm3, %v2445_v37, inf  ;;  %v6479_v43 = vpop.eup %6478  ;;  %v8012_v37 = vmax.f32 %v10356_v38, 0.0 }
 0x494   : > { %2451 = vmin.xlane.f32.xlu0 %v2450_v0  ;;  %v7965_v50 = vpop.xlane.xlu1 %2461  ;;  %v1988_v42 = vmul.f32 %v6479_v43, %v1971_v11  ;;  %v10357_v0 = vld [vmem:[#allocation10_spill] sm:$0xff] }
 0x495   : > { %10347 = vst [vmem:[#allocation46_spill] sm:$0xff] %v7965_v50  ;;  %v7968_v61 = vpop.xlane.xlu0 %2475  ;;  %vm2463_vm4 = vcmp.eq.f32.partialorder %v7885_v36, %v7965_v50  ;;  %v1972_v36 = vmax.f32 %v7316_v48, 0.0  ;;  %v7998_v48 = vmax.f32 %v10353_v47, 0.0  ;;  %v8025_v47 = vmax.f32 %v10359_v60, 0.0 }
 0x496   : > { %10348 = vst [vmem:[#allocation47_spill] sm:$0xff] %v7968_v61  ;;  %v2464_v58 = vsel %vm2463_vm4, %v2459_v45, inf  ;;  %vm2477_vm5 = vcmp.eq.f32.partialorder %v7890_v14, %v7968_v61  ;;  %v7984_v14 = vmax.f32 %v7333_v1, 0.0  ;;  %v10354_v1 = vld [vmem:[#allocation7_spill] sm:$0xff]  ;;  %v8015_v45 = vmax.f32 %v10357_v0, 0.0 }
 0x497   : > { %2465 = vmin.xlane.f32.xlu1 %v2464_v58  ;;  %v2478_v26 = vsel %vm2477_vm5, %v2473_v62, inf  ;;  %6480 = vrsqrt.f32 %v1972_v36  ;;  %v8002_v55 = vmax.f32 %v10354_v1, 0.0  ;;  %v1990_v25 = vsel %vm1989_vm7, %v1971_v11, %v1988_v42 }
 0x498   : > { %2479 = vmin.xlane.f32.xlu0 %v2478_v26  ;;  %v7974_v20 = vpop.xlane.xlu1 %2489  ;;  %6482 = vrsqrt.f32 %v7981_v6  ;;  %v1992_v1 = vand.u32 2147483648, %v1971_v11  ;;  %vm1996_vm9 = vcmp.eq.f32.partialorder %v1972_v36, inf  ;;  %vm1998_vm10 = vcmp.eq.f32.partialorder %v1972_v36, 0.0 }
 0x499   : > { %10349 = vst [vmem:[#allocation48_spill] sm:$0xff] %v7974_v20  ;;  %vm2491_vm6 = vcmp.eq.f32.partialorder %v7895_v49, %v7974_v20  ;;  %v10351_v49 = vld [vmem:[#allocation4_spill] sm:$0xff]  ;;  %6484 = vrsqrt.f32 %v7984_v14  ;;  %v1999_v61 = vand.u32 2147483648, %v1972_v36  ;;  %vm2010_vm13 = vcmp.eq.f32.partialorder %v7984_v14, inf }
 0x49a   : > { %v2492_v27 = vsel %vm2491_vm6, %v2487_v10, inf  ;;  %v7991_v30 = vmax.f32 %v10351_v49, 0.0  ;;  %6486 = vrsqrt.f32 %v7988_v39  ;;  %v10358_v10 = vld [vmem:[#allocation11_spill] sm:$0xff]  ;;  %v1993_v20 = vsel %vm1991_vm8, %v1992_v1, %v1990_v25 }
 0x49b   : > { %2493 = vmin.xlane.f32.xlu1 %v2492_v27  ;;  %v8022_v27 = vmax.f32 %v10358_v10, 0.0  ;;  %v10361_v10 = vld [vmem:[#allocation14_spill] sm:$0xff]  ;;  %vm2012_vm1 = vcmp.eq.f32.partialorder %v7984_v14, 0.0  ;;  %vm2031_vm4 = vcmp.eq.f32.partialorder %v7994_v19, inf  ;;  %vm2033_vm5 = vcmp.eq.f32.partialorder %v7994_v19, 0.0 }
 0x49c   : > { %6488 = vrsqrt.f32 %v7991_v30  ;;  %v8033_v42 = vmax.f32 %v10361_v10, 0.0  ;;  %vm2024_vm15 = vcmp.eq.f32.partialorder %v7991_v30, inf  ;;  %vm2026_vm3 = vcmp.eq.f32.partialorder %v7991_v30, 0.0 }
 0x49d   : > { %6490 = vrsqrt.f32 %v7994_v19  ;;  %vm2038_vm6 = vcmp.eq.f32.partialorder %v7998_v48, inf  ;;  %vm2045_vm7 = vcmp.eq.f32.partialorder %v8002_v55, inf  ;;  %vm2040_vm8 = vcmp.eq.f32.partialorder %v7998_v48, 0.0 }
 0x49e   : > { %6492 = vrsqrt.f32 %v7998_v48 }
 0x49f   : > { %6494 = vrsqrt.f32 %v8002_v55 }
 0x4a0   : > { %6496 = vrsqrt.f32 %v8009_v22 }
 0x4a1   : > { %v6481_v33 = vpop.eup %6480  ;;  %6498 = vrsqrt.f32 %v8012_v37 }
 0x4a2   : > { %v6483_v12 = vpop.eup %6482  ;;  %v1995_v15 = vmul.f32 %v6481_v33, %v1972_v36  ;;  %6500 = vrsqrt.f32 %v8015_v45  ;;  %v10360_v33 = vld [vmem:[#allocation13_spill] sm:$0xff] }
 0x4a3   : > { %v6485_v62 = vpop.eup %6484  ;;  %v2002_v58 = vmul.f32 %v6483_v12, %v7981_v6  ;;  %v8029_v38 = vmax.f32 %v10360_v33, 0.0  ;;  %6502 = vrsqrt.f32 %v8022_v27 }
 0x4a4   : > { %v6487_v26 = vpop.eup %6486  ;;  %v2009_v56 = vmul.f32 %v6485_v62, %v7984_v14  ;;  %v1997_v12 = vsel %vm1996_vm9, %v1972_v36, %v1995_v15  ;;  %v2006_v62 = vand.u32 2147483648, %v7981_v6  ;;  %6504 = vrsqrt.f32 %v8025_v47 }
 0x4a5   : > { %v2004_v60 = vsel %vm2003_vm11, %v7981_v6, %v2002_v58  ;;  %v2016_v50 = vmul.f32 %v6487_v26, %v7988_v39  ;;  %v2000_v33 = vsel %vm1998_vm10, %v1999_v61, %v1997_v12  ;;  %6506 = vrsqrt.f32 %v8029_v38 }
 0x4a6   : > { %v6489_v49 = vpop.eup %6488  ;;  %v2099_v58 = vadd.f32 1e-07, %v1993_v20  ;;  %v2007_v26 = vsel %vm2005_vm12, %v2006_v62, %v2004_v60  ;;  %6508 = vrsqrt.f32 %v8033_v42  ;;  %v2011_v61 = vsel %vm2010_vm13, %v7984_v14, %v2009_v56 }
 0x4a7   : > { %v6491_v43 = vpop.eup %6490  ;;  %v2023_v31 = vmul.f32 %v6489_v49, %v7991_v30  ;;  %v2018_v36 = vsel %vm2017_vm14, %v7988_v39, %v2016_v50  ;;  %v2101_v12 = vadd.f32 1e-07, %v2007_v26  ;;  %v2013_v20 = vand.u32 2147483648, %v7984_v14 }
 0x4a8   : > { %v6493_v0 = vpop.eup %6492  ;;  %v2030_v15 = vmul.f32 %v6491_v43, %v7994_v19  ;;  %v2100_v43 = vadd.f32 1e-07, %v2000_v33  ;;  %6510 = vrcp.f32 %v2099_v58  ;;  %v2027_v56 = vand.u32 2147483648, %v7991_v30 }
 0x4a9   : > { %v6495_v11 = vpop.eup %6494  ;;  %v2037_v25 = vmul.f32 %v6493_v0, %v7998_v48  ;;  %v2020_v0 = vand.u32 2147483648, %v7988_v39  ;;  %v2025_v10 = vsel %vm2024_vm15, %v7991_v30, %v2023_v31  ;;  %v2034_v39 = vand.u32 2147483648, %v7994_v19 }
 0x4aa   : > { %v2044_v49 = vmul.f32 %v6495_v11, %v8002_v55  ;;  %v6497_v1 = vpop.eup %6496  ;;  %v2014_v11 = vsel %vm2012_vm1, %v2013_v20, %v2011_v61  ;;  %6512 = vrcp.f32 %v2100_v43  ;;  %v2028_v33 = vsel %vm2026_vm3, %v2027_v56, %v2025_v10 }
 0x4ab   : > { %v6499_v6 = vpop.eup %6498  ;;  %v2021_v50 = vsel %vm2019_vm2, %v2020_v0, %v2018_v36  ;;  %v2051_v62 = vmul.f32 %v6497_v1, %v8009_v22  ;;  %v2032_v31 = vsel %vm2031_vm4, %v7994_v19, %v2030_v15  ;;  %6514 = vrcp.f32 %v2101_v12 }
 0x4ac   : > { %v6501_v60 = vpop.eup %6500  ;;  %v2058_v58 = vmul.f32 %v6499_v6, %v8012_v37  ;;  %v2102_v61 = vadd.f32 1e-07, %v2014_v11  ;;  %v2103_v36 = vadd.f32 1e-07, %v2021_v50  ;;  %v2104_v1 = vadd.f32 1e-07, %v2028_v33 }
 0x4ad   : > { %v2065_v14 = vmul.f32 %v6501_v60, %v8015_v45  ;;  %v6503_v26 = vpop.eup %6502  ;;  %v2035_v43 = vsel %vm2033_vm5, %v2034_v39, %v2032_v31  ;;  %v2039_v20 = vsel %vm2038_vm6, %v7998_v48, %v2037_v25  ;;  %v2041_v6 = vand.u32 2147483648, %v7998_v48 }
 0x4ae   : > { %v6505_v30 = vpop.eup %6504  ;;  %v2046_v12 = vsel %vm2045_vm7, %v8002_v55, %v2044_v49  ;;  %vm2052_vm9 = vcmp.eq.f32.partialorder %v8009_v22, inf  ;;  %vm2047_vm10 = vcmp.eq.f32.partialorder %v8002_v55, 0.0  ;;  %v2048_v19 = vand.u32 2147483648, %v8002_v55 }
 0x4af   : > { %v6507_v15 = vpop.eup %6506  ;;  %v2053_v10 = vsel %vm2052_vm9, %v8009_v22, %v2051_v62  ;;  %vm2059_vm11 = vcmp.eq.f32.partialorder %v8012_v37, inf  ;;  %v2042_v25 = vsel %vm2040_vm8, %v2041_v6, %v2039_v20  ;;  %v2055_v60 = vand.u32 2147483648, %v8009_v22 }
 0x4b0   : > { %v6509_v0 = vpop.eup %6508  ;;  %v2060_v56 = vsel %vm2059_vm11, %v8012_v37, %v2058_v58  ;;  %vm2066_vm12 = vcmp.eq.f32.partialorder %v8015_v45, inf  ;;  %v2049_v48 = vsel %vm2047_vm10, %v2048_v19, %v2046_v12  ;;  %vm2054_vm13 = vcmp.eq.f32.partialorder %v8009_v22, 0.0 }
 0x4b1   : > { %v2062_v49 = vand.u32 2147483648, %v8012_v37  ;;  %v2067_v11 = vsel %vm2066_vm12, %v8015_v45, %v2065_v14  ;;  %v2105_v55 = vadd.f32 1e-07, %v2035_v43  ;;  %v2056_v62 = vsel %vm2054_vm13, %v2055_v60, %v2053_v10 }
 0x4b2   : > { %v8084_v50 = vpop.eup %6510  ;;  %vm2061_vm14 = vcmp.eq.f32.partialorder %v8012_v37, 0.0  ;;  %v2069_v33 = vand.u32 2147483648, %v8015_v45  ;;  %6516 = vrcp.f32 %v2102_v61  ;;  %v2106_v31 = vadd.f32 1e-07, %v2042_v25 }
 0x4b3   : > { %v2063_v58 = vsel %vm2061_vm14, %v2062_v49, %v2060_v56  ;;  %vm2068_vm15 = vcmp.eq.f32.partialorder %v8015_v45, 0.0  ;;  %6518 = vrcp.f32 %v2103_v36  ;;  %v2107_v22 = vadd.f32 1e-07, %v2049_v48 }
 0x4b4   : > { %v8089_v39 = vpop.eup %6512  ;;  %v2070_v20 = vsel %vm2068_vm15, %v2069_v33, %v2067_v11  ;;  %6520 = vrcp.f32 %v2104_v1  ;;  %v2108_v14 = vadd.f32 1e-07, %v2056_v62  ;;  %v2072_v43 = vmul.f32 %v6503_v26, %v8022_v27 }
 0x4b5   : > { %v8091_v6 = vpop.eup %6514  ;;  %6522 = vrcp.f32 %v2105_v55  ;;  %v2109_v37 = vadd.f32 1e-07, %v2063_v58  ;;  %v2110_v12 = vadd.f32 1e-07, %v2070_v20  ;;  %v2079_v61 = vmul.f32 %v6505_v30, %v8025_v47 }
 0x4b6   : > { %6524 = vrcp.f32 %v2106_v31  ;;  %v2086_v19 = vmul.f32 %v6507_v15, %v8029_v38  ;;  %v8097_v45 = vmax.f32 %v7722_v4, 0.0  ;;  %v2093_v36 = vmul.f32 %v6509_v0, %v8033_v42 }
 0x4b7   : > { %6526 = vrcp.f32 %v2107_v22  ;;  %vm2073_vm1 = vcmp.eq.f32.partialorder %v8022_v27, inf  ;;  %v8102_v1 = vmax.f32 %v7730_v23, 0.0  ;;  %vm2075_vm2 = vcmp.eq.f32.partialorder %v8022_v27, 0.0 }
 0x4b8   : > { %6528 = vrcp.f32 %v2108_v14  ;;  %v2074_v26 = vsel %vm2073_vm1, %v8022_v27, %v2072_v43  ;;  %v8107_v30 = vmax.f32 %v7734_v5, 0.0  ;;  %v2076_v4 = vand.u32 2147483648, %v8022_v27 }
 0x4b9   : > { %6530 = vrcp.f32 %v2109_v37  ;;  %vm2080_vm3 = vcmp.eq.f32.partialorder %v8025_v47, inf  ;;  %v8112_v15 = vmax.f32 %v7748_v34, 0.0  ;;  %vm2082_vm4 = vcmp.eq.f32.partialorder %v8025_v47, 0.0 }
 0x4ba   : > { %6532 = vrcp.f32 %v2110_v12  ;;  %v2081_v0 = vsel %vm2080_vm3, %v8025_v47, %v2079_v61  ;;  %v8118_v23 = vmax.f32 %v7755_v35, 0.0  ;;  %v2077_v5 = vsel %vm2075_vm2, %v2076_v4, %v2074_v26 }
 0x4bb   : > { %6534 = vrsqrt.f32 %v8097_v45  ;;  %vm2087_vm5 = vcmp.eq.f32.partialorder %v8029_v38, inf  ;;  %v8125_v27 = vmax.f32 %v7770_v51, 0.0  ;;  %v2083_v25 = vand.u32 2147483648, %v8025_v47 }
 0x4bc   : > { %v8120_v10 = vpop.eup %6516  ;;  %6536 = vrsqrt.f32 %v8102_v1  ;;  %v2088_v60 = vsel %vm2087_vm5, %v8029_v38, %v2086_v19  ;;  %v8133_v35 = vmax.f32 %v7777_v46, 0.0  ;;  %vm2089_vm6 = vcmp.eq.f32.partialorder %v8029_v38, 0.0 }
 0x4bd   : > { %v8127_v34 = vpop.eup %6518  ;;  %6538 = vrsqrt.f32 %v8107_v30  ;;  %vm2094_vm7 = vcmp.eq.f32.partialorder %v8033_v42, inf  ;;  %v8141_v51 = vmax.f32 %v7792_v63, 0.0  ;;  %v2090_v49 = vand.u32 2147483648, %v8029_v38 }
 0x4be   : > { %v8135_v56 = vpop.eup %6520  ;;  %6540 = vrsqrt.f32 %v8112_v15  ;;  %v2095_v11 = vsel %vm2094_vm7, %v8033_v42, %v2093_v36  ;;  %v8149_v46 = vmax.f32 %v7797_v29, 0.0  ;;  %v2084_v62 = vsel %vm2082_vm4, %v2083_v25, %v2081_v0 }
 0x4bf   : > { %v8143_v48 = vpop.eup %6522  ;;  %6542 = vrsqrt.f32 %v8118_v23  ;;  %v2097_v33 = vand.u32 2147483648, %v8033_v42  ;;  %v8158_v63 = vmax.f32 %v7813_v24, 0.0  ;;  %v2091_v31 = vsel %vm2089_vm6, %v2090_v49, %v2088_v60 }
 0x4c0   : > { %v8151_v55 = vpop.eup %6524  ;;  %6544 = vrsqrt.f32 %v8125_v27  ;;  %vm2096_vm8 = vcmp.eq.f32.partialorder %v8033_v42, 0.0  ;;  %v8165_v29 = vmax.f32 %v7819_v13, 0.0  ;;  %v2111_v47 = vadd.f32 1e-07, %v2077_v5 }
 0x4c1   : > { %v8160_v38 = vpop.eup %6526  ;;  %6546 = vrsqrt.f32 %v8133_v35  ;;  %v2098_v22 = vsel %vm2096_vm8, %v2097_v33, %v2095_v11  ;;  %v2112_v24 = vadd.f32 1e-07, %v2084_v62  ;;  %v2113_v43 = vadd.f32 1e-07, %v2091_v31 }
 0x4c2   : > { %v8167_v58 = vpop.eup %6528  ;;  %6548 = vrsqrt.f32 %v8141_v51  ;;  %v2114_v37 = vadd.f32 1e-07, %v2098_v22  ;;  %v8178_v12 = vmax.f32 %v7835_v28, 0.0  ;;  %v8181_v19 = vmax.f32 %v7841_v59, 0.0 }
 0x4c3   : > { %v8170_v20 = vpop.eup %6530  ;;  %6550 = vrsqrt.f32 %v8149_v46  ;;  %v8185_v4 = vmul.f32 %v8084_v50, %v7571_v54  ;;  %v8190_v28 = vmul.f32 %v8089_v39, %v7581_v32  ;;  %v8194_v25 = vmul.f32 %v8091_v6, %v7584_v44 }
 0x4c4   : > { %v8173_v14 = vpop.eup %6532  ;;  %6552 = vrsqrt.f32 %v8158_v63  ;;  %v8200_v54 = vmax.f32 %v7853_v18, 0.0  ;;  %vm2565_vm9 = vcmp.eq.f32.partialorder %v8097_v45, inf  ;;  %vm2567_vm10 = vcmp.eq.f32.partialorder %v8097_v45, 0.0 }
 0x4c5   : > { %v6535_v42 = vpop.eup %6534  ;;  %6554 = vrsqrt.f32 %v8165_v29  ;;  %v8206_v44 = vmax.f32 %v7862_v7, 0.0  ;;  %v2568_v39 = vand.u32 2147483648, %v8097_v45  ;;  %vm2572_vm11 = vcmp.eq.f32.partialorder %v8102_v1, inf  ;;  %v10362_v7 = vld [vmem:[#allocation44_spill] sm:$0xff] }
 0x4c6   : > { %v6537_v13 = vpop.eup %6536  ;;  %6556 = vrcp.f32 %v2111_v47  ;;  %v2564_v0 = vmul.f32 %v6535_v42, %v8097_v45  ;;  %vm2574_vm12 = vcmp.eq.f32.partialorder %v8102_v1, 0.0  ;;  %v2575_v18 = vand.u32 2147483648, %v8102_v1 }
 0x4c7   : > { %v6539_v61 = vpop.eup %6538  ;;  %6558 = vrcp.f32 %v2112_v24  ;;  %v2571_v59 = vmul.f32 %v6537_v13, %v8102_v1  ;;  %vm2579_vm13 = vcmp.eq.f32.partialorder %v8107_v30, inf  ;;  %v8217_v31 = vmax.f32 %v10362_v7, 0.0 }
 0x4c8   : > { %v6541_v36 = vpop.eup %6540  ;;  %6560 = vrcp.f32 %v2113_v43  ;;  %v2578_v50 = vmul.f32 %v6539_v61, %v8107_v30  ;;  %v2566_v49 = vsel %vm2565_vm9, %v8097_v45, %v2564_v0  ;;  %vm2586_vm14 = vcmp.eq.f32.partialorder %v8112_v15, inf }
 0x4c9   : > { %v6543_v26 = vpop.eup %6542  ;;  %6562 = vrcp.f32 %v2114_v37  ;;  %v2585_v62 = vmul.f32 %v6541_v36, %v8112_v15  ;;  %v2573_v47 = vsel %vm2572_vm11, %v8102_v1, %v2571_v59  ;;  %v2569_v61 = vsel %vm2567_vm10, %v2568_v39, %v2566_v49 }
 0x4ca   : > { %v6545_v5 = vpop.eup %6544  ;;  %6564 = vrsqrt.f32 %v8178_v12  ;;  %v2592_v33 = vmul.f32 %v6543_v26, %v8118_v23  ;;  %v2580_v36 = vsel %vm2579_vm13, %v8107_v30, %v2578_v50  ;;  %v2582_v59 = vand.u32 2147483648, %v8107_v30 }
 0x4cb   : > { %v6547_v60 = vpop.eup %6546  ;;  %6566 = vrsqrt.f32 %v8181_v19  ;;  %v2599_v24 = vmul.f32 %v6545_v5, %v8125_v27  ;;  %v2576_v5 = vsel %vm2574_vm12, %v2575_v18, %v2573_v47  ;;  %vm2581_vm15 = vcmp.eq.f32.partialorder %v8107_v30, 0.0 }
 0x4cc   : > { %v6549_v32 = vpop.eup %6548  ;;  %v2606_v43 = vmul.f32 %v6547_v60, %v8133_v35  ;;  %6568 = vrsqrt.f32 %v8200_v54  ;;  %v2587_v45 = vsel %vm2586_vm14, %v8112_v15, %v2585_v62  ;;  %v2675_v39 = vadd.f32 1e-07, %v2569_v61 }
 0x4cd   : > { %v6551_v6 = vpop.eup %6550  ;;  %v2613_v42 = vmul.f32 %v6549_v32, %v8141_v51  ;;  %6570 = vrsqrt.f32 %v8206_v44  ;;  %v2583_v1 = vsel %vm2581_vm15, %v2582_v59, %v2580_v36  ;;  %vm2593_vm1 = vcmp.eq.f32.partialorder %v8118_v23, inf }
 0x4ce   : > { %v6553_v11 = vpop.eup %6552  ;;  %v2620_v13 = vmul.f32 %v6551_v6, %v8149_v46  ;;  %6572 = vrsqrt.f32 %v8217_v31  ;;  %v2589_v6 = vand.u32 2147483648, %v8112_v15  ;;  %v2676_v18 = vadd.f32 1e-07, %v2576_v5 }
 0x4cf   : > { %v6555_v22 = vpop.eup %6554  ;;  %v2627_v0 = vmul.f32 %v6553_v11, %v8158_v63  ;;  %vm2588_vm2 = vcmp.eq.f32.partialorder %v8112_v15, 0.0  ;;  %v2594_v11 = vsel %vm2593_vm1, %v8118_v23, %v2592_v33  ;;  %vm2600_vm3 = vcmp.eq.f32.partialorder %v8125_v27, inf }
 0x4d0   : > { %v8224_v37 = vpop.eup %6556  ;;  %v8241_v32 = vmul.f32 %v6555_v22, %v8165_v29  ;;  %v2590_v30 = vsel %vm2588_vm2, %v2589_v6, %v2587_v45  ;;  %v2596_v62 = vand.u32 2147483648, %v8118_v23  ;;  %v2601_v47 = vsel %vm2600_vm3, %v8125_v27, %v2599_v24 }
 0x4d1   : > { %v8231_v26 = vpop.eup %6558  ;;  %vm2607_vm4 = vcmp.eq.f32.partialorder %v8133_v35, inf  ;;  %v2677_v22 = vadd.f32 1e-07, %v2583_v1  ;;  %vm2595_vm5 = vcmp.eq.f32.partialorder %v8118_v23, 0.0  ;;  %v2603_v61 = vand.u32 2147483648, %v8125_v27 }
 0x4d2   : > { %v8238_v60 = vpop.eup %6560  ;;  %v2608_v36 = vsel %vm2607_vm4, %v8133_v35, %v2606_v43  ;;  %v2597_v33 = vsel %vm2595_vm5, %v2596_v62, %v2594_v11  ;;  %vm2602_vm6 = vcmp.eq.f32.partialorder %v8125_v27, 0.0  ;;  %v2610_v5 = vand.u32 2147483648, %v8133_v35 }
 0x4d3   : > { %v8246_v50 = vpop.eup %6562  ;;  %6574 = vrcp.f32 %v2675_v39  ;;  %v2604_v24 = vsel %vm2602_vm6, %v2603_v61, %v2601_v47  ;;  %vm2609_vm7 = vcmp.eq.f32.partialorder %v8133_v35, 0.0  ;;  %v2678_v23 = vadd.f32 1e-07, %v2590_v30 }
 0x4d4   : > { %v6565_v49 = vpop.eup %6564  ;;  %6576 = vrcp.f32 %v2676_v18  ;;  %v2611_v1 = vsel %vm2609_vm7, %v2610_v5, %v2608_v36  ;;  %vm2614_vm8 = vcmp.eq.f32.partialorder %v8141_v51, inf  ;;  %v2679_v6 = vadd.f32 1e-07, %v2597_v33 }
 0x4d5   : > { %v6567_v7 = vpop.eup %6566  ;;  %v2641_v15 = vmul.f32 %v6565_v49, %v8178_v12  ;;  %6578 = vrcp.f32 %v2677_v22  ;;  %v2615_v49 = vsel %vm2614_vm8, %v8141_v51, %v2613_v42  ;;  %vm2621_vm9 = vcmp.eq.f32.partialorder %v8149_v46, inf }
 0x4d6   : > { %v2648_v59 = vmul.f32 %v6567_v7, %v8181_v19  ;;  %v6569_v45 = vpop.eup %6568  ;;  %v2680_v27 = vadd.f32 1e-07, %v2604_v24  ;;  %v2617_v11 = vand.u32 2147483648, %v8141_v51  ;;  %v2622_v39 = vsel %vm2621_vm9, %v8149_v46, %v2620_v13 }
 0x4d7   : > { %v6571_v43 = vpop.eup %6570  ;;  %vm2628_vm10 = vcmp.eq.f32.partialorder %v8158_v63, inf  ;;  %v2681_v18 = vadd.f32 1e-07, %v2611_v1  ;;  %vm2616_vm11 = vcmp.eq.f32.partialorder %v8141_v51, 0.0  ;;  %v2624_v7 = vand.u32 2147483648, %v8149_v46 }
 0x4d8   : > { %v6573_v35 = vpop.eup %6572  ;;  %v2629_v30 = vsel %vm2628_vm10, %v8158_v63, %v2627_v0  ;;  %6580 = vrcp.f32 %v2678_v23  ;;  %v2618_v62 = vsel %vm2616_vm11, %v2617_v11, %v2615_v49  ;;  %vm2623_vm12 = vcmp.eq.f32.partialorder %v8149_v46, 0.0 }
 0x4d9   : > { %v2631_v42 = vand.u32 2147483648, %v8158_v63  ;;  %v2655_v47 = vmul.f32 %v6569_v45, %v8200_v54  ;;  %6582 = vrcp.f32 %v2679_v6  ;;  %v2625_v13 = vsel %vm2623_vm12, %v2624_v7, %v2622_v39 }
 0x4da   : > { %vm2630_vm13 = vcmp.eq.f32.partialorder %v8158_v63, 0.0  ;;  %v2662_v22 = vmul.f32 %v6571_v43, %v8206_v44  ;;  %6584 = vrcp.f32 %v2680_v27  ;;  %vm2635_vm14 = vcmp.eq.f32.partialorder %v8165_v29, inf }
 0x4db   : > { %v2632_v51 = vsel %vm2630_vm13, %v2631_v42, %v2629_v30  ;;  %v2669_v0 = vmul.f32 %v6573_v35, %v8217_v31  ;;  %6586 = vrcp.f32 %v2681_v18  ;;  %v2682_v61 = vadd.f32 1e-07, %v2618_v62  ;;  %v10363_v42 = vld [vmem:[#allocation18_spill] sm:$0xff] }
 0x4dc   : > { %v2636_v46 = vsel %vm2635_vm14, %v8165_v29, %v8241_v32  ;;  %v2683_v36 = vadd.f32 1e-07, %v2625_v13  ;;  %vm2637_vm15 = vcmp.eq.f32.partialorder %v8165_v29, 0.0  ;;  %v2638_v33 = vand.u32 2147483648, %v8165_v29 }
 0x4dd   : > { %vm2642_vm1 = vcmp.eq.f32.partialorder %v8178_v12, inf  ;;  %v8285_v63 = vpop.eup %6574  ;;  %v2684_v5 = vadd.f32 1e-07, %v2632_v51  ;;  %vm2644_vm2 = vcmp.eq.f32.partialorder %v8178_v12, 0.0  ;;  %vm2649_vm3 = vcmp.eq.f32.partialorder %v8181_v19, inf }
 0x4de   : > { %v2643_v24 = vsel %vm2642_vm1, %v8178_v12, %v2641_v15  ;;  %v8290_v45 = vpop.eup %6576  ;;  %v2639_v23 = vsel %vm2637_vm15, %v2638_v33, %v2636_v46  ;;  %v2645_v32 = vand.u32 2147483648, %v8178_v12  ;;  %v2650_v1 = vsel %vm2649_vm3, %v8181_v19, %v2648_v59  ;;  %v10366_v33 = vld [vmem:[#allocation23_spill] sm:$0xff] }
 0x4df   : > { %vm2656_vm4 = vcmp.eq.f32.partialorder %v8200_v54, inf  ;;  %v8295_v29 = vpop.eup %6578  ;;  %vm2651_vm5 = vcmp.eq.f32.partialorder %v8181_v19, 0.0  ;;  %v2652_v43 = vand.u32 2147483648, %v8181_v19  ;;  %vm2663_vm6 = vcmp.eq.f32.partialorder %v8206_v44, inf }
 0x4e0   : > { %v2657_v15 = vsel %vm2656_vm4, %v8200_v54, %v2655_v47  ;;  %v2646_v6 = vsel %vm2644_vm2, %v2645_v32, %v2643_v24  ;;  %v2659_v49 = vand.u32 2147483648, %v8200_v54  ;;  %v2664_v27 = vsel %vm2663_vm6, %v8206_v44, %v2662_v22 }
 0x4e1   : > { %vm2670_vm7 = vcmp.eq.f32.partialorder %v8217_v31, inf  ;;  %v2653_v12 = vsel %vm2651_vm5, %v2652_v43, %v2650_v1  ;;  %vm2658_vm8 = vcmp.eq.f32.partialorder %v8200_v54, 0.0  ;;  %v2666_v59 = vand.u32 2147483648, %v8206_v44 }
 0x4e2   : > { %v2671_v11 = vsel %vm2670_vm7, %v8217_v31, %v2669_v0  ;;  %v8307_v39 = vpop.eup %6580  ;;  %v2685_v19 = vadd.f32 1e-07, %v2639_v23  ;;  %v2660_v35 = vsel %vm2658_vm8, %v2659_v49, %v2657_v15  ;;  %vm2665_vm9 = vcmp.eq.f32.partialorder %v8206_v44, 0.0  ;;  %v10364_v44 = vld [vmem:[#allocation20_spill] sm:$0xff]  ;;  %v10367_v23 = vld [vmem:[#allocation26_spill] sm:$0xff] }
 0x4e3   : > { %v2673_v18 = vand.u32 2147483648, %v8217_v31  ;;  %v8311_v7 = vpop.eup %6582  ;;  %6588 = vrcp.f32 %v2682_v61  ;;  %v2686_v30 = vadd.f32 1e-07, %v2646_v6  ;;  %v2667_v62 = vsel %vm2665_vm9, %v2666_v59, %v2664_v27  ;;  %v10365_v61 = vld [vmem:[#allocation22_spill] sm:$0xff] }
 0x4e4   : > { %vm2672_vm10 = vcmp.eq.f32.partialorder %v8217_v31, 0.0  ;;  %v8314_v54 = vpop.eup %6584  ;;  %v8318_v47 = vmul.f32 %v8120_v10, %v10363_v42  ;;  %6590 = vrcp.f32 %v2683_v36  ;;  %v2687_v13 = vadd.f32 1e-07, %v2653_v12 }
 0x4e5   : > { %v2674_v22 = vsel %vm2672_vm10, %v2673_v18, %v2671_v11  ;;  %v8320_v51 = vpop.eup %6586  ;;  %v8324_v0 = vmul.f32 %v8127_v34, %v10364_v44  ;;  %v8328_v46 = vmul.f32 %v8135_v56, %v10365_v61  ;;  %6592 = vrcp.f32 %v2684_v5  ;;  %v10368_v34 = vld [vmem:[#allocation27_spill] sm:$0xff]  ;;  %v10369_v5 = vld [vmem:[#allocation30_spill] sm:$0xff] }
 0x4e6   : > { %v2688_v31 = vadd.f32 1e-07, %v2660_v35  ;;  %v8332_v24 = vmul.f32 %v8143_v48, %v10366_v33  ;;  %v2286_v10 = vcvt.f32.s32 %v7899_v52  ;;  %6594 = vrcp.f32 %v2685_v19  ;;  %v10373_v61 = vld [vmem:[#allocation2_spill] sm:$0xff] }
 0x4e7   : > { %v2689_v36 = vadd.f32 1e-07, %v2667_v62  ;;  %v8337_v32 = vmul.f32 %v8151_v55, %v10367_v23  ;;  %v8341_v1 = vmul.f32 %v8160_v38, %v10368_v34  ;;  %6596 = vrcp.f32 %v2686_v30 }
 0x4e8   : > { %v2690_v56 = vadd.f32 1e-07, %v2674_v22  ;;  %v8345_v43 = vmul.f32 %v8167_v58, %v10369_v5  ;;  %v2300_v48 = vcvt.f32.s32 %v7905_v53  ;;  %v2314_v52 = vcvt.f32.s32 %v7908_v41  ;;  %v10370_v58 = vld [vmem:[#allocation31_spill] sm:$0xff]  ;;  %v10371_v53 = vld [vmem:[#allocation34_spill] sm:$0xff] }
 0x4e9   : > { %6598 = vrcp.f32 %v2687_v13  ;;  %v2328_v15 = vcvt.f32.s32 %v7915_v57  ;;  %v2342_v55 = vcvt.f32.s32 %v7920_v17  ;;  %v2356_v6 = vcvt.f32.s32 %v7925_v40  ;;  %v10372_v57 = vld [vmem:[#allocation35_spill] sm:$0xff] }
 0x4ea   : > { %6600 = vrcp.f32 %v2688_v31  ;;  %v2287_v38 = vshll.u32 %v2286_v10, 16  ;;  %v2370_v27 = vcvt.f32.s32 %v7927_v3  ;;  %v8355_v59 = vmul.f32 %v8170_v20, %v10370_v58 }
 0x4eb   : > { %6602 = vrcp.f32 %v2689_v36  ;;  %v8359_v41 = vmul.f32 %v8173_v14, %v10371_v53  ;;  %v8363_v17 = vmul.f32 %v8224_v37, %v10372_v57  ;;  %v2301_v40 = vshll.u32 %v2300_v48, 16 }
 0x4ec   : > { %6604 = vrcp.f32 %v2690_v56  ;;  %v2315_v11 = vshll.u32 %v2314_v52, 16  ;;  %v2384_v19 = vcvt.f32.s32 %v7935_v8  ;;  %v2329_v18 = vshll.u32 %v2328_v15, 16  ;;  %v10375_v52 = vld [vmem:[#allocation45_spill] sm:$0xff] }
 0x4ed   : > { %v8366_v35 = vpop.eup %6588  ;;  %v2343_v30 = vshll.u32 %v2342_v55, 16  ;;  %v8368_v20 = vshll.u32 %v2356_v6, 16  ;;  %v2398_v62 = vcvt.f32.s32 %v7937_v9  ;;  %v8373_v13 = vshll.u32 %v2370_v27, 16 }
 0x4ee   : > { %v8371_v42 = vpop.eup %6590  ;;  %v2412_v37 = vcvt.f32.s32 %v7945_v2  ;;  %v2426_v31 = vcvt.f32.s32 %v7948_v21  ;;  %v2440_v33 = vcvt.f32.s32 %v7955_v16  ;;  %v10374_v36 = vmov 0.0   ;;  %v10376_v16 = vld [vmem:[#allocation15_spill] sm:$0xff] }
 0x4ef   : > { %v8377_v8 = vpop.eup %6592  ;;  %v8384_v34 = vshll.u32 %v2384_v19, 16  ;;  %v8389_v48 = vshll.u32 %v2398_v62, 16  ;;  %v2454_v15 = vcvt.f32.s32 %v10375_v52 }
 0x4f0   : > { %v8382_v23 = vpop.eup %6594  ;;  %v8406_v58 = vshll.u32 %v2426_v31, 16  ;;  %v8408_v53 = vshll.u32 %v2440_v33, 16 }
 0x4f1   : > { %v8387_v5 = vpop.eup %6596 }
 0x508   : > { %v2284_v49 = vpop.xlane.xlu0 %2283 }
 0x509   : > { %v2285_v12 = vcvt.f32.s32 %v2284_v49  ;;  %v8395_v49 = vpop.eup %6598 }
 0x50b   : > { %v2288_v3 = vadd.s32 %v2287_v38, %v2285_v12  ;;  %v8397_v38 = vshll.u32 %v2412_v37, 16  ;;  %v8404_v12 = vpop.eup %6600  ;;  %v10377_v37 = vld [vmem:[#allocation46_spill] sm:$0xff] }
 0x50c   : > { %v2298_v14 = vpop.xlane.xlu1 %2297  ;;  %v2312_v44 = vpop.xlane.xlu0 %2311 }
 0x50d   : > { %v2299_v22 = vcvt.f32.s32 %v2298_v14  ;;  %vm2499_vm11 = vcmp.eq.s32.totalorder %v10373_v61, %v2288_v3  ;;  %v2313_v10 = vcvt.f32.s32 %v2312_v44  ;;  %v8417_v14 = vshll.u32 %v2454_v15, 16  ;;  %v10378_v44 = vld [vmem:[#allocation16_spill] sm:$0xff] }
 0x50e   : > { %v5545_v9 = vsel %vm2499_vm11, 1.0, %v10374_v36 }
 0x50f   : > { %v2302_v56 = vadd.s32 %v2301_v40, %v2299_v22  ;;  %vm2755_vm12 = vcmp.gt.f32.partialorder %v5545_v9, 0.0  ;;  %v2723_v2 = vmul.f32 %v8285_v63, %v5545_v9  ;;  %v2316_v21 = vadd.s32 %v2315_v11, %v2313_v10  ;;  %v8412_v11 = vpop.eup %6602 }
 0x510   : > { %v2326_v55 = vpop.xlane.xlu1 %2325  ;;  %v8393_v6 = vsel %vm2755_vm12, 1e+30, %v10376_v16  ;;  %v8415_v62 = vpop.eup %6604  ;;  %v2468_v22 = vcvt.f32.s32 %v10377_v37 }
 0x511   : > { %v2327_v27 = vcvt.f32.s32 %v2326_v55  ;;  %2787 = vmin.xlane.f32.xlu0 %v8393_v6  ;;  %v8401_v63 = vadd.f32 %v2723_v2, %v8185_v4  ;;  %vm2500_vm13 = vcmp.eq.s32.totalorder %v10373_v61, %v2302_v56  ;;  %v2340_v57 = vpop.xlane.xlu0 %2339  ;;  %vm2501_vm14 = vcmp.eq.s32.totalorder %v10373_v61, %v2316_v21  ;;  %v10379_v56 = vld [vmem:[#allocation47_spill] sm:$0xff]  ;;  %v10380_v21 = vld [vmem:[#allocation17_spill] sm:$0xff] }
 0x512   : > { %v5546_v40 = vsel %vm2500_vm13, 1.0, %v10374_v36  ;;  %v2341_v3 = vcvt.f32.s32 %v2340_v57  ;;  %v5547_v33 = vsel %vm2501_vm14, 1.0, %v10374_v36  ;;  %v2482_v2 = vcvt.f32.s32 %v10379_v56 }
 0x513   : > { %v2330_v19 = vadd.s32 %v2329_v18, %v2327_v27  ;;  %vm2756_vm15 = vcmp.gt.f32.partialorder %v5546_v40, 0.0  ;;  %v2724_v4 = vmul.f32 %v8290_v45, %v5546_v40  ;;  %vm2757_vm1 = vcmp.gt.f32.partialorder %v5547_v33, 0.0 }
 0x514   : > { %v8421_v31 = vsel %vm2756_vm15, 1e+30, %v10378_v44  ;;  %v2344_v10 = vadd.s32 %v2343_v30, %v2341_v3  ;;  %v2354_v9 = vpop.xlane.xlu1 %2353  ;;  %v2725_v45 = vmul.f32 %v8295_v29, %v5547_v33  ;;  %v8431_v55 = vsel %vm2757_vm1, 1e+30, %v10380_v21 }
 0x515   : > { %2789 = vmin.xlane.f32.xlu1 %v8421_v31  ;;  %v8426_v18 = vadd.f32 %v2724_v4, %v8190_v28  ;;  %v2355_v52 = vcvt.f32.s32 %v2354_v9  ;;  %v2368_v15 = vpop.xlane.xlu0 %2367  ;;  %10381 = vst [vmem:[#allocation3_spill] sm:$0xff] %v8431_v55  ;;  %vm2502_vm2 = vcmp.eq.s32.totalorder %v10373_v61, %v2330_v19  ;;  %2791 = vmin.xlane.f32.xlu0 %v8431_v55  ;;  %v10383_v19 = vld [vmem:[#allocation19_spill] sm:$0xff]  ;;  %v8448_v4 = vshll.u32 %v2468_v22, 16 }
 0x516   : > { %v2369_v16 = vcvt.f32.s32 %v2368_v15  ;;  %v8436_v30 = vadd.f32 %v2725_v45, %v8194_v25  ;;  %v5548_v28 = vsel %vm2502_vm2, 1.0, %v10374_v36  ;;  %vm2503_vm3 = vcmp.eq.s32.totalorder %v10373_v61, %v2344_v10 }
 0x517   : > { %v2358_v29 = vadd.s32 %v8368_v20, %v2355_v52  ;;  %vm2758_vm4 = vcmp.gt.f32.partialorder %v5548_v28, 0.0  ;;  %v2726_v27 = vmul.f32 %v8307_v39, %v5548_v28  ;;  %v5549_v57 = vsel %vm2503_vm3, 1.0, %v10374_v36  ;;  %v10386_v39 = vld [vmem:[#allocation21_spill] sm:$0xff]  ;;  %v10389_v52 = vld [vmem:[#allocation24_spill] sm:$0xff] }
 0x518   : > { %10382 = vst [vmem:[#allocation4_spill] sm:$0xff] %v8436_v30  ;;  %v2372_v40 = vadd.s32 %v8373_v13, %v2369_v16  ;;  %v8445_v3 = vsel %vm2758_vm4, 1e+30, %v10383_v19  ;;  %vm2759_vm5 = vcmp.gt.f32.partialorder %v5549_v57, 0.0  ;;  %v2727_v25 = vmul.f32 %v8311_v7, %v5549_v57  ;;  %v2382_v37 = vpop.xlane.xlu1 %2381 }
 0x519   : > { %10384 = vst [vmem:[#allocation5_spill] sm:$0xff] %v8445_v3  ;;  %v2396_v44 = vpop.xlane.xlu0 %2395  ;;  %2793 = vmin.xlane.f32.xlu1 %v8445_v3  ;;  %v8452_v20 = vadd.f32 %v2726_v27, %v8318_v47  ;;  %v8455_v33 = vsel %vm2759_vm5, 1e+30, %v10386_v39  ;;  %vm2504_vm6 = vcmp.eq.s32.totalorder %v10373_v61, %v2358_v29  ;;  %v2383_v13 = vcvt.f32.s32 %v2382_v37  ;;  %v10393_v27 = vld [vmem:[#allocation25_spill] sm:$0xff]  ;;  %v10396_v39 = vld [vmem:[#allocation28_spill] sm:$0xff] }
 0x51a   : > { %10387 = vst [vmem:[#allocation7_spill] sm:$0xff] %v8455_v33  ;;  %v2397_v10 = vcvt.f32.s32 %v2396_v44  ;;  %2795 = vmin.xlane.f32.xlu0 %v8455_v33  ;;  %v8460_v7 = vadd.f32 %v2727_v25, %v8324_v0  ;;  %v5550_v22 = vsel %vm2504_vm6, 1.0, %v10374_v36  ;;  %v8463_v9 = vshll.u32 %v2482_v2, 16  ;;  %v10391_v0 = vld [vmem:[#allocation48_spill] sm:$0xff] }
 0x51b   : > { %10385 = vst [vmem:[#allocation6_spill] sm:$0xff] %v8452_v20  ;;  %vm2760_vm7 = vcmp.gt.f32.partialorder %v5550_v22, 0.0  ;;  %v2728_v47 = vmul.f32 %v8314_v54, %v5550_v22  ;;  %vm2505_vm8 = vcmp.eq.s32.totalorder %v10373_v61, %v2372_v40  ;;  %v2386_v45 = vadd.s32 %v8384_v34, %v2383_v13 }
 0x51c   : > { %10388 = vst [vmem:[#allocation8_spill] sm:$0xff] %v8460_v7  ;;  %v2400_v56 = vadd.s32 %v8389_v48, %v2397_v10  ;;  %v8470_v15 = vsel %vm2760_vm7, 1e+30, %v10389_v52  ;;  %v5551_v21 = vsel %vm2505_vm8, 1.0, %v10374_v36  ;;  %v2496_v16 = vcvt.f32.s32 %v10391_v0  ;;  %v2410_v28 = vpop.xlane.xlu1 %2409  ;;  %v10398_v10 = vld [vmem:[#allocation29_spill] sm:$0xff] }
 0x51d   : > { %10390 = vst [vmem:[#allocation9_spill] sm:$0xff] %v8470_v15  ;;  %2797 = vmin.xlane.f32.xlu1 %v8470_v15  ;;  %v8476_v2 = vadd.f32 %v2728_v47, %v8328_v46  ;;  %vm2761_vm9 = vcmp.gt.f32.partialorder %v5551_v21, 0.0  ;;  %v2729_v54 = vmul.f32 %v8320_v51, %v5551_v21  ;;  %v2411_v29 = vcvt.f32.s32 %v2410_v28  ;;  %v2424_v34 = vpop.xlane.xlu0 %2423  ;;  %v10402_v28 = vld [vmem:[#allocation32_spill] sm:$0xff] }
 0x51e   : > { %v8480_v48 = vsel %vm2761_vm9, 1e+30, %v10393_v27  ;;  %vm2506_vm10 = vcmp.eq.s32.totalorder %v10373_v61, %v2386_v45  ;;  %vm2507_vm11 = vcmp.eq.s32.totalorder %v10373_v61, %v2400_v56  ;;  %v2425_v57 = vcvt.f32.s32 %v2424_v34  ;;  %v10405_v27 = vld [vmem:[#allocation33_spill] sm:$0xff] }
 0x51f   : > { %10392 = vst [vmem:[#allocation10_spill] sm:$0xff] %v8476_v2  ;;  %10394 = vst [vmem:[#allocation11_spill] sm:$0xff] %v8480_v48  ;;  %2799 = vmin.xlane.f32.xlu0 %v8480_v48  ;;  %v8486_v40 = vadd.f32 %v2729_v54, %v8332_v24  ;;  %v5552_v46 = vsel %vm2506_vm10, 1.0, %v10374_v36  ;;  %v5553_v19 = vsel %vm2507_vm11, 1.0, %v10374_v36  ;;  %v2414_v51 = vadd.s32 %v8397_v38, %v2411_v29 }
 0x520   : > { %vm2762_vm12 = vcmp.gt.f32.partialorder %v5552_v46, 0.0  ;;  %v2730_v25 = vmul.f32 %v8366_v35, %v5552_v46  ;;  %vm2763_vm13 = vcmp.gt.f32.partialorder %v5553_v19, 0.0  ;;  %v2428_v37 = vadd.s32 %v8406_v58, %v2425_v57  ;;  %v2438_v44 = vpop.xlane.xlu1 %2437 }
 0x521   : > { %10395 = vst [vmem:[#allocation12_spill] sm:$0xff] %v8486_v40  ;;  %v8494_v13 = vsel %vm2762_vm12, 1e+30, %v10396_v39  ;;  %v8497_v22 = vsel %vm2763_vm13, 1e+30, %v10398_v10  ;;  %v2731_v24 = vmul.f32 %v8371_v42, %v5553_v19  ;;  %v2497_v47 = vshll.u32 %v2496_v16, 16  ;;  %v2452_v56 = vpop.xlane.xlu0 %2451 }
 0x522   : > { %10397 = vst [vmem:[#allocation13_spill] sm:$0xff] %v8494_v13  ;;  %10399 = vst [vmem:[#allocation14_spill] sm:$0xff] %v8497_v22  ;;  %v2439_v45 = vcvt.f32.s32 %v2438_v44  ;;  %2801 = vmin.xlane.f32.xlu1 %v8494_v13  ;;  %v8502_v38 = vadd.f32 %v2730_v25, %v8337_v32  ;;  %vm2508_vm14 = vcmp.eq.s32.totalorder %v10373_v61, %v2414_v51  ;;  %v2453_v35 = vcvt.f32.s32 %v2452_v56 }
 0x523   : > { %2803 = vmin.xlane.f32.xlu0 %v8497_v22  ;;  %v8507_v58 = vadd.f32 %v2731_v24, %v8341_v1  ;;  %v5554_v52 = vsel %vm2508_vm14, 1.0, %v10374_v36  ;;  %vm2509_vm15 = vcmp.eq.s32.totalorder %v10373_v61, %v2428_v37  ;;  %v10408_v37 = vld [vmem:[#allocation36_spill] sm:$0xff] }
 0x524   : > { %10400 = vst [vmem:[#allocation44_spill] sm:$0xff] %v8502_v38  ;;  %v2442_v42 = vadd.s32 %v8408_v53, %v2439_v45  ;;  %vm2764_vm1 = vcmp.gt.f32.partialorder %v5554_v52, 0.0  ;;  %v2732_v21 = vmul.f32 %v8377_v8, %v5554_v52  ;;  %v5555_v32 = vsel %vm2509_vm15, 1.0, %v10374_v36  ;;  %v2466_v16 = vpop.xlane.xlu1 %2465  ;;  %v10415_v52 = vld [vmem:[#allocation39_spill] sm:$0xff] }
 0x525   : > { %10401 = vst [vmem:[#allocation18_spill] sm:$0xff] %v8507_v58  ;;  %v2456_v0 = vadd.s32 %v8417_v14, %v2453_v35  ;;  %v8516_v54 = vsel %vm2764_vm1, 1e+30, %v10402_v28  ;;  %vm2765_vm2 = vcmp.gt.f32.partialorder %v5555_v32, 0.0  ;;  %v2733_v1 = vmul.f32 %v8382_v23, %v5555_v32  ;;  %v2480_v34 = vpop.xlane.xlu0 %2479 }
 0x526   : > { %10403 = vst [vmem:[#allocation20_spill] sm:$0xff] %v8516_v54  ;;  %v2467_v29 = vcvt.f32.s32 %v2466_v16  ;;  %2805 = vmin.xlane.f32.xlu1 %v8516_v54  ;;  %v8521_v53 = vadd.f32 %v2732_v21, %v8345_v43  ;;  %v8524_v8 = vsel %vm2765_vm2, 1e+30, %v10405_v27  ;;  %vm2510_vm3 = vcmp.eq.s32.totalorder %v10373_v61, %v2442_v42  ;;  %v10416_v21 = vld [vmem:[#allocation40_spill] sm:$0xff]  ;;  %v10422_v16 = vld [vmem:[#allocation42_spill] sm:$0xff] }
 0x527   : > { %10406 = vst [vmem:[#allocation23_spill] sm:$0xff] %v8524_v8  ;;  %v2481_v14 = vcvt.f32.s32 %v2480_v34  ;;  %2807 = vmin.xlane.f32.xlu0 %v8524_v8  ;;  %v8529_v57 = vadd.f32 %v2733_v1, %v8355_v59  ;;  %v5556_v23 = vsel %vm2510_vm3, 1.0, %v10374_v36  ;;  %vm2511_vm4 = vcmp.eq.s32.totalorder %v10373_v61, %v2456_v0  ;;  %v10419_v0 = vld [vmem:[#allocation41_spill] sm:$0xff]  ;;  %v10423_v1 = vld [vmem:[#allocation43_spill] sm:$0xff] }
 0x528   : > { %10404 = vst [vmem:[#allocation22_spill] sm:$0xff] %v8521_v53  ;;  %v2470_v46 = vadd.s32 %v8448_v4, %v2467_v29  ;;  %vm2766_vm5 = vcmp.gt.f32.partialorder %v5556_v23, 0.0  ;;  %v2734_v43 = vmul.f32 %v8387_v5, %v5556_v23  ;;  %v5557_v19 = vsel %vm2511_vm4, 1.0, %v10374_v36  ;;  %v2494_v25 = vpop.xlane.xlu1 %2493  ;;  %v10411_v4 = vld [vmem:[#allocation37_spill] sm:$0xff]  ;;  %v10413_v5 = vld [vmem:[#allocation38_spill] sm:$0xff] }
 0x529   : > { %10407 = vst [vmem:[#allocation26_spill] sm:$0xff] %v8529_v57  ;;  %v2484_v51 = vadd.s32 %v8463_v9, %v2481_v14  ;;  %v8538_v44 = vsel %vm2766_vm5, 1e+30, %v10408_v37  ;;  %vm2767_vm6 = vcmp.gt.f32.partialorder %v5557_v19, 0.0  ;;  %v2735_v59 = vmul.f32 %v8395_v49, %v5557_v19 }
 0x52a   : > { %10409 = vst [vmem:[#allocation27_spill] sm:$0xff] %v8538_v44  ;;  %v2495_v39 = vcvt.f32.s32 %v2494_v25  ;;  %2809 = vmin.xlane.f32.xlu1 %v8538_v44  ;;  %v8543_v10 = vadd.f32 %v2734_v43, %v8359_v41  ;;  %v8546_v24 = vsel %vm2767_vm6, 1e+30, %v10411_v4  ;;  %vm2512_vm7 = vcmp.eq.s32.totalorder %v10373_v61, %v2470_v46 }
 0x52b   : > { %10412 = vst [vmem:[#allocation31_spill] sm:$0xff] %v8546_v24  ;;  %v2160_v9 = vmul.f32 %v8231_v26, %v10413_v5  ;;  %2811 = vmin.xlane.f32.xlu0 %v8546_v24  ;;  %v8553_v45 = vadd.f32 %v2735_v59, %v8363_v17  ;;  %v5558_v49 = vsel %vm2512_vm7, 1.0, %v10374_v36  ;;  %vm2513_vm8 = vcmp.eq.s32.totalorder %v10373_v61, %v2484_v51 }
 0x52c   : > { %10410 = vst [vmem:[#allocation30_spill] sm:$0xff] %v8543_v10  ;;  %v2498_v56 = vadd.s32 %v2497_v47, %v2495_v39  ;;  %vm2768_vm9 = vcmp.gt.f32.partialorder %v5558_v49, 0.0  ;;  %v2736_v41 = vmul.f32 %v8404_v12, %v5558_v49  ;;  %v5559_v35 = vsel %vm2513_vm8, 1.0, %v10374_v36 }
 0x52d   : > { %10414 = vst [vmem:[#allocation34_spill] sm:$0xff] %v8553_v45  ;;  %v2161_v42 = vmul.f32 %v8238_v60, %v10415_v52  ;;  %v8562_v26 = vsel %vm2768_vm9, 1e+30, %v10416_v21  ;;  %vm2769_vm10 = vcmp.gt.f32.partialorder %v5559_v35, 0.0  ;;  %v2737_v17 = vmul.f32 %v8412_v11, %v5559_v35 }
 0x52e   : > { %10417 = vst [vmem:[#allocation35_spill] sm:$0xff] %v8562_v26  ;;  %2813 = vmin.xlane.f32.xlu1 %v8562_v26  ;;  %v8566_v32 = vadd.f32 %v2736_v41, %v2160_v9  ;;  %v8569_v47 = vsel %vm2769_vm10, 1e+30, %v10419_v0  ;;  %vm2514_vm11 = vcmp.eq.s32.totalorder %v10373_v61, %v2498_v56  ;;  %v2162_v28 = vmul.f32 %v8246_v50, %v10422_v16 }
 0x52f   : > { %10420 = vst [vmem:[#allocation45_spill] sm:$0xff] %v8569_v47  ;;  %2815 = vmin.xlane.f32.xlu0 %v8569_v47  ;;  %v8573_v12 = vadd.f32 %v2737_v17, %v2161_v42  ;;  %v5560_v60 = vsel %vm2514_vm11, 1.0, %v10374_v36 }
 0x530   : > { %10418 = vst [vmem:[#allocation2_spill] sm:$0xff] %v8566_v32  ;;  %vm2770_vm12 = vcmp.gt.f32.partialorder %v5560_v60, 0.0  ;;  %v2738_v11 = vmul.f32 %v8415_v62, %v5560_v60 }
 0x531   : > { %10421 = vst [vmem:[#allocation15_spill] sm:$0xff] %v8573_v12  ;;  %v8580_v29 = vsel %vm2770_vm12, 1e+30, %v10423_v1 }
 0x532   : > { %10424 = vst [vmem:[#allocation46_spill] sm:$0xff] %v8580_v29  ;;  %2817 = vmin.xlane.f32.xlu1 %v8580_v29  ;;  %v8583_v34 = vadd.f32 %v2738_v11, %v2162_v28 }
 0x534   : > { %10425 = vst [vmem:[#allocation16_spill] sm:$0xff] %v8583_v34 }
 0x59e   : > { %v8585_v27 = vpop.xlane.xlu0 %2787 }
 0x59f   : > { %vm2819_vm13 = vcmp.le.f32.partialorder %v8393_v6, %v8585_v27 }
 0x5a0   : > { %v8590_v14 = vsel %vm2819_vm13, %v10373_v61, 128 }
 0x5a1   : > { %v2852_v50 = vshra.s32 %v8590_v14, 16  ;;  %v2851_v7 = vand.u32 65535, %v8590_v14 }
 0x5a2   : > { %v8593_v23 = vpop.xlane.xlu1 %2789  ;;  %v8602_v43 = vpop.xlane.xlu0 %2791 }
 0x5a3   : > { %vm2820_vm14 = vcmp.le.f32.partialorder %v8421_v31, %v8593_v23  ;;  %v8597_v62 = vcvt.s32.f32 %v2852_v50  ;;  %vm2821_vm15 = vcmp.le.f32.partialorder %v8431_v55, %v8602_v43  ;;  %v2853_v20 = vcvt.s32.f32 %v2851_v7 }
 0x5a4   : > { %v8600_v46 = vsel %vm2820_vm14, %v10373_v61, 128  ;;  %v8609_v51 = vsel %vm2821_vm15, %v10373_v61, 128 }
 0x5a5   : > { %2855 = vmin.xlane.f32.xlu0 %v8597_v62  ;;  %v2866_v19 = vshra.s32 %v8600_v46, 16  ;;  %v2880_v59 = vshra.s32 %v8609_v51, 16 }
 0x5a6   : > { %v8611_v25 = vpop.xlane.xlu1 %2793 }
 0x5a7   : > { %v8613_v37 = vcvt.s32.f32 %v2866_v19  ;;  %vm2822_vm1 = vcmp.le.f32.partialorder %v8445_v3, %v8611_v25  ;;  %v8618_v39 = vpop.xlane.xlu0 %2795  ;;  %v8626_v5 = vcvt.s32.f32 %v2880_v59 }
 0x5a8   : > { %v8621_v4 = vsel %vm2822_vm1, %v10373_v61, 128  ;;  %vm2823_vm2 = vcmp.le.f32.partialorder %v8455_v33, %v8618_v39  ;;  %v2879_v33 = vand.u32 65535, %v8609_v51 }
 0x5a9   : > { %2869 = vmin.xlane.f32.xlu1 %v8613_v37  ;;  %v8629_v9 = vsel %vm2823_vm2, %v10373_v61, 128  ;;  %v2894_v49 = vshra.s32 %v8621_v4, 16  ;;  %2883 = vmin.xlane.f32.xlu0 %v8626_v5  ;;  %v2893_v14 = vand.u32 65535, %v8621_v4 }
 0x5aa   : > { %v8633_v56 = vpop.xlane.xlu1 %2797  ;;  %v2908_v41 = vshra.s32 %v8629_v9, 16  ;;  %v2881_v55 = vcvt.s32.f32 %v2879_v33 }
 0x5ab   : > { %vm2824_vm3 = vcmp.le.f32.partialorder %v8470_v15, %v8633_v56  ;;  %v8638_v35 = vcvt.s32.f32 %v2894_v49  ;;  %v2895_v51 = vcvt.s32.f32 %v2893_v14 }
 0x5ac   : > { %v8641_v52 = vsel %vm2824_vm3, %v10373_v61, 128  ;;  %v8643_v42 = vpop.xlane.xlu0 %2799  ;;  %v8645_v21 = vcvt.s32.f32 %v2908_v41 }
 0x5ad   : > { %vm2825_vm4 = vcmp.le.f32.partialorder %v8480_v48, %v8643_v42  ;;  %2897 = vmin.xlane.f32.xlu1 %v8638_v35  ;;  %v2922_v17 = vshra.s32 %v8641_v52, 16 }
 0x5ae   : > { %v8652_v0 = vsel %vm2825_vm4, %v10373_v61, 128  ;;  %2911 = vmin.xlane.f32.xlu0 %v8645_v21 }
 0x5af   : > { %v8655_v60 = vpop.xlane.xlu1 %2801  ;;  %v8657_v16 = vcvt.s32.f32 %v2922_v17  ;;  %v2936_v28 = vshra.s32 %v8652_v0, 16 }
 0x5b0   : > { %vm2826_vm5 = vcmp.le.f32.partialorder %v8494_v13, %v8655_v60  ;;  %v8662_v11 = vpop.xlane.xlu0 %2803 }
 0x5b1   : > { %v8665_v1 = vsel %vm2826_vm5, %v10373_v61, 128  ;;  %vm2827_vm6 = vcmp.le.f32.partialorder %v8497_v22, %v8662_v11  ;;  %2925 = vmin.xlane.f32.xlu1 %v8657_v16  ;;  %v8673_v19 = vcvt.s32.f32 %v2936_v28 }
 0x5b2   : > { %v8671_v50 = vsel %vm2827_vm6, %v10373_v61, 128  ;;  %v2950_v59 = vshra.s32 %v8665_v1, 16 }
 0x5b3   : > { %v8676_v49 = vpop.xlane.xlu1 %2805  ;;  %v2964_v41 = vshra.s32 %v8671_v50, 16  ;;  %2939 = vmin.xlane.f32.xlu0 %v8673_v19 }
 0x5b4   : > { %vm2828_vm7 = vcmp.le.f32.partialorder %v8516_v54, %v8676_v49  ;;  %v8682_v17 = vpop.xlane.xlu0 %2807  ;;  %v8684_v34 = vcvt.s32.f32 %v2950_v59 }
 0x5b5   : > { %v8687_v12 = vsel %vm2828_vm7, %v10373_v61, 128  ;;  %vm2829_vm8 = vcmp.le.f32.partialorder %v8524_v8, %v8682_v17  ;;  %v8695_v32 = vcvt.s32.f32 %v2964_v41 }
 0x5b6   : > { %v8692_v28 = vsel %vm2829_vm8, %v10373_v61, 128  ;;  %2953 = vmin.xlane.f32.xlu1 %v8684_v34  ;;  %v2978_v45 = vshra.s32 %v8687_v12, 16 }
 0x5b7   : > { %v8698_v10 = vpop.xlane.xlu1 %2809  ;;  %v2992_v59 = vshra.s32 %v8692_v28, 16  ;;  %2967 = vmin.xlane.f32.xlu0 %v8695_v32 }
 0x5b8   : > { %vm2830_vm9 = vcmp.le.f32.partialorder %v8538_v44, %v8698_v10  ;;  %v8704_v57 = vpop.xlane.xlu0 %2811  ;;  %v8706_v53 = vcvt.s32.f32 %v2978_v45 }
 0x5b9   : > { %v8709_v8 = vsel %vm2830_vm9, %v10373_v61, 128  ;;  %vm2831_vm10 = vcmp.le.f32.partialorder %v8546_v24, %v8704_v57  ;;  %v8713_v41 = vcvt.s32.f32 %v2992_v59 }
 0x5ba   : > { %v8716_v58 = vsel %vm2831_vm10, %v10373_v61, 128  ;;  %2981 = vmin.xlane.f32.xlu1 %v8706_v53  ;;  %v3006_v54 = vshra.s32 %v8709_v8, 16 }
 0x5bb   : > { %v8720_v44 = vpop.xlane.xlu1 %2813  ;;  %v3020_v45 = vshra.s32 %v8716_v58, 16  ;;  %2995 = vmin.xlane.f32.xlu0 %v8713_v41 }
 0x5bc   : > { %vm2832_vm11 = vcmp.le.f32.partialorder %v8562_v26, %v8720_v44  ;;  %v8726_v38 = vpop.xlane.xlu0 %2815  ;;  %v8728_v59 = vcvt.s32.f32 %v3006_v54 }
 0x5bd   : > { %v8731_v24 = vsel %vm2832_vm11, %v10373_v61, 128  ;;  %vm2833_vm12 = vcmp.le.f32.partialorder %v8569_v47, %v8726_v38  ;;  %v8739_v40 = vcvt.s32.f32 %v3020_v45 }
 0x5be   : > { %v8736_v22 = vsel %vm2833_vm12, %v10373_v61, 128  ;;  %3009 = vmin.xlane.f32.xlu1 %v8728_v59  ;;  %v3034_v26 = vshra.s32 %v8731_v24, 16 }
 0x5bf   : > { %v8741_v13 = vpop.xlane.xlu1 %2817  ;;  %v3048_v54 = vshra.s32 %v8736_v22, 16  ;;  %3023 = vmin.xlane.f32.xlu0 %v8739_v40 }
 0x5c0   : > { %vm2834_vm13 = vcmp.le.f32.partialorder %v8580_v29, %v8741_v13  ;;  %v8751_v48 = vcvt.s32.f32 %v3034_v26  ;;  %v2865_v26 = vand.u32 65535, %v8600_v46  ;;  %v2907_v46 = vand.u32 65535, %v8629_v9 }
 0x5c1   : > { %v8749_v47 = vsel %vm2834_vm13, %v10373_v61, 128  ;;  %v8753_v2 = vcvt.s32.f32 %v3048_v54 }
 0x5c2   : > { %v3062_v45 = vshra.s32 %v8749_v47, 16  ;;  %3037 = vmin.xlane.f32.xlu1 %v8751_v48  ;;  %v2909_v4 = vcvt.s32.f32 %v2907_v46 }
 0x5c3   : > { %3051 = vmin.xlane.f32.xlu0 %v8753_v2 }
 0x5c4   : > { %v8758_v15 = vcvt.s32.f32 %v3062_v45  ;;  %v2867_v45 = vcvt.s32.f32 %v2865_v26  ;;  %v2921_v26 = vand.u32 65535, %v8641_v52  ;;  %v2949_v52 = vand.u32 65535, %v8665_v1 }
 0x5c6   : > { %3065 = vmin.xlane.f32.xlu1 %v8758_v15  ;;  %v2951_v46 = vcvt.s32.f32 %v2949_v52 }
 0x632   : > { %v8762_v29 = vpop.xlane.xlu0 %2855 }
 0x633   : > { %vm2857_vm14 = vcmp.eq.f32.partialorder %v8597_v62, %v8762_v29 }
 0x634   : > { %v2858_v54 = vsel %vm2857_vm14, %v2853_v20, inf }
 0x635   : > { %2859 = vmin.xlane.f32.xlu0 %v2858_v54  ;;  %v2923_v54 = vcvt.s32.f32 %v2921_v26  ;;  %v2991_v26 = vand.u32 65535, %v8692_v28  ;;  %v3019_v28 = vand.u32 65535, %v8716_v58  ;;  %v3047_v58 = vand.u32 65535, %v8736_v22 }
 0x636   : > { %v8768_v3 = vpop.xlane.xlu1 %2869  ;;  %v8773_v30 = vpop.xlane.xlu0 %2883 }
 0x637   : > { %vm2871_vm15 = vcmp.eq.f32.partialorder %v8613_v37, %v8768_v3  ;;  %vm2885_vm1 = vcmp.eq.f32.partialorder %v8626_v5, %v8773_v30 }
 0x638   : > { %v2872_v7 = vsel %vm2871_vm15, %v2867_v45, inf  ;;  %v2886_v20 = vsel %vm2885_vm1, %v2881_v55, inf  ;;  %v2935_v55 = vand.u32 65535, %v8652_v0 }
 0x639   : > { %2873 = vmin.xlane.f32.xlu1 %v2872_v7  ;;  %2887 = vmin.xlane.f32.xlu0 %v2886_v20  ;;  %v2977_v20 = vand.u32 65535, %v8687_v12  ;;  %v3005_v12 = vand.u32 65535, %v8709_v8 }
 0x63a   : > { %v8778_v62 = vpop.xlane.xlu1 %2897  ;;  %v2937_v14 = vcvt.s32.f32 %v2935_v55 }
 0x63b   : > { %v8781_v37 = vpop.xlane.xlu0 %2911  ;;  %vm2899_vm2 = vcmp.eq.f32.partialorder %v8638_v35, %v8778_v62 }
 0x63c   : > { %v2900_v33 = vsel %vm2899_vm2, %v2895_v51, inf  ;;  %vm2913_vm3 = vcmp.eq.f32.partialorder %v8645_v21, %v8781_v37  ;;  %v2963_v21 = vand.u32 65535, %v8671_v50 }
 0x63d   : > { %2901 = vmin.xlane.f32.xlu1 %v2900_v33  ;;  %v2914_v9 = vsel %vm2913_vm3, %v2909_v4, inf  ;;  %v2979_v4 = vcvt.s32.f32 %v2977_v20 }
 0x63e   : > { %2915 = vmin.xlane.f32.xlu0 %v2914_v9  ;;  %v8788_v5 = vpop.xlane.xlu1 %2925  ;;  %v2965_v51 = vcvt.s32.f32 %v2963_v21  ;;  %v2993_v9 = vcvt.s32.f32 %v2991_v26  ;;  %v8850_v26 = vmax.f32 %v8618_v39, 0.0 }
 0x63f   : > { %vm2927_vm4 = vcmp.eq.f32.partialorder %v8657_v16, %v8788_v5 }
 0x640   : > { %v2928_v45 = vsel %vm2927_vm4, %v2923_v54, inf  ;;  %v8793_v35 = vpop.xlane.xlu0 %2939  ;;  %v3007_v54 = vcvt.s32.f32 %v3005_v12 }
 0x641   : > { %2929 = vmin.xlane.f32.xlu1 %v2928_v45  ;;  %vm2941_vm5 = vcmp.eq.f32.partialorder %v8673_v19, %v8793_v35  ;;  %v3021_v45 = vcvt.s32.f32 %v3019_v28 }
 0x642   : > { %v2942_v0 = vsel %vm2941_vm5, %v2937_v14, inf }
 0x643   : > { %v8798_v7 = vpop.xlane.xlu1 %2953  ;;  %2943 = vmin.xlane.f32.xlu0 %v2942_v0  ;;  %v3061_v0 = vand.u32 65535, %v8749_v47 }
 0x644   : > { %vm2955_vm6 = vcmp.eq.f32.partialorder %v8684_v34, %v8798_v7  ;;  %v8803_v16 = vpop.xlane.xlu0 %2967 }
 0x645   : > { %v2956_v1 = vsel %vm2955_vm6, %v2951_v46, inf  ;;  %vm2969_vm7 = vcmp.eq.f32.partialorder %v8695_v32, %v8803_v16  ;;  %v3063_v20 = vcvt.s32.f32 %v3061_v0 }
 0x646   : > { %2957 = vmin.xlane.f32.xlu1 %v2956_v1  ;;  %v2970_v50 = vsel %vm2969_vm7, %v2965_v51, inf  ;;  %v3123_v1 = vmax.f32 %v8585_v27, 0.0  ;;  %v8844_v51 = vmax.f32 %v8602_v43, 0.0  ;;  %v8861_v27 = vmax.f32 %v8655_v60, 0.0 }
 0x647   : > { %v8808_v19 = vpop.xlane.xlu1 %2981  ;;  %2971 = vmin.xlane.f32.xlu0 %v2970_v50  ;;  %v8853_v50 = vmax.f32 %v8633_v56, 0.0  ;;  %v8869_v43 = vmax.f32 %v8676_v49, 0.0  ;;  %vm3169_vm7 = vcmp.eq.f32.partialorder %v8850_v26, inf }
 0x648   : > { %vm2983_vm8 = vcmp.eq.f32.partialorder %v8706_v53, %v8808_v19  ;;  %v8813_v34 = vpop.xlane.xlu0 %2995  ;;  %v3033_v53 = vand.u32 65535, %v8731_v24  ;;  %v3049_v24 = vcvt.s32.f32 %v3047_v58  ;;  %6606 = vrsqrt.f32 %v3123_v1 }
 0x649   : > { %v2984_v33 = vsel %vm2983_vm8, %v2979_v4, inf  ;;  %vm2997_vm9 = vcmp.eq.f32.partialorder %v8713_v41, %v8813_v34  ;;  %vm3141_vm15 = vcmp.eq.f32.partialorder %v3123_v1, inf  ;;  %vm3143_vm1 = vcmp.eq.f32.partialorder %v3123_v1, 0.0 }
 0x64a   : > { %2985 = vmin.xlane.f32.xlu1 %v2984_v33  ;;  %v2998_v32 = vsel %vm2997_vm9, %v2993_v9, inf  ;;  %v3035_v21 = vcvt.s32.f32 %v3033_v53  ;;  %v8892_v53 = vmax.f32 %v8726_v38, 0.0  ;;  %vm3155_vm4 = vcmp.eq.f32.partialorder %v8844_v51, inf }
 0x64b   : > { %v8818_v55 = vpop.xlane.xlu1 %3009  ;;  %2999 = vmin.xlane.f32.xlu0 %v2998_v32  ;;  %v8889_v32 = vmax.f32 %v8720_v44, 0.0  ;;  %vm3157_vm5 = vcmp.eq.f32.partialorder %v8844_v51, 0.0  ;;  %vm3176_vm9 = vcmp.eq.f32.partialorder %v8853_v50, inf }
 0x64c   : > { %vm3011_vm10 = vcmp.eq.f32.partialorder %v8728_v59, %v8818_v55  ;;  %v8823_v8 = vpop.xlane.xlu0 %3023 }
 0x64d   : > { %v3012_v52 = vsel %vm3011_vm10, %v3007_v54, inf  ;;  %vm3025_vm11 = vcmp.eq.f32.partialorder %v8739_v40, %v8823_v8 }
 0x64e   : > { %3013 = vmin.xlane.f32.xlu1 %v3012_v52  ;;  %v3026_v41 = vsel %vm3025_vm11, %v3021_v45, inf  ;;  %vm3171_vm11 = vcmp.eq.f32.partialorder %v8850_v26, 0.0 }
 0x64f   : > { %3027 = vmin.xlane.f32.xlu0 %v3026_v41  ;;  %v8828_v14 = vpop.xlane.xlu1 %3037 }
 0x650   : > { %v8831_v59 = vpop.xlane.xlu0 %3051  ;;  %vm3039_vm12 = vcmp.eq.f32.partialorder %v8751_v48, %v8828_v14  ;;  %v3124_v48 = vmax.f32 %v8593_v23, 0.0  ;;  %v8865_v23 = vmax.f32 %v8662_v11, 0.0  ;;  %v8883_v11 = vmax.f32 %v8704_v57, 0.0 }
 0x651   : > { %vm3053_vm13 = vcmp.eq.f32.partialorder %v8753_v2, %v8831_v59  ;;  %v3040_v22 = vsel %vm3039_vm12, %v3035_v21, inf  ;;  %v8847_v2 = vmax.f32 %v8611_v25, 0.0  ;;  %v8873_v25 = vmax.f32 %v8682_v17, 0.0 }
 0x652   : > { %3041 = vmin.xlane.f32.xlu1 %v3040_v22  ;;  %v3054_v40 = vsel %vm3053_vm13, %v3049_v24, inf  ;;  %6608 = vrsqrt.f32 %v3124_v48  ;;  %v6607_v39 = vpop.eup %6606  ;;  %v3144_v57 = vand.u32 2147483648, %v3123_v1  ;;  %vm3148_vm2 = vcmp.eq.f32.partialorder %v3124_v48, inf }
 0x653   : > { %3055 = vmin.xlane.f32.xlu0 %v3054_v40  ;;  %v8837_v46 = vpop.xlane.xlu1 %3065  ;;  %6610 = vrsqrt.f32 %v8844_v51  ;;  %v3140_v4 = vmul.f32 %v6607_v39, %v3123_v1  ;;  %vm3150_vm3 = vcmp.eq.f32.partialorder %v3124_v48, 0.0  ;;  %v3151_v58 = vand.u32 2147483648, %v3124_v48 }
 0x654   : > { %vm3067_vm14 = vcmp.eq.f32.partialorder %v8758_v15, %v8837_v46  ;;  %v8857_v15 = vmax.f32 %v8643_v42, 0.0  ;;  %6612 = vrsqrt.f32 %v8847_v2  ;;  %v8880_v42 = vmax.f32 %v8698_v10, 0.0 }
 0x655   : > { %v3068_v47 = vsel %vm3067_vm14, %v3063_v20, inf  ;;  %6614 = vrsqrt.f32 %v8850_v26  ;;  %v3142_v52 = vsel %vm3141_vm15, %v3123_v1, %v3140_v4  ;;  %v8897_v24 = vmax.f32 %v8741_v13, 0.0 }
 0x656   : > { %3069 = vmin.xlane.f32.xlu1 %v3068_v47  ;;  %6616 = vrsqrt.f32 %v8853_v50  ;;  %v3145_v47 = vsel %vm3143_vm1, %v3144_v57, %v3142_v52  ;;  %v3158_v13 = vand.u32 2147483648, %v8844_v51  ;;  %vm3162_vm6 = vcmp.eq.f32.partialorder %v8847_v2, inf }
 0x657   : > { %6618 = vrsqrt.f32 %v8857_v15  ;;  %v3251_v1 = vadd.f32 1e-07, %v3145_v47  ;;  %vm3164_vm8 = vcmp.eq.f32.partialorder %v8847_v2, 0.0  ;;  %vm3183_vm10 = vcmp.eq.f32.partialorder %v8857_v15, inf }
 0x658   : > { %6620 = vrsqrt.f32 %v8861_v27  ;;  %v3179_v52 = vand.u32 2147483648, %v8853_v50  ;;  %vm3178_vm12 = vcmp.eq.f32.partialorder %v8853_v50, 0.0  ;;  %vm3185_vm13 = vcmp.eq.f32.partialorder %v8857_v15, 0.0 }
 0x659   : > { %6622 = vrsqrt.f32 %v8865_v23  ;;  %vm3190_vm14 = vcmp.eq.f32.partialorder %v8861_v27, inf  ;;  %vm3197_vm15 = vcmp.eq.f32.partialorder %v8865_v23, inf  ;;  %vm3204_vm1 = vcmp.eq.f32.partialorder %v8869_v43, inf }
 0x65a   : > { %6624 = vrsqrt.f32 %v8869_v43 }
 0x65b   : > { %6626 = vrsqrt.f32 %v8873_v25 }
 0x65c   : > { %v6609_v56 = vpop.eup %6608  ;;  %6628 = vrsqrt.f32 %v8880_v42 }
 0x65d   : > { %v6611_v60 = vpop.eup %6610  ;;  %v3147_v12 = vmul.f32 %v6609_v56, %v3124_v48  ;;  %6630 = vrsqrt.f32 %v8883_v11 }
 0x65e   : > { %v6613_v49 = vpop.eup %6612  ;;  %v3154_v28 = vmul.f32 %v6611_v60, %v8844_v51  ;;  %6632 = vrsqrt.f32 %v8889_v32 }
 0x65f   : > { %v6615_v17 = vpop.eup %6614  ;;  %v3149_v45 = vsel %vm3148_vm2, %v3124_v48, %v3147_v12  ;;  %v3161_v21 = vmul.f32 %v6613_v49, %v8847_v2  ;;  %6634 = vrsqrt.f32 %v8892_v53  ;;  %vm3192_vm2 = vcmp.eq.f32.partialorder %v8861_v27, 0.0 }
 0x660   : > { %v6617_v33 = vpop.eup %6616  ;;  %v3168_v0 = vmul.f32 %v6615_v17, %v8850_v26  ;;  %v3156_v20 = vsel %vm3155_vm4, %v8844_v51, %v3154_v28  ;;  %v3152_v39 = vsel %vm3150_vm3, %v3151_v58, %v3149_v45  ;;  %6636 = vrsqrt.f32 %v8897_v24 }
 0x661   : > { %v6619_v9 = vpop.eup %6618  ;;  %v3175_v22 = vmul.f32 %v6617_v33, %v8853_v50  ;;  %v3159_v17 = vsel %vm3157_vm5, %v3158_v13, %v3156_v20  ;;  %v3252_v48 = vadd.f32 1e-07, %v3152_v39  ;;  %v3163_v4 = vsel %vm3162_vm6, %v8847_v2, %v3161_v21 }
 0x662   : > { %v6621_v10 = vpop.eup %6620  ;;  %v3182_v40 = vmul.f32 %v6619_v9, %v8857_v15  ;;  %v3165_v33 = vand.u32 2147483648, %v8847_v2  ;;  %v3170_v51 = vsel %vm3169_vm7, %v8850_v26, %v3168_v0  ;;  %v3253_v28 = vadd.f32 1e-07, %v3159_v17 }
 0x663   : > { %v6623_v54 = vpop.eup %6622  ;;  %v3189_v38 = vmul.f32 %v6621_v10, %v8861_v27  ;;  %v3172_v10 = vand.u32 2147483648, %v8850_v26  ;;  %v3177_v57 = vsel %vm3176_vm9, %v8853_v50, %v3175_v22  ;;  %6638 = vrcp.f32 %v3251_v1 }
 0x664   : > { %v6625_v41 = vpop.eup %6624  ;;  %v3196_v56 = vmul.f32 %v6623_v54, %v8865_v23  ;;  %v3166_v54 = vsel %vm3164_vm8, %v3165_v33, %v3163_v4  ;;  %v3184_v45 = vsel %vm3183_vm10, %v8857_v15, %v3182_v40  ;;  %v3180_v0 = vsel %vm3178_vm12, %v3179_v52, %v3177_v57 }
 0x665   : > { %v6627_v44 = vpop.eup %6626  ;;  %v3203_v60 = vmul.f32 %v6625_v41, %v8869_v43  ;;  %v3173_v58 = vsel %vm3171_vm11, %v3172_v10, %v3170_v51  ;;  %v3186_v41 = vand.u32 2147483648, %v8857_v15  ;;  %6640 = vrcp.f32 %v3252_v48 }
 0x666   : > { %v8913_v49 = vmul.f32 %v6627_v44, %v8873_v25  ;;  %v6629_v12 = vpop.eup %6628  ;;  %v3254_v44 = vadd.f32 1e-07, %v3166_v54  ;;  %6642 = vrcp.f32 %v3253_v28  ;;  %v3255_v40 = vadd.f32 1e-07, %v3173_v58 }
 0x667   : > { %v6631_v9 = vpop.eup %6630  ;;  %v3217_v2 = vmul.f32 %v6629_v12, %v8880_v42  ;;  %v3187_v26 = vsel %vm3185_vm13, %v3186_v41, %v3184_v45  ;;  %v3191_v20 = vsel %vm3190_vm14, %v8861_v27, %v3189_v38  ;;  %v3256_v47 = vadd.f32 1e-07, %v3180_v0 }
 0x668   : > { %v3224_v21 = vmul.f32 %v6631_v9, %v8883_v11  ;;  %v6633_v22 = vpop.eup %6632  ;;  %v3193_v39 = vand.u32 2147483648, %v8861_v27  ;;  %v3198_v13 = vsel %vm3197_vm15, %v8865_v23, %v3196_v56  ;;  %v3257_v17 = vadd.f32 1e-07, %v3187_v26 }
 0x669   : > { %v6635_v50 = vpop.eup %6634  ;;  %v3200_v1 = vand.u32 2147483648, %v8865_v23  ;;  %v3205_v48 = vsel %vm3204_vm1, %v8869_v43, %v3203_v60  ;;  %6644 = vrcp.f32 %v3254_v44  ;;  %vm3199_vm3 = vcmp.eq.f32.partialorder %v8865_v23, 0.0 }
 0x66a   : > { %v6637_v15 = vpop.eup %6636  ;;  %v3194_v38 = vsel %vm3192_vm2, %v3193_v39, %v3191_v20  ;;  %v3207_v4 = vand.u32 2147483648, %v8869_v43  ;;  %v3231_v12 = vmul.f32 %v6633_v22, %v8889_v32  ;;  %6646 = vrcp.f32 %v3255_v40 }
 0x66b   : > { %v3201_v56 = vsel %vm3199_vm3, %v3200_v1, %v3198_v13  ;;  %vm3206_vm4 = vcmp.eq.f32.partialorder %v8869_v43, 0.0  ;;  %v3238_v33 = vmul.f32 %v6635_v50, %v8892_v53  ;;  %6648 = vrcp.f32 %v3256_v47 }
 0x66c   : > { %v3208_v27 = vsel %vm3206_vm4, %v3207_v4, %v3205_v48  ;;  %vm3211_vm5 = vcmp.eq.f32.partialorder %v8873_v25, inf  ;;  %v3245_v60 = vmul.f32 %v6637_v15, %v8897_v24  ;;  %6650 = vrcp.f32 %v3257_v17 }
 0x66d   : > { %v3258_v51 = vadd.f32 1e-07, %v3194_v38  ;;  %v3212_v23 = vsel %vm3211_vm5, %v8873_v25, %v8913_v49  ;;  %v3259_v9 = vadd.f32 1e-07, %v3201_v56  ;;  %vm3213_vm6 = vcmp.eq.f32.partialorder %v8873_v25, 0.0  ;;  %v8955_v43 = vpop.eup %6638 }
 0x66e   : > { %v3214_v28 = vand.u32 2147483648, %v8873_v25  ;;  %vm3218_vm7 = vcmp.eq.f32.partialorder %v8880_v42, inf  ;;  %v3260_v10 = vadd.f32 1e-07, %v3208_v27  ;;  %vm3220_vm8 = vcmp.eq.f32.partialorder %v8880_v42, 0.0 }
 0x66f   : > { %v3219_v57 = vsel %vm3218_vm7, %v8880_v42, %v3217_v2  ;;  %vm3225_vm9 = vcmp.eq.f32.partialorder %v8883_v11, inf  ;;  %v8960_v54 = vpop.eup %6640  ;;  %v3221_v49 = vand.u32 2147483648, %v8880_v42  ;;  %vm3232_vm10 = vcmp.eq.f32.partialorder %v8889_v32, inf }
 0x670   : > { %v3215_v52 = vsel %vm3213_vm6, %v3214_v28, %v3212_v23  ;;  %v3226_v45 = vsel %vm3225_vm9, %v8883_v11, %v3224_v21  ;;  %v8965_v25 = vpop.eup %6642  ;;  %vm3227_vm11 = vcmp.eq.f32.partialorder %v8883_v11, 0.0  ;;  %v3228_v58 = vand.u32 2147483648, %v8883_v11 }
 0x671   : > { %v3233_v2 = vsel %vm3232_vm10, %v8889_v32, %v3231_v12  ;;  %vm3239_vm12 = vcmp.eq.f32.partialorder %v8892_v53, inf  ;;  %v3222_v41 = vsel %vm3220_vm8, %v3221_v49, %v3219_v57  ;;  %v3235_v0 = vand.u32 2147483648, %v8889_v32 }
 0x672   : > { %v3240_v44 = vsel %vm3239_vm12, %v8892_v53, %v3238_v33  ;;  %vm3246_vm13 = vcmp.eq.f32.partialorder %v8897_v24, inf  ;;  %v3229_v42 = vsel %vm3227_vm11, %v3228_v58, %v3226_v45  ;;  %vm3234_vm14 = vcmp.eq.f32.partialorder %v8889_v32, 0.0 }
 0x673   : > { %v3242_v21 = vand.u32 2147483648, %v8892_v53  ;;  %v3247_v26 = vsel %vm3246_vm13, %v8897_v24, %v3245_v60  ;;  %v8977_v22 = vpop.eup %6644  ;;  %v3261_v11 = vadd.f32 1e-07, %v3215_v52  ;;  %v3236_v40 = vsel %vm3234_vm14, %v3235_v0, %v3233_v2 }
 0x674   : > { %vm3241_vm15 = vcmp.eq.f32.partialorder %v8892_v53, 0.0  ;;  %v3249_v20 = vand.u32 2147483648, %v8897_v24  ;;  %v8981_v50 = vpop.eup %6646  ;;  %6652 = vrcp.f32 %v3258_v51  ;;  %v3262_v47 = vadd.f32 1e-07, %v3222_v41 }
 0x675   : > { %v3243_v39 = vsel %vm3241_vm15, %v3242_v21, %v3240_v44  ;;  %vm3248_vm1 = vcmp.eq.f32.partialorder %v8897_v24, 0.0  ;;  %v8984_v32 = vpop.eup %6648  ;;  %6654 = vrcp.f32 %v3259_v9  ;;  %v3263_v13 = vadd.f32 1e-07, %v3229_v42 }
 0x676   : > { %v3250_v15 = vsel %vm3248_vm1, %v3249_v20, %v3247_v26  ;;  %v8986_v17 = vpop.eup %6650  ;;  %v2862_v1 = vcvt.f32.s32 %v8762_v29  ;;  %6656 = vrcp.f32 %v3260_v10  ;;  %v3264_v53 = vadd.f32 1e-07, %v3236_v40 }
 0x677   : > { %6658 = vrcp.f32 %v3261_v11  ;;  %v3265_v48 = vadd.f32 1e-07, %v3243_v39  ;;  %v2876_v38 = vcvt.f32.s32 %v8768_v3  ;;  %v3266_v4 = vadd.f32 1e-07, %v3250_v15 }
 0x678   : > { %6660 = vrcp.f32 %v3262_v47  ;;  %v2890_v12 = vcvt.f32.s32 %v8773_v30  ;;  %v2863_v56 = vshll.u32 %v2862_v1, 16  ;;  %v2904_v33 = vcvt.f32.s32 %v8778_v62 }
 0x679   : > { %6662 = vrcp.f32 %v3263_v13  ;;  %v2918_v60 = vcvt.f32.s32 %v8781_v37  ;;  %v2877_v29 = vshll.u32 %v2876_v38, 16  ;;  %v2932_v3 = vcvt.f32.s32 %v8788_v5 }
 0x67a   : > { %6664 = vrcp.f32 %v3264_v53  ;;  %v2891_v23 = vshll.u32 %v2890_v12, 16  ;;  %v2946_v9 = vcvt.f32.s32 %v8793_v35  ;;  %v2960_v30 = vcvt.f32.s32 %v8798_v7 }
 0x67b   : > { %6666 = vrcp.f32 %v3265_v48  ;;  %v2905_v57 = vshll.u32 %v2904_v33, 16  ;;  %v2974_v62 = vcvt.f32.s32 %v8803_v16  ;;  %v2919_v49 = vshll.u32 %v2918_v60, 16 }
 0x67c   : > { %6668 = vrcp.f32 %v3266_v4  ;;  %v2988_v45 = vcvt.f32.s32 %v8808_v19  ;;  %v3002_v5 = vcvt.f32.s32 %v8813_v34  ;;  %v2933_v44 = vshll.u32 %v2932_v3, 16 }
 0x67d   : > { %v2947_v42 = vshll.u32 %v2946_v9, 16  ;;  %v9010_v21 = vshll.u32 %v2960_v30, 16  ;;  %v9017_v26 = vshll.u32 %v2974_v62, 16  ;;  %v3016_v38 = vcvt.f32.s32 %v8818_v55  ;;  %v10428_v62 = vld [vmem:[#allocation5_spill] sm:$0xff] }
 0x67e   : > { %v8996_v10 = vpop.eup %6652  ;;  %v9026_v47 = vshll.u32 %v2988_v45, 16  ;;  %v9028_v39 = vshll.u32 %v3002_v5, 16  ;;  %v3030_v55 = vcvt.f32.s32 %v8823_v8  ;;  %v10429_v5 = vld [vmem:[#allocation7_spill] sm:$0xff] }
 0x67f   : > { %v9000_v52 = vpop.eup %6654 }
 0x680   : > { %v9005_v7 = vpop.eup %6656 }
 0x681   : > { %v9008_v0 = vpop.eup %6658 }
 0x682   : > { %v9015_v34 = vpop.eup %6660 }
 0x683   : > { %v9024_v20 = vpop.eup %6662 }
 0x684   : > { %v9031_v1 = vpop.eup %6664 }
 0x6c2   : > { %v2860_v24 = vpop.xlane.xlu0 %2859 }
 0x6c3   : > { %v2861_v27 = vcvt.f32.s32 %v2860_v24 }
 0x6c5   : > { %v2864_v51 = vadd.s32 %v2863_v56, %v2861_v27 }
 0x6c6   : > { %v2874_v28 = vpop.xlane.xlu1 %2873  ;;  %v2888_v58 = vpop.xlane.xlu0 %2887 }
 0x6c7   : > { %vm3075_vm2 = vcmp.eq.s32.totalorder %v10373_v61, %v2864_v51  ;;  %v2875_v37 = vcvt.f32.s32 %v2874_v28  ;;  %v2889_v41 = vcvt.f32.s32 %v2888_v58  ;;  %v10426_v51 = vld [vmem:[#allocation3_spill] sm:$0xff] }
 0x6c8   : > { %v5561_v35 = vsel %vm3075_vm2, 1.0, %v10374_v36 }
 0x6c9   : > { %v2878_v2 = vadd.s32 %v2877_v29, %v2875_v37  ;;  %vm3331_vm3 = vcmp.gt.f32.partialorder %v5561_v35, 0.0  ;;  %v3299_v16 = vmul.f32 %v8955_v43, %v5561_v35  ;;  %v2892_v11 = vadd.s32 %v2891_v23, %v2889_v41 }
 0x6ca   : > { %v9013_v19 = vsel %vm3331_vm3, 1e+30, %v8393_v6  ;;  %v2902_v40 = vpop.xlane.xlu1 %2901  ;;  %v3044_v23 = vcvt.f32.s32 %v8828_v14 }
 0x6cb   : > { %3363 = vmin.xlane.f32.xlu0 %v9013_v19  ;;  %vm3076_vm4 = vcmp.eq.s32.totalorder %v10373_v61, %v2878_v2  ;;  %v9022_v43 = vadd.f32 %v3299_v16, %v8401_v63  ;;  %v2903_v6 = vcvt.f32.s32 %v2902_v40  ;;  %v2916_v13 = vpop.xlane.xlu0 %2915  ;;  %vm3077_vm5 = vcmp.eq.s32.totalorder %v10373_v61, %v2892_v11  ;;  %v9035_v63 = vpop.eup %6666 }
 0x6cc   : > { %v5562_v15 = vsel %vm3076_vm4, 1.0, %v10374_v36  ;;  %v2917_v53 = vcvt.f32.s32 %v2916_v13  ;;  %v5563_v24 = vsel %vm3077_vm5, 1.0, %v10374_v36  ;;  %v9042_v56 = vpop.eup %6668  ;;  %v3031_v11 = vshll.u32 %v3030_v55, 16 }
 0x6cd   : > { %vm3332_vm6 = vcmp.gt.f32.partialorder %v5562_v15, 0.0  ;;  %v3300_v48 = vmul.f32 %v8960_v54, %v5562_v15  ;;  %v2906_v4 = vadd.s32 %v2905_v57, %v2903_v6  ;;  %vm3333_vm7 = vcmp.gt.f32.partialorder %v5563_v24, 0.0 }
 0x6ce   : > { %v9039_v12 = vsel %vm3332_vm6, 1e+30, %v8421_v31  ;;  %v2920_v33 = vadd.s32 %v2919_v49, %v2917_v53  ;;  %v2930_v27 = vpop.xlane.xlu1 %2929  ;;  %v3301_v60 = vmul.f32 %v8965_v25, %v5563_v24  ;;  %v9051_v31 = vsel %vm3333_vm7, 1e+30, %v10426_v51  ;;  %v10427_v25 = vld [vmem:[#allocation4_spill] sm:$0xff] }
 0x6cf   : > { %3365 = vmin.xlane.f32.xlu1 %v9039_v12  ;;  %v9047_v54 = vadd.f32 %v3300_v48, %v8426_v18  ;;  %v2931_v29 = vcvt.f32.s32 %v2930_v27  ;;  %vm3078_vm8 = vcmp.eq.s32.totalorder %v10373_v61, %v2906_v4  ;;  %3367 = vmin.xlane.f32.xlu0 %v9051_v31  ;;  %v3058_v49 = vcvt.f32.s32 %v8831_v59 }
 0x6d0   : > { %vm3079_vm9 = vcmp.eq.s32.totalorder %v10373_v61, %v2920_v33  ;;  %v5564_v3 = vsel %vm3078_vm8, 1.0, %v10374_v36  ;;  %v9059_v9 = vadd.f32 %v3301_v60, %v10427_v25  ;;  %v2944_v30 = vpop.xlane.xlu0 %2943  ;;  %v3017_v59 = vshll.u32 %v3016_v38, 16  ;;  %v10433_v33 = vld [vmem:[#allocation10_spill] sm:$0xff] }
 0x6d1   : > { %v2934_v18 = vadd.s32 %v2933_v44, %v2931_v29  ;;  %vm3334_vm10 = vcmp.gt.f32.partialorder %v5564_v3, 0.0  ;;  %v3302_v8 = vmul.f32 %v8977_v22, %v5564_v3  ;;  %v5565_v28 = vsel %vm3079_vm9, 1.0, %v10374_v36  ;;  %v10430_v22 = vld [vmem:[#allocation6_spill] sm:$0xff]  ;;  %v10435_v29 = vld [vmem:[#allocation11_spill] sm:$0xff] }
 0x6d2   : > { %v2945_v57 = vcvt.f32.s32 %v2944_v30  ;;  %v9064_v37 = vsel %vm3334_vm10, 1e+30, %v10428_v62  ;;  %vm3335_vm11 = vcmp.gt.f32.partialorder %v5565_v28, 0.0  ;;  %v3303_v14 = vmul.f32 %v8981_v50, %v5565_v28  ;;  %v10431_v50 = vld [vmem:[#allocation8_spill] sm:$0xff]  ;;  %v10436_v30 = vld [vmem:[#allocation13_spill] sm:$0xff] }
 0x6d3   : > { %vm3080_vm12 = vcmp.eq.s32.totalorder %v10373_v61, %v2934_v18  ;;  %v2958_v45 = vpop.xlane.xlu1 %2957  ;;  %3369 = vmin.xlane.f32.xlu1 %v9064_v37  ;;  %v9071_v58 = vsel %vm3335_vm11, 1e+30, %v10429_v5  ;;  %v9074_v35 = vadd.f32 %v3302_v8, %v10430_v22  ;;  %v3045_v48 = vshll.u32 %v3044_v23, 16  ;;  %v10440_v22 = vld [vmem:[#allocation44_spill] sm:$0xff] }
 0x6d4   : > { %v2948_v2 = vadd.s32 %v2947_v42, %v2945_v57  ;;  %v2959_v41 = vcvt.f32.s32 %v2958_v45  ;;  %3371 = vmin.xlane.f32.xlu0 %v9071_v58  ;;  %v5566_v16 = vsel %vm3080_vm12, 1.0, %v10374_v36  ;;  %v9079_v44 = vadd.f32 %v3303_v14, %v10431_v50  ;;  %v2972_v40 = vpop.xlane.xlu0 %2971  ;;  %v10432_v42 = vld [vmem:[#allocation9_spill] sm:$0xff]  ;;  %v10437_v57 = vld [vmem:[#allocation12_spill] sm:$0xff] }
 0x6d5   : > { %vm3336_vm13 = vcmp.gt.f32.partialorder %v5566_v16, 0.0  ;;  %v3304_v6 = vmul.f32 %v8984_v32, %v5566_v16  ;;  %v2973_v15 = vcvt.f32.s32 %v2972_v40  ;;  %v9087_v4 = vshll.u32 %v3058_v49, 16  ;;  %v10439_v49 = vld [vmem:[#allocation14_spill] sm:$0xff] }
 0x6d6   : > { %vm3081_vm14 = vcmp.eq.s32.totalorder %v10373_v61, %v2948_v2  ;;  %v2962_v13 = vadd.s32 %v9010_v21, %v2959_v41  ;;  %v9085_v53 = vsel %vm3336_vm13, 1e+30, %v10432_v42  ;;  %v3072_v60 = vcvt.f32.s32 %v8837_v46 }
 0x6d7   : > { %v2986_v24 = vpop.xlane.xlu1 %2985  ;;  %3373 = vmin.xlane.f32.xlu1 %v9085_v53  ;;  %v5567_v38 = vsel %vm3081_vm14, 1.0, %v10374_v36  ;;  %v9092_v27 = vadd.f32 %v3304_v6, %v10433_v33  ;;  %v2976_v32 = vadd.s32 %v9017_v26, %v2973_v15  ;;  %v10445_v33 = vld [vmem:[#allocation23_spill] sm:$0xff] }
 0x6d8   : > { %vm3082_vm15 = vcmp.eq.s32.totalorder %v10373_v61, %v2962_v13  ;;  %v2987_v21 = vcvt.f32.s32 %v2986_v24  ;;  %vm3337_vm1 = vcmp.gt.f32.partialorder %v5567_v38, 0.0  ;;  %v3000_v55 = vpop.xlane.xlu0 %2999  ;;  %v3305_v23 = vmul.f32 %v8986_v17, %v5567_v38 }
 0x6d9   : > { %10434 = vst [vmem:[#allocation47_spill] sm:$0xff] %v9092_v27  ;;  %v9098_v51 = vsel %vm3337_vm1, 1e+30, %v10435_v29  ;;  %v5568_v3 = vsel %vm3082_vm15, 1.0, %v10374_v36  ;;  %vm3083_vm2 = vcmp.eq.s32.totalorder %v10373_v61, %v2976_v32  ;;  %v3001_v18 = vcvt.f32.s32 %v3000_v55 }
 0x6da   : > { %v2990_v25 = vadd.s32 %v9026_v47, %v2987_v21  ;;  %3375 = vmin.xlane.f32.xlu0 %v9098_v51  ;;  %vm3338_vm3 = vcmp.gt.f32.partialorder %v5568_v3, 0.0  ;;  %v3306_v46 = vmul.f32 %v8996_v10, %v5568_v3  ;;  %v5569_v28 = vsel %vm3083_vm2, 1.0, %v10374_v36  ;;  %v10446_v21 = vld [vmem:[#allocation22_spill] sm:$0xff] }
 0x6db   : > { %v3014_v26 = vpop.xlane.xlu1 %3013  ;;  %v9106_v8 = vsel %vm3338_vm3, 1e+30, %v10436_v30  ;;  %v9111_v17 = vadd.f32 %v3305_v23, %v10437_v57  ;;  %v3004_v62 = vadd.s32 %v9028_v39, %v3001_v18  ;;  %vm3339_vm5 = vcmp.gt.f32.partialorder %v5569_v28, 0.0  ;;  %v10442_v39 = vld [vmem:[#allocation20_spill] sm:$0xff]  ;;  %v10449_v18 = vld [vmem:[#allocation26_spill] sm:$0xff] }
 0x6dc   : > { %vm3084_vm4 = vcmp.eq.s32.totalorder %v10373_v61, %v2990_v25  ;;  %v3015_v47 = vcvt.f32.s32 %v3014_v26  ;;  %3377 = vmin.xlane.f32.xlu1 %v9106_v8  ;;  %v3028_v14 = vpop.xlane.xlu0 %3027  ;;  %v9117_v45 = vsel %vm3339_vm5, 1e+30, %v10439_v49  ;;  %v3307_v5 = vmul.f32 %v9000_v52, %v5569_v28  ;;  %v10443_v52 = vld [vmem:[#allocation18_spill] sm:$0xff] }
 0x6dd   : > { %10438 = vst [vmem:[#allocation17_spill] sm:$0xff] %v9111_v17  ;;  %v5570_v10 = vsel %vm3084_vm4, 1.0, %v10374_v36  ;;  %v9122_v2 = vadd.f32 %v3306_v46, %v10440_v22  ;;  %vm3085_vm6 = vcmp.eq.s32.totalorder %v10373_v61, %v3004_v62  ;;  %v3029_v16 = vcvt.f32.s32 %v3028_v14  ;;  %v10451_v57 = vld [vmem:[#allocation30_spill] sm:$0xff]  ;;  %v10456_v22 = vld [vmem:[#allocation35_spill] sm:$0xff] }
 0x6de   : > { %v3018_v41 = vadd.s32 %v3017_v59, %v3015_v47  ;;  %3379 = vmin.xlane.f32.xlu0 %v9117_v45  ;;  %vm3340_vm7 = vcmp.gt.f32.partialorder %v5570_v10, 0.0  ;;  %v3308_v40 = vmul.f32 %v9005_v7, %v5570_v10  ;;  %v5571_v6 = vsel %vm3085_vm6, 1.0, %v10374_v36  ;;  %v10453_v47 = vld [vmem:[#allocation31_spill] sm:$0xff]  ;;  %v10454_v49 = vld [vmem:[#allocation34_spill] sm:$0xff] }
 0x6df   : > { %10441 = vst [vmem:[#allocation19_spill] sm:$0xff] %v9122_v2  ;;  %v9127_v50 = vsel %vm3340_vm7, 1e+30, %v10442_v39  ;;  %v9132_v13 = vadd.f32 %v3307_v5, %v10443_v52  ;;  %v3032_v15 = vadd.s32 %v3031_v11, %v3029_v16  ;;  %v3042_v42 = vpop.xlane.xlu1 %3041  ;;  %vm3341_vm9 = vcmp.gt.f32.partialorder %v5571_v6, 0.0  ;;  %v10457_v39 = vld [vmem:[#allocation45_spill] sm:$0xff] }
 0x6e0   : > { %vm3086_vm8 = vcmp.eq.s32.totalorder %v10373_v61, %v3018_v41  ;;  %3381 = vmin.xlane.f32.xlu1 %v9127_v50  ;;  %v3309_v59 = vmul.f32 %v9008_v0, %v5571_v6  ;;  %v3043_v24 = vcvt.f32.s32 %v3042_v42  ;;  %v3056_v38 = vpop.xlane.xlu0 %3055  ;;  %v9138_v32 = vsel %vm3341_vm9, 1e+30, %v10445_v33  ;;  %v10448_v0 = vld [vmem:[#allocation27_spill] sm:$0xff]  ;;  %v10458_v6 = vld [vmem:[#allocation2_spill] sm:$0xff] }
 0x6e1   : > { %10444 = vst [vmem:[#allocation21_spill] sm:$0xff] %v9132_v13  ;;  %v5572_v7 = vsel %vm3086_vm8, 1.0, %v10374_v36  ;;  %v9142_v55 = vadd.f32 %v3308_v40, %v10446_v21  ;;  %vm3087_vm10 = vcmp.eq.s32.totalorder %v10373_v61, %v3032_v15  ;;  %v3057_v29 = vcvt.f32.s32 %v3056_v38  ;;  %v10460_v15 = vld [vmem:[#allocation15_spill] sm:$0xff]  ;;  %v10463_v38 = vld [vmem:[#allocation16_spill] sm:$0xff] }
 0x6e2   : > { %3383 = vmin.xlane.f32.xlu0 %v9138_v32  ;;  %vm3342_vm11 = vcmp.gt.f32.partialorder %v5572_v7, 0.0  ;;  %v3310_v11 = vmul.f32 %v9015_v34, %v5572_v7  ;;  %v3046_v23 = vadd.s32 %v3045_v48, %v3043_v24  ;;  %v5573_v25 = vsel %vm3087_vm10, 1.0, %v10374_v36 }
 0x6e3   : > { %10447 = vst [vmem:[#allocation24_spill] sm:$0xff] %v9142_v55  ;;  %v9148_v3 = vsel %vm3342_vm11, 1e+30, %v10448_v0  ;;  %v9152_v26 = vadd.f32 %v3309_v59, %v10449_v18  ;;  %v3060_v30 = vadd.s32 %v9087_v4, %v3057_v29  ;;  %v3070_v46 = vpop.xlane.xlu1 %3069  ;;  %vm3343_vm12 = vcmp.gt.f32.partialorder %v5573_v25, 0.0  ;;  %v10462_v59 = vld [vmem:[#allocation46_spill] sm:$0xff] }
 0x6e4   : > { %3385 = vmin.xlane.f32.xlu1 %v9148_v3  ;;  %v3311_v28 = vmul.f32 %v9024_v20, %v5573_v25  ;;  %v9158_v62 = vadd.f32 %v3310_v11, %v10451_v57  ;;  %v3073_v34 = vshll.u32 %v3072_v60, 16  ;;  %vm3088_vm13 = vcmp.eq.s32.totalorder %v10373_v61, %v3046_v23 }
 0x6e5   : > { %10450 = vst [vmem:[#allocation48_spill] sm:$0xff] %v9152_v26  ;;  %v3071_v48 = vcvt.f32.s32 %v3070_v46  ;;  %v9162_v14 = vsel %vm3343_vm12, 1e+30, %v10453_v47  ;;  %vm3089_vm14 = vcmp.eq.s32.totalorder %v10373_v61, %v3060_v30  ;;  %v5574_v4 = vsel %vm3088_vm13, 1.0, %v10374_v36 }
 0x6e6   : > { %10452 = vst [vmem:[#allocation25_spill] sm:$0xff] %v9158_v62  ;;  %3387 = vmin.xlane.f32.xlu0 %v9162_v14  ;;  %v9168_v5 = vadd.f32 %v3311_v28, %v10454_v49  ;;  %vm3344_vm15 = vcmp.gt.f32.partialorder %v5574_v4, 0.0  ;;  %v3312_v10 = vmul.f32 %v9031_v1, %v5574_v4  ;;  %v5575_v60 = vsel %vm3089_vm14, 1.0, %v10374_v36 }
 0x6e7   : > { %v3074_v20 = vadd.s32 %v3073_v34, %v3071_v48  ;;  %v9173_v41 = vsel %vm3344_vm15, 1e+30, %v10456_v22  ;;  %vm3345_vm1 = vcmp.gt.f32.partialorder %v5575_v60, 0.0  ;;  %v3313_v16 = vmul.f32 %v9035_v63, %v5575_v60 }
 0x6e8   : > { %10455 = vst [vmem:[#allocation28_spill] sm:$0xff] %v9168_v5  ;;  %3389 = vmin.xlane.f32.xlu1 %v9173_v41  ;;  %v9179_v40 = vsel %vm3345_vm1, 1e+30, %v10457_v39  ;;  %v9182_v52 = vadd.f32 %v3312_v10, %v10458_v6 }
 0x6e9   : > { %vm3090_vm2 = vcmp.eq.s32.totalorder %v10373_v61, %v3074_v20  ;;  %v9187_v42 = vadd.f32 %v3313_v16, %v10460_v15 }
 0x6ea   : > { %10459 = vst [vmem:[#allocation29_spill] sm:$0xff] %v9182_v52  ;;  %3391 = vmin.xlane.f32.xlu0 %v9179_v40  ;;  %v5576_v1 = vsel %vm3090_vm2, 1.0, %v10374_v36 }
 0x6eb   : > { %10461 = vst [vmem:[#allocation32_spill] sm:$0xff] %v9187_v42  ;;  %vm3346_vm3 = vcmp.gt.f32.partialorder %v5576_v1, 0.0  ;;  %v3314_v63 = vmul.f32 %v9042_v56, %v5576_v1 }
 0x6ec   : > { %v9191_v24 = vsel %vm3346_vm3, 1e+30, %v10462_v59 }
 0x6ed   : > { %3393 = vmin.xlane.f32.xlu1 %v9191_v24  ;;  %v9195_v33 = vadd.f32 %v3314_v63, %v10463_v38 }
 0x6ef   : > { %10464 = vst [vmem:[#allocation33_spill] sm:$0xff] %v9195_v33 }
 0x758   : > { %v9197_v7 = vpop.xlane.xlu0 %3363 }
 0x759   : > { %vm3395_vm4 = vcmp.le.f32.partialorder %v9013_v19, %v9197_v7 }
 0x75a   : > { %v9202_v21 = vsel %vm3395_vm4, %v10373_v61, 128 }
 0x75b   : > { %v3428_v29 = vshra.s32 %v9202_v21, 16 }
 0x75c   : > { %v9205_v11 = vpop.xlane.xlu1 %3365  ;;  %v9214_v0 = vpop.xlane.xlu0 %3367 }
 0x75d   : > { %vm3396_vm5 = vcmp.le.f32.partialorder %v9039_v12, %v9205_v11  ;;  %v9209_v56 = vcvt.s32.f32 %v3428_v29  ;;  %vm3397_vm6 = vcmp.le.f32.partialorder %v9051_v31, %v9214_v0 }
 0x75e   : > { %v9212_v23 = vsel %vm3396_vm5, %v10373_v61, 128  ;;  %v9221_v19 = vsel %vm3397_vm6, %v10373_v61, 128 }
 0x75f   : > { %v3442_v25 = vshra.s32 %v9212_v23, 16  ;;  %3431 = vmin.xlane.f32.xlu0 %v9209_v56  ;;  %v3456_v30 = vshra.s32 %v9221_v19, 16 }
 0x760   : > { %v9223_v18 = vpop.xlane.xlu1 %3369 }
 0x761   : > { %v9225_v12 = vcvt.s32.f32 %v3442_v25  ;;  %v9228_v46 = vpop.xlane.xlu0 %3371  ;;  %vm3398_vm7 = vcmp.le.f32.partialorder %v9064_v37, %v9223_v18  ;;  %v9235_v31 = vcvt.s32.f32 %v3456_v30 }
 0x762   : > { %vm3399_vm8 = vcmp.le.f32.partialorder %v9071_v58, %v9228_v46  ;;  %v9241_v57 = vsel %vm3398_vm7, %v10373_v61, 128 }
 0x763   : > { %3445 = vmin.xlane.f32.xlu1 %v9225_v12  ;;  %3459 = vmin.xlane.f32.xlu0 %v9235_v31  ;;  %v9244_v34 = vsel %vm3399_vm8, %v10373_v61, 128  ;;  %v3470_v47 = vshra.s32 %v9241_v57, 16 }
 0x764   : > { %v9237_v28 = vpop.xlane.xlu1 %3373  ;;  %v3484_v37 = vshra.s32 %v9244_v34, 16 }
 0x765   : > { %vm3400_vm9 = vcmp.le.f32.partialorder %v9085_v53, %v9237_v28  ;;  %v9264_v10 = vcvt.s32.f32 %v3470_v47 }
 0x766   : > { %v9259_v49 = vsel %vm3400_vm9, %v10373_v61, 128  ;;  %v9266_v60 = vcvt.s32.f32 %v3484_v37 }
 0x767   : > { %v9246_v48 = vpop.xlane.xlu0 %3375  ;;  %v3498_v22 = vshra.s32 %v9259_v49, 16  ;;  %3473 = vmin.xlane.f32.xlu1 %v9264_v10 }
 0x768   : > { %vm3401_vm10 = vcmp.le.f32.partialorder %v9098_v51, %v9246_v48  ;;  %3487 = vmin.xlane.f32.xlu0 %v9266_v60 }
 0x769   : > { %v9254_v58 = vpop.xlane.xlu1 %3377  ;;  %v9262_v20 = vsel %vm3401_vm10, %v10373_v61, 128  ;;  %v9286_v1 = vcvt.s32.f32 %v3498_v22 }
 0x76a   : > { %v3512_v53 = vshra.s32 %v9262_v20, 16  ;;  %vm3402_vm11 = vcmp.le.f32.partialorder %v9106_v8, %v9254_v58 }
 0x76b   : > { %v9256_v4 = vpop.xlane.xlu0 %3379  ;;  %v9281_v39 = vsel %vm3402_vm11, %v10373_v61, 128  ;;  %3501 = vmin.xlane.f32.xlu1 %v9286_v1 }
 0x76c   : > { %vm3403_vm12 = vcmp.le.f32.partialorder %v9117_v45, %v9256_v4  ;;  %v9288_v15 = vcvt.s32.f32 %v3512_v53  ;;  %v3526_v63 = vshra.s32 %v9281_v39, 16 }
 0x76d   : > { %v9276_v51 = vpop.xlane.xlu1 %3381  ;;  %v9284_v6 = vsel %vm3403_vm12, %v10373_v61, 128 }
 0x76e   : > { %v3540_v8 = vshra.s32 %v9284_v6, 16  ;;  %3515 = vmin.xlane.f32.xlu0 %v9288_v15  ;;  %vm3404_vm13 = vcmp.le.f32.partialorder %v9127_v50, %v9276_v51  ;;  %v9308_v25 = vcvt.s32.f32 %v3526_v63 }
 0x76f   : > { %v9278_v16 = vpop.xlane.xlu0 %3383  ;;  %v9303_v38 = vsel %vm3404_vm13, %v10373_v61, 128 }
 0x770   : > { %vm3405_vm14 = vcmp.le.f32.partialorder %v9138_v32, %v9278_v16  ;;  %v9310_v30 = vcvt.s32.f32 %v3540_v8  ;;  %v3554_v47 = vshra.s32 %v9303_v38, 16  ;;  %3529 = vmin.xlane.f32.xlu1 %v9308_v25 }
 0x771   : > { %v9298_v45 = vpop.xlane.xlu1 %3385  ;;  %v9306_v29 = vsel %vm3405_vm14, %v10373_v61, 128 }
 0x772   : > { %v3568_v50 = vshra.s32 %v9306_v29, 16  ;;  %3543 = vmin.xlane.f32.xlu0 %v9310_v30  ;;  %vm3406_vm15 = vcmp.le.f32.partialorder %v9148_v3, %v9298_v45  ;;  %v9330_v63 = vcvt.s32.f32 %v3554_v47 }
 0x773   : > { %v9300_v59 = vpop.xlane.xlu0 %3387  ;;  %v9325_v22 = vsel %vm3406_vm15, %v10373_v61, 128 }
 0x774   : > { %vm3407_vm1 = vcmp.le.f32.partialorder %v9162_v14, %v9300_v59  ;;  %v9332_v8 = vcvt.s32.f32 %v3568_v50  ;;  %v3582_v14 = vshra.s32 %v9325_v22, 16  ;;  %3557 = vmin.xlane.f32.xlu1 %v9330_v63 }
 0x775   : > { %v9320_v32 = vpop.xlane.xlu1 %3389  ;;  %v9328_v53 = vsel %vm3407_vm1, %v10373_v61, 128 }
 0x776   : > { %vm3408_vm2 = vcmp.le.f32.partialorder %v9173_v41, %v9320_v32  ;;  %v3596_v33 = vshra.s32 %v9328_v53, 16  ;;  %3571 = vmin.xlane.f32.xlu0 %v9332_v8  ;;  %v9352_v52 = vcvt.s32.f32 %v3582_v14  ;;  %v3441_v14 = vand.u32 65535, %v9212_v23 }
 0x777   : > { %v9322_v37 = vpop.xlane.xlu0 %3391  ;;  %v9337_v3 = vsel %vm3408_vm2, %v10373_v61, 128 }
 0x778   : > { %vm3409_vm3 = vcmp.le.f32.partialorder %v9179_v40, %v9322_v37  ;;  %v3610_v41 = vshra.s32 %v9337_v3, 16  ;;  %v9354_v40 = vcvt.s32.f32 %v3596_v33  ;;  %3585 = vmin.xlane.f32.xlu1 %v9352_v52 }
 0x779   : > { %v9346_v47 = vsel %vm3409_vm3, %v10373_v61, 128 }
 0x77a   : > { %v9348_v50 = vpop.xlane.xlu1 %3393  ;;  %v3624_v42 = vshra.s32 %v9346_v47, 16  ;;  %3599 = vmin.xlane.f32.xlu0 %v9354_v40  ;;  %v9364_v26 = vcvt.s32.f32 %v3610_v41  ;;  %v3455_v41 = vand.u32 65535, %v9221_v19 }
 0x77b   : > { %vm3410_vm4 = vcmp.le.f32.partialorder %v9191_v24, %v9348_v50  ;;  %v3427_v24 = vand.u32 65535, %v9202_v21 }
 0x77c   : > { %v9359_v5 = vsel %vm3410_vm4, %v10373_v61, 128  ;;  %v9366_v55 = vcvt.s32.f32 %v3624_v42  ;;  %3613 = vmin.xlane.f32.xlu1 %v9364_v26  ;;  %v3457_v23 = vcvt.s32.f32 %v3455_v41 }
 0x77d   : > { %v3638_v62 = vshra.s32 %v9359_v5, 16  ;;  %v3429_v2 = vcvt.s32.f32 %v3427_v24 }
 0x77e   : > { %3627 = vmin.xlane.f32.xlu0 %v9366_v55 }
 0x77f   : > { %v9370_v33 = vcvt.s32.f32 %v3638_v62  ;;  %v3443_v62 = vcvt.s32.f32 %v3441_v14 }
 0x781   : > { %3641 = vmin.xlane.f32.xlu1 %v9370_v33 }
 0x7ec   : > { %v9375_v13 = vpop.xlane.xlu0 %3431 }
 0x7ed   : > { %vm3433_vm5 = vcmp.eq.f32.partialorder %v9209_v56, %v9375_v13  ;;  %v3483_v56 = vand.u32 65535, %v9244_v34 }
 0x7ee   : > { %v3434_v42 = vsel %vm3433_vm5, %v3429_v2, inf  ;;  %v3469_v2 = vand.u32 65535, %v9241_v57 }
 0x7ef   : > { %3435 = vmin.xlane.f32.xlu0 %v3434_v42 }
 0x7f0   : > { %v9380_v17 = vpop.xlane.xlu1 %3445  ;;  %v9384_v21 = vpop.xlane.xlu0 %3459  ;;  %v3471_v42 = vcvt.s32.f32 %v3469_v2 }
 0x7f1   : > { %vm3447_vm6 = vcmp.eq.f32.partialorder %v9225_v12, %v9380_v17  ;;  %vm3461_vm7 = vcmp.eq.f32.partialorder %v9235_v31, %v9384_v21  ;;  %v3485_v12 = vcvt.s32.f32 %v3483_v56  ;;  %v3511_v31 = vand.u32 65535, %v9262_v20 }
 0x7f2   : > { %v3448_v27 = vsel %vm3447_vm6, %v3443_v62, inf  ;;  %v3462_v24 = vsel %vm3461_vm7, %v3457_v23, inf  ;;  %v3539_v20 = vand.u32 65535, %v9284_v6  ;;  %v3567_v6 = vand.u32 65535, %v9306_v29 }
 0x7f3   : > { %3449 = vmin.xlane.f32.xlu1 %v3448_v27  ;;  %3463 = vmin.xlane.f32.xlu0 %v3462_v24  ;;  %v3497_v27 = vand.u32 65535, %v9259_v49  ;;  %v3513_v24 = vcvt.s32.f32 %v3511_v31  ;;  %v3525_v49 = vand.u32 65535, %v9281_v39  ;;  %v3553_v39 = vand.u32 65535, %v9303_v38 }
 0x7f4   : > { %v9390_v19 = vpop.xlane.xlu1 %3473  ;;  %v3581_v38 = vand.u32 65535, %v9325_v22  ;;  %v3595_v29 = vand.u32 65535, %v9328_v53 }
 0x7f5   : > { %v9392_v14 = vpop.xlane.xlu0 %3487  ;;  %vm3475_vm8 = vcmp.eq.f32.partialorder %v9264_v10, %v9390_v19  ;;  %v3499_v23 = vcvt.s32.f32 %v3497_v27 }
 0x7f6   : > { %vm3489_vm9 = vcmp.eq.f32.partialorder %v9266_v60, %v9392_v14  ;;  %v3476_v41 = vsel %vm3475_vm8, %v3471_v42, inf  ;;  %v3527_v42 = vcvt.s32.f32 %v3525_v49 }
 0x7f7   : > { %v3490_v57 = vsel %vm3489_vm9, %v3485_v12, inf  ;;  %3477 = vmin.xlane.f32.xlu1 %v3476_v41  ;;  %v3541_v12 = vcvt.s32.f32 %v3539_v20  ;;  %v3555_v41 = vcvt.s32.f32 %v3553_v39 }
 0x7f8   : > { %3491 = vmin.xlane.f32.xlu0 %v3490_v57  ;;  %v9400_v34 = vpop.xlane.xlu1 %3501  ;;  %v3569_v57 = vcvt.s32.f32 %v3567_v6  ;;  %v459_v6 = vld [vmem:[%s9457_s20 + $0x10] sm:$0xff] }
 0x7f9   : > { %vm3503_vm10 = vcmp.eq.f32.partialorder %v9286_v1, %v9400_v34 }
 0x7fa   : > { %v3504_v10 = vsel %vm3503_vm10, %v3499_v23, inf  ;;  %v3609_v23 = vand.u32 65535, %v9337_v3 }
 0x7fb   : > { %v9402_v62 = vpop.xlane.xlu0 %3515  ;;  %3505 = vmin.xlane.f32.xlu1 %v3504_v10  ;;  %v3597_v10 = vcvt.s32.f32 %v3595_v29  ;;  %v463_v29 = vld [vmem:[%s9457_s20 + $0x30] sm:$0xff] }
 0x7fc   : > { %vm3517_vm11 = vcmp.eq.f32.partialorder %v9288_v15, %v9402_v62 }
 0x7fd   : > { %v3518_v60 = vsel %vm3517_vm11, %v3513_v24, inf  ;;  %v9410_v2 = vpop.xlane.xlu1 %3529  ;;  %v3623_v24 = vand.u32 65535, %v9346_v47 }
 0x7fe   : > { %3519 = vmin.xlane.f32.xlu0 %v3518_v60  ;;  %vm3531_vm12 = vcmp.eq.f32.partialorder %v9308_v25, %v9410_v2  ;;  %v3611_v60 = vcvt.s32.f32 %v3609_v23  ;;  %v3699_v23 = vmax.f32 %v9197_v7, 0.0  ;;  %v9484_v7 = vmax.f32 %v9246_v48, 0.0 }
 0x7ff   : > { %v9412_v56 = vpop.xlane.xlu0 %3543  ;;  %v3532_v1 = vsel %vm3531_vm12, %v3527_v42, inf  ;;  %v3625_v42 = vcvt.s32.f32 %v3623_v24  ;;  %v3700_v24 = vmax.f32 %v9205_v11, 0.0 }
 0x800   : > { %vm3545_vm13 = vcmp.eq.f32.partialorder %v9310_v30, %v9412_v56  ;;  %3533 = vmin.xlane.f32.xlu1 %v3532_v1  ;;  %v460_v1 = vld [vmem:[%s9457_s20 + $0x18] sm:$0xff]  ;;  %6670 = vrsqrt.f32 %v3699_v23  ;;  %vm3717_vm6 = vcmp.eq.f32.partialorder %v3699_v23, inf  ;;  %v3720_v48 = vand.u32 2147483648, %v3699_v23 }
 0x801   : > { %v3546_v15 = vsel %vm3545_vm13, %v3541_v12, inf  ;;  %v9420_v27 = vpop.xlane.xlu1 %3557  ;;  %6672 = vrsqrt.f32 %v3700_v24  ;;  %vm3719_vm7 = vcmp.eq.f32.partialorder %v3699_v23, 0.0  ;;  %vm3724_vm8 = vcmp.eq.f32.partialorder %v3700_v24, inf }
 0x802   : > { %3547 = vmin.xlane.f32.xlu0 %v3546_v15  ;;  %vm3559_vm14 = vcmp.eq.f32.partialorder %v9330_v63, %v9420_v27  ;;  %v3583_v63 = vcvt.s32.f32 %v3581_v38  ;;  %v6254_v15 = vpack.c.bf16 %v460_v1, %v459_v6  ;;  %vm3726_vm9 = vcmp.eq.f32.partialorder %v3700_v24, 0.0 }
 0x803   : > { %v9422_v31 = vpop.xlane.xlu0 %3571  ;;  %v3560_v25 = vsel %vm3559_vm14, %v3555_v41, inf  ;;  %v461_v41 = vld [vmem:[%s9457_s20 + $0x20] sm:$0xff] }
 0x804   : > { %vm3573_vm15 = vcmp.eq.f32.partialorder %v9332_v8, %v9422_v31  ;;  %3561 = vmin.xlane.f32.xlu1 %v3560_v25  ;;  %v3637_v8 = vand.u32 65535, %v9359_v5  ;;  %v464_v25 = vld [vmem:[%s9457_s20 + $0x38] sm:$0xff] }
 0x805   : > { %v3574_v30 = vsel %vm3573_vm15, %v3569_v57, inf  ;;  %v9432_v49 = vpop.xlane.xlu1 %3585  ;;  %v462_v57 = vld [vmem:[%s9457_s20 + $0x28] sm:$0xff]  ;;  %vm3759_vm15 = vcmp.eq.f32.partialorder %v9484_v7, inf }
 0x806   : > { %3575 = vmin.xlane.f32.xlu0 %v3574_v30  ;;  %vm3587_vm1 = vcmp.eq.f32.partialorder %v9352_v52, %v9432_v49  ;;  %v3639_v5 = vcvt.s32.f32 %v3637_v8  ;;  %v6258_v38 = vpack.c.bf16 %v462_v57, %v461_v41  ;;  %v6262_v30 = vpack.c.bf16 %v464_v25, %v463_v29 }
 0x807   : > { %v9434_v20 = vpop.xlane.xlu0 %3599  ;;  %v3588_v22 = vsel %vm3587_vm1, %v3583_v63, inf  ;;  %v9470_v63 = vmax.f32 %v9214_v0, 0.0  ;;  %v9480_v8 = vmax.f32 %v9237_v28, 0.0  ;;  %v9488_v0 = vmax.f32 %v9254_v58, 0.0 }
 0x808   : > { %vm3601_vm2 = vcmp.eq.f32.partialorder %v9354_v40, %v9434_v20  ;;  %3589 = vmin.xlane.f32.xlu1 %v3588_v22  ;;  %v9477_v22 = vmax.f32 %v9228_v46, 0.0  ;;  %v9493_v46 = vmax.f32 %v9256_v4, 0.0  ;;  %v3727_v58 = vand.u32 2147483648, %v3700_v24 }
 0x809   : > { %v3602_v53 = vsel %vm3601_vm2, %v3597_v10, inf  ;;  %v9441_v3 = vpop.xlane.xlu1 %3613  ;;  %6674 = vrsqrt.f32 %v9470_v63  ;;  %v9474_v10 = vmax.f32 %v9223_v18, 0.0  ;;  %vm3731_vm10 = vcmp.eq.f32.partialorder %v9470_v63, inf }
 0x80a   : > { %3603 = vmin.xlane.f32.xlu0 %v3602_v53  ;;  %vm3615_vm3 = vcmp.eq.f32.partialorder %v9364_v26, %v9441_v3  ;;  %v458_v26 = vld [vmem:[%s9457_s20 + $0x8] sm:$0xff]  ;;  %v6671_v53 = vpop.eup %6670  ;;  %vm3733_vm11 = vcmp.eq.f32.partialorder %v9470_v63, 0.0  ;;  %vm3745_vm13 = vcmp.eq.f32.partialorder %v9477_v22, inf  ;;  %v3748_v1 = vand.u32 2147483648, %v9477_v22 }
 0x80b   : > { %v9443_v47 = vpop.xlane.xlu0 %3627  ;;  %v3616_v52 = vsel %vm3615_vm3, %v3611_v60, inf  ;;  %6676 = vrsqrt.f32 %v9474_v10  ;;  %v3716_v11 = vmul.f32 %v6671_v53, %v3699_v23  ;;  %v6673_v18 = vpop.eup %6672  ;;  %vm3738_vm12 = vcmp.eq.f32.partialorder %v9474_v10, inf }
 0x80c   : > { %vm3629_vm4 = vcmp.eq.f32.partialorder %v9366_v55, %v9443_v47  ;;  %3617 = vmin.xlane.f32.xlu1 %v3616_v52  ;;  %v457_v55 = vld [vmem:[%s9457_s20] sm:$0xff]  ;;  %6678 = vrsqrt.f32 %v9477_v22  ;;  %v9497_v52 = vmax.f32 %v9276_v51, 0.0  ;;  %v3734_v51 = vand.u32 2147483648, %v9470_v63 }
 0x80d   : > { %v3630_v40 = vsel %vm3629_vm4, %v3625_v42, inf  ;;  %6680 = vrsqrt.f32 %v9480_v8  ;;  %v3718_v60 = vsel %vm3717_vm6, %v3699_v23, %v3716_v11  ;;  %v3723_v42 = vmul.f32 %v6673_v18, %v3700_v24 }
 0x80e   : > { %3631 = vmin.xlane.f32.xlu0 %v3630_v40  ;;  %v9449_v12 = vpop.xlane.xlu1 %3641  ;;  %6682 = vrsqrt.f32 %v9484_v7  ;;  %vm3752_vm14 = vcmp.eq.f32.partialorder %v9480_v8, inf  ;;  %v9518_v57 = vmax.f32 %v9300_v59, 0.0  ;;  %v3755_v29 = vand.u32 2147483648, %v9480_v8 }
 0x80f   : > { %vm3643_vm5 = vcmp.eq.f32.partialorder %v9370_v33, %v9449_v12  ;;  %v6250_v33 = vpack.c.bf16 %v458_v26, %v457_v55  ;;  %6684 = vrsqrt.f32 %v9488_v0  ;;  %v3725_v4 = vsel %vm3724_vm8, %v3700_v24, %v3723_v42 }
 0x810   : > { %v3644_v39 = vsel %vm3643_vm5, %v3639_v5, inf  ;;  %6686 = vrsqrt.f32 %v9493_v46  ;;  %v3721_v5 = vsel %vm3719_vm7, %v3720_v48, %v3718_v60  ;;  %v9510_v26 = vmax.f32 %v9298_v45, 0.0 }
 0x811   : > { %3645 = vmin.xlane.f32.xlu1 %v3644_v39  ;;  %6251 = vmatprep.subr.bf16.mxu1 %v6250_v33  ;;  %v9504_v39 = vmax.f32 %v9278_v16, 0.0  ;;  %6688 = vrsqrt.f32 %v9497_v52  ;;  %vm3740_vm1 = vcmp.eq.f32.partialorder %v9474_v10, 0.0  ;;  %v3762_v23 = vand.u32 2147483648, %v9484_v7 }
 0x812   : > { %6253 = vmatpush3.bf16.msra.mxu1 %v6250_v33  ;;  %v3741_v33 = vand.u32 2147483648, %v9474_v10  ;;  %vm3766_vm2 = vcmp.eq.f32.partialorder %v9488_v0, inf  ;;  %vm3747_vm3 = vcmp.eq.f32.partialorder %v9477_v22, 0.0  ;;  %v3769_v18 = vand.u32 2147483648, %v9488_v0 }
 0x813   : > { %6255 = vmatprep.subr.bf16.mxu1 %v6254_v15  ;;  %v6675_v28 = vpop.eup %6674  ;;  %6690 = vrsqrt.f32 %v9504_v39  ;;  %v3438_v60 = vcvt.f32.s32 %v9375_v13  ;;  %vm3773_vm4 = vcmp.eq.f32.partialorder %v9493_v46, inf  ;;  %vm3754_vm5 = vcmp.eq.f32.partialorder %v9480_v8, 0.0 }
 0x814   : > { %v3730_v40 = vmul.f32 %v6675_v28, %v9470_v63  ;;  %6692 = vrsqrt.f32 %v9510_v26  ;;  %v9537_v28 = vmax.f32 %v9320_v32, 0.0  ;;  %v3776_v32 = vand.u32 2147483648, %v9493_v46 }
 0x815   : > { %v6677_v55 = vpop.eup %6676  ;;  %vm3780_vm6 = vcmp.eq.f32.partialorder %v9497_v52, inf  ;;  %vm3761_vm7 = vcmp.eq.f32.partialorder %v9484_v7, 0.0  ;;  %vm3768_vm8 = vcmp.eq.f32.partialorder %v9488_v0, 0.0 }
 0x816   : > { %6257 = vmatpush3.bf16.msra.mxu1 %v6254_v15  ;;  %v6679_v6 = vpop.eup %6678  ;;  %v3827_v15 = vadd.f32 1e-07, %v3721_v5  ;;  %v3732_v41 = vsel %vm3731_vm10, %v9470_v63, %v3730_v40  ;;  %v3737_v45 = vmul.f32 %v6677_v55, %v9474_v10  ;;  %v9546_v63 = vmax.f32 %v9322_v37, 0.0 }
 0x817   : > { %6259 = vmatprep.subr.bf16.mxu1 %v6258_v38  ;;  %v6681_v16 = vpop.eup %6680  ;;  %v3735_v11 = vsel %vm3733_vm11, %v3734_v51, %v3732_v41  ;;  %v3783_v37 = vand.u32 2147483648, %v9497_v52  ;;  %vm3787_vm10 = vcmp.eq.f32.partialorder %v9504_v39, inf  ;;  %vm3794_vm11 = vcmp.eq.f32.partialorder %v9510_v26, inf }
 0x818   : > { %v6683_v25 = vpop.eup %6682  ;;  %v3751_v24 = vmul.f32 %v6681_v16, %v9480_v8  ;;  %6694 = vrcp.f32 %v3827_v15  ;;  %v3739_v42 = vsel %vm3738_vm12, %v9474_v10, %v3737_v45  ;;  %v3829_v5 = vadd.f32 1e-07, %v3735_v11 }
 0x819   : > { %v6685_v59 = vpop.eup %6684  ;;  %6696 = vrsqrt.f32 %v9518_v57  ;;  %v3758_v48 = vmul.f32 %v6683_v25, %v9484_v7  ;;  %v3452_v15 = vcvt.f32.s32 %v9380_v17  ;;  %v9568_v45 = vmax.f32 %v9348_v50, 0.0 }
 0x81a   : > { %6261 = vmatpush3.bf16.msra.mxu1 %v6258_v38  ;;  %v3728_v38 = vsel %vm3726_vm9, %v3727_v58, %v3725_v4  ;;  %v6687_v58 = vpop.eup %6686  ;;  %v3765_v13 = vmul.f32 %v6685_v59, %v9488_v0  ;;  %v3753_v4 = vsel %vm3752_vm14, %v9480_v8, %v3751_v24  ;;  %vm3775_vm9 = vcmp.eq.f32.partialorder %v9493_v46, 0.0 }
 0x81b   : > { %6263 = vmatprep.subr.bf16.mxu1 %v6262_v30  ;;  %v3828_v53 = vadd.f32 1e-07, %v3728_v38  ;;  %v6689_v51 = vpop.eup %6688  ;;  %v3760_v41 = vsel %vm3759_vm15, %v9484_v7, %v3758_v48  ;;  %v3772_v38 = vmul.f32 %v6687_v58, %v9493_v46  ;;  %v3790_v17 = vand.u32 2147483648, %v9504_v39 }
 0x81c   : > { %v3767_v25 = vsel %vm3766_vm2, %v9488_v0, %v3765_v13  ;;  %v3779_v24 = vmul.f32 %v6689_v51, %v9497_v52  ;;  %v3466_v50 = vcvt.f32.s32 %v9384_v21  ;;  %v3453_v58 = vshll.u32 %v3452_v15, 16 }
 0x81d   : > { %6698 = vrcp.f32 %v3828_v53  ;;  %v6691_v59 = vpop.eup %6690  ;;  %v3797_v53 = vand.u32 2147483648, %v9510_v26  ;;  %v3774_v10 = vsel %vm3773_vm4, %v9493_v46, %v3772_v38  ;;  %vm3782_vm14 = vcmp.eq.f32.partialorder %v9497_v52, 0.0 }
 0x81e   : > { %6265 = vmatpush3.bf16.msra.mxu1 %v6262_v30  ;;  %v3744_v30 = vmul.f32 %v6679_v6, %v9477_v22  ;;  %6700 = vrsqrt.f32 %v9537_v28  ;;  %v3439_v6 = vshll.u32 %v3438_v60, 16  ;;  %v3742_v60 = vsel %vm3740_vm1, %v3741_v33, %v3739_v42  ;;  %v6693_v48 = vpop.eup %6692 }
 0x81f   : > { %6702 = vrsqrt.f32 %v9546_v63  ;;  %v3804_v33 = vand.u32 2147483648, %v9518_v57  ;;  %vm3789_vm15 = vcmp.eq.f32.partialorder %v9504_v39, 0.0  ;;  %v3467_v15 = vshll.u32 %v3466_v50, 16 }
 0x820   : > { %v3746_v40 = vsel %vm3745_vm13, %v9477_v22, %v3744_v30  ;;  %6704 = vrcp.f32 %v3829_v5  ;;  %vm3801_vm13 = vcmp.eq.f32.partialorder %v9518_v57, inf  ;;  %v3786_v51 = vmul.f32 %v6691_v59, %v9504_v39 }
 0x821   : > { %v3749_v21 = vsel %vm3747_vm3, %v3748_v1, %v3746_v40  ;;  %6706 = vrsqrt.f32 %v9568_v45  ;;  %v3793_v50 = vmul.f32 %v6693_v48, %v9510_v26  ;;  %vm3808_vm2 = vcmp.eq.f32.partialorder %v9537_v28, inf }
 0x822   : > { %v6695_v5 = vpop.eup %6694  ;;  %v3831_v38 = vadd.f32 1e-07, %v3749_v21  ;;  %vm3815_vm3 = vcmp.eq.f32.partialorder %v9546_v63, inf  ;;  %vm3796_vm4 = vcmp.eq.f32.partialorder %v9510_v26, 0.0  ;;  %v3770_v21 = vsel %vm3768_vm8, %v3769_v18, %v3767_v25 }
 0x823   : > { %v3480_v7 = vcvt.f32.s32 %v9390_v19  ;;  %v3788_v0 = vsel %vm3787_vm10, %v9504_v39, %v3786_v51  ;;  %v3795_v18 = vsel %vm3794_vm11, %v9510_v26, %v3793_v50  ;;  %v3818_v46 = vand.u32 2147483648, %v9546_v63 }
 0x824   : > { %vm3822_vm8 = vcmp.eq.f32.partialorder %v9568_v45, inf  ;;  %v3550_v26 = vcvt.f32.s32 %v9412_v56  ;;  %v10465_v56 = vand.u32 2147483648, %v9537_v28 }
 0x87c   : > { %v3436_v55 = vpop.xlane.xlu0 %3435 }
 0x87d   : > { %v3437_v16 = vcvt.f32.s32 %v3436_v55  ;;  %v6697_v55 = vpop.eup %6696 }
 0x87f   : > { %v3440_v30 = vadd.s32 %v3439_v6, %v3437_v16  ;;  %v3830_v6 = vadd.f32 1e-07, %v3742_v60 }
 0x880   : > { %v3450_v11 = vpop.xlane.xlu1 %3449  ;;  %v3464_v1 = vpop.xlane.xlu0 %3463 }
 0x881   : > { %vm3651_vm12 = vcmp.eq.s32.totalorder %v10373_v61, %v3440_v30  ;;  %v3451_v13 = vcvt.f32.s32 %v3450_v11  ;;  %v3465_v16 = vcvt.f32.s32 %v3464_v1  ;;  %v3756_v30 = vsel %vm3754_vm5, %v3755_v29, %v3753_v4 }
 0x882   : > { %v5577_v42 = vsel %vm3651_vm12, 1.0, %v10374_v36  ;;  %v3781_v11 = vsel %vm3780_vm6, %v9497_v52, %v3779_v24  ;;  %6708 = vrcp.f32 %v3830_v6  ;;  %v3763_v24 = vsel %vm3761_vm7, %v3762_v23, %v3760_v41 }
 0x883   : > { %v3454_v22 = vadd.s32 %v3453_v58, %v3451_v13  ;;  %v3875_v40 = vmul.f32 %v6695_v5, %v5577_v42  ;;  %v6699_v58 = vpop.eup %6698  ;;  %v3800_v13 = vmul.f32 %v6697_v55, %v9518_v57  ;;  %v3468_v29 = vadd.s32 %v3467_v15, %v3465_v16 }
 0x884   : > { %v6701_v4 = vpop.eup %6700  ;;  %vm3803_vm5 = vcmp.eq.f32.partialorder %v9518_v57, 0.0  ;;  %6710 = vrcp.f32 %v3831_v38  ;;  %v3777_v5 = vsel %vm3775_vm9, %v3776_v32, %v3774_v10  ;;  %v3494_v23 = vcvt.f32.s32 %v9392_v14  ;;  %v3478_v16 = vpop.xlane.xlu1 %3477 }
 0x885   : > { %vm3652_vm1 = vcmp.eq.s32.totalorder %v10373_v61, %v3454_v22  ;;  %v9610_v60 = vadd.f32 %v3875_v40, %v9022_v43  ;;  %v3832_v43 = vadd.f32 1e-07, %v3756_v30  ;;  %v6703_v48 = vpop.eup %6702  ;;  %vm3653_vm6 = vcmp.eq.s32.totalorder %v10373_v61, %v3468_v29  ;;  %v3492_v38 = vpop.xlane.xlu0 %3491 }
 0x886   : > { %v5578_v8 = vsel %vm3652_vm1, 1.0, %v10374_v36  ;;  %v6705_v42 = vpop.eup %6704  ;;  %v5579_v41 = vsel %vm3653_vm6, 1.0, %v10374_v36  ;;  %v3802_v19 = vsel %vm3801_vm13, %v9518_v57, %v3800_v13  ;;  %v3807_v14 = vmul.f32 %v6701_v4, %v9537_v28 }
 0x887   : > { %3907 = vadd.xlane.f32.xlu0 %v9610_v60  ;;  %v3876_v59 = vmul.f32 %v6699_v58, %v5578_v8  ;;  %v3877_v32 = vmul.f32 %v6705_v42, %v5579_v41  ;;  %v3833_v25 = vadd.f32 1e-07, %v3763_v24  ;;  %v6707_v10 = vpop.eup %6706  ;;  %vm3810_vm7 = vcmp.eq.f32.partialorder %v9537_v28, 0.0 }
 0x888   : > { %v3834_v22 = vadd.f32 1e-07, %v3770_v21  ;;  %v3835_v1 = vadd.f32 1e-07, %v3777_v5  ;;  %v3784_v40 = vsel %vm3782_vm14, %v3783_v37, %v3781_v11  ;;  %v3481_v6 = vshll.u32 %v3480_v7, 16  ;;  %v3506_v5 = vpop.xlane.xlu1 %3505 }
 0x889   : > { %v9637_v55 = vadd.f32 %v3876_v59, %v9047_v54  ;;  %v3814_v54 = vmul.f32 %v6703_v48, %v9546_v63  ;;  %v9655_v51 = vadd.f32 %v3877_v32, %v9059_v9  ;;  %v3495_v15 = vshll.u32 %v3494_v23, 16 }
 0x88a   : > { %6712 = vrcp.f32 %v3832_v43  ;;  %v3791_v30 = vsel %vm3789_vm15, %v3790_v17, %v3788_v0  ;;  %vm3817_vm9 = vcmp.eq.f32.partialorder %v9546_v63, 0.0  ;;  %v3508_v9 = vcvt.f32.s32 %v9400_v34 }
 0x88b   : > { %3909 = vadd.xlane.f32.xlu1 %v9637_v55  ;;  %v3522_v58 = vcvt.f32.s32 %v9402_v62  ;;  %v3479_v50 = vcvt.f32.s32 %v3478_v16  ;;  %v3493_v13 = vcvt.f32.s32 %v3492_v38  ;;  %3911 = vadd.xlane.f32.xlu0 %v9655_v51  ;;  %v3809_v52 = vsel %vm3808_vm2, %v9537_v28, %v3807_v14  ;;  %v3520_v42 = vpop.xlane.xlu0 %3519  ;;  %v466_v28 = vld [vmem:[%s9457_s20 + $0x48] sm:$0xff] }
 0x88c   : > { %v3816_v37 = vsel %vm3815_vm3, %v9546_v63, %v3814_v54  ;;  %v3821_v39 = vmul.f32 %v6707_v10, %v9568_v45  ;;  %6714 = vrcp.f32 %v3833_v25  ;;  %v3798_v34 = vsel %vm3796_vm4, %v3797_v53, %v3795_v18  ;;  %v6709_v62 = vpop.eup %6708 }
 0x88d   : > { %v3482_v17 = vadd.s32 %v3481_v6, %v3479_v50  ;;  %v3496_v11 = vadd.s32 %v3495_v15, %v3493_v13  ;;  %6716 = vrcp.f32 %v3834_v22  ;;  %v3836_v8 = vadd.f32 1e-07, %v3784_v40  ;;  %v3534_v16 = vpop.xlane.xlu1 %3533 }
 0x88e   : > { %6718 = vrcp.f32 %v3835_v1  ;;  %v3837_v29 = vadd.f32 1e-07, %v3791_v30  ;;  %v3805_v4 = vsel %vm3803_vm5, %v3804_v33, %v3802_v19  ;;  %v6711_v59 = vpop.eup %6710  ;;  %v3509_v43 = vshll.u32 %v3508_v9, 16  ;;  %v465_v1 = vld [vmem:[%s9457_s20 + $0x40] sm:$0xff] }
 0x88f   : > { %v3523_v24 = vshll.u32 %v3522_v58, 16  ;;  %vm3654_vm10 = vcmp.eq.s32.totalorder %v10373_v61, %v3482_v17  ;;  %vm3655_vm11 = vcmp.eq.s32.totalorder %v10373_v61, %v3496_v11  ;;  %v3536_v48 = vcvt.f32.s32 %v9410_v2  ;;  %v3548_v38 = vpop.xlane.xlu0 %3547  ;;  %v10466_v17 = vld [vmem:[#allocation47_spill] sm:$0xff] }
 0x890   : > { %v5580_v53 = vsel %vm3654_vm10, 1.0, %v10374_v36  ;;  %v5581_v21 = vsel %vm3655_vm11, 1.0, %v10374_v36  ;;  %v3507_v7 = vcvt.f32.s32 %v3506_v5  ;;  %v3521_v57 = vcvt.f32.s32 %v3520_v42 }
 0x891   : > { %v3878_v33 = vmul.f32 %v6709_v62, %v5580_v53  ;;  %v3879_v23 = vmul.f32 %v6711_v59, %v5581_v21  ;;  %v3823_v41 = vsel %vm3822_vm8, %v9568_v45, %v3821_v39  ;;  %6720 = vrcp.f32 %v3836_v8  ;;  %v3562_v5 = vpop.xlane.xlu1 %3561 }
 0x892   : > { %v3838_v2 = vadd.f32 1e-07, %v3798_v34  ;;  %v3812_v0 = vsel %vm3810_vm7, %v10465_v56, %v3809_v52  ;;  %v3510_v18 = vadd.s32 %v3509_v43, %v3507_v7  ;;  %v3524_v32 = vadd.s32 %v3523_v24, %v3521_v57  ;;  %v10467_v34 = vld [vmem:[#allocation17_spill] sm:$0xff]  ;;  %v467_v43 = vld [vmem:[%s9457_s20 + $0x50] sm:$0xff] }
 0x893   : > { %v9698_v19 = vadd.f32 %v3878_v33, %v9074_v35  ;;  %v9701_v14 = vadd.f32 %v3879_v23, %v9079_v44  ;;  %v3537_v25 = vshll.u32 %v3536_v48, 16  ;;  %6722 = vrcp.f32 %v3837_v29  ;;  %v468_v24 = vld [vmem:[%s9457_s20 + $0x58] sm:$0xff]  ;;  %v3576_v42 = vpop.xlane.xlu0 %3575 }
 0x894   : > { %v6713_v54 = vpop.eup %6712  ;;  %v3839_v10 = vadd.f32 1e-07, %v3805_v4  ;;  %v3819_v22 = vsel %vm3817_vm9, %v3818_v46, %v3816_v37  ;;  %v3551_v40 = vshll.u32 %v3550_v26, 16  ;;  %vm3656_vm12 = vcmp.eq.s32.totalorder %v10373_v61, %v3510_v18 }
 0x895   : > { %vm3657_vm13 = vcmp.eq.s32.totalorder %v10373_v61, %v3524_v32  ;;  %3913 = vadd.xlane.f32.xlu1 %v9698_v19  ;;  %3915 = vadd.xlane.f32.xlu0 %v9701_v14  ;;  %v6266_v35 = vpack.c.bf16 %v466_v28, %v465_v1  ;;  %v3564_v6 = vcvt.f32.s32 %v9420_v27  ;;  %v3578_v15 = vcvt.f32.s32 %v9422_v31 }
 0x896   : > { %v6715_v44 = vpop.eup %6714  ;;  %v5582_v63 = vsel %vm3656_vm12, 1.0, %v10374_v36  ;;  %v5583_v46 = vsel %vm3657_vm13, 1.0, %v10374_v36  ;;  %v3535_v9 = vcvt.f32.s32 %v3534_v16  ;;  %v3549_v58 = vcvt.f32.s32 %v3548_v38 }
 0x897   : > { %v6717_v30 = vpop.eup %6716  ;;  %v3880_v50 = vmul.f32 %v6713_v54, %v5582_v63  ;;  %v3881_v13 = vmul.f32 %v6715_v44, %v5583_v46  ;;  %6267 = vmatprep.subr.bf16.mxu1 %v6266_v35  ;;  %vm3824_vm14 = vcmp.eq.f32.partialorder %v9568_v45, 0.0  ;;  %v3825_v37 = vand.u32 2147483648, %v9568_v45  ;;  %v3590_v44 = vpop.xlane.xlu1 %3589 }
 0x898   : > { %v6719_v52 = vpop.eup %6718  ;;  %6724 = vrcp.f32 %v3838_v2  ;;  %v3840_v27 = vadd.f32 1e-07, %v3812_v0  ;;  %6269 = vmatpush3.bf16.msra.mxu1 %v6266_v35  ;;  %v3538_v31 = vadd.s32 %v3537_v25, %v3535_v9  ;;  %v3552_v39 = vadd.s32 %v3551_v40, %v3549_v58  ;;  %v10468_v0 = vld [vmem:[#allocation19_spill] sm:$0xff]  ;;  %v10470_v58 = vld [vmem:[#allocation24_spill] sm:$0xff] }
 0x899   : > { %v9720_v11 = vadd.f32 %v3880_v50, %v10466_v17  ;;  %v9723_v62 = vadd.f32 %v3881_v13, %v10467_v34  ;;  %v3565_v8 = vshll.u32 %v3564_v6, 16  ;;  %6726 = vrcp.f32 %v3839_v10  ;;  %v3604_v6 = vpop.xlane.xlu0 %3603  ;;  %v470_v17 = vld [vmem:[%s9457_s20 + $0x68] sm:$0xff] }
 0x89a   : > { %v3841_v29 = vadd.f32 1e-07, %v3819_v22  ;;  %v3826_v4 = vsel %vm3824_vm14, %v3825_v37, %v3823_v41  ;;  %v3579_v59 = vshll.u32 %v3578_v15, 16  ;;  %v3592_v45 = vcvt.f32.s32 %v9432_v49 }
 0x89b   : > { %vm3658_vm15 = vcmp.eq.s32.totalorder %v10373_v61, %v3538_v31  ;;  %vm3659_vm1 = vcmp.eq.s32.totalorder %v10373_v61, %v3552_v39  ;;  %3917 = vadd.xlane.f32.xlu1 %v9720_v11  ;;  %3919 = vadd.xlane.f32.xlu0 %v9723_v62  ;;  %v6721_v48 = vpop.eup %6720  ;;  %v3606_v26 = vcvt.f32.s32 %v9434_v20  ;;  %v6270_v49 = vpack.c.bf16 %v468_v24, %v467_v43  ;;  %v10469_v20 = vld [vmem:[#allocation21_spill] sm:$0xff]  ;;  %v469_v39 = vld [vmem:[%s9457_s20 + $0x60] sm:$0xff] }
 0x89c   : > { %v5584_v53 = vsel %vm3658_vm15, 1.0, %v10374_v36  ;;  %v5585_v21 = vsel %vm3659_vm1, 1.0, %v10374_v36  ;;  %v3563_v7 = vcvt.f32.s32 %v3562_v5  ;;  %v3577_v57 = vcvt.f32.s32 %v3576_v42  ;;  %v10472_v42 = vld [vmem:[#allocation25_spill] sm:$0xff] }
 0x89d   : > { %v3882_v33 = vmul.f32 %v6717_v30, %v5584_v53  ;;  %v3883_v23 = vmul.f32 %v6719_v52, %v5585_v21  ;;  %v6723_v41 = vpop.eup %6722  ;;  %6728 = vrcp.f32 %v3840_v27  ;;  %6271 = vmatprep.subr.bf16.mxu1 %v6270_v49  ;;  %v3842_v54 = vadd.f32 1e-07, %v3826_v4  ;;  %v3618_v27 = vpop.xlane.xlu1 %3617 }
 0x89e   : > { %v3566_v2 = vadd.s32 %v3565_v8, %v3563_v7  ;;  %v3580_v56 = vadd.s32 %v3579_v59, %v3577_v57  ;;  %6273 = vmatpush3.bf16.msra.mxu1 %v6270_v49  ;;  %6730 = vrcp.f32 %v3841_v29  ;;  %v3593_v25 = vshll.u32 %v3592_v45, 16  ;;  %v3632_v31 = vpop.xlane.xlu0 %3631 }
 0x89f   : > { %v9736_v18 = vadd.f32 %v3882_v33, %v10468_v0  ;;  %v9739_v32 = vadd.f32 %v3883_v23, %v10469_v20  ;;  %v3607_v10 = vshll.u32 %v3606_v26, 16  ;;  %v3620_v1 = vcvt.f32.s32 %v9441_v3  ;;  %v10471_v3 = vld [vmem:[#allocation48_spill] sm:$0xff] }
 0x8a0   : > { %vm3660_vm2 = vcmp.eq.s32.totalorder %v10373_v61, %v3566_v2  ;;  %vm3661_vm3 = vcmp.eq.s32.totalorder %v10373_v61, %v3580_v56  ;;  %v3634_v28 = vcvt.f32.s32 %v9443_v47  ;;  %v3591_v15 = vcvt.f32.s32 %v3590_v44  ;;  %v10473_v33 = vld [vmem:[#allocation28_spill] sm:$0xff]  ;;  %v472_v2 = vld [vmem:[%s9457_s20 + $0x78] sm:$0xff] }
 0x8a1   : > { %3921 = vadd.xlane.f32.xlu1 %v9736_v18  ;;  %3923 = vadd.xlane.f32.xlu0 %v9739_v32  ;;  %v5586_v40 = vsel %vm3660_vm2, 1.0, %v10374_v36  ;;  %v5587_v35 = vsel %vm3661_vm3, 1.0, %v10374_v36  ;;  %v3605_v63 = vcvt.f32.s32 %v3604_v6  ;;  %v3621_v13 = vshll.u32 %v3620_v1, 16  ;;  %v3646_v21 = vpop.xlane.xlu1 %3645  ;;  %v10476_v44 = vld [vmem:[#allocation33_spill] sm:$0xff] }
 0x8a2   : > { %v6725_v22 = vpop.eup %6724  ;;  %v3884_v46 = vmul.f32 %v6721_v48, %v5586_v40  ;;  %v3885_v16 = vmul.f32 %v6723_v41, %v5587_v35  ;;  %v3594_v30 = vadd.s32 %v3593_v25, %v3591_v15  ;;  %v3635_v52 = vshll.u32 %v3634_v28, 16  ;;  %v471_v41 = vld [vmem:[%s9457_s20 + $0x70] sm:$0xff]  ;;  %v10474_v25 = vld [vmem:[#allocation29_spill] sm:$0xff]  ;;  %v4136_v15 = vld [vmem:[%s10232_s4] sm:$0xff]  ;;  %s10150_s20 = scalar_lea.vmem %s10238_s10, %s5521_s27 }
 0x8a3   : > { %v6727_v38 = vpop.eup %6726  ;;  %v3608_v9 = vadd.s32 %v3607_v10, %v3605_v63  ;;  %v3648_v37 = vcvt.f32.s32 %v9449_v12  ;;  %6732 = vrcp.f32 %v3842_v54  ;;  %v3619_v34 = vcvt.f32.s32 %v3618_v27 }
 0x8a4   : > { %v9750_v50 = vadd.f32 %v3884_v46, %v10470_v58  ;;  %v9753_v47 = vadd.f32 %v3885_v16, %v10471_v3  ;;  %vm3662_vm4 = vcmp.eq.s32.totalorder %v10373_v61, %v3594_v30  ;;  %v3633_v8 = vcvt.f32.s32 %v3632_v31 }
 0x8a5   : > { %vm3663_vm5 = vcmp.eq.s32.totalorder %v10373_v61, %v3608_v9  ;;  %v5588_v4 = vsel %vm3662_vm4, 1.0, %v10374_v36  ;;  %v6274_v59 = vpack.c.bf16 %v470_v17, %v469_v39  ;;  %v3622_v45 = vadd.s32 %v3621_v13, %v3619_v34  ;;  %v4132_v13 = vld [vmem:[%s10231_s3] sm:$0xff] }
 0x8a6   : > { %3925 = vadd.xlane.f32.xlu1 %v9750_v50  ;;  %3927 = vadd.xlane.f32.xlu0 %v9753_v47  ;;  %v5589_v12 = vsel %vm3663_vm5, 1.0, %v10374_v36  ;;  %v3636_v43 = vadd.s32 %v3635_v52, %v3633_v8  ;;  %v3886_v24 = vmul.f32 %v6725_v22, %v5588_v4  ;;  %v3649_v53 = vshll.u32 %v3648_v37, 16  ;;  %v10475_v22 = vld [vmem:[#allocation32_spill] sm:$0xff]  ;;  %v4133_v52 = vld [vmem:[%s10231_s3 + $0x8] sm:$0xff] }
 0x8a7   : > { %v6729_v29 = vpop.eup %6728  ;;  %v3887_v48 = vmul.f32 %v6727_v38, %v5589_v12  ;;  %6275 = vmatprep.subr.bf16.mxu1 %v6274_v59  ;;  %vm3664_vm6 = vcmp.eq.s32.totalorder %v10373_v61, %v3622_v45  ;;  %v3647_v5 = vcvt.f32.s32 %v3646_v21  ;;  %v6278_v54 = vpack.c.bf16 %v472_v2, %v471_v41 }
 0x8a8   : > { %v6731_v26 = vpop.eup %6730  ;;  %vm3665_vm7 = vcmp.eq.s32.totalorder %v10373_v61, %v3636_v43  ;;  %v9767_v49 = vadd.f32 %v3886_v24, %v10472_v42  ;;  %6277 = vmatpush3.bf16.msra.mxu1 %v6274_v59  ;;  %v5590_v7 = vsel %vm3664_vm6, 1.0, %v10374_v36  ;;  %v9803_v8 = vpack.c.bf16 %v4133_v52, %v4132_v13 }
 0x8a9   : > { %v5591_v57 = vsel %vm3665_vm7, 1.0, %v10374_v36  ;;  %v9772_v23 = vadd.f32 %v3887_v48, %v10473_v33  ;;  %v3650_v56 = vadd.s32 %v3649_v53, %v3647_v5  ;;  %v3888_v0 = vmul.f32 %v6729_v29, %v5590_v7  ;;  %6279 = vmatprep.subr.bf16.mxu1 %v6278_v54 }
 0x8aa   : > { %3929 = vadd.xlane.f32.xlu1 %v9767_v49  ;;  %v3889_v20 = vmul.f32 %v6731_v26, %v5591_v57  ;;  %vm4282_vm9 = vcmask 261120   ;;  %vm4578_vm12 = vcmask 523264  }
 0x8ab   : > { %3931 = vadd.xlane.f32.xlu0 %v9772_v23  ;;  %vm3666_vm8 = vcmp.eq.s32.totalorder %v10373_v61, %v3650_v56  ;;  %v9780_v10 = vadd.f32 %v3888_v0, %v10474_v25 }
 0x8ac   : > { %v9783_v1 = vadd.f32 %v3889_v20, %v10475_v22  ;;  %v5592_v40 = vsel %vm3666_vm8, 1.0, %v10374_v36  ;;  %6281 = vmatpush3.bf16.msra.mxu1 %v6278_v54 }
 0x8ad   : > { %v6733_v28 = vpop.eup %6732  ;;  %6112 = vmatprep.subr.mxu1 %v4136_v15 }
 0x8ae   : > { %3933 = vadd.xlane.f32.xlu1 %v9780_v10  ;;  %v3890_v35 = vmul.f32 %v6733_v28, %v5592_v40 }
 0x8af   : > { %3935 = vadd.xlane.f32.xlu0 %v9783_v1 }
 0x8b0   : > { %v9789_v6 = vadd.f32 %v3890_v35, %v10476_v44 }
 0x8b2   : > { %3937 = vadd.xlane.f32.xlu1 %v9789_v6 }
 0x914   : > { %v3908_v63 = vpop.xlane.xlu0 %3907 }
 0x915   : > { %v3939_v46 = vmax.f32 %v3908_v63, 1e-12 }
 0x917   : > { %6734 = vrcp.f32 %v3939_v46 }
 0x918   : > { %v3910_v16 = vpop.xlane.xlu1 %3909  ;;  %v3912_v30 = vpop.xlane.xlu0 %3911 }
 0x919   : > { %v3940_v38 = vmax.f32 %v3910_v16, 1e-12  ;;  %v3941_v9 = vmax.f32 %v3912_v30, 1e-12 }
 0x91b   : > { %6736 = vrcp.f32 %v3940_v38 }
 0x91c   : > { %6738 = vrcp.f32 %v3941_v9 }
 0x921   : > { %v6735_v58 = vpop.eup %6734 }
 0x922   : > { %v3956_v3 = vmul.f32 %v6735_v58, %v9610_v60  ;;  %v3914_v27 = vpop.xlane.xlu1 %3913  ;;  %v3916_v31 = vpop.xlane.xlu0 %3915 }
 0x923   : > { %v3942_v39 = vmax.f32 %v3914_v27, 1e-12  ;;  %v3943_v17 = vmax.f32 %v3916_v31, 1e-12  ;;  %v9843_v27 = vld [vmem:[%s6959_s30 + $0x18] sm:$0xff]  ;;  %v9848_v31 = vld [vmem:[%s6959_s30 + $0x20] sm:$0xff] }
 0x924   : > { %6088 = vmatprep.mubr.f32.mxu1 %v3956_v3 }
 0x925   : > { %v6737_v37 = vpop.eup %6736  ;;  %6740 = vrcp.f32 %v3942_v39  ;;  %v9853_v39 = vld [vmem:[%s6959_s30 + $0x28] sm:$0xff] }
 0x926   : > { %v3958_v34 = vmul.f32 %v6737_v37, %v9637_v55  ;;  %v6739_v29 = vpop.eup %6738  ;;  %6742 = vrcp.f32 %v3943_v17  ;;  %v9832_v37 = vld [vmem:[%s6959_s30 + $0x8] sm:$0xff]  ;;  %v9858_v17 = vld [vmem:[%s6959_s30 + $0x30] sm:$0xff] }
 0x927   : > { %v3960_v60 = vmul.f32 %v6739_v29, %v9655_v51  ;;  %v9873_v29 = vld [vmem:[%s6959_s30 + $0x48] sm:$0xff] }
 0x928   : > { %6089 = vmatmul.mubr.f32.vlgmr.msra.gmra.mrb[0].mxu1 %v3958_v34  ;;  %v3918_v4 = vpop.xlane.xlu1 %3917  ;;  %v3920_v12 = vpop.xlane.xlu0 %3919  ;;  %v9863_v34 = vld [vmem:[%s6959_s30 + $0x38] sm:$0xff] }
 0x929   : > { %6113 = vmatpush3.msra.mxu1 %v4136_v15  ;;  %6091 = vmatprep.mubr.f32.mxu1 %v3960_v60  ;;  %v3944_v59 = vmax.f32 %v3918_v4, 1e-12  ;;  %v3945_v45 = vmax.f32 %v3920_v12, 1e-12  ;;  %v9878_v60 = vld [vmem:[%s6959_s30 + $0x50] sm:$0xff]  ;;  %v9883_v4 = vld [vmem:[%s6959_s30 + $0x58] sm:$0xff] }
 0x92a   : > { %6283 = vmatprep.subr.bf16.mxu1 %v9803_v8  ;;  %v9888_v12 = vld [vmem:[%s6959_s30 + $0x60] sm:$0xff] }
 0x92b   : > { %6744 = vrcp.f32 %v3944_v59  ;;  %v9893_v59 = vld [vmem:[%s6959_s30 + $0x68] sm:$0xff] }
 0x92c   : > { %6746 = vrcp.f32 %v3945_v45  ;;  %v9898_v45 = vld [vmem:[%s6959_s30 + $0x70] sm:$0xff] }
 0x92e   : > { %v3922_v43 = vpop.xlane.xlu1 %3921  ;;  %v3924_v55 = vpop.xlane.xlu0 %3923 }
 0x92f   : > { %v6741_v24 = vpop.eup %6740  ;;  %v3946_v48 = vmax.f32 %v3922_v43, 1e-12  ;;  %v3947_v26 = vmax.f32 %v3924_v55, 1e-12  ;;  %v9903_v43 = vld [vmem:[%s6959_s30 + $0x78] sm:$0xff]  ;;  %v4563_v55 = vld [vmem:[%s10234_s6] sm:$0xff] }
 0x930   : > { %v6743_v53 = vpop.eup %6742  ;;  %v3962_v21 = vmul.f32 %v6741_v24, %v9698_v19  ;;  %v4564_v24 = vld [vmem:[%s10234_s6 + $0x8] sm:$0xff] }
 0x931   : > { %6748 = vrcp.f32 %v3946_v48  ;;  %v3964_v51 = vmul.f32 %v6743_v53, %v9701_v14  ;;  %v6290_v48 = vpack.c.bf16 %v4564_v24, %v4563_v55  ;;  %v4566_v53 = vld [vmem:[%s10234_s6 + $0x18] sm:$0xff]  ;;  %v4841_v55 = vld [vmem:[%s10236_s8 + $0x28] sm:$0xff] }
 0x932   : > { %6750 = vrcp.f32 %v3947_v26  ;;  %6092 = vmatmul.mubr.f32.gmra.mrb[2].mxu1 %v3962_v21  ;;  %v4565_v26 = vld [vmem:[%s10234_s6 + $0x10] sm:$0xff] }
 0x933   : > { %6094 = vmatprep.mubr.f32.mxu1 %v3964_v51  ;;  %v3926_v5 = vpop.xlane.xlu1 %3925  ;;  %v3928_v42 = vpop.xlane.xlu0 %3927 }
 0x934   : > { %v3948_v57 = vmax.f32 %v3926_v5, 1e-12  ;;  %v3949_v33 = vmax.f32 %v3928_v42, 1e-12  ;;  %v6294_v5 = vpack.c.bf16 %v4566_v53, %v4565_v26  ;;  %v4567_v42 = vld [vmem:[%s10234_s6 + $0x20] sm:$0xff] }
 0x935   : > { %v6745_v7 = vpop.eup %6744 }
 0x936   : > { %v6747_v41 = vpop.eup %6746  ;;  %v3966_v2 = vmul.f32 %v6745_v7, %v9720_v11  ;;  %6752 = vrcp.f32 %v3948_v57  ;;  %v4568_v7 = vld [vmem:[%s10234_s6 + $0x28] sm:$0xff] }
 0x937   : > { %v3968_v56 = vmul.f32 %v6747_v41, %v9723_v62  ;;  %6754 = vrcp.f32 %v3949_v33  ;;  %v3930_v19 = vpop.xlane.xlu1 %3929  ;;  %v6298_v57 = vpack.c.bf16 %v4568_v7, %v4567_v42 }
 0x938   : > { %6095 = vmatmul.mubr.f32.gmra.mrb[4].mxu1 %v3966_v2  ;;  %v3950_v14 = vmax.f32 %v3930_v19, 1e-12  ;;  %v3932_v20 = vpop.xlane.xlu0 %3931 }
 0x939   : > { %6097 = vmatprep.mubr.f32.mxu1 %v3968_v56  ;;  %v3951_v25 = vmax.f32 %v3932_v20, 1e-12 }
 0x93a   : > { %6756 = vrcp.f32 %v3950_v14 }
 0x93b   : > { %v6749_v0 = vpop.eup %6748  ;;  %6758 = vrcp.f32 %v3951_v25  ;;  %v3934_v40 = vpop.xlane.xlu1 %3933 }
 0x93c   : > { %v6751_v54 = vpop.eup %6750  ;;  %v3970_v22 = vmul.f32 %v6749_v0, %v9736_v18  ;;  %v3952_v11 = vmax.f32 %v3934_v40, 1e-12  ;;  %v3936_v35 = vpop.xlane.xlu0 %3935 }
 0x93d   : > { %v3972_v28 = vmul.f32 %v6751_v54, %v9739_v32  ;;  %v3953_v62 = vmax.f32 %v3936_v35, 1e-12  ;;  %v4569_v35 = vld [vmem:[%s10234_s6 + $0x30] sm:$0xff] }
 0x93e   : > { %6098 = vmatmul.mubr.f32.gmra.mrb[6].mxu1 %v3970_v22  ;;  %6760 = vrcp.f32 %v3952_v11 }
 0x93f   : > { %6100 = vmatprep.mubr.f32.mxu1 %v3972_v28  ;;  %6762 = vrcp.f32 %v3953_v62  ;;  %v3938_v63 = vpop.xlane.xlu1 %3937  ;;  %v4570_v62 = vld [vmem:[%s10234_s6 + $0x38] sm:$0xff] }
 0x940   : > { %v6753_v44 = vpop.eup %6752  ;;  %v3954_v16 = vmax.f32 %v3938_v63, 1e-12  ;;  %v4837_v63 = vld [vmem:[%s10236_s8 + $0x8] sm:$0xff] }
 0x941   : > { %v6755_v15 = vpop.eup %6754  ;;  %v3974_v46 = vmul.f32 %v6753_v44, %v9750_v50  ;;  %v6302_v44 = vpack.c.bf16 %v4570_v62, %v4569_v35 }
 0x942   : > { %v3976_v18 = vmul.f32 %v6755_v15, %v9753_v47  ;;  %6764 = vrcp.f32 %v3954_v16  ;;  %v4836_v15 = vld [vmem:[%s10236_s8] sm:$0xff] }
 0x943   : > { %6101 = vmatmul.mubr.f32.gmra.mrb[8].mxu1 %v3974_v46  ;;  %v6306_v46 = vpack.c.bf16 %v4837_v63, %v4836_v15  ;;  %v9956_v16 = vld [vmem:[%s10233_s5] ss:$0 sm:$0xff] }
 0x944   : > { %6103 = vmatprep.mubr.f32.mxu1 %v3976_v18  ;;  %v6757_v32 = vpop.eup %6756 }
 0x945   : > { %v6759_v38 = vpop.eup %6758  ;;  %v3978_v30 = vmul.f32 %v6757_v32, %v9767_v49  ;;  %v4134_v49 = vld [vmem:[%s10231_s3 + $0x10] sm:$0xff] }
 0x946   : > { %v3980_v9 = vmul.f32 %v6759_v38, %v9772_v23  ;;  %v4135_v23 = vld [vmem:[%s10231_s3 + $0x18] sm:$0xff] }
 0x947   : > { %6104 = vmatmul.mubr.f32.gmra.mrb[10].mxu1 %v3978_v30 }
 0x948   : > { %v6761_v58 = vpop.eup %6760  ;;  %6106 = vmatprep.mubr.f32.mxu1 %v3980_v9 }
 0x949   : > { %v6763_v3 = vpop.eup %6762  ;;  %v3982_v50 = vmul.f32 %v6761_v58, %v9780_v10  ;;  %v9827_v10 = vld [vmem:[%s6959_s30] sm:$0xff] }
 0x94a   : > { %v3984_v47 = vmul.f32 %v6763_v3, %v9783_v1  ;;  %v6286_v1 = vpack.c.bf16 %v4135_v23, %v4134_v49 }
 0x94b   : > { %6107 = vmatmul.mubr.f32.gmra.mrb[12].mxu1 %v3982_v50  ;;  %v4838_v50 = vld [vmem:[%s10236_s8 + $0x10] sm:$0xff] }
 0x94c   : > { %v6765_v13 = vpop.eup %6764  ;;  %6109 = vmatprep.mubr.f32.mxu1 %v3984_v47  ;;  %v4839_v47 = vld [vmem:[%s10236_s8 + $0x18] sm:$0xff] }
 0x94d   : > { %v3986_v52 = vmul.f32 %v6765_v13, %v9789_v6  ;;  %v9838_v6 = vld [vmem:[%s6959_s30 + $0x10] sm:$0xff]  ;;  %v6310_v23 = vpack.c.bf16 %v4839_v47, %v4838_v50 }
 0x94f   : > { %6110 = vmatmul.mubr.f32.gmra.mrb[14].mxu1 %v3986_v52 }
 0x950   : > { %6114 = vmatprep.mubr.msk.f32.mxu1 %vm477_vm0, %v9827_v10 }
 0x953   : > { %6115 = vmatmul.mubr.msk.f32.vlgmr.msra.gmra.mrb[16].mxu1 %vm477_vm0, %v9832_v37 }
 0x954   : > { %6285 = vmatpush3.bf16.msra.mxu1 %v9803_v8  ;;  %6117 = vmatprep.mubr.msk.f32.mxu1 %vm477_vm0, %v9838_v6  ;;  %v9868_v8 = vld [vmem:[%s6959_s30 + $0x40] sm:$0xff] }
 0x955   : > { %6287 = vmatprep.subr.bf16.mxu1 %v6286_v1 }
 0x957   : > { %6118 = vmatmul.mubr.msk.f32.gmra.mrb[18].mxu1 %vm477_vm0, %v9843_v27 }
 0x958   : > { %6120 = vmatprep.mubr.msk.f32.mxu1 %vm477_vm0, %v9848_v31  ;;  %6289 = vmatpush3.bf16.msra.mxu1 %v6286_v1  ;;  %v4840_v1 = vld [vmem:[%s10236_s8 + $0x20] sm:$0xff] }
 0x959   : > { %6291 = vmatprep.subr.bf16.mxu1 %v6290_v48  ;;  %v6314_v24 = vpack.c.bf16 %v4841_v55, %v4840_v1 }
 0x95b   : > { %6121 = vmatmul.mubr.msk.f32.gmra.mrb[20].mxu1 %vm477_vm0, %v9853_v39 }
 0x95c   : > { %6123 = vmatprep.mubr.msk.f32.mxu1 %vm477_vm0, %v9858_v17 }
 0x95f   : > { %6124 = vmatmul.mubr.msk.f32.gmra.mrb[22].mxu1 %vm477_vm0, %v9863_v34 }
 0x960   : > { %6126 = vmatprep.mubr.msk.f32.mxu1 %vm477_vm0, %v9868_v8 }
 0x963   : > { %6127 = vmatmul.mubr.msk.f32.gmra.mrb[24].mxu1 %vm477_vm0, %v9873_v29 }
 0x964   : > { %6129 = vmatprep.mubr.msk.f32.mxu1 %vm477_vm0, %v9878_v60 }
 0x967   : > { %6130 = vmatmul.mubr.msk.f32.gmra.mrb[26].mxu1 %vm477_vm0, %v9883_v4 }
 0x968   : > { %6132 = vmatprep.mubr.msk.f32.mxu1 %vm477_vm0, %v9888_v12 }
 0x96b   : > { %6133 = vmatmul.mubr.msk.f32.gmra.mrb[28].mxu1 %vm477_vm0, %v9893_v59 }
 0x96c   : > { %6135 = vmatprep.mubr.msk.f32.mxu1 %vm477_vm0, %v9898_v45 }
 0x96f   : > { %6136 = vmatmul.mubr.msk.f32.gmra.mrb[30].mxu1 %vm477_vm0, %v9903_v43 }
 0x9fb   : > { %v6090_v21 = vpop.f32.mrb[0].mxu1 }
 0x9fc   : > { %v4053_v51 = vpop.f32.mrb[1].mxu1 }
 0x9fd   : > { %6146 = vmatprep.mubr.msk.f32.mxu1 %vm4282_vm9, %v4053_v51 }
 0x9fe   : > { %6147 = vmatmul.mubr.msk.f32.vlgmr.msra.gmra.mrb[16].mxu1 %vm4282_vm9, %v6090_v21 }
 0x9ff   : > { %6293 = vmatpush3.bf16.msra.mxu1 %v6290_v48 }
 0xa00   : > { %6295 = vmatprep.subr.bf16.mxu1 %v6294_v5 }
 0xa03   : > { %6297 = vmatpush3.bf16.msra.mxu1 %v6294_v5 }
 0xa04   : > { %6299 = vmatprep.subr.bf16.mxu1 %v6298_v57 }
 0xa05   : > { %v6093_v33 = vpop.f32.mrb[2].mxu1 }
 0xa06   : > { %v4063_v41 = vpop.f32.mrb[3].mxu1 }
 0xa07   : > { %6301 = vmatpush3.bf16.msra.mxu1 %v6298_v57  ;;  %6149 = vmatprep.mubr.msk.f32.mxu1 %vm4282_vm9, %v4063_v41 }
 0xa08   : > { %6150 = vmatmul.mubr.msk.f32.gmra.mrb[18].mxu1 %vm4282_vm9, %v6093_v33  ;;  %6303 = vmatprep.subr.bf16.mxu1 %v6302_v44 }
 0xa0b   : > { %v6096_v2 = vpop.f32.mrb[4].mxu1  ;;  %6305 = vmatpush3.bf16.msra.mxu1 %v6302_v44 }
 0xa0c   : > { %v4073_v56 = vpop.f32.mrb[5].mxu1  ;;  %6307 = vmatprep.subr.bf16.mxu1 %v6306_v46 }
 0xa0d   : > { %6152 = vmatprep.mubr.msk.f32.mxu1 %vm4282_vm9, %v4073_v56 }
 0xa0e   : > { %6153 = vmatmul.mubr.msk.f32.gmra.mrb[20].mxu1 %vm4282_vm9, %v6096_v2 }
 0xa11   : > { %v6099_v19 = vpop.f32.mrb[6].mxu1 }
 0xa12   : > { %v4083_v0 = vpop.f32.mrb[7].mxu1 }
 0xa13   : > { %6155 = vmatprep.mubr.msk.f32.mxu1 %vm4282_vm9, %v4083_v0 }
 0xa14   : > { %6156 = vmatmul.mubr.msk.f32.gmra.mrb[22].mxu1 %vm4282_vm9, %v6099_v19 }
 0xa16   : > { %v6102_v14 = vpop.f32.mrb[8].mxu1 }
 0xa17   : > { %v4093_v20 = vpop.f32.mrb[9].mxu1 }
 0xa18   : > { %6158 = vmatprep.mubr.msk.f32.mxu1 %vm4282_vm9, %v4093_v20 }
 0xa19   : > { %6159 = vmatmul.mubr.msk.f32.gmra.mrb[24].mxu1 %vm4282_vm9, %v6102_v14 }
 0xa1a   : > { %v6105_v54 = vpop.f32.mrb[10].mxu1 }
 0xa1b   : > { %v4103_v25 = vpop.f32.mrb[11].mxu1 }
 0xa1c   : > { %6161 = vmatprep.mubr.msk.f32.mxu1 %vm4282_vm9, %v4103_v25 }
 0xa1d   : > { %6162 = vmatmul.mubr.msk.f32.gmra.mrb[26].mxu1 %vm4282_vm9, %v6105_v54 }
 0xa1e   : > { %v6108_v22 = vpop.f32.mrb[12].mxu1 }
 0xa1f   : > { %v4113_v28 = vpop.f32.mrb[13].mxu1 }
 0xa20   : > { %6164 = vmatprep.mubr.msk.f32.mxu1 %vm4282_vm9, %v4113_v28 }
 0xa21   : > { %6165 = vmatmul.mubr.msk.f32.gmra.mrb[28].mxu1 %vm4282_vm9, %v6108_v22 }
 0xa22   : > { %v6111_v40 = vpop.f32.mrb[14].mxu1 }
 0xa23   : > { %v4123_v11 = vpop.f32.mrb[15].mxu1 }
 0xa24   : > { %6167 = vmatprep.mubr.msk.f32.mxu1 %vm4282_vm9, %v4123_v11 }
 0xa25   : > { %6168 = vmatmul.mubr.msk.f32.gmra.mrb[30].mxu1 %vm4282_vm9, %v6111_v40 }
 0xad1   : > { %v6148_v18 = vpop.f32.mrb[16].mxu1 }
 0xad2   : > { %v4484_v32 = vadd.f32 %v6148_v18, %v9956_v16  ;;  %v4397_v38 = vpop.f32.mrb[17].mxu1 }
 0xad3   : > { %v4483_v30 = vadd.f32 %v9956_v16, %v4397_v38 }
 0xad4   : > { %vm4500_vm10 = vcmp.ge.f32.partialorder %v4484_v32, 0.0  ;;  %v4516_v9 = vmul.f32 0.2, %v4484_v32 }
 0xad5   : > { %vm4499_vm11 = vcmp.ge.f32.partialorder %v4483_v30, 0.0  ;;  %v4515_v58 = vmul.f32 0.2, %v4483_v30 }
 0xad6   : > { %v4532_v3 = vsel %vm4500_vm10, %v4484_v32, %v4516_v9 }
 0xad7   : > { %v4531_v13 = vsel %vm4499_vm11, %v4483_v30, %v4515_v58  ;;  %v4548_v49 = vmul.f32 1.4142135, %v4532_v3 }
 0xad8   : > { %v4547_v52 = vmul.f32 1.4142135, %v4531_v13 }
 0xada   : > { %6186 = vmatprep.mubr.msk.f32.mxu1 %vm4578_vm12, %v4547_v52 }
 0xadb   : > { %6187 = vmatmul.mubr.msk.f32.vlgmr.msra.gmra.mrb[32].mxu1 %vm4578_vm12, %v4548_v49  ;;  %v6151_v48 = vpop.f32.mrb[18].mxu1 }
 0xadc   : > { %6309 = vmatpush3.bf16.msra.mxu1 %v6306_v46  ;;  %v4486_v26 = vadd.f32 %v6151_v48, %v9956_v16  ;;  %v4407_v53 = vpop.f32.mrb[19].mxu1 }
 0xadd   : > { %6311 = vmatprep.subr.bf16.mxu1 %v6310_v23  ;;  %v4485_v21 = vadd.f32 %v9956_v16, %v4407_v53 }
 0xade   : > { %vm4502_vm13 = vcmp.ge.f32.partialorder %v4486_v26, 0.0  ;;  %v4518_v51 = vmul.f32 0.2, %v4486_v26 }
 0xadf   : > { %vm4501_vm14 = vcmp.ge.f32.partialorder %v4485_v21, 0.0  ;;  %v4517_v5 = vmul.f32 0.2, %v4485_v21 }
 0xae0   : > { %6313 = vmatpush3.bf16.msra.mxu1 %v6310_v23  ;;  %v4534_v42 = vsel %vm4502_vm13, %v4486_v26, %v4518_v51  ;;  %vm5061_vm13 = vcmp.lt.f32.partialorder %v9832_v37, 0.0 }
 0xae1   : > { %6315 = vmatprep.subr.bf16.mxu1 %v6314_v24  ;;  %v4533_v7 = vsel %vm4501_vm14, %v4485_v21, %v4517_v5  ;;  %v6154_v57 = vpop.f32.mrb[20].mxu1  ;;  %v4550_v56 = vmul.f32 1.4142135, %v4534_v42  ;;  %vm5045_vm14 = vcmp.gt.f32.partialorder %v9832_v37, 0.0 }
 0xae2   : > { %v4549_v33 = vmul.f32 1.4142135, %v4533_v7  ;;  %v4488_v41 = vadd.f32 %v6154_v57, %v9956_v16  ;;  %v4417_v2 = vpop.f32.mrb[21].mxu1 }
 0xae3   : > { %v4487_v19 = vadd.f32 %v9956_v16, %v4417_v2 }
 0xae4   : > { %6317 = vmatpush3.bf16.msra.mxu1 %v6314_v24  ;;  %vm4504_vm15 = vcmp.ge.f32.partialorder %v4488_v41, 0.0  ;;  %v4520_v0 = vmul.f32 0.2, %v4488_v41  ;;  %6189 = vmatprep.mubr.msk.f32.mxu1 %vm4578_vm12, %v4549_v33 }
 0xae5   : > { %vm4503_vm1 = vcmp.ge.f32.partialorder %v4487_v19, 0.0  ;;  %v4519_v14 = vmul.f32 0.2, %v4487_v19  ;;  %6190 = vmatmul.mubr.msk.f32.gmra.mrb[34].mxu1 %vm4578_vm12, %v4550_v56 }
 0xae6   : > { %v4536_v20 = vsel %vm4504_vm15, %v4488_v41, %v4520_v0  ;;  %vm5062_vm15 = vcmp.lt.f32.partialorder %v9838_v6, 0.0 }
 0xae7   : > { %v4535_v54 = vsel %vm4503_vm1, %v4487_v19, %v4519_v14  ;;  %v6157_v25 = vpop.f32.mrb[22].mxu1  ;;  %v4552_v11 = vmul.f32 1.4142135, %v4536_v20  ;;  %vm5063_vm1 = vcmp.lt.f32.partialorder %v9843_v27, 0.0 }
 0xae8   : > { %v4551_v22 = vmul.f32 1.4142135, %v4535_v54  ;;  %v4490_v28 = vadd.f32 %v6157_v25, %v9956_v16  ;;  %v4427_v40 = vpop.f32.mrb[23].mxu1 }
 0xae9   : > { %v4489_v35 = vadd.f32 %v9956_v16, %v4427_v40 }
 0xaea   : > { %vm4506_vm2 = vcmp.ge.f32.partialorder %v4490_v28, 0.0  ;;  %v4522_v62 = vmul.f32 0.2, %v4490_v28  ;;  %6192 = vmatprep.mubr.msk.f32.mxu1 %vm4578_vm12, %v4551_v22 }
 0xaeb   : > { %vm4505_vm3 = vcmp.ge.f32.partialorder %v4489_v35, 0.0  ;;  %v4521_v44 = vmul.f32 0.2, %v4489_v35  ;;  %6193 = vmatmul.mubr.msk.f32.gmra.mrb[36].mxu1 %vm4578_vm12, %v4552_v11 }
 0xaec   : > { %v4538_v15 = vsel %vm4506_vm2, %v4490_v28, %v4522_v62  ;;  %v6160_v46 = vpop.f32.mrb[24].mxu1  ;;  %vm5064_vm2 = vcmp.lt.f32.partialorder %v9848_v31, 0.0 }
 0xaed   : > { %v4537_v63 = vsel %vm4505_vm3, %v4489_v35, %v4521_v44  ;;  %v4492_v32 = vadd.f32 %v6160_v46, %v9956_v16  ;;  %v4437_v38 = vpop.f32.mrb[25].mxu1  ;;  %v4554_v30 = vmul.f32 1.4142135, %v4538_v15  ;;  %v4843_v44 = vld [vmem:[%s10236_s8 + $0x38] sm:$0xff]  ;;  %v6855_v46 = vmov 7  }
 0xaee   : > { %v4553_v18 = vmul.f32 1.4142135, %v4537_v63  ;;  %v4491_v9 = vadd.f32 %v9956_v16, %v4437_v38  ;;  %v5125_v63 = vand.u32 2147483647, %v9832_v37  ;;  %6477 = vset.pattern.permute.xlu1 %v6855_v46  ;;  %6476 = vset.pattern.permute.xlu0 %v6855_v46  ;;  %vm5046_vm3 = vcmp.gt.f32.partialorder %v9838_v6, 0.0 }
 0xaef   : > { %vm4508_vm4 = vcmp.ge.f32.partialorder %v4492_v32, 0.0  ;;  %v4524_v58 = vmul.f32 0.2, %v4492_v32 }
 0xaf0   : > { %6195 = vmatprep.mubr.msk.f32.mxu1 %vm4578_vm12, %v4553_v18  ;;  %vm4507_vm5 = vcmp.ge.f32.partialorder %v4491_v9, 0.0  ;;  %v4523_v3 = vmul.f32 0.2, %v4491_v9  ;;  %v6163_v13 = vpop.f32.mrb[26].mxu1  ;;  %v5126_v18 = vand.u32 2147483647, %v9838_v6 }
 0xaf1   : > { %6196 = vmatmul.mubr.msk.f32.gmra.mrb[38].mxu1 %vm4578_vm12, %v4554_v30  ;;  %v4540_v50 = vsel %vm4508_vm4, %v4492_v32, %v4524_v58  ;;  %v4494_v49 = vadd.f32 %v6163_v13, %v9956_v16  ;;  %v4447_v23 = vpop.f32.mrb[27].mxu1  ;;  %v5141_v32 = vsub.f32 0.0, %v5125_v63  ;;  %vm5047_vm4 = vcmp.gt.f32.partialorder %v9843_v27, 0.0 }
 0xaf2   : > { %v4539_v47 = vsel %vm4507_vm5, %v4491_v9, %v4523_v3  ;;  %v4556_v1 = vmul.f32 1.4142135, %v4540_v50  ;;  %v4493_v55 = vadd.f32 %v9956_v16, %v4447_v23  ;;  %v5142_v38 = vsub.f32 0.0, %v5126_v18 }
 0xaf3   : > { %v4555_v52 = vmul.f32 1.4142135, %v4539_v47  ;;  %vm4510_vm6 = vcmp.ge.f32.partialorder %v4494_v49, 0.0  ;;  %v4526_v24 = vmul.f32 0.2, %v4494_v49  ;;  %v5158_v30 = vmul.f32 200.0, %v5141_v32 }
 0xaf4   : > { %vm4509_vm7 = vcmp.ge.f32.partialorder %v4493_v55, 0.0  ;;  %v4525_v48 = vmul.f32 0.2, %v4493_v55  ;;  %v6166_v26 = vpop.f32.mrb[28].mxu1  ;;  %v5127_v9 = vand.u32 2147483647, %v9843_v27 }
 0xaf5   : > { %6198 = vmatprep.mubr.msk.f32.mxu1 %vm4578_vm12, %v4555_v52  ;;  %v4542_v53 = vsel %vm4510_vm6, %v4494_v49, %v4526_v24  ;;  %v4496_v21 = vadd.f32 %v6166_v26, %v9956_v16  ;;  %v4457_v51 = vpop.f32.mrb[29].mxu1  ;;  %v5159_v58 = vmul.f32 200.0, %v5142_v38  ;;  %v5175_v3 = vmul.f32 1.442695, %v5158_v30 }
 0xaf6   : > { %6199 = vmatmul.mubr.msk.f32.gmra.mrb[40].mxu1 %vm4578_vm12, %v4556_v1  ;;  %v4541_v5 = vsel %vm4509_vm7, %v4493_v55, %v4525_v48  ;;  %v4495_v42 = vadd.f32 %v9956_v16, %v4457_v51  ;;  %v4558_v33 = vmul.f32 1.4142135, %v4542_v53  ;;  %v5143_v50 = vsub.f32 0.0, %v5127_v9 }
 0xaf7   : > { %v4557_v7 = vmul.f32 1.4142135, %v4541_v5  ;;  %vm4512_vm8 = vcmp.ge.f32.partialorder %v4496_v21, 0.0  ;;  %v4528_v57 = vmul.f32 0.2, %v4496_v21  ;;  %v5077_v47 = vsel %vm5061_vm13, -1.0, %v10374_v36 }
 0xaf8   : > { %vm4511_vm9 = vcmp.ge.f32.partialorder %v4495_v42, 0.0  ;;  %v4527_v41 = vmul.f32 0.2, %v4495_v42  ;;  %v6169_v2 = vpop.f32.mrb[30].mxu1  ;;  %v5177_v13 = vmul.f32 1.442695, %v5159_v58  ;;  %6766 = vpow2.f32 %v5175_v3 }
 0xaf9   : > { %v4544_v56 = vsel %vm4512_vm8, %v4496_v21, %v4528_v57  ;;  %v4498_v19 = vadd.f32 %v6169_v2, %v9956_v16  ;;  %v4467_v0 = vpop.f32.mrb[31].mxu1  ;;  %6201 = vmatprep.mubr.msk.f32.mxu1 %vm4578_vm12, %v4557_v7  ;;  %v5128_v52 = vand.u32 2147483647, %v9848_v31  ;;  %v5160_v49 = vmul.f32 200.0, %v5143_v50 }
 0xafa   : > { %v4543_v14 = vsel %vm4511_vm9, %v4495_v42, %v4527_v41  ;;  %v4497_v20 = vadd.f32 %v9956_v16, %v4467_v0  ;;  %6202 = vmatmul.mubr.msk.f32.gmra.mrb[42].mxu1 %vm4578_vm12, %v4558_v33  ;;  %v4560_v22 = vmul.f32 1.4142135, %v4544_v56  ;;  %v4842_v16 = vld [vmem:[%s10236_s8 + $0x30] sm:$0xff]  ;;  %6768 = vpow2.f32 %v5177_v13 }
 0xafb   : > { %v4559_v54 = vmul.f32 1.4142135, %v4543_v14  ;;  %vm4514_vm10 = vcmp.ge.f32.partialorder %v4498_v19, 0.0  ;;  %v4530_v25 = vmul.f32 0.2, %v4498_v19  ;;  %v6318_v15 = vpack.c.bf16 %v4843_v44, %v4842_v16 }
 0xafc   : > { %vm4513_vm11 = vcmp.ge.f32.partialorder %v4497_v20, 0.0  ;;  %v4529_v28 = vmul.f32 0.2, %v4497_v20  ;;  %v5144_v23 = vsub.f32 0.0, %v5128_v52  ;;  %v5129_v1 = vand.u32 2147483647, %v9853_v39 }
 0xafd   : > { %v4546_v40 = vsel %vm4514_vm10, %v4498_v19, %v4530_v25  ;;  %6204 = vmatprep.mubr.msk.f32.mxu1 %vm4578_vm12, %v4559_v54  ;;  %6319 = vmatprep.subr.bf16.mxu1 %v6318_v15  ;;  %v5093_v37 = vsel %vm5045_vm14, 1.0, %v5077_v47  ;;  %v5078_v55 = vsel %vm5062_vm15, -1.0, %v10374_v36  ;;  %v5179_v24 = vmul.f32 1.442695, %v5160_v49 }
 0xafe   : > { %v4545_v11 = vsel %vm4513_vm11, %v4497_v20, %v4529_v28  ;;  %6205 = vmatmul.mubr.msk.f32.gmra.mrb[44].mxu1 %vm4578_vm12, %v4560_v22  ;;  %v4562_v62 = vmul.f32 1.4142135, %v4546_v40  ;;  %v5079_v48 = vsel %vm5063_vm1, -1.0, %v10374_v36  ;;  %v5161_v26 = vmul.f32 200.0, %v5144_v23 }
 0xaff   : > { %v4561_v35 = vmul.f32 1.4142135, %v4545_v11  ;;  %6321 = vmatpush3.bf16.msra.mxu1 %v6318_v15  ;;  %v5145_v53 = vsub.f32 0.0, %v5129_v1  ;;  %6770 = vpow2.f32 %v5179_v24  ;;  %vm5048_vm5 = vcmp.gt.f32.partialorder %v9848_v31, 0.0 }
 0xb00   : > { %v5080_v21 = vsel %vm5064_vm2, -1.0, %v10374_v36  ;;  %v5130_v51 = vand.u32 2147483647, %v9858_v17  ;;  %v5094_v5 = vsel %vm5046_vm3, 1.0, %v5078_v55  ;;  %v5181_v42 = vmul.f32 1.442695, %v5161_v26 }
 0xb01   : > { %6207 = vmatprep.mubr.msk.f32.mxu1 %vm4578_vm12, %v4561_v35  ;;  %v5162_v7 = vmul.f32 200.0, %v5145_v53  ;;  %v5095_v6 = vsel %vm5047_vm4, 1.0, %v5079_v48  ;;  %v5131_v33 = vand.u32 2147483647, %v9863_v34  ;;  %v5109_v41 = vmul.f32 0.5, %v5093_v37 }
 0xb02   : > { %6208 = vmatmul.mubr.msk.f32.gmra.mrb[46].mxu1 %vm4578_vm12, %v4562_v62  ;;  %v5146_v57 = vsub.f32 0.0, %v5130_v51  ;;  %v5096_v27 = vsel %vm5048_vm5, 1.0, %v5080_v21  ;;  %6772 = vpow2.f32 %v5181_v42  ;;  %v5110_v56 = vmul.f32 0.5, %v5094_v5  ;;  %v6767_v20 = vpop.eup %6766 }
 0xb03   : > { %v5183_v2 = vmul.f32 1.442695, %v5162_v7  ;;  %vm5065_vm6 = vcmp.lt.f32.partialorder %v9853_v39, 0.0  ;;  %v5147_v31 = vsub.f32 0.0, %v5131_v33  ;;  %v5111_v0 = vmul.f32 0.5, %v5095_v6 }
 0xb04   : > { %v5163_v19 = vmul.f32 200.0, %v5146_v57  ;;  %vm5049_vm7 = vcmp.gt.f32.partialorder %v9853_v39, 0.0  ;;  %v5132_v14 = vand.u32 2147483647, %v9868_v8  ;;  %v5112_v54 = vmul.f32 0.5, %v5096_v27  ;;  %v6769_v28 = vpop.eup %6768 }
 0xb05   : > { %6774 = vpow2.f32 %v5183_v2  ;;  %vm5066_vm8 = vcmp.lt.f32.partialorder %v9858_v17, 0.0  ;;  %v5164_v22 = vmul.f32 200.0, %v5147_v31  ;;  %v5661_v40 = vadd.f32 -1.0, %v6767_v20 }
 0xb06   : > { %v5185_v25 = vmul.f32 1.442695, %v5163_v19  ;;  %v5081_v11 = vsel %vm5065_vm6, -1.0, %v10374_v36  ;;  %v5148_v35 = vsub.f32 0.0, %v5132_v14  ;;  %v5134_v62 = vand.u32 2147483647, %v9878_v60 }
 0xb07   : > { %v5662_v16 = vadd.f32 -1.0, %v6769_v28  ;;  %vm5050_vm9 = vcmp.gt.f32.partialorder %v9858_v17, 0.0  ;;  %v5187_v44 = vmul.f32 1.442695, %v5164_v22  ;;  %v5222_v15 = vmul.f32 %v5661_v40, %v5109_v41 }
 0xb08   : > { %6776 = vpow2.f32 %v5185_v25  ;;  %v5082_v63 = vsel %vm5066_vm8, -1.0, %v10374_v36  ;;  %v5165_v46 = vmul.f32 200.0, %v5148_v35  ;;  %v5150_v18 = vsub.f32 0.0, %v5134_v62 }
 0xb09   : > { %v6771_v32 = vpop.eup %6770  ;;  %v5223_v38 = vmul.f32 %v5662_v16, %v5110_v56  ;;  %v5097_v30 = vsel %vm5049_vm7, 1.0, %v5081_v11  ;;  %vm5067_vm10 = vcmp.lt.f32.partialorder %v9863_v34, 0.0  ;;  %6778 = vpow2.f32 %v5187_v44 }
 0xb0a   : > { %v5238_v9 = vadd.f32 0.5, %v5222_v15  ;;  %v5663_v58 = vadd.f32 -1.0, %v6771_v32  ;;  %v5189_v3 = vmul.f32 1.442695, %v5165_v46  ;;  %v5167_v50 = vmul.f32 200.0, %v5150_v18 }
 0xb0b   : > { %v5239_v47 = vadd.f32 0.5, %v5223_v38  ;;  %v5098_v13 = vsel %vm5050_vm9, 1.0, %v5082_v63  ;;  %vm5051_vm11 = vcmp.gt.f32.partialorder %v9863_v34, 0.0  ;;  %v5136_v52 = vand.u32 2147483647, %v9888_v12 }
 0xb0c   : > { %v6773_v49 = vpop.eup %6772  ;;  %v5254_v23 = vmul.f32 200.0, %v5238_v9  ;;  %v5224_v1 = vmul.f32 %v5663_v58, %v5111_v0  ;;  %6780 = vpow2.f32 %v5189_v3  ;;  %v5193_v39 = vmul.f32 1.442695, %v5167_v50 }
 0xb0d   : > { %v5664_v37 = vadd.f32 -1.0, %v6773_v49  ;;  %v5083_v55 = vsel %vm5067_vm10, -1.0, %v10374_v36  ;;  %vm5068_vm13 = vcmp.lt.f32.partialorder %v9868_v8, 0.0  ;;  %v5152_v24 = vsub.f32 0.0, %v5136_v52 }
 0xb0e   : > { %5279 = vperm.xlu1 %6477, %v5254_v23   ;;  %v5255_v17 = vmul.f32 200.0, %v5239_v47  ;;  %v5240_v26 = vadd.f32 0.5, %v5224_v1  ;;  %v5113_v53 = vmul.f32 0.5, %v5097_v30  ;;  %v5114_v21 = vmul.f32 0.5, %v5098_v13 }
 0xb0f   : > { %v6775_v48 = vpop.eup %6774  ;;  %v5225_v51 = vmul.f32 %v5664_v37, %v5112_v54  ;;  %vm5052_vm14 = vcmp.gt.f32.partialorder %v9868_v8, 0.0  ;;  %v5169_v42 = vmul.f32 200.0, %v5152_v24  ;;  %v5099_v7 = vsel %vm5051_vm11, 1.0, %v5083_v55 }
 0xb10   : > { %v5665_v5 = vadd.f32 -1.0, %v6775_v48  ;;  %v5084_v6 = vsel %vm5068_vm13, -1.0, %v10374_v36  ;;  %6782 = vpow2.f32 %v5193_v39  ;;  %v5138_v57 = vand.u32 2147483647, %v9898_v45 }
 0xb11   : > { %v5256_v41 = vmul.f32 200.0, %v5240_v26  ;;  %v5241_v27 = vadd.f32 0.5, %v5225_v51  ;;  %vm5070_vm15 = vcmp.lt.f32.partialorder %v9878_v60, 0.0  ;;  %v5197_v2 = vmul.f32 1.442695, %v5169_v42 }
 0xb12   : > { %v6777_v33 = vpop.eup %6776  ;;  %5284 = vperm.xlu1 %6477, %v5255_v17   ;;  %v5226_v56 = vmul.f32 %v5665_v5, %v5113_v53  ;;  %v5154_v31 = vsub.f32 0.0, %v5138_v57  ;;  %v5124_v0 = vand.u32 2147483647, %v9827_v10  ;;  %v5115_v34 = vmul.f32 0.5, %v5099_v7 }
 0xb13   : > { %v5666_v19 = vadd.f32 -1.0, %v6777_v33  ;;  %v6779_v14 = vpop.eup %6778  ;;  %v5100_v20 = vsel %vm5052_vm14, 1.0, %v5084_v6  ;;  %vm5054_vm1 = vcmp.gt.f32.partialorder %v9878_v60, 0.0  ;;  %v5086_v54 = vsel %vm5070_vm15, -1.0, %v10374_v36 }
 0xb14   : > { %v5171_v25 = vmul.f32 200.0, %v5154_v31  ;;  %v5257_v22 = vmul.f32 200.0, %v5241_v27  ;;  %vm5072_vm2 = vcmp.lt.f32.partialorder %v9888_v12, 0.0  ;;  %6784 = vpow2.f32 %v5197_v2 }
 0xb15   : > { %v5140_v28 = vsub.f32 0.0, %v5124_v0  ;;  %v5242_v11 = vadd.f32 0.5, %v5226_v56  ;;  %v5227_v35 = vmul.f32 %v5666_v19, %v5114_v21  ;;  %v5667_v62 = vadd.f32 -1.0, %v6779_v14 }
 0xb16   : > { %v6781_v40 = vpop.eup %6780  ;;  %5289 = vperm.xlu1 %6477, %v5256_v41   ;;  %v5201_v16 = vmul.f32 1.442695, %v5171_v25  ;;  %v5116_v44 = vmul.f32 0.5, %v5100_v20  ;;  %v5133_v8 = vand.u32 2147483647, %v9873_v29  ;;  %v5102_v63 = vsel %vm5054_vm1, 1.0, %v5086_v54 }
 0xb17   : > { %v5157_v15 = vmul.f32 200.0, %v5140_v28  ;;  %vm5056_vm3 = vcmp.gt.f32.partialorder %v9888_v12, 0.0  ;;  %v5088_v46 = vsel %vm5072_vm2, -1.0, %v10374_v36  ;;  %vm5074_vm4 = vcmp.lt.f32.partialorder %v9898_v45, 0.0 }
 0xb18   : > { %v5668_v18 = vadd.f32 -1.0, %v6781_v40  ;;  %6786 = vpow2.f32 %v5201_v16  ;;  %vm5060_vm5 = vcmp.lt.f32.partialorder %v9827_v10, 0.0  ;;  %v5258_v30 = vmul.f32 200.0, %v5242_v11 }
 0xb19   : > { %v5173_v32 = vmul.f32 1.442695, %v5157_v15  ;;  %v5243_v9 = vadd.f32 0.5, %v5227_v35  ;;  %v5228_v58 = vmul.f32 %v5667_v62, %v5115_v34  ;;  %v5149_v3 = vsub.f32 0.0, %v5133_v8 }
 0xb1a   : > { %v6783_v38 = vpop.eup %6782  ;;  %5294 = vperm.xlu1 %6477, %v5257_v22   ;;  %v5118_v50 = vmul.f32 0.5, %v5102_v63  ;;  %vm5058_vm6 = vcmp.gt.f32.partialorder %v9898_v45, 0.0  ;;  %v5090_v60 = vsel %vm5074_vm4, -1.0, %v10374_v36  ;;  %vm5044_vm7 = vcmp.gt.f32.partialorder %v9827_v10, 0.0 }
 0xb1b   : > { %6788 = vpow2.f32 %v5173_v32  ;;  %v5076_v47 = vsel %vm5060_vm5, -1.0, %v10374_v36  ;;  %v5166_v13 = vmul.f32 200.0, %v5149_v3  ;;  %v5135_v52 = vand.u32 2147483647, %v9883_v4 }
 0xb1c   : > { %v5229_v49 = vmul.f32 %v5668_v18, %v5116_v44  ;;  %v5670_v23 = vadd.f32 -1.0, %v6783_v38  ;;  %v5104_v1 = vsel %vm5056_vm3, 1.0, %v5088_v46  ;;  %vm5069_vm8 = vcmp.lt.f32.partialorder %v9873_v29, 0.0 }
 0xb1d   : > { %v5259_v39 = vmul.f32 200.0, %v5243_v9  ;;  %v5244_v37 = vadd.f32 0.5, %v5228_v58  ;;  %v5191_v55 = vmul.f32 1.442695, %v5166_v13  ;;  %v5151_v24 = vsub.f32 0.0, %v5135_v52 }
 0xb1e   : > { %5299 = vperm.xlu1 %6477, %v5258_v30   ;;  %v6785_v48 = vpop.eup %6784  ;;  %v5106_v10 = vsel %vm5058_vm6, 1.0, %v5090_v60  ;;  %v5092_v17 = vsel %vm5044_vm7, 1.0, %v5076_v47  ;;  %vm5053_vm9 = vcmp.gt.f32.partialorder %v9873_v29, 0.0  ;;  %v5137_v26 = vand.u32 2147483647, %v9893_v59 }
 0xb1f   : > { %v5085_v53 = vsel %vm5069_vm8, -1.0, %v10374_v36  ;;  %6790 = vpow2.f32 %v5191_v55  ;;  %vm5071_vm10 = vcmp.lt.f32.partialorder %v9883_v4, 0.0  ;;  %v5168_v12 = vmul.f32 200.0, %v5151_v24 }
 0xb20   : > { %v5245_v21 = vadd.f32 0.5, %v5229_v49  ;;  %v5231_v51 = vmul.f32 %v5670_v23, %v5118_v50  ;;  %v5153_v5 = vsub.f32 0.0, %v5137_v26  ;;  %v5139_v42 = vand.u32 2147483647, %v9903_v43 }
 0xb21   : > { %v5260_v7 = vmul.f32 200.0, %v5244_v37  ;;  %v5120_v45 = vmul.f32 0.5, %v5104_v1  ;;  %v5672_v6 = vadd.f32 -1.0, %v6785_v48  ;;  %v5195_v57 = vmul.f32 1.442695, %v5168_v12 }
 0xb22   : > { %5304 = vperm.xlu1 %6477, %v5259_v39   ;;  %v6787_v33 = vpop.eup %6786  ;;  %v5122_v41 = vmul.f32 0.5, %v5106_v10  ;;  %v5108_v27 = vmul.f32 0.5, %v5092_v17  ;;  %v5170_v2 = vmul.f32 200.0, %v5153_v5  ;;  %v5155_v56 = vsub.f32 0.0, %v5139_v42  ;;  %v10099_v12 = vld [vmem:[%s10235_s7] ss:$0 sm:$0xff] }
 0xb23   : > { %v5101_v19 = vsel %vm5053_vm9, 1.0, %v5085_v53  ;;  %vm5055_vm11 = vcmp.gt.f32.partialorder %v9883_v4, 0.0  ;;  %v5087_v31 = vsel %vm5071_vm10, -1.0, %v10374_v36  ;;  %6792 = vpow2.f32 %v5195_v57 }
 0xb24   : > { %v5261_v14 = vmul.f32 200.0, %v5245_v21  ;;  %v5247_v34 = vadd.f32 0.5, %v5231_v51  ;;  %v5199_v20 = vmul.f32 1.442695, %v5170_v2  ;;  %v5172_v54 = vmul.f32 200.0, %v5155_v56 }
 0xb25   : > { %v6789_v0 = vpop.eup %6788  ;;  %v5233_v25 = vmul.f32 %v5672_v6, %v5120_v45  ;;  %v5674_v22 = vadd.f32 -1.0, %v6787_v33  ;;  %vm5073_vm13 = vcmp.lt.f32.partialorder %v9893_v59, 0.0  ;;  %v5117_v11 = vmul.f32 0.5, %v5101_v19 }
 0xb26   : > { %5309 = vperm.xlu1 %6477, %v5260_v7   ;;  %v5660_v28 = vadd.f32 -1.0, %v6789_v0  ;;  %6794 = vpow2.f32 %v5199_v20  ;;  %v5203_v29 = vmul.f32 1.442695, %v5172_v54  ;;  %v5103_v35 = vsel %vm5055_vm11, 1.0, %v5087_v31 }
 0xb27   : > { %vm5057_vm14 = vcmp.gt.f32.partialorder %v9893_v59, 0.0  ;;  %v5089_v62 = vsel %vm5073_vm13, -1.0, %v10374_v36  ;;  %vm5075_vm15 = vcmp.lt.f32.partialorder %v9903_v43, 0.0  ;;  %v5263_v44 = vmul.f32 200.0, %v5247_v34 }
 0xb28   : > { %v5221_v40 = vmul.f32 %v5660_v28, %v5108_v27  ;;  %6796 = vpow2.f32 %v5203_v29  ;;  %v5249_v15 = vadd.f32 0.5, %v5233_v25  ;;  %v5235_v8 = vmul.f32 %v5674_v22, %v5122_v41 }
 0xb29   : > { %v6791_v16 = vpop.eup %6790  ;;  %vm5059_vm1 = vcmp.gt.f32.partialorder %v9903_v43, 0.0  ;;  %v5091_v4 = vsel %vm5075_vm15, -1.0, %v10374_v36  ;;  %v5119_v38 = vmul.f32 0.5, %v5103_v35  ;;  %v5105_v30 = vsel %vm5057_vm14, 1.0, %v5089_v62 }
 0xb2a   : > { %5314 = vperm.xlu1 %6477, %v5261_v14   ;;  %v5237_v63 = vadd.f32 0.5, %v5221_v40  ;;  %v5669_v46 = vadd.f32 -1.0, %v6791_v16  ;;  %v5265_v58 = vmul.f32 200.0, %v5249_v15  ;;  %v5251_v3 = vadd.f32 0.5, %v5235_v8 }
 0xb2b   : > { %v5107_v47 = vsel %vm5059_vm1, 1.0, %v5091_v4  ;;  %v5121_v13 = vmul.f32 0.5, %v5105_v30 }
 0xb2c   : > { %v5253_v18 = vmul.f32 200.0, %v5237_v63  ;;  %v5230_v32 = vmul.f32 %v5669_v46, %v5117_v11  ;;  %v5267_v43 = vmul.f32 200.0, %v5251_v3  ;;  %v5123_v39 = vmul.f32 0.5, %v5107_v47 }
 0xb2d   : > { %v6793_v9 = vpop.eup %6792 }
 0xb2e   : > { %5324 = vperm.xlu1 %6477, %v5263_v44   ;;  %5274 = vperm.xlu0 %6476, %v5253_v18   ;;  %v5246_v50 = vadd.f32 0.5, %v5230_v32  ;;  %v5671_v60 = vadd.f32 -1.0, %v6793_v9 }
 0xb30   : > { %v6795_v52 = vpop.eup %6794  ;;  %v5262_v49 = vmul.f32 200.0, %v5246_v50  ;;  %v5232_v23 = vmul.f32 %v5671_v60, %v5119_v38 }
 0xb31   : > { %v5673_v1 = vadd.f32 -1.0, %v6795_v52 }
 0xb32   : > { %5334 = vperm.xlu1 %6477, %v5265_v58   ;;  %v6797_v37 = vpop.eup %6796  ;;  %5319 = vperm.xlu0 %6476, %v5262_v49   ;;  %v5248_v59 = vadd.f32 0.5, %v5232_v23 }
 0xb33   : > { %v5234_v55 = vmul.f32 %v5673_v1, %v5121_v13  ;;  %v5675_v24 = vadd.f32 -1.0, %v6797_v37 }
 0xb34   : > { %v5264_v48 = vmul.f32 200.0, %v5248_v59 }
 0xb35   : > { %v5250_v10 = vadd.f32 0.5, %v5234_v55  ;;  %v5236_v17 = vmul.f32 %v5675_v24, %v5123_v39 }
 0xb36   : > { %5344 = vperm.xlu1 %6477, %v5267_v43   ;;  %5329 = vperm.xlu0 %6476, %v5264_v48  }
 0xb37   : > { %v5266_v26 = vmul.f32 200.0, %v5250_v10  ;;  %v5252_v53 = vadd.f32 0.5, %v5236_v17 }
 0xb39   : > { %v5268_v21 = vmul.f32 200.0, %v5252_v53 }
 0xb3a   : > { %5339 = vperm.xlu0 %6476, %v5266_v26  }
 0xb3e   : > { %5349 = vperm.xlu0 %6476, %v5268_v21  }
 0xbae   : > { %v6188_v51 = vpop.f32.mrb[32].mxu1 }
 0xbaf   : > { %v4699_v5 = vadd.f32 %v6188_v51, %v10099_v12  ;;  %v4693_v42 = vpop.f32.mrb[33].mxu1 }
 0xbb0   : > { %v4694_v7 = vadd.f32 %v10099_v12, %v4693_v42 }
 0xbb1   : > { %vm4773_vm2 = vcmp.ge.f32.partialorder %v4699_v5, 0.0  ;;  %v4789_v45 = vmul.f32 0.2, %v4699_v5 }
 0xbb2   : > { %vm4772_vm3 = vcmp.ge.f32.partialorder %v4694_v7, 0.0  ;;  %v4788_v6 = vmul.f32 0.2, %v4694_v7 }
 0xbb3   : > { %v4805_v57 = vsel %vm4773_vm2, %v4699_v5, %v4789_v45 }
 0xbb4   : > { %v4804_v33 = vsel %vm4772_vm3, %v4694_v7, %v4788_v6  ;;  %v4821_v27 = vmul.f32 1.4142135, %v4805_v57 }
 0xbb5   : > { %v4820_v41 = vmul.f32 1.4142135, %v4804_v33 }
 0xbb7   : > { %6226 = vmatprep.mubr.msk.f32.mxu1 %vm4578_vm12, %v4820_v41 }
 0xbb8   : > { %6227 = vmatmul.mubr.msk.f32.vlgmr.msra.gmra.mrb[48].mxu1 %vm4578_vm12, %v4821_v27  ;;  %v6191_v2 = vpop.f32.mrb[34].mxu1 }
 0xbb9   : > { %v4709_v56 = vadd.f32 %v6191_v2, %v10099_v12  ;;  %v4703_v19 = vpop.f32.mrb[35].mxu1 }
 0xbba   : > { %v4704_v31 = vadd.f32 %v10099_v12, %v4703_v19 }
 0xbbb   : > { %vm4775_vm4 = vcmp.ge.f32.partialorder %v4709_v56, 0.0  ;;  %v4791_v0 = vmul.f32 0.2, %v4709_v56 }
 0xbbc   : > { %vm4774_vm5 = vcmp.ge.f32.partialorder %v4704_v31, 0.0  ;;  %v4790_v14 = vmul.f32 0.2, %v4704_v31 }
 0xbbd   : > { %v4807_v34 = vsel %vm4775_vm4, %v4709_v56, %v4791_v0  ;;  %vm5269_vm4 = vcmp.eq.s32.totalorder %v10373_v61, 3 }
 0xbbe   : > { %v4806_v20 = vsel %vm4774_vm5, %v4704_v31, %v4790_v14  ;;  %v6194_v54 = vpop.f32.mrb[36].mxu1  ;;  %v4823_v29 = vmul.f32 1.4142135, %v4807_v34 }
 0xbbf   : > { %v4822_v25 = vmul.f32 1.4142135, %v4806_v20  ;;  %v4719_v22 = vadd.f32 %v6194_v54, %v10099_v12  ;;  %v4713_v28 = vpop.f32.mrb[37].mxu1 }
 0xbc0   : > { %v4714_v40 = vadd.f32 %v10099_v12, %v4713_v28  ;;  %v10135_v28 = vsel %vm5269_vm4, 1.0, %v10374_v36 }
 0xbc1   : > { %vm4777_vm6 = vcmp.ge.f32.partialorder %v4719_v22, 0.0  ;;  %v4793_v11 = vmul.f32 0.2, %v4719_v22  ;;  %6229 = vmatprep.mubr.msk.f32.mxu1 %vm4578_vm12, %v4822_v25 }
 0xbc2   : > { %vm4776_vm7 = vcmp.ge.f32.partialorder %v4714_v40, 0.0  ;;  %v4792_v35 = vmul.f32 0.2, %v4714_v40  ;;  %6230 = vmatmul.mubr.msk.f32.gmra.mrb[50].mxu1 %vm4578_vm12, %v4823_v29  ;;  %v10140_v29 = vld [vmem:[%s10237_s9] ss:$0 sm:$0xff] }
 0xbc3   : > { %v4809_v62 = vsel %vm4777_vm6, %v4719_v22, %v4793_v11 }
 0xbc4   : > { %v4808_v16 = vsel %vm4776_vm7, %v4714_v40, %v4792_v35  ;;  %v6197_v44 = vpop.f32.mrb[38].mxu1  ;;  %v4825_v46 = vmul.f32 1.4142135, %v4809_v62  ;;  %v5275_v40 = vpop.permute.xlu0 %5274 }
 0xbc5   : > { %v4824_v15 = vmul.f32 1.4142135, %v4808_v16  ;;  %v4729_v8 = vadd.f32 %v6197_v44, %v10099_v12  ;;  %v4723_v63 = vpop.f32.mrb[39].mxu1  ;;  %v5352_v11 = vmul.f32 %v10135_v28, %v5275_v40 }
 0xbc6   : > { %v4724_v18 = vadd.f32 %v10099_v12, %v4723_v63 }
 0xbc7   : > { %vm4779_vm8 = vcmp.ge.f32.partialorder %v4729_v8, 0.0  ;;  %v4795_v4 = vmul.f32 0.2, %v4729_v8  ;;  %6232 = vmatprep.mubr.msk.f32.mxu1 %vm4578_vm12, %v4824_v15 }
 0xbc8   : > { %vm4778_vm9 = vcmp.ge.f32.partialorder %v4724_v18, 0.0  ;;  %v4794_v32 = vmul.f32 0.2, %v4724_v18  ;;  %6233 = vmatmul.mubr.msk.f32.gmra.mrb[52].mxu1 %vm4578_vm12, %v4825_v46 }
 0xbc9   : > { %v4811_v38 = vsel %vm4779_vm8, %v4729_v8, %v4795_v4  ;;  %v6200_v9 = vpop.f32.mrb[40].mxu1 }
 0xbca   : > { %v4810_v30 = vsel %vm4778_vm9, %v4724_v18, %v4794_v32  ;;  %v4739_v3 = vadd.f32 %v6200_v9, %v10099_v12  ;;  %v4733_v50 = vpop.f32.mrb[41].mxu1  ;;  %v4827_v60 = vmul.f32 1.4142135, %v4811_v38 }
 0xbcb   : > { %v4826_v58 = vmul.f32 1.4142135, %v4810_v30  ;;  %v4734_v47 = vadd.f32 %v10099_v12, %v4733_v50 }
 0xbcc   : > { %vm4781_vm10 = vcmp.ge.f32.partialorder %v4739_v3, 0.0  ;;  %v4797_v13 = vmul.f32 0.2, %v4739_v3 }
 0xbcd   : > { %6235 = vmatprep.mubr.msk.f32.mxu1 %vm4578_vm12, %v4826_v58  ;;  %vm4780_vm11 = vcmp.ge.f32.partialorder %v4734_v47, 0.0  ;;  %v4796_v52 = vmul.f32 0.2, %v4734_v47  ;;  %v6203_v43 = vpop.f32.mrb[42].mxu1 }
 0xbce   : > { %6236 = vmatmul.mubr.msk.f32.gmra.mrb[54].mxu1 %vm4578_vm12, %v4827_v60  ;;  %v4813_v49 = vsel %vm4781_vm10, %v4739_v3, %v4797_v13  ;;  %v4749_v39 = vadd.f32 %v6203_v43, %v10099_v12  ;;  %v4743_v37 = vpop.f32.mrb[43].mxu1 }
 0xbcf   : > { %v4812_v23 = vsel %vm4780_vm11, %v4734_v47, %v4796_v52  ;;  %v4829_v59 = vmul.f32 1.4142135, %v4813_v49  ;;  %v4744_v55 = vadd.f32 %v10099_v12, %v4743_v37 }
 0xbd0   : > { %v4828_v1 = vmul.f32 1.4142135, %v4812_v23  ;;  %vm4783_vm13 = vcmp.ge.f32.partialorder %v4749_v39, 0.0  ;;  %v4799_v24 = vmul.f32 0.2, %v4749_v39 }
 0xbd1   : > { %vm4782_vm14 = vcmp.ge.f32.partialorder %v4744_v55, 0.0  ;;  %v4798_v48 = vmul.f32 0.2, %v4744_v55  ;;  %v6206_v10 = vpop.f32.mrb[44].mxu1 }
 0xbd2   : > { %6238 = vmatprep.mubr.msk.f32.mxu1 %vm4578_vm12, %v4828_v1  ;;  %v4815_v17 = vsel %vm4783_vm13, %v4749_v39, %v4799_v24  ;;  %v4759_v26 = vadd.f32 %v6206_v10, %v10099_v12  ;;  %v4753_v53 = vpop.f32.mrb[45].mxu1  ;;  %v5320_v39 = vpop.permute.xlu0 %5319 }
 0xbd3   : > { %6239 = vmatmul.mubr.msk.f32.gmra.mrb[56].mxu1 %vm4578_vm12, %v4829_v59  ;;  %v4814_v21 = vsel %vm4782_vm14, %v4744_v55, %v4798_v48  ;;  %v4754_v51 = vadd.f32 %v10099_v12, %v4753_v53  ;;  %v4831_v7 = vmul.f32 1.4142135, %v4815_v17 }
 0xbd4   : > { %v4830_v5 = vmul.f32 1.4142135, %v4814_v21  ;;  %vm4785_vm15 = vcmp.ge.f32.partialorder %v4759_v26, 0.0  ;;  %v4801_v42 = vmul.f32 0.2, %v4759_v26 }
 0xbd5   : > { %vm4784_vm1 = vcmp.ge.f32.partialorder %v4754_v51, 0.0  ;;  %v4800_v45 = vmul.f32 0.2, %v4754_v51  ;;  %v6209_v6 = vpop.f32.mrb[46].mxu1 }
 0xbd6   : > { %v4817_v57 = vsel %vm4785_vm15, %v4759_v26, %v4801_v42  ;;  %v4769_v33 = vadd.f32 %v6209_v6, %v10099_v12  ;;  %v4763_v41 = vpop.f32.mrb[47].mxu1  ;;  %6241 = vmatprep.mubr.msk.f32.mxu1 %vm4578_vm12, %v4830_v5  ;;  %v5330_v21 = vpop.permute.xlu0 %5329  ;;  %v5361_v42 = vmul.f32 %v10135_v28, %v5320_v39 }
 0xbd7   : > { %v4816_v27 = vsel %vm4784_vm1, %v4754_v51, %v4800_v45  ;;  %v4764_v2 = vadd.f32 %v10099_v12, %v4763_v41  ;;  %6242 = vmatmul.mubr.msk.f32.gmra.mrb[58].mxu1 %vm4578_vm12, %v4831_v7  ;;  %v4833_v31 = vmul.f32 1.4142135, %v4817_v57  ;;  %v5280_v12 = vpop.permute.xlu1 %5279 }
 0xbd8   : > { %v4832_v56 = vmul.f32 1.4142135, %v4816_v27  ;;  %vm4787_vm2 = vcmp.ge.f32.partialorder %v4769_v33, 0.0  ;;  %v4803_v19 = vmul.f32 0.2, %v4769_v33  ;;  %v5353_v62 = vmul.f32 %v10135_v28, %v5280_v12 }
 0xbd9   : > { %vm4786_vm3 = vcmp.ge.f32.partialorder %v4764_v2, 0.0  ;;  %v4802_v0 = vmul.f32 0.2, %v4764_v2 }
 0xbda   : > { %v4819_v14 = vsel %vm4787_vm2, %v4769_v33, %v4803_v19  ;;  %6244 = vmatprep.mubr.msk.f32.mxu1 %vm4578_vm12, %v4832_v56  ;;  %v5340_v27 = vpop.permute.xlu0 %5339  ;;  %v5363_v19 = vmul.f32 %v10135_v28, %v5330_v21 }
 0xbdb   : > { %v4818_v34 = vsel %vm4786_vm3, %v4764_v2, %v4802_v0  ;;  %6245 = vmatmul.mubr.msk.f32.gmra.mrb[60].mxu1 %vm4578_vm12, %v4833_v31  ;;  %v4835_v54 = vmul.f32 1.4142135, %v4819_v14  ;;  %v5285_v25 = vpop.permute.xlu1 %5284 }
 0xbdc   : > { %v4834_v20 = vmul.f32 1.4142135, %v4818_v34  ;;  %v5354_v30 = vmul.f32 %v10135_v28, %v5285_v25  ;;  %v5365_v25 = vmul.f32 %v10135_v28, %v5340_v27 }
 0xbde   : > { %6247 = vmatprep.mubr.msk.f32.mxu1 %vm4578_vm12, %v4834_v20 }
 0xbdf   : > { %6248 = vmatmul.mubr.msk.f32.gmra.mrb[62].mxu1 %vm4578_vm12, %v4835_v54  ;;  %v5290_v22 = vpop.permute.xlu1 %5289 }
 0xbe0   : > { %v5355_v18 = vmul.f32 %v10135_v28, %v5290_v22 }
 0xbe3   : > { %v5295_v61 = vpop.permute.xlu1 %5294 }
 0xbe4   : > { %v5356_v49 = vmul.f32 %v10135_v28, %v5295_v61 }
 0xbe7   : > { %v5300_v63 = vpop.permute.xlu1 %5299 }
 0xbe8   : > { %v5357_v60 = vmul.f32 %v10135_v28, %v5300_v63 }
 0xbeb   : > { %v5305_v4 = vpop.permute.xlu1 %5304 }
 0xbec   : > { %v5358_v10 = vmul.f32 %v10135_v28, %v5305_v4 }
 0xbef   : > { %v5310_v47 = vpop.permute.xlu1 %5309 }
 0xbf0   : > { %v5359_v59 = vmul.f32 %v10135_v28, %v5310_v47 }
 0xbf3   : > { %v5315_v55 = vpop.permute.xlu1 %5314 }
 0xbf4   : > { %v5360_v6 = vmul.f32 %v10135_v28, %v5315_v55 }
 0xbf7   : > { %v5325_v5 = vpop.permute.xlu1 %5324 }
 0xbf8   : > { %v5362_v14 = vmul.f32 %v10135_v28, %v5325_v5 }
 0xbfb   : > { %v5335_v56 = vpop.permute.xlu1 %5334 }
 0xc8b   : > { %v6228_v35 = vpop.f32.mrb[48].mxu1 }
 0xc8c   : > { %v4971_v16 = vadd.f32 %v6228_v35, %v10140_v29  ;;  %v4965_v44 = vpop.f32.mrb[49].mxu1  ;;  %v5350_v35 = vpop.permute.xlu0 %5349 }
 0xc8d   : > { %v4966_v36 = vadd.f32 %v10140_v29, %v4965_v44 }
 0xc8e   : > { %v5369_v15 = vadd.f32 %v5353_v62, %v4971_v16  ;;  %v5345_v16 = vpop.permute.xlu1 %5344 }
 0xc8f   : > { %v5368_v8 = vadd.f32 %v5352_v11, %v4966_v36  ;;  %v5364_v11 = vmul.f32 %v10135_v28, %v5335_v56 }
 0xc90   : > { %5385 = vst.msk [vmem:[%s10150_s20 + $0x8] sm:$0xff] %vm477_vm0, %v5369_v15  ;;  %v5367_v15 = vmul.f32 %v10135_v28, %v5350_v35 }
 0xc91   : > { %5384 = vst.msk [vmem:[%s10150_s20] sm:$0xff] %vm477_vm0, %v5368_v8 }
 0xc95   : > { %v6231_v46 = vpop.f32.mrb[50].mxu1 }
 0xc96   : > { %v4981_v32 = vadd.f32 %v6231_v46, %v10140_v29  ;;  %v4975_v38 = vpop.f32.mrb[51].mxu1  ;;  %v5366_v46 = vmul.f32 %v10135_v28, %v5345_v16 }
 0xc97   : > { %v4976_v9 = vadd.f32 %v10140_v29, %v4975_v38 }
 0xc98   : > { %v5371_v58 = vadd.f32 %v5355_v18, %v4981_v32 }
 0xc99   : > { %v5370_v3 = vadd.f32 %v5354_v30, %v4976_v9 }
 0xc9a   : > { %5387 = vst.msk [vmem:[%s10150_s20 + $0x18] sm:$0xff] %vm477_vm0, %v5371_v58 }
 0xc9b   : > { %5386 = vst.msk [vmem:[%s10150_s20 + $0x10] sm:$0xff] %vm477_vm0, %v5370_v3  ;;  %v6234_v50 = vpop.f32.mrb[52].mxu1 }
 0xc9c   : > { %v4991_v13 = vadd.f32 %v6234_v50, %v10140_v29  ;;  %v4985_v52 = vpop.f32.mrb[53].mxu1 }
 0xc9d   : > { %v4986_v23 = vadd.f32 %v10140_v29, %v4985_v52 }
 0xc9e   : > { %v5373_v43 = vadd.f32 %v5357_v60, %v4991_v13 }
 0xc9f   : > { %v5372_v1 = vadd.f32 %v5356_v49, %v4986_v23 }
 0xca0   : > { %5389 = vst.msk [vmem:[%s10150_s20 + $0x28] sm:$0xff] %vm477_vm0, %v5373_v43 }
 0xca1   : > { %5388 = vst.msk [vmem:[%s10150_s20 + $0x20] sm:$0xff] %vm477_vm0, %v5372_v1  ;;  %v6237_v37 = vpop.f32.mrb[54].mxu1 }
 0xca2   : > { %v5001_v24 = vadd.f32 %v6237_v37, %v10140_v29  ;;  %v4995_v48 = vpop.f32.mrb[55].mxu1 }
 0xca3   : > { %v4996_v17 = vadd.f32 %v10140_v29, %v4995_v48 }
 0xca4   : > { %v5375_v26 = vadd.f32 %v5359_v59, %v5001_v24 }
 0xca5   : > { %v5374_v53 = vadd.f32 %v5358_v10, %v4996_v17 }
 0xca6   : > { %5391 = vst.msk [vmem:[%s10150_s20 + $0x38] sm:$0xff] %vm477_vm0, %v5375_v26  ;;  %v6240_v51 = vpop.f32.mrb[56].mxu1 }
 0xca7   : > { %5390 = vst.msk [vmem:[%s10150_s20 + $0x30] sm:$0xff] %vm477_vm0, %v5374_v53  ;;  %v5011_v7 = vadd.f32 %v6240_v51, %v10140_v29  ;;  %v5005_v45 = vpop.f32.mrb[57].mxu1 }
 0xca8   : > { %v5006_v57 = vadd.f32 %v10140_v29, %v5005_v45 }
 0xca9   : > { %v5377_v33 = vadd.f32 %v5361_v42, %v5011_v7 }
 0xcaa   : > { %v5376_v41 = vadd.f32 %v5360_v6, %v5006_v57  ;;  %v6243_v2 = vpop.f32.mrb[58].mxu1 }
 0xcab   : > { %5393 = vst.msk [vmem:[%s10150_s20 + $0x48] sm:$0xff] %vm477_vm0, %v5377_v33  ;;  %v5021_v31 = vadd.f32 %v6243_v2, %v10140_v29  ;;  %v5015_v0 = vpop.f32.mrb[59].mxu1 }
 0xcac   : > { %5392 = vst.msk [vmem:[%s10150_s20 + $0x40] sm:$0xff] %vm477_vm0, %v5376_v41  ;;  %v5016_v34 = vadd.f32 %v10140_v29, %v5015_v0 }
 0xcad   : > { %v5379_v20 = vadd.f32 %v5363_v19, %v5021_v31 }
 0xcae   : > { %v5378_v54 = vadd.f32 %v5362_v14, %v5016_v34  ;;  %v6246_v12 = vpop.f32.mrb[60].mxu1 }
 0xcaf   : > { %5395 = vst.msk [vmem:[%s10150_s20 + $0x58] sm:$0xff] %vm477_vm0, %v5379_v20  ;;  %v5031_v22 = vadd.f32 %v6246_v12, %v10140_v29  ;;  %v5025_v40 = vpop.f32.mrb[61].mxu1 }
 0xcb0   : > { %5394 = vst.msk [vmem:[%s10150_s20 + $0x50] sm:$0xff] %vm477_vm0, %v5378_v54  ;;  %v5026_v62 = vadd.f32 %v10140_v29, %v5025_v40 }
 0xcb1   : > { %v5381_v44 = vadd.f32 %v5365_v25, %v5031_v22 }
 0xcb2   : > { %v5380_v61 = vadd.f32 %v5364_v11, %v5026_v62  ;;  %v6249_v36 = vpop.f32.mrb[62].mxu1 }
 0xcb3   : > { %5397 = vst.msk [vmem:[%s10150_s20 + $0x68] sm:$0xff] %vm477_vm0, %v5381_v44  ;;  %v5041_v8 = vadd.f32 %v6249_v36, %v10140_v29  ;;  %v5035_v63 = vpop.f32.mrb[63].mxu1 }
 0xcb4   : > { %5396 = vst.msk [vmem:[%s10150_s20 + $0x60] sm:$0xff] %vm477_vm0, %v5380_v61  ;;  %v5036_v18 = vadd.f32 %v10140_v29, %v5035_v63 }
 0xcb5   : > { %v5383_v4 = vadd.f32 %v5367_v15, %v5041_v8 }
 0xcb6   : > { %v5382_v32 = vadd.f32 %v5366_v46, %v5036_v18 }
 0xcb7   : > { %5399 = vst.msk [vmem:[%s10150_s20 + $0x78] sm:$0xff] %vm477_vm0, %v5383_v4 }
 0xcb8   : > { %5398 = vst.msk [vmem:[%s10150_s20 + $0x70] sm:$0xff] %vm477_vm0, %v5382_v32 }
 0xcb9 PF: > { %s20_s17 = sadd.s32 1, %s6852_s17   ;;  %s10477_s13 = smov %s6844_s15 }
 0xcba   : > { %p17_p7 = scmp.ge.s32.totalorder %s20_s17, 10   ;;  %s10478_s14 = smov %s6848_s16 }
 0xcbb   : > { %s10479_s15 = smov %s10482_s18  ;;  %s10480_s16 = smov %s10486_s19 }
 0xcbc   :  { %19 = sbr.rel (!%p17_p7) target bundleno = 3 (0x3), region = 96 }

// kernel: synthesis_network_forward.7
= control target key start
LH: loop header
LB: loop body
LE: loop exit
PB: predicated region body
PF: predicated region fallthrough
CT: control target
= control target key end

     0   :  { %s1006_s9 = smov 0   ;;  %s1346_s0 = inlined_call_operand.vmem [shape: f32[2,4,64,8], index: 0, kind: input, shape index: {}]   ;;  %s1347_s1 = inlined_call_operand.vmem [shape: f32[2,64,8], index: 1, kind: input, shape index: {}]   ;;  %s1348_s2 = inlined_call_operand.vmem [shape: f32[2,64,128], index: 2, kind: output, shape index: {}]  }
   0x1 LB: > { %s854_s10 = sadd.s32 4294967295, %s986_s9   ;;  %p858_p0 = scmp.ge.s32.totalorder %s986_s9, 1  ;;  %s986_s9 = sphi %s1006_s9, %s12_s9  }
   0x2   : > { %p122_p1 = scmp.lt.s32.totalorder %s986_s9, 3 }
   0x4   : > { %p123_p2 = pnand %p858_p0, %p122_p1 }
   0x5   : > { %p149_p3 = scmp.lt.s32.totalorder (!%p123_p2), %s854_s10, 1  ;;  %s988_s15 = smov (!%p123_p2), 1   ;;  %v381_v24 = vlaneseq (!%p123_p2)  ;;  %v990_v27 = vmov (!%p123_p2), 1.0   ;;  %vm276_vm1 = vcmask (!%p123_p2), 56320   ;;  %vm388_vm2 = vcmask (!%p123_p2), 64512  }
   0x6   : > { %126 = sbr.rel (%p123_p2) target bundleno = 734 (0x2de), region = 28  ;;  %s989_s16 = smov (!%p123_p2), 127   ;;  %vm734_vm3 = vcmask (!%p123_p2), 72704   ;;  %vm743_vm4 = vcmask (!%p123_p2), 80896   ;;  %vm752_vm5 = vcmask (!%p123_p2), 89088   ;;  %vm761_vm6 = vcmask (!%p123_p2), 97280  }
   0x7   : > { %v382_v25 = vshrl.u32 (!%p123_p2), %v381_v24, 7  ;;  %v384_v26 = vand.u32 (!%p123_p2), 127, %v381_v24  ;;  %vm770_vm7 = vcmask (!%p123_p2), 105472  }
   0x9   : > { %vm385_vm0 = vcmp.lt.s32.totalorder (!%p123_p2), %v382_v25, %v384_v26 }
   0xa   : > { %889 = vmatprep.subr.msk.mxu0 (!%p123_p2), %vm385_vm0, %v990_v27  ;;  %903 = vmatprep.subr.msk.mxu1 (!%p123_p2), %vm385_vm0, %v990_v27 }
   0xb   : > { %890 = vmatpush3.msk.msra.mxu0 (!%p123_p2), %vm385_vm0, %v990_v27  ;;  %904 = vmatpush3.msk.msra.mxu1 (!%p123_p2), %vm385_vm0, %v990_v27 }
   0xd   : > { %s1350_s10 = smov (!%p149_p3, %s854_s10), 1 }
   0xe   : > { %s878_s11 = sshll.u32 %s1350_s10, 6  ;;  %s877_s17 = sshll.u32 %s1350_s10, 8 }
   0xf   : > { %s158_s14 = scalar_lea.vmem %s1347_s1, %s878_s11  ;;  %s1058_s20 = scalar_lea.vmem %s1346_s0, %s877_s17 }
  0x10   : > { %v1022_v0 = vld [vmem:[%s158_s14] sm:$0xff]  ;;  %v1024_v1 = vld [vmem:[%s158_s14 + $0x8] sm:$0xff]  ;;  %v1034_v4 = vld [vmem:[%s158_s14 + $0x10] sm:$0xff]  ;;  %s1280_s23 = scalar_lea.vmem %s1348_s2, %s878_s11 }
  0x11   : > { %212 = vrot.lane.b32.xlu0 %v1022_v0, %s988_s15  ;;  %214 = vrot.lane.b32.xlu1 %v1024_v1, %s988_s15  ;;  %v1028_v2 = vld [vmem:[%s158_s14 + $0x20] sm:$0xff]  ;;  %v1030_v3 = vld [vmem:[%s158_s14 + $0x28] sm:$0xff] }
  0x12   : > { %v1036_v5 = vld [vmem:[%s158_s14 + $0x30] sm:$0xff]  ;;  %v1040_v6 = vld [vmem:[%s158_s14 + $0x18] sm:$0xff]  ;;  %v188_v28 = vld [vmem:[%s1058_s20 + $0xc0] sm:$0xff] }
  0x13   : > { %v1042_v7 = vld [vmem:[%s158_s14 + $0x38] sm:$0xff]  ;;  %v285_v29 = vmax.f32 %v188_v28, 0.0  ;;  %v192_v30 = vld [vmem:[%s1058_s20 + $0xe0] sm:$0xff]  ;;  %v189_v31 = vld [vmem:[%s1058_s20 + $0xc8] sm:$0xff] }
  0x14   : > { %v289_v35 = vmax.f32 %v192_v30, 0.0  ;;  %v286_v36 = vmax.f32 %v189_v31, 0.0  ;;  %v193_v37 = vld [vmem:[%s1058_s20 + $0xe8] sm:$0xff]  ;;  %v190_v41 = vld [vmem:[%s1058_s20 + $0xd0] sm:$0xff]  ;;  %v191_v49 = vld [vmem:[%s1058_s20 + $0xd8] sm:$0xff] }
  0x15   : > { %220 = vrot.lane.b32.xlu0 %v1028_v2, %s988_s15  ;;  %222 = vrot.lane.b32.xlu1 %v1030_v3, %s988_s15  ;;  %v290_v47 = vmax.f32 %v193_v37, 0.0  ;;  %v194_v48 = vld [vmem:[%s1058_s20 + $0xf0] sm:$0xff]  ;;  %v287_v50 = vmax.f32 %v190_v41, 0.0  ;;  %v288_v59 = vmax.f32 %v191_v49, 0.0  ;;  %v195_v63 = vld [vmem:[%s1058_s20 + $0xf8] sm:$0xff] }
  0x16   : > { %v291_v58 = vmax.f32 %v194_v48, 0.0 }
  0x19   : > { %216 = vrot.lane.b32.xlu0 %v1034_v4, %s988_s15  ;;  %224 = vrot.lane.b32.xlu1 %v1036_v5, %s988_s15 }
  0x1d   : > { %218 = vrot.lane.b32.xlu0 %v1040_v6, %s988_s15  ;;  %226 = vrot.lane.b32.xlu1 %v1042_v7, %s988_s15 }
  0x83   : > { %v213_v8 = vpop.permute.xlu0 %212  ;;  %v215_v9 = vpop.permute.xlu1 %214 }
  0x84   : > { %v236_v10 = vsub.f32 %v1022_v0, %v213_v8  ;;  %v237_v11 = vsub.f32 %v1024_v1, %v215_v9 }
  0x86   : > { %252 = vrot.lane.b32.xlu0 %v236_v10, %s989_s16 }
  0x87   : > { %v221_v12 = vpop.permute.xlu0 %220  ;;  %v223_v13 = vpop.permute.xlu1 %222 }
  0x88   : > { %v240_v14 = vsub.f32 %v1028_v2, %v221_v12  ;;  %v241_v15 = vsub.f32 %v1030_v3, %v223_v13 }
  0x8a   : > { %254 = vrot.lane.b32.xlu0 %v237_v11, %s989_s16  ;;  %260 = vrot.lane.b32.xlu1 %v240_v14, %s989_s16 }
  0x8b   : > { %v217_v16 = vpop.permute.xlu0 %216  ;;  %v225_v17 = vpop.permute.xlu1 %224 }
  0x8c   : > { %v238_v18 = vsub.f32 %v1034_v4, %v217_v16  ;;  %v242_v19 = vsub.f32 %v1036_v5, %v225_v17  ;;  %v292_v17 = vmax.f32 %v195_v63, 0.0 }
  0x8e   : > { %262 = vrot.lane.b32.xlu1 %v241_v15, %s989_s16  ;;  %256 = vrot.lane.b32.xlu0 %v238_v18, %s989_s16 }
  0x8f   : > { %v219_v20 = vpop.permute.xlu0 %218  ;;  %v227_v21 = vpop.permute.xlu1 %226 }
  0x90   : > { %v239_v22 = vsub.f32 %v1040_v6, %v219_v20  ;;  %v243_v23 = vsub.f32 %v1042_v7, %v227_v21 }
  0x92   : > { %264 = vrot.lane.b32.xlu1 %v242_v19, %s989_s16  ;;  %258 = vrot.lane.b32.xlu0 %v239_v22, %s989_s16 }
  0x96   : > { %266 = vrot.lane.b32.xlu1 %v243_v23, %s989_s16 }
  0xf8   : > { %v253_v32 = vpop.permute.xlu0 %252 }
  0xf9   : > { %v277_v33 = vsel %vm276_vm1, %v253_v32, 1e+10 }
  0xfa   : > { %v293_v34 = vmul.f32 %v285_v29, %v277_v33 }
  0xfc   : > { %v301_v38 = vmin.f32 %v293_v34, 80.0  ;;  %v261_v39 = vpop.permute.xlu1 %260  ;;  %v255_v40 = vpop.permute.xlu0 %254 }
  0xfd   : > { %v281_v42 = vsel %vm276_vm1, %v261_v39, 1e+10  ;;  %v278_v43 = vsel %vm276_vm1, %v255_v40, 1e+10 }
  0xfe   : > { %v309_v44 = vsub.f32 0.0, %v301_v38  ;;  %v297_v45 = vmul.f32 %v289_v35, %v281_v42  ;;  %v294_v46 = vmul.f32 %v286_v36, %v278_v43 }
 0x100   : > { %v317_v51 = vmul.f32 1.442695, %v309_v44  ;;  %v305_v52 = vmin.f32 %v297_v45, 80.0  ;;  %v302_v53 = vmin.f32 %v294_v46, 80.0  ;;  %v263_v54 = vpop.permute.xlu1 %262  ;;  %v257_v55 = vpop.permute.xlu0 %256 }
 0x101   : > { %v282_v56 = vsel %vm276_vm1, %v263_v54, 1e+10  ;;  %v279_v57 = vsel %vm276_vm1, %v257_v55, 1e+10 }
 0x102   : > { %916 = vpow2.f32 %v317_v51  ;;  %v313_v60 = vsub.f32 0.0, %v305_v52  ;;  %v310_v61 = vsub.f32 0.0, %v302_v53  ;;  %v298_v62 = vmul.f32 %v290_v47, %v282_v56 }
 0x103   : > { %v295_v8 = vmul.f32 %v287_v50, %v279_v57 }
 0x104   : > { %v325_v9 = vmul.f32 1.442695, %v313_v60  ;;  %v319_v10 = vmul.f32 1.442695, %v310_v61  ;;  %v306_v11 = vmin.f32 %v298_v62, 80.0  ;;  %v265_v12 = vpop.permute.xlu1 %264  ;;  %v259_v13 = vpop.permute.xlu0 %258 }
 0x105   : > { %v303_v14 = vmin.f32 %v295_v8, 80.0  ;;  %v283_v15 = vsel %vm276_vm1, %v265_v12, 1e+10  ;;  %v280_v16 = vsel %vm276_vm1, %v259_v13, 1e+10 }
 0x106   : > { %918 = vpow2.f32 %v325_v9  ;;  %v314_v18 = vsub.f32 0.0, %v306_v11  ;;  %v299_v19 = vmul.f32 %v291_v58, %v283_v15  ;;  %v296_v20 = vmul.f32 %v288_v59, %v280_v16 }
 0x107   : > { %920 = vpow2.f32 %v319_v10  ;;  %v311_v21 = vsub.f32 0.0, %v303_v14 }
 0x108   : > { %v327_v22 = vmul.f32 1.442695, %v314_v18  ;;  %v307_v23 = vmin.f32 %v299_v19, 80.0  ;;  %v304_v24 = vmin.f32 %v296_v20, 80.0  ;;  %v267_v25 = vpop.permute.xlu1 %266 }
 0x109   : > { %v321_v26 = vmul.f32 1.442695, %v311_v21  ;;  %v284_v27 = vsel %vm276_vm1, %v267_v25, 1e+10 }
 0x10a   : > { %922 = vpow2.f32 %v327_v22  ;;  %v315_v28 = vsub.f32 0.0, %v307_v23  ;;  %v312_v29 = vsub.f32 0.0, %v304_v24  ;;  %v300_v30 = vmul.f32 %v292_v17, %v284_v27 }
 0x10b   : > { %924 = vpow2.f32 %v321_v26 }
 0x10c   : > { %v1076_v31 = vpop.eup %916  ;;  %v329_v32 = vmul.f32 1.442695, %v315_v28  ;;  %v323_v33 = vmul.f32 1.442695, %v312_v29  ;;  %v308_v34 = vmin.f32 %v300_v30, 80.0 }
 0x10d   : > { %v333_v35 = vsub.f32 1.0, %v1076_v31 }
 0x10e   : > { %926 = vpow2.f32 %v329_v32  ;;  %v316_v36 = vsub.f32 0.0, %v308_v34 }
 0x10f   : > { %928 = vpow2.f32 %v323_v33  ;;  %v341_v37 = vsub.f32 1.0, %v333_v35 }
 0x110   : > { %v1081_v38 = vpop.eup %918  ;;  %v331_v39 = vmul.f32 1.442695, %v316_v36 }
 0x111   : > { %v1083_v40 = vpop.eup %920  ;;  %v337_v41 = vsub.f32 1.0, %v1081_v38  ;;  %v349_v42 = vmax.f32 %v341_v37, 0.0 }
 0x112   : > { %v334_v43 = vsub.f32 1.0, %v1083_v40  ;;  %930 = vpow2.f32 %v331_v39 }
 0x113   : > { %v357_v44 = vadd.f32 1e-10, %v349_v42  ;;  %v345_v45 = vsub.f32 1.0, %v337_v41 }
 0x114   : > { %v1089_v46 = vpop.eup %922  ;;  %v342_v47 = vsub.f32 1.0, %v334_v43 }
 0x115   : > { %v1093_v48 = vpop.eup %924  ;;  %v338_v49 = vsub.f32 1.0, %v1089_v46  ;;  %932 = vlog2.f32 %v357_v44  ;;  %v353_v50 = vmax.f32 %v345_v45, 0.0 }
 0x116   : > { %v350_v51 = vmax.f32 %v342_v47, 0.0  ;;  %v335_v52 = vsub.f32 1.0, %v1093_v48 }
 0x117   : > { %v346_v53 = vsub.f32 1.0, %v338_v49  ;;  %v361_v54 = vadd.f32 1e-10, %v353_v50 }
 0x118   : > { %v1099_v55 = vpop.eup %926  ;;  %v358_v56 = vadd.f32 1e-10, %v350_v51  ;;  %v343_v57 = vsub.f32 1.0, %v335_v52 }
 0x119   : > { %v1103_v58 = vpop.eup %928  ;;  %v354_v59 = vmax.f32 %v346_v53, 0.0  ;;  %v339_v60 = vsub.f32 1.0, %v1099_v55  ;;  %934 = vlog2.f32 %v361_v54 }
 0x11a   : > { %936 = vlog2.f32 %v358_v56  ;;  %v336_v61 = vsub.f32 1.0, %v1103_v58  ;;  %v351_v62 = vmax.f32 %v343_v57, 0.0 }
 0x11b   : > { %v362_v63 = vadd.f32 1e-10, %v354_v59  ;;  %v347_v8 = vsub.f32 1.0, %v339_v60 }
 0x11c   : > { %v1109_v9 = vpop.eup %930  ;;  %v344_v10 = vsub.f32 1.0, %v336_v61  ;;  %v359_v11 = vadd.f32 1e-10, %v351_v62 }
 0x11d   : > { %938 = vlog2.f32 %v362_v63  ;;  %v355_v12 = vmax.f32 %v347_v8, 0.0  ;;  %v340_v13 = vsub.f32 1.0, %v1109_v9  ;;  %v170_v9 = vld [vmem:[%s1058_s20 + $0x30] sm:$0xff] }
 0x11e   : > { %v352_v14 = vmax.f32 %v344_v10, 0.0  ;;  %940 = vlog2.f32 %v359_v11 }
 0x11f   : > { %v933_v15 = vpop.eup %932  ;;  %v363_v16 = vadd.f32 1e-10, %v355_v12  ;;  %v348_v17 = vsub.f32 1.0, %v340_v13 }
 0x120   : > { %v360_v18 = vadd.f32 1e-10, %v352_v14  ;;  %v366_v19 = vmul.f32 0.6931472, %v933_v15 }
 0x121   : > { %942 = vlog2.f32 %v363_v16  ;;  %v356_v20 = vmax.f32 %v348_v17, 0.0 }
 0x122   : > { %944 = vlog2.f32 %v360_v18  ;;  %891 = vmatprep.mubr.msk.f32.mxu0 %vm388_vm2, %v366_v19  ;;  %v550_v21 = vsel %vm388_vm2, %v366_v19, 0.0 }
 0x123   : > { %v935_v22 = vpop.eup %934  ;;  %v364_v23 = vadd.f32 1e-10, %v356_v20  ;;  %551 = vadd.xlane.f32.xlu0 %v550_v21  ;;  %v165_v21 = vld [vmem:[%s1058_s20 + $0x8] sm:$0xff] }
 0x124   : > { %v937_v24 = vpop.eup %936  ;;  %v374_v25 = vmul.f32 0.6931472, %v935_v22 }
 0x125   : > { %946 = vlog2.f32 %v364_v23  ;;  %v368_v26 = vmul.f32 0.6931472, %v937_v24  ;;  %v164_v24 = vld [vmem:[%s1058_s20] sm:$0xff] }
 0x126   : > { %897 = vmatprep.mubr.msk.f32.mxu1 %vm388_vm2, %v374_v25  ;;  %v562_v34 = vsel %vm388_vm2, %v374_v25, 0.0 }
 0x127   : > { %v939_v27 = vpop.eup %938  ;;  %892 = vmatmul.mubr.msk.f32.vlgmr.msra.gmra.mrb[0].mxu0 %vm388_vm2, %v368_v26  ;;  %v553_v28 = vsel %vm388_vm2, %v368_v26, 0.0 }
 0x128   : > { %v941_v29 = vpop.eup %940  ;;  %554 = vadd.xlane.f32.xlu1 %v553_v28  ;;  %v376_v30 = vmul.f32 0.6931472, %v939_v27  ;;  %v169_v28 = vld [vmem:[%s1058_s20 + $0x28] sm:$0xff] }
 0x129   : > { %v370_v32 = vmul.f32 0.6931472, %v941_v29 }
 0x12a   : > { %898 = vmatmul.mubr.msk.f32.vlgmr.msra.gmra.mrb[0].mxu1 %vm388_vm2, %v376_v30  ;;  %v565_v51 = vsel %vm388_vm2, %v376_v30, 0.0 }
 0x12b   : > { %v943_v33 = vpop.eup %942  ;;  %v556_v36 = vsel %vm388_vm2, %v370_v32, 0.0  ;;  %894 = vmatprep.mubr.msk.f32.mxu0 %vm388_vm2, %v370_v32  ;;  %v168_v32 = vld [vmem:[%s1058_s20 + $0x20] sm:$0xff] }
 0x12c   : > { %v945_v37 = vpop.eup %944  ;;  %563 = vadd.xlane.f32.xlu1 %v562_v34  ;;  %557 = vadd.xlane.f32.xlu0 %v556_v36  ;;  %v378_v39 = vmul.f32 0.6931472, %v943_v33  ;;  %v173_v34 = vld [vmem:[%s1058_s20 + $0x48] sm:$0xff] }
 0x12d   : > { %v372_v42 = vmul.f32 0.6931472, %v945_v37 }
 0x12e   : > { %900 = vmatprep.mubr.msk.f32.mxu1 %vm388_vm2, %v378_v39  ;;  %v568_v44 = vsel %vm388_vm2, %v378_v39, 0.0 }
 0x12f   : > { %v947_v45 = vpop.eup %946  ;;  %895 = vmatmul.mubr.msk.f32.gmra.mrb[2].mxu0 %vm388_vm2, %v372_v42  ;;  %v559_v47 = vsel %vm388_vm2, %v372_v42, 0.0 }
 0x130   : > { %560 = vadd.xlane.f32.xlu0 %v559_v47  ;;  %v380_v50 = vmul.f32 0.6931472, %v947_v45  ;;  %569 = vadd.xlane.f32.xlu1 %v568_v44  ;;  %v177_v44 = vld [vmem:[%s1058_s20 + $0x68] sm:$0xff]  ;;  %v176_v45 = vld [vmem:[%s1058_s20 + $0x60] sm:$0xff] }
 0x132   : > { %901 = vmatmul.mubr.msk.f32.gmra.mrb[2].mxu1 %vm388_vm2, %v380_v50  ;;  %v571_v53 = vsel %vm388_vm2, %v380_v50, 0.0 }
 0x134   : > { %566 = vadd.xlane.f32.xlu0 %v565_v51 }
 0x138   : > { %572 = vadd.xlane.f32.xlu0 %v571_v53 }
 0x1fa   : > { %v893_v54 = vpop.f32.mrb[0].mxu0 }
 0x1fb   : > { %v519_v56 = vmin.f32 %v893_v54, 0.0  ;;  %v479_v57 = vpop.f32.mrb[1].mxu0 }
 0x1fc   : > { %v518_v59 = vmin.f32 %v479_v57, 0.0 }
 0x1fd   : > { %v528_v62 = vmul.f32 1.442695, %v519_v56  ;;  %v899_v63 = vpop.f32.mrb[0].mxu1 }
 0x1fe   : > { %v526_v8 = vmul.f32 1.442695, %v518_v59  ;;  %v523_v10 = vmin.f32 %v899_v63, 0.0  ;;  %v499_v11 = vpop.f32.mrb[1].mxu1  ;;  %v180_v63 = vld [vmem:[%s1058_s20 + $0x80] sm:$0xff] }
 0x1ff   : > { %948 = vpow2.f32 %v528_v62  ;;  %v522_v12 = vmin.f32 %v499_v11, 0.0  ;;  %v181_v62 = vld [vmem:[%s1058_s20 + $0x88] sm:$0xff] }
 0x200   : > { %950 = vpow2.f32 %v526_v8  ;;  %v536_v14 = vmul.f32 1.442695, %v523_v10 }
 0x201   : > { %v534_v15 = vmul.f32 1.442695, %v522_v12 }
 0x202   : > { %952 = vpow2.f32 %v536_v14  ;;  %v896_v16 = vpop.f32.mrb[2].mxu0 }
 0x203   : > { %954 = vpow2.f32 %v534_v15  ;;  %v489_v17 = vpop.f32.mrb[3].mxu0  ;;  %v521_v36 = vmin.f32 %v896_v16, 0.0  ;;  %v185_v16 = vld [vmem:[%s1058_s20 + $0xa8] sm:$0xff] }
 0x204   : > { %v520_v38 = vmin.f32 %v489_v17, 0.0  ;;  %v184_v17 = vld [vmem:[%s1058_s20 + $0xa0] sm:$0xff] }
 0x205   : > { %v902_v18 = vpop.f32.mrb[2].mxu1  ;;  %v532_v47 = vmul.f32 1.442695, %v521_v36  ;;  %v171_v36 = vld [vmem:[%s1058_s20 + $0x38] sm:$0xff] }
 0x206   : > { %v509_v19 = vpop.f32.mrb[3].mxu1  ;;  %v525_v50 = vmin.f32 %v902_v18, 0.0  ;;  %v530_v51 = vmul.f32 1.442695, %v520_v38 }
 0x207   : > { %v524_v53 = vmin.f32 %v509_v19, 0.0  ;;  %956 = vpow2.f32 %v532_v47  ;;  %v179_v47 = vld [vmem:[%s1058_s20 + $0x78] sm:$0xff] }
 0x208   : > { %v540_v8 = vmul.f32 1.442695, %v525_v50  ;;  %958 = vpow2.f32 %v530_v51  ;;  %v178_v50 = vld [vmem:[%s1058_s20 + $0x70] sm:$0xff] }
 0x209   : > { %v949_v20 = vpop.eup %948  ;;  %v538_v10 = vmul.f32 1.442695, %v524_v53 }
 0x20a   : > { %v951_v22 = vpop.eup %950  ;;  %v1135_v23 = vmul.f32 %v949_v20, %v334_v43  ;;  %960 = vpow2.f32 %v540_v8 }
 0x20b   : > { %v1140_v25 = vmul.f32 %v951_v22, %v333_v35  ;;  %962 = vpow2.f32 %v538_v10 }
 0x20c   : > { %v953_v26 = vpop.eup %952  ;;  %v599_v27 = vmul.f32 %v1135_v23, %v165_v21  ;;  %v631_v39 = vmul.f32 %v1135_v23, %v173_v34  ;;  %v663_v12 = vmul.f32 %v1135_v23, %v181_v62  ;;  %v166_v34 = vld [vmem:[%s1058_s20 + $0x10] sm:$0xff] }
 0x20d   : > { %v955_v29 = vpop.eup %954  ;;  %v1146_v30 = vmul.f32 %v953_v26, %v338_v49  ;;  %v598_v40 = vmul.f32 %v1140_v25, %v164_v24  ;;  %v172_v49 = vld [vmem:[%s1058_s20 + $0x40] sm:$0xff]  ;;  %v662_v15 = vmul.f32 %v1140_v25, %v180_v63  ;;  %v695_v24 = vmul.f32 %v1135_v23, %v1024_v1 }
 0x20e   : > { %v1152_v43 = vmul.f32 %v955_v29, %v337_v41  ;;  %v609_v31 = vsel %vm388_vm2, %v599_v27, 0.0  ;;  %v630_v42 = vmul.f32 %v1140_v25, %v172_v49  ;;  %v641_v54 = vsel %vm388_vm2, %v631_v39, 0.0 }
 0x20f   : > { %610 = vadd.xlane.f32.xlu0 %v609_v31  ;;  %v606_v35 = vsel %vm388_vm2, %v598_v40, 0.0  ;;  %v603_v33 = vmul.f32 %v1146_v30, %v169_v28  ;;  %v635_v56 = vmul.f32 %v1146_v30, %v177_v44  ;;  %v673_v18 = vsel %vm388_vm2, %v663_v12, 0.0  ;;  %v186_v12 = vld [vmem:[%s1058_s20 + $0xb0] sm:$0xff] }
 0x210   : > { %607 = vadd.xlane.f32.xlu1 %v606_v35  ;;  %v602_v46 = vmul.f32 %v1152_v43, %v168_v32  ;;  %v638_v57 = vsel %vm388_vm2, %v630_v42, 0.0  ;;  %v634_v59 = vmul.f32 %v1152_v43, %v176_v45  ;;  %v667_v19 = vmul.f32 %v1146_v30, %v185_v16 }
 0x211   : > { %v621_v37 = vsel %vm388_vm2, %v603_v33, 0.0  ;;  %v653_v11 = vsel %vm388_vm2, %v635_v56, 0.0  ;;  %v670_v20 = vsel %vm388_vm2, %v662_v15, 0.0  ;;  %v666_v21 = vmul.f32 %v1152_v43, %v184_v17  ;;  %v957_v26 = vpop.eup %956 }
 0x212   : > { %v618_v41 = vsel %vm388_vm2, %v602_v46, 0.0  ;;  %v650_v14 = vsel %vm388_vm2, %v634_v59, 0.0  ;;  %v685_v22 = vsel %vm388_vm2, %v667_v19, 0.0  ;;  %v694_v28 = vmul.f32 %v1140_v25, %v1022_v0  ;;  %v959_v29 = vpop.eup %958  ;;  %v182_v59 = vld [vmem:[%s1058_s20 + $0x90] sm:$0xff] }
 0x213   : > { %622 = vadd.xlane.f32.xlu0 %v621_v37  ;;  %v682_v27 = vsel %vm388_vm2, %v666_v21, 0.0  ;;  %v1190_v40 = vmul.f32 %v957_v26, %v336_v61  ;;  %v705_v32 = vsel %vm388_vm2, %v695_v24, 0.0  ;;  %v699_v31 = vmul.f32 %v1146_v30, %v1030_v3  ;;  %v167_v61 = vld [vmem:[%s1058_s20 + $0x18] sm:$0xff] }
 0x214   : > { %619 = vadd.xlane.f32.xlu1 %v618_v41  ;;  %v961_v1 = vpop.eup %960  ;;  %v1197_v35 = vmul.f32 %v959_v29, %v335_v52  ;;  %v702_v0 = vsel %vm388_vm2, %v694_v28, 0.0  ;;  %v698_v58 = vmul.f32 %v1152_v43, %v1028_v2  ;;  %v174_v41 = vld [vmem:[%s1058_s20 + $0x50] sm:$0xff] }
 0x215   : > { %v963_v33 = vpop.eup %962  ;;  %v1206_v3 = vmul.f32 %v961_v1, %v340_v13  ;;  %v717_v48 = vsel %vm388_vm2, %v699_v31, 0.0  ;;  %v601_v52 = vmul.f32 %v1190_v40, %v167_v61  ;;  %v697_v19 = vmul.f32 %v1190_v40, %v1040_v6  ;;  %v555_v31 = vpop.xlane.xlu1 %554 }
 0x216   : > { %v1212_v46 = vmul.f32 %v963_v33, %v339_v60  ;;  %v714_v2 = vsel %vm388_vm2, %v698_v58, 0.0  ;;  %v600_v49 = vmul.f32 %v1197_v35, %v166_v34  ;;  %v175_v60 = vld [vmem:[%s1058_s20 + $0x58] sm:$0xff]  ;;  %v632_v45 = vmul.f32 %v1197_v35, %v174_v41 }
 0x217   : > { %642 = vadd.xlane.f32.xlu0 %v641_v54  ;;  %v615_v13 = vsel %vm388_vm2, %v601_v52, 0.0  ;;  %v605_v37 = vmul.f32 %v1206_v3, %v171_v36  ;;  %v633_v42 = vmul.f32 %v1190_v40, %v175_v60  ;;  %v637_v53 = vmul.f32 %v1206_v3, %v179_v47 }
 0x218   : > { %639 = vadd.xlane.f32.xlu1 %v638_v57  ;;  %v612_v38 = vsel %vm388_vm2, %v600_v49, 0.0  ;;  %v604_v55 = vmul.f32 %v1212_v46, %v170_v9  ;;  %v644_v54 = vsel %vm388_vm2, %v632_v45, 0.0  ;;  %v636_v56 = vmul.f32 %v1212_v46, %v178_v50  ;;  %v183_v57 = vld [vmem:[%s1058_s20 + $0x98] sm:$0xff] }
 0x219   : > { %v627_v39 = vsel %vm388_vm2, %v605_v37, 0.0  ;;  %v647_v51 = vsel %vm388_vm2, %v633_v42, 0.0  ;;  %v659_v62 = vsel %vm388_vm2, %v637_v53, 0.0  ;;  %v665_v63 = vmul.f32 %v1190_v40, %v183_v57  ;;  %v564_v1 = vpop.xlane.xlu1 %563 }
 0x21a   : > { %v624_v44 = vsel %vm388_vm2, %v604_v55, 0.0  ;;  %v656_v8 = vsel %vm388_vm2, %v636_v56, 0.0  ;;  %v664_v10 = vmul.f32 %v1197_v35, %v182_v59  ;;  %v668_v17 = vmul.f32 %v1212_v46, %v186_v12 }
 0x21b   : > { %654 = vadd.xlane.f32.xlu0 %v653_v11  ;;  %v187_v11 = vld [vmem:[%s1058_s20 + $0xb8] sm:$0xff]  ;;  %v696_v21 = vmul.f32 %v1197_v35, %v1034_v4  ;;  %v701_v24 = vmul.f32 %v1206_v3, %v1042_v7  ;;  %v552_v4 = vpop.xlane.xlu0 %551  ;;  %v578_v37 = vmin.f32 %v564_v1, 0.0 }
 0x21c   : > { %651 = vadd.xlane.f32.xlu1 %v650_v14  ;;  %v679_v14 = vsel %vm388_vm2, %v665_v63, 0.0  ;;  %v669_v15 = vmul.f32 %v1206_v3, %v187_v11  ;;  %v676_v16 = vsel %vm388_vm2, %v664_v10, 0.0  ;;  %v574_v52 = vmin.f32 %v552_v4, 0.0 }
 0x21d   : > { %v708_v26 = vsel %vm388_vm2, %v696_v21, 0.0  ;;  %v723_v6 = vsel %vm388_vm2, %v701_v24, 0.0  ;;  %v1266_v58 = vpop.xlane.xlu1 %569  ;;  %v590_v41 = vmul.f32 1.442695, %v578_v37 }
 0x21f   : > { %674 = vadd.xlane.f32.xlu0 %v673_v18  ;;  %v691_v18 = vsel %vm388_vm2, %v669_v15, 0.0  ;;  %v1260_v29 = vpop.xlane.xlu0 %557 }
 0x220   : > { %671 = vadd.xlane.f32.xlu1 %v670_v20  ;;  %v688_v20 = vsel %vm388_vm2, %v668_v17, 0.0 }
 0x223   : > { %686 = vadd.xlane.f32.xlu0 %v685_v22  ;;  %v711_v22 = vsel %vm388_vm2, %v697_v19, 0.0 }
 0x224   : > { %683 = vadd.xlane.f32.xlu1 %v682_v27  ;;  %v700_v27 = vmul.f32 %v1212_v46, %v1036_v5 }
 0x226   : > { %v720_v28 = vsel %vm388_vm2, %v700_v27, 0.0 }
 0x227   : > { %706 = vadd.xlane.f32.xlu0 %v705_v32  ;;  %v1262_v32 = vpop.xlane.xlu0 %560 }
 0x228   : > { %703 = vadd.xlane.f32.xlu1 %v702_v0 }
 0x22b   : > { %718 = vadd.xlane.f32.xlu0 %v717_v48  ;;  %v567_v7 = vpop.xlane.xlu0 %566  ;;  %v575_v48 = vmin.f32 %v555_v31, 0.0 }
 0x22c   : > { %715 = vadd.xlane.f32.xlu1 %v714_v2  ;;  %v579_v9 = vmin.f32 %v567_v7, 0.0 }
 0x22d   : > { %v584_v36 = vmul.f32 1.442695, %v575_v48 }
 0x22e   : > { %v592_v60 = vmul.f32 1.442695, %v579_v9 }
 0x22f   : > { %616 = vadd.xlane.f32.xlu0 %v615_v13  ;;  %v1264_v0 = vpop.xlane.xlu0 %572  ;;  %v582_v13 = vmul.f32 1.442695, %v574_v52  ;;  %964 = vpow2.f32 %v584_v36 }
 0x230   : > { %613 = vadd.xlane.f32.xlu1 %v612_v38  ;;  %v581_v52 = vmin.f32 %v1264_v0, 0.0 }
 0x231   : > { %966 = vpow2.f32 %v582_v13 }
 0x232   : > { %968 = vpow2.f32 %v592_v60  ;;  %v596_v13 = vmul.f32 1.442695, %v581_v52 }
 0x233   : > { %628 = vadd.xlane.f32.xlu0 %v627_v39  ;;  %970 = vpow2.f32 %v590_v41 }
 0x234   : > { %625 = vadd.xlane.f32.xlu1 %v624_v44 }
 0x237   : > { %648 = vadd.xlane.f32.xlu0 %v647_v51 }
 0x238   : > { %645 = vadd.xlane.f32.xlu1 %v644_v54 }
 0x239   : > { %v965_v57 = vpop.eup %964 }
 0x23b   : > { %660 = vadd.xlane.f32.xlu0 %v659_v62  ;;  %v967_v62 = vpop.eup %966 }
 0x23c   : > { %657 = vadd.xlane.f32.xlu1 %v656_v8  ;;  %v969_v19 = vpop.eup %968 }
 0x23f   : > { %680 = vadd.xlane.f32.xlu0 %v679_v14 }
 0x240   : > { %677 = vadd.xlane.f32.xlu1 %v676_v16 }
 0x243   : > { %692 = vadd.xlane.f32.xlu0 %v691_v18 }
 0x244   : > { %689 = vadd.xlane.f32.xlu1 %v688_v20 }
 0x247   : > { %712 = vadd.xlane.f32.xlu0 %v711_v22  ;;  %v971_v22 = vpop.eup %970 }
 0x248   : > { %709 = vadd.xlane.f32.xlu1 %v708_v26 }
 0x24b   : > { %724 = vadd.xlane.f32.xlu0 %v723_v6 }
 0x24c   : > { %721 = vadd.xlane.f32.xlu1 %v720_v28 }
 0x29c   : > { %v611_v5 = vpop.xlane.xlu0 %610 }
 0x29d   : > { %v608_v61 = vpop.xlane.xlu1 %607  ;;  %v727_v47 = vsel %vm388_vm2, %v1135_v23, %v611_v5  ;;  %v577_v5 = vmin.f32 %v1262_v32, 0.0 }
 0x29e   : > { %v726_v50 = vsel %vm388_vm2, %v1140_v25, %v608_v61  ;;  %v576_v61 = vmin.f32 %v1260_v29, 0.0 }
 0x29f   : > { %v588_v48 = vmul.f32 1.442695, %v577_v5 }
 0x2a0   : > { %v623_v33 = vpop.xlane.xlu0 %622 }
 0x2a1   : > { %v620_v34 = vpop.xlane.xlu1 %619  ;;  %v731_v63 = vsel %vm388_vm2, %v1146_v30, %v623_v33  ;;  %972 = vpow2.f32 %v588_v48 }
 0x2a2   : > { %v730_v11 = vsel %vm388_vm2, %v1152_v43, %v620_v34 }
 0x2a4   : > { %v643_v2 = vpop.xlane.xlu0 %642 }
 0x2a5   : > { %v640_v49 = vpop.xlane.xlu1 %639  ;;  %v736_v51 = vsel %vm734_vm3, %v727_v47, %v643_v2  ;;  %v586_v2 = vmul.f32 1.442695, %v576_v61 }
 0x2a6   : > { %v735_v53 = vsel %vm734_vm3, %v726_v50, %v640_v49  ;;  %v580_v49 = vmin.f32 %v1266_v58, 0.0 }
 0x2a7   : > { %974 = vpow2.f32 %v586_v2 }
 0x2a8   : > { %v655_v38 = vpop.xlane.xlu0 %654  ;;  %v594_v37 = vmul.f32 1.442695, %v580_v49  ;;  %976 = vpow2.f32 %v596_v13 }
 0x2a9   : > { %v652_v55 = vpop.xlane.xlu1 %651  ;;  %v740_v12 = vsel %vm734_vm3, %v731_v63, %v655_v38 }
 0x2aa   : > { %v739_v16 = vsel %vm734_vm3, %v730_v11, %v652_v55  ;;  %978 = vpow2.f32 %v594_v37 }
 0x2ac   : > { %v675_v39 = vpop.xlane.xlu0 %674 }
 0x2ad   : > { %v672_v42 = vpop.xlane.xlu1 %671  ;;  %v745_v54 = vsel %vm743_vm4, %v736_v51, %v675_v39 }
 0x2ae   : > { %v744_v23 = vsel %vm743_vm4, %v735_v53, %v672_v42 }
 0x2b0   : > { %v687_v44 = vpop.xlane.xlu0 %686 }
 0x2b1   : > { %v684_v45 = vpop.xlane.xlu1 %683  ;;  %v749_v17 = vsel %vm743_vm4, %v740_v12, %v687_v44  ;;  %v973_v44 = vpop.eup %972 }
 0x2b2   : > { %v748_v20 = vsel %vm743_vm4, %v739_v16, %v684_v45  ;;  %v975_v51 = vpop.eup %974 }
 0x2b3   : > { %v977_v63 = vpop.eup %976 }
 0x2b4   : > { %v707_v56 = vpop.xlane.xlu0 %706  ;;  %v979_v11 = vpop.eup %978 }
 0x2b5   : > { %v754_v25 = vsel %vm752_vm5, %v745_v54, %v707_v56  ;;  %v704_v59 = vpop.xlane.xlu1 %703 }
 0x2b6   : > { %v763_v8 = vsel %vm761_vm6, %v754_v25, %v965_v57  ;;  %v753_v10 = vsel %vm752_vm5, %v744_v23, %v704_v59 }
 0x2b7   : > { %v772_v14 = vsel %vm770_vm7, %v763_v8, 0.0  ;;  %v762_v15 = vsel %vm761_vm6, %v753_v10, %v967_v62 }
 0x2b8   : > { %780 = vst [vmem:[%s1280_s23 + $0x8] sm:$0xff] %v772_v14  ;;  %v771_v30 = vsel %vm770_vm7, %v762_v15, 0.0  ;;  %v719_v18 = vpop.xlane.xlu0 %718 }
 0x2b9   : > { %779 = vst [vmem:[%s1280_s23] sm:$0xff] %v771_v30  ;;  %v758_v43 = vsel %vm752_vm5, %v749_v17, %v719_v18  ;;  %v716_v21 = vpop.xlane.xlu1 %715 }
 0x2ba   : > { %v767_v24 = vsel %vm761_vm6, %v758_v43, %v969_v19  ;;  %v757_v26 = vsel %vm752_vm5, %v748_v20, %v716_v21 }
 0x2bb   : > { %v776_v27 = vsel %vm770_vm7, %v767_v24, 0.0  ;;  %v766_v6 = vsel %vm761_vm6, %v757_v26, %v971_v22 }
 0x2bc   : > { %784 = vst [vmem:[%s1280_s23 + $0x28] sm:$0xff] %v776_v27  ;;  %v775_v28 = vsel %vm770_vm7, %v766_v6, 0.0  ;;  %v617_v4 = vpop.xlane.xlu0 %616 }
 0x2bd   : > { %783 = vst [vmem:[%s1280_s23 + $0x20] sm:$0xff] %v775_v28  ;;  %v614_v31 = vpop.xlane.xlu1 %613  ;;  %v729_v60 = vsel %vm388_vm2, %v1190_v40, %v617_v4 }
 0x2be   : > { %v728_v0 = vsel %vm388_vm2, %v1197_v35, %v614_v31 }
 0x2c0   : > { %v629_v7 = vpop.xlane.xlu0 %628 }
 0x2c1   : > { %v626_v1 = vpop.xlane.xlu1 %625  ;;  %v733_v40 = vsel %vm388_vm2, %v1206_v3, %v629_v7 }
 0x2c2   : > { %v732_v54 = vsel %vm388_vm2, %v1212_v46, %v626_v1 }
 0x2c4   : > { %v649_v33 = vpop.xlane.xlu0 %648 }
 0x2c5   : > { %v646_v34 = vpop.xlane.xlu1 %645  ;;  %v738_v58 = vsel %vm734_vm3, %v729_v60, %v649_v33 }
 0x2c6   : > { %v737_v41 = vsel %vm734_vm3, %v728_v0, %v646_v34 }
 0x2c8   : > { %v661_v36 = vpop.xlane.xlu0 %660 }
 0x2c9   : > { %v658_v9 = vpop.xlane.xlu1 %657  ;;  %v742_v56 = vsel %vm734_vm3, %v733_v40, %v661_v36 }
 0x2ca   : > { %v741_v25 = vsel %vm734_vm3, %v732_v54, %v658_v9 }
 0x2cc   : > { %v681_v38 = vpop.xlane.xlu0 %680 }
 0x2cd   : > { %v678_v55 = vpop.xlane.xlu1 %677  ;;  %v747_v39 = vsel %vm743_vm4, %v738_v58, %v681_v38 }
 0x2ce   : > { %v746_v45 = vsel %vm743_vm4, %v737_v41, %v678_v55 }
 0x2d0   : > { %v693_v32 = vpop.xlane.xlu0 %692 }
 0x2d1   : > { %v690_v29 = vpop.xlane.xlu1 %689  ;;  %v751_v59 = vsel %vm743_vm4, %v742_v56, %v693_v32 }
 0x2d2   : > { %v750_v8 = vsel %vm743_vm4, %v741_v25, %v690_v29 }
 0x2d4   : > { %v713_v42 = vpop.xlane.xlu0 %712 }
 0x2d5   : > { %v756_v47 = vsel %vm752_vm5, %v747_v39, %v713_v42  ;;  %v710_v50 = vpop.xlane.xlu1 %709 }
 0x2d6   : > { %v765_v35 = vsel %vm761_vm6, %v756_v47, %v973_v44  ;;  %v755_v53 = vsel %vm752_vm5, %v746_v45, %v710_v50 }
 0x2d7   : > { %v774_v57 = vsel %vm770_vm7, %v765_v35, 0.0  ;;  %v764_v23 = vsel %vm761_vm6, %v755_v53, %v975_v51 }
 0x2d8   : > { %782 = vst [vmem:[%s1280_s23 + $0x18] sm:$0xff] %v774_v57  ;;  %v773_v3 = vsel %vm770_vm7, %v764_v23, 0.0  ;;  %v725_v62 = vpop.xlane.xlu0 %724 }
 0x2d9   : > { %781 = vst [vmem:[%s1280_s23 + $0x10] sm:$0xff] %v773_v3  ;;  %v760_v46 = vsel %vm752_vm5, %v751_v59, %v725_v62  ;;  %v722_v10 = vpop.xlane.xlu1 %721 }
 0x2da   : > { %v769_v12 = vsel %vm761_vm6, %v760_v46, %v977_v63  ;;  %v759_v14 = vsel %vm752_vm5, %v750_v8, %v722_v10 }
 0x2db   : > { %v778_v15 = vsel %vm770_vm7, %v769_v12, 0.0  ;;  %v768_v16 = vsel %vm761_vm6, %v759_v14, %v979_v11 }
 0x2dc   : > { %786 = vst [vmem:[%s1280_s23 + $0x38] sm:$0xff] %v778_v15  ;;  %v777_v17 = vsel %vm770_vm7, %v768_v16, 0.0 }
 0x2dd   : > { %785 = vst [vmem:[%s1280_s23 + $0x30] sm:$0xff] %v777_v17 }
 0x2de PF: > { %s12_s9 = sadd.s32 1, %s986_s9  }
 0x2df   : > { %p9_p4 = scmp.ge.s32.totalorder %s12_s9, 4  }
 0x2e1   :  { %11 = sbr.rel (!%p9_p4) target bundleno = 1 (0x1), region = 61 }

// kernel: squeeze.8
= control target key start
LH: loop header
LB: loop body
LE: loop exit
PB: predicated region body
PF: predicated region fallthrough
CT: control target
= control target key end

     0   :  { %vm3_vm0 = vcmask 64512   ;;  %s264_s8 = smov 104   ;;  %s265_s17 = smov 112   ;;  %s547_s0 = inlined_call_operand.vmem [shape: f32[1024], index: 0, kind: input, shape index: {}]   ;;  %s548_s1 = inlined_call_operand.vmem [shape: f32[128,8], index: 1, kind: output, shape index: {}]  }
   0x1   :  { %v8_v0 = vld [vmem:[%s547_s0] sm:$0xff]   ;;  %s263_s0 = smov 120   ;;  %s266_s18 = smov 96  }
   0x2   :  { %9 = vrot.lane.b32.xlu0 %v8_v0, %s263_s0  ;;  %33 = vrot.lane.b32.xlu1 %v8_v0, %s264_s8  ;;  %4 = vst.msk [vmem:[%s548_s1] ss:$16 sm:$0x3] %vm3_vm0, %v8_v0   ;;  %5 = vst.msk [vmem:[%s548_s1] ss:$16 sm:$0xc] %vm3_vm0, %v8_v0  }
   0x3   :  { %6 = vst.msk [vmem:[%s548_s1] ss:$16 sm:$0x30] %vm3_vm0, %v8_v0   ;;  %7 = vst.msk [vmem:[%s548_s1] ss:$16 sm:$0xc0] %vm3_vm0, %v8_v0  }
   0x4   :  { %s267_s19 = smov 88   ;;  %s268_s20 = smov 80  }
   0x5   :  { %s269_s21 = smov 72   ;;  %s270_s22 = smov 64  }
   0x6   :  { %21 = vrot.lane.b32.xlu0 %v8_v0, %s265_s17  ;;  %45 = vrot.lane.b32.xlu1 %v8_v0, %s266_s18  ;;  %s271_s23 = smov 56   ;;  %s272_s24 = smov 48  }
   0x7   :  { %s273_s25 = smov 40   ;;  %s274_s26 = smov 32  }
   0x8   :  { %s275_s27 = smov 24   ;;  %s276_s28 = smov 16  }
   0x9   :  { %s277_s29 = smov 8  }
   0xa   :  { %57 = vrot.lane.b32.xlu0 %v8_v0, %s267_s19  ;;  %69 = vrot.lane.b32.xlu1 %v8_v0, %s268_s20 }
   0xe   :  { %81 = vrot.lane.b32.xlu0 %v8_v0, %s269_s21  ;;  %93 = vrot.lane.b32.xlu1 %v8_v0, %s270_s22 }
  0x12   :  { %105 = vrot.lane.b32.xlu0 %v8_v0, %s271_s23  ;;  %117 = vrot.lane.b32.xlu1 %v8_v0, %s272_s24 }
  0x16   :  { %129 = vrot.lane.b32.xlu0 %v8_v0, %s273_s25  ;;  %141 = vrot.lane.b32.xlu1 %v8_v0, %s274_s26 }
  0x1a   :  { %153 = vrot.lane.b32.xlu0 %v8_v0, %s275_s27  ;;  %165 = vrot.lane.b32.xlu1 %v8_v0, %s276_s28 }
  0x1e   :  { %177 = vrot.lane.b32.xlu0 %v8_v0, %s277_s29 }
  0x74   :  { %v10_v1 = vpop.permute.xlu0 %9   ;;  %v34_v2 = vpop.permute.xlu1 %33  }
  0x75   :  { %188 = vst.msk [vmem:[%s548_s1 + $0x1] ss:$16 sm:$0x3] %vm3_vm0, %v10_v1   ;;  %189 = vst.msk [vmem:[%s548_s1 + $0x1] ss:$16 sm:$0xc] %vm3_vm0, %v10_v1  }
  0x76   :  { %190 = vst.msk [vmem:[%s548_s1 + $0x1] ss:$16 sm:$0x30] %vm3_vm0, %v10_v1   ;;  %191 = vst.msk [vmem:[%s548_s1 + $0x1] ss:$16 sm:$0xc0] %vm3_vm0, %v10_v1  }
  0x77   :  { %196 = vst.msk [vmem:[%s548_s1 + $0x3] ss:$16 sm:$0x3] %vm3_vm0, %v34_v2   ;;  %197 = vst.msk [vmem:[%s548_s1 + $0x3] ss:$16 sm:$0xc] %vm3_vm0, %v34_v2  }
  0x78   :  { %198 = vst.msk [vmem:[%s548_s1 + $0x3] ss:$16 sm:$0x30] %vm3_vm0, %v34_v2   ;;  %199 = vst.msk [vmem:[%s548_s1 + $0x3] ss:$16 sm:$0xc0] %vm3_vm0, %v34_v2   ;;  %v22_v3 = vpop.permute.xlu0 %21   ;;  %v46_v4 = vpop.permute.xlu1 %45  }
  0x79   :  { %192 = vst.msk [vmem:[%s548_s1 + $0x2] ss:$16 sm:$0x3] %vm3_vm0, %v22_v3   ;;  %193 = vst.msk [vmem:[%s548_s1 + $0x2] ss:$16 sm:$0xc] %vm3_vm0, %v22_v3  }
  0x7a   :  { %194 = vst.msk [vmem:[%s548_s1 + $0x2] ss:$16 sm:$0x30] %vm3_vm0, %v22_v3   ;;  %195 = vst.msk [vmem:[%s548_s1 + $0x2] ss:$16 sm:$0xc0] %vm3_vm0, %v22_v3  }
  0x7b   :  { %200 = vst.msk [vmem:[%s548_s1 + $0x4] ss:$16 sm:$0x3] %vm3_vm0, %v46_v4   ;;  %201 = vst.msk [vmem:[%s548_s1 + $0x4] ss:$16 sm:$0xc] %vm3_vm0, %v46_v4  }
  0x7c   :  { %202 = vst.msk [vmem:[%s548_s1 + $0x4] ss:$16 sm:$0x30] %vm3_vm0, %v46_v4   ;;  %203 = vst.msk [vmem:[%s548_s1 + $0x4] ss:$16 sm:$0xc0] %vm3_vm0, %v46_v4   ;;  %v58_v5 = vpop.permute.xlu0 %57   ;;  %v70_v6 = vpop.permute.xlu1 %69  }
  0x7d   :  { %204 = vst.msk [vmem:[%s548_s1 + $0x5] ss:$16 sm:$0x3] %vm3_vm0, %v58_v5   ;;  %205 = vst.msk [vmem:[%s548_s1 + $0x5] ss:$16 sm:$0xc] %vm3_vm0, %v58_v5  }
  0x7e   :  { %206 = vst.msk [vmem:[%s548_s1 + $0x5] ss:$16 sm:$0x30] %vm3_vm0, %v58_v5   ;;  %207 = vst.msk [vmem:[%s548_s1 + $0x5] ss:$16 sm:$0xc0] %vm3_vm0, %v58_v5  }
  0x7f   :  { %208 = vst.msk [vmem:[%s548_s1 + $0x6] ss:$16 sm:$0x3] %vm3_vm0, %v70_v6   ;;  %209 = vst.msk [vmem:[%s548_s1 + $0x6] ss:$16 sm:$0xc] %vm3_vm0, %v70_v6  }
  0x80   :  { %210 = vst.msk [vmem:[%s548_s1 + $0x6] ss:$16 sm:$0x30] %vm3_vm0, %v70_v6   ;;  %211 = vst.msk [vmem:[%s548_s1 + $0x6] ss:$16 sm:$0xc0] %vm3_vm0, %v70_v6   ;;  %v82_v7 = vpop.permute.xlu0 %81   ;;  %v94_v8 = vpop.permute.xlu1 %93  }
  0x81   :  { %212 = vst.msk [vmem:[%s548_s1 + $0x7] ss:$16 sm:$0x3] %vm3_vm0, %v82_v7   ;;  %213 = vst.msk [vmem:[%s548_s1 + $0x7] ss:$16 sm:$0xc] %vm3_vm0, %v82_v7  }
  0x82   :  { %214 = vst.msk [vmem:[%s548_s1 + $0x7] ss:$16 sm:$0x30] %vm3_vm0, %v82_v7   ;;  %215 = vst.msk [vmem:[%s548_s1 + $0x7] ss:$16 sm:$0xc0] %vm3_vm0, %v82_v7  }
  0x83   :  { %216 = vst.msk [vmem:[%s548_s1 + $0x8] ss:$16 sm:$0x3] %vm3_vm0, %v94_v8   ;;  %217 = vst.msk [vmem:[%s548_s1 + $0x8] ss:$16 sm:$0xc] %vm3_vm0, %v94_v8  }
  0x84   :  { %218 = vst.msk [vmem:[%s548_s1 + $0x8] ss:$16 sm:$0x30] %vm3_vm0, %v94_v8   ;;  %219 = vst.msk [vmem:[%s548_s1 + $0x8] ss:$16 sm:$0xc0] %vm3_vm0, %v94_v8   ;;  %v106_v9 = vpop.permute.xlu0 %105   ;;  %v118_v10 = vpop.permute.xlu1 %117  }
  0x85   :  { %220 = vst.msk [vmem:[%s548_s1 + $0x9] ss:$16 sm:$0x3] %vm3_vm0, %v106_v9   ;;  %221 = vst.msk [vmem:[%s548_s1 + $0x9] ss:$16 sm:$0xc] %vm3_vm0, %v106_v9  }
  0x86   :  { %222 = vst.msk [vmem:[%s548_s1 + $0x9] ss:$16 sm:$0x30] %vm3_vm0, %v106_v9   ;;  %223 = vst.msk [vmem:[%s548_s1 + $0x9] ss:$16 sm:$0xc0] %vm3_vm0, %v106_v9  }
  0x87   :  { %224 = vst.msk [vmem:[%s548_s1 + $0xa] ss:$16 sm:$0x3] %vm3_vm0, %v118_v10   ;;  %225 = vst.msk [vmem:[%s548_s1 + $0xa] ss:$16 sm:$0xc] %vm3_vm0, %v118_v10  }
  0x88   :  { %226 = vst.msk [vmem:[%s548_s1 + $0xa] ss:$16 sm:$0x30] %vm3_vm0, %v118_v10   ;;  %227 = vst.msk [vmem:[%s548_s1 + $0xa] ss:$16 sm:$0xc0] %vm3_vm0, %v118_v10   ;;  %v130_v11 = vpop.permute.xlu0 %129   ;;  %v142_v12 = vpop.permute.xlu1 %141  }
  0x89   :  { %228 = vst.msk [vmem:[%s548_s1 + $0xb] ss:$16 sm:$0x3] %vm3_vm0, %v130_v11   ;;  %229 = vst.msk [vmem:[%s548_s1 + $0xb] ss:$16 sm:$0xc] %vm3_vm0, %v130_v11  }
  0x8a   :  { %230 = vst.msk [vmem:[%s548_s1 + $0xb] ss:$16 sm:$0x30] %vm3_vm0, %v130_v11   ;;  %231 = vst.msk [vmem:[%s548_s1 + $0xb] ss:$16 sm:$0xc0] %vm3_vm0, %v130_v11  }
  0x8b   :  { %232 = vst.msk [vmem:[%s548_s1 + $0xc] ss:$16 sm:$0x3] %vm3_vm0, %v142_v12   ;;  %233 = vst.msk [vmem:[%s548_s1 + $0xc] ss:$16 sm:$0xc] %vm3_vm0, %v142_v12  }
  0x8c   :  { %234 = vst.msk [vmem:[%s548_s1 + $0xc] ss:$16 sm:$0x30] %vm3_vm0, %v142_v12   ;;  %235 = vst.msk [vmem:[%s548_s1 + $0xc] ss:$16 sm:$0xc0] %vm3_vm0, %v142_v12   ;;  %v154_v13 = vpop.permute.xlu0 %153   ;;  %v166_v14 = vpop.permute.xlu1 %165  }
  0x8d   :  { %236 = vst.msk [vmem:[%s548_s1 + $0xd] ss:$16 sm:$0x3] %vm3_vm0, %v154_v13   ;;  %237 = vst.msk [vmem:[%s548_s1 + $0xd] ss:$16 sm:$0xc] %vm3_vm0, %v154_v13  }
  0x8e   :  { %238 = vst.msk [vmem:[%s548_s1 + $0xd] ss:$16 sm:$0x30] %vm3_vm0, %v154_v13   ;;  %239 = vst.msk [vmem:[%s548_s1 + $0xd] ss:$16 sm:$0xc0] %vm3_vm0, %v154_v13  }
  0x8f   :  { %240 = vst.msk [vmem:[%s548_s1 + $0xe] ss:$16 sm:$0x3] %vm3_vm0, %v166_v14   ;;  %241 = vst.msk [vmem:[%s548_s1 + $0xe] ss:$16 sm:$0xc] %vm3_vm0, %v166_v14  }
  0x90   :  { %242 = vst.msk [vmem:[%s548_s1 + $0xe] ss:$16 sm:$0x30] %vm3_vm0, %v166_v14   ;;  %243 = vst.msk [vmem:[%s548_s1 + $0xe] ss:$16 sm:$0xc0] %vm3_vm0, %v166_v14   ;;  %v178_v15 = vpop.permute.xlu0 %177  }
  0x91   :  { %244 = vst.msk [vmem:[%s548_s1 + $0xf] ss:$16 sm:$0x3] %vm3_vm0, %v178_v15   ;;  %245 = vst.msk [vmem:[%s548_s1 + $0xf] ss:$16 sm:$0xc] %vm3_vm0, %v178_v15  }
  0x92   :  { %246 = vst.msk [vmem:[%s548_s1 + $0xf] ss:$16 sm:$0x30] %vm3_vm0, %v178_v15   ;;  %247 = vst.msk [vmem:[%s548_s1 + $0xf] ss:$16 sm:$0xc0] %vm3_vm0, %v178_v15  }

// kernel: squeeze.93
= control target key start
LH: loop header
LB: loop body
LE: loop exit
PB: predicated region body
PF: predicated region fallthrough
CT: control target
= control target key end

     0   :  { %s66_s8 = smov 104   ;;  %vm7_vm0 = vcmask 64512   ;;  %s67_s11 = smov 112   ;;  %s117_s0 = inlined_call_operand.vmem [shape: f32[2,64], index: 0, kind: input, shape index: {}]   ;;  %s118_s1 = inlined_call_operand.vmem [shape: f32[2,1,8,8], index: 1, kind: output, shape index: {}]  }
   0x1   :  { %v4_v0 = vld [vmem:[%s117_s0] sm:$0x3]  ;;  %s65_s0 = smov 120   ;;  %s68_s12 = smov 96  }
   0x2   :  { %5 = vst [vmem:[#allocation0] sm:$0x3] %v4_v0  ;;  %s69_s13 = smov 88   ;;  %s70_s14 = smov 80  }
   0x3   :  { %s71_s15 = smov 72  }
   0x9   :  { %v9_v1 = vld [vmem:[#allocation0] sm:$0x3]  }
   0xa   :  { %v21_v2 = vld [vmem:[#allocation0] sm:$0x3]   ;;  %10 = vrot.lane.b32.xlu0 %v9_v1, %s65_s0 }
   0xb   :  { %22 = vrot.lane.b32.xlu1 %v21_v2, %s66_s8  ;;  %v15_v3 = vld [vmem:[#allocation0] sm:$0x3]  }
   0xc   :  { %v27_v4 = vld [vmem:[#allocation0] sm:$0x3]  }
   0xd   :  { %v6_v5 = vld [vmem:[#allocation0] sm:$0x3]  }
   0xe   :  { %8 = vst.msk [vmem:[%s118_s1] ss:$8 sm:$0x3] %vm7_vm0, %v6_v5   ;;  %16 = vrot.lane.b32.xlu0 %v15_v3, %s67_s11  ;;  %v33_v6 = vld [vmem:[#allocation0] sm:$0x3]  }
   0xf   :  { %28 = vrot.lane.b32.xlu1 %v27_v4, %s68_s12  ;;  %v39_v7 = vld [vmem:[#allocation0] sm:$0x3]  }
  0x10   :  { %v45_v8 = vld [vmem:[#allocation0] sm:$0x3]  }
  0x12   :  { %34 = vrot.lane.b32.xlu0 %v33_v6, %s69_s13 }
  0x13   :  { %40 = vrot.lane.b32.xlu1 %v39_v7, %s70_s14 }
  0x16   :  { %46 = vrot.lane.b32.xlu0 %v45_v8, %s71_s15 }
  0x7c   :  { %v11_v9 = vpop.permute.xlu0 %10  }
  0x7d   :  { %v23_v10 = vpop.permute.xlu1 %22   ;;  %51 = vst.msk [vmem:[%s118_s1 + $0x1] ss:$8 sm:$0x3] %vm7_vm0, %v11_v9  }
  0x7e   :  { %53 = vst.msk [vmem:[%s118_s1 + $0x3] ss:$8 sm:$0x3] %vm7_vm0, %v23_v10  }
  0x80   :  { %v17_v11 = vpop.permute.xlu0 %16  }
  0x81   :  { %v29_v12 = vpop.permute.xlu1 %28   ;;  %52 = vst.msk [vmem:[%s118_s1 + $0x2] ss:$8 sm:$0x3] %vm7_vm0, %v17_v11  }
  0x82   :  { %54 = vst.msk [vmem:[%s118_s1 + $0x4] ss:$8 sm:$0x3] %vm7_vm0, %v29_v12  }
  0x84   :  { %v35_v13 = vpop.permute.xlu0 %34  }
  0x85   :  { %v41_v14 = vpop.permute.xlu1 %40   ;;  %55 = vst.msk [vmem:[%s118_s1 + $0x5] ss:$8 sm:$0x3] %vm7_vm0, %v35_v13  }
  0x86   :  { %56 = vst.msk [vmem:[%s118_s1 + $0x6] ss:$8 sm:$0x3] %vm7_vm0, %v41_v14  }
  0x88   :  { %v47_v15 = vpop.permute.xlu0 %46  }
  0x89   :  { %57 = vst.msk [vmem:[%s118_s1 + $0x7] ss:$8 sm:$0x3] %vm7_vm0, %v47_v15  }

// kernel: synthesis_network_forward.9
= control target key start
LH: loop header
LB: loop body
LE: loop exit
PB: predicated region body
PF: predicated region fallthrough
CT: control target
= control target key end

     0   :  { %s1019_s9 = smov 0   ;;  %s1359_s0 = inlined_call_operand.vmem [shape: f32[2,4,64,16], index: 0, kind: input, shape index: {}]   ;;  %s1360_s1 = inlined_call_operand.vmem [shape: f32[2,64,16], index: 1, kind: input, shape index: {}]   ;;  %s1361_s2 = inlined_call_operand.vmem [shape: f32[2,64,128], index: 2, kind: output, shape index: {}]  }
   0x1 LB: > { %s858_s10 = sadd.s32 4294967295, %s999_s9   ;;  %p862_p0 = scmp.ge.s32.totalorder %s999_s9, 1  ;;  %s999_s9 = sphi %s1019_s9, %s12_s9  }
   0x2   : > { %p122_p1 = scmp.lt.s32.totalorder %s999_s9, 3 }
   0x4   : > { %p123_p2 = pnand %p862_p0, %p122_p1 }
   0x5   : > { %p149_p3 = scmp.lt.s32.totalorder (!%p123_p2), %s858_s10, 1  ;;  %s1001_s15 = smov (!%p123_p2), 1   ;;  %v381_v24 = vlaneseq (!%p123_p2)  ;;  %v1003_v28 = vmov (!%p123_p2), 1.0|1.0   ;;  %vm276_vm3 = vcmask (!%p123_p2), 121856   ;;  %vm392_vm4 = vcmask (!%p123_p2), 130048  }
   0x6   : > { %126 = sbr.rel (%p123_p2) target bundleno = 734 (0x2de), region = 28  ;;  %s1002_s16 = smov (!%p123_p2), 127   ;;  %vm738_vm5 = vcmask (!%p123_p2), 138240   ;;  %vm747_vm6 = vcmask (!%p123_p2), 146432   ;;  %vm756_vm7 = vcmask (!%p123_p2), 154624   ;;  %vm765_vm8 = vcmask (!%p123_p2), 162816  }
   0x7   : > { %v382_v25 = vshrl.u32 (!%p123_p2), %v381_v24, 7  ;;  %v385_v27 = vand.u32 (!%p123_p2), 127, %v381_v24  ;;  %vm774_vm9 = vcmask (!%p123_p2), 171008  }
   0x9   : > { %v383_v26 = vadd.s32 (!%p123_p2), 8, %v382_v25  ;;  %vm386_vm0 = vcmp.lt.s32.totalorder (!%p123_p2), %v382_v25, %v385_v27 }
   0xb   : > { %vm387_vm1 = vcmp.lt.s32.totalorder (!%p123_p2), %v383_v26, %v385_v27 }
   0xc   : > { %vm912_vm2 = vmpackc.low (!%p123_p2), %vm387_vm1, %vm386_vm0 }
   0xd   : > { %s1363_s10 = smov (!%p149_p3, %s858_s10), 1  ;;  %913 = vmatprep.subr.msk.bf16.mxu0 %vm912_vm2, %v1003_v28  ;;  %916 = vmatprep.subr.msk.bf16.mxu1 %vm912_vm2, %v1003_v28 }
   0xe   : > { %s884_s11 = sshll.u32 %s1363_s10, 6  ;;  %915 = vmatpush3.bf16.msk.msra.mxu0 %vm912_vm2, %v1003_v28  ;;  %917 = vmatpush3.bf16.msk.msra.mxu1 %vm912_vm2, %v1003_v28  ;;  %s883_s17 = sshll.u32 %s1363_s10, 8 }
   0xf   : > { %s158_s14 = scalar_lea.vmem %s1360_s1, %s884_s11  ;;  %s1071_s20 = scalar_lea.vmem %s1359_s0, %s883_s17 }
  0x10   : > { %v1035_v0 = vld [vmem:[%s158_s14] sm:$0xff]  ;;  %v1037_v1 = vld [vmem:[%s158_s14 + $0x8] sm:$0xff]  ;;  %v1047_v4 = vld [vmem:[%s158_s14 + $0x10] sm:$0xff]  ;;  %s1293_s23 = scalar_lea.vmem %s1361_s2, %s884_s11 }
  0x11   : > { %212 = vrot.lane.b32.xlu0 %v1035_v0, %s1001_s15  ;;  %214 = vrot.lane.b32.xlu1 %v1037_v1, %s1001_s15  ;;  %v1041_v2 = vld [vmem:[%s158_s14 + $0x20] sm:$0xff]  ;;  %v1043_v3 = vld [vmem:[%s158_s14 + $0x28] sm:$0xff] }
  0x12   : > { %v1049_v5 = vld [vmem:[%s158_s14 + $0x30] sm:$0xff]  ;;  %v1053_v6 = vld [vmem:[%s158_s14 + $0x18] sm:$0xff]  ;;  %v188_v29 = vld [vmem:[%s1071_s20 + $0xc0] sm:$0xff] }
  0x13   : > { %v1055_v7 = vld [vmem:[%s158_s14 + $0x38] sm:$0xff]  ;;  %v285_v30 = vmax.f32 %v188_v29, 0.0  ;;  %v192_v31 = vld [vmem:[%s1071_s20 + $0xe0] sm:$0xff]  ;;  %v189_v32 = vld [vmem:[%s1071_s20 + $0xc8] sm:$0xff] }
  0x14   : > { %v289_v36 = vmax.f32 %v192_v31, 0.0  ;;  %v286_v37 = vmax.f32 %v189_v32, 0.0  ;;  %v193_v38 = vld [vmem:[%s1071_s20 + $0xe8] sm:$0xff]  ;;  %v190_v42 = vld [vmem:[%s1071_s20 + $0xd0] sm:$0xff]  ;;  %v191_v50 = vld [vmem:[%s1071_s20 + $0xd8] sm:$0xff] }
  0x15   : > { %220 = vrot.lane.b32.xlu0 %v1041_v2, %s1001_s15  ;;  %222 = vrot.lane.b32.xlu1 %v1043_v3, %s1001_s15  ;;  %v290_v48 = vmax.f32 %v193_v38, 0.0  ;;  %v194_v49 = vld [vmem:[%s1071_s20 + $0xf0] sm:$0xff]  ;;  %v287_v51 = vmax.f32 %v190_v42, 0.0  ;;  %v288_v60 = vmax.f32 %v191_v50, 0.0 }
  0x16   : > { %v291_v59 = vmax.f32 %v194_v49, 0.0 }
  0x19   : > { %216 = vrot.lane.b32.xlu0 %v1047_v4, %s1001_s15  ;;  %224 = vrot.lane.b32.xlu1 %v1049_v5, %s1001_s15 }
  0x1d   : > { %218 = vrot.lane.b32.xlu0 %v1053_v6, %s1001_s15  ;;  %226 = vrot.lane.b32.xlu1 %v1055_v7, %s1001_s15 }
  0x83   : > { %v213_v8 = vpop.permute.xlu0 %212  ;;  %v215_v9 = vpop.permute.xlu1 %214 }
  0x84   : > { %v236_v10 = vsub.f32 %v1035_v0, %v213_v8  ;;  %v237_v11 = vsub.f32 %v1037_v1, %v215_v9  ;;  %v195_v8 = vld [vmem:[%s1071_s20 + $0xf8] sm:$0xff] }
  0x86   : > { %252 = vrot.lane.b32.xlu0 %v236_v10, %s1002_s16 }
  0x87   : > { %v221_v12 = vpop.permute.xlu0 %220  ;;  %v223_v13 = vpop.permute.xlu1 %222 }
  0x88   : > { %v240_v14 = vsub.f32 %v1041_v2, %v221_v12  ;;  %v241_v15 = vsub.f32 %v1043_v3, %v223_v13 }
  0x8a   : > { %254 = vrot.lane.b32.xlu0 %v237_v11, %s1002_s16  ;;  %260 = vrot.lane.b32.xlu1 %v240_v14, %s1002_s16 }
  0x8b   : > { %v217_v16 = vpop.permute.xlu0 %216  ;;  %v225_v17 = vpop.permute.xlu1 %224 }
  0x8c   : > { %v238_v18 = vsub.f32 %v1047_v4, %v217_v16  ;;  %v242_v19 = vsub.f32 %v1049_v5, %v225_v17 }
  0x8e   : > { %262 = vrot.lane.b32.xlu1 %v241_v15, %s1002_s16  ;;  %256 = vrot.lane.b32.xlu0 %v238_v18, %s1002_s16  ;;  %v292_v18 = vmax.f32 %v195_v8, 0.0 }
  0x8f   : > { %v219_v20 = vpop.permute.xlu0 %218  ;;  %v227_v21 = vpop.permute.xlu1 %226 }
  0x90   : > { %v239_v22 = vsub.f32 %v1053_v6, %v219_v20  ;;  %v243_v23 = vsub.f32 %v1055_v7, %v227_v21 }
  0x92   : > { %264 = vrot.lane.b32.xlu1 %v242_v19, %s1002_s16  ;;  %258 = vrot.lane.b32.xlu0 %v239_v22, %s1002_s16 }
  0x96   : > { %266 = vrot.lane.b32.xlu1 %v243_v23, %s1002_s16 }
  0xf8   : > { %v253_v33 = vpop.permute.xlu0 %252 }
  0xf9   : > { %v277_v34 = vsel %vm276_vm3, %v253_v33, 1e+10 }
  0xfa   : > { %v293_v35 = vmul.f32 %v285_v30, %v277_v34 }
  0xfc   : > { %v301_v39 = vmin.f32 %v293_v35, 80.0  ;;  %v261_v40 = vpop.permute.xlu1 %260  ;;  %v255_v41 = vpop.permute.xlu0 %254 }
  0xfd   : > { %v281_v43 = vsel %vm276_vm3, %v261_v40, 1e+10  ;;  %v278_v44 = vsel %vm276_vm3, %v255_v41, 1e+10 }
  0xfe   : > { %v309_v45 = vsub.f32 0.0, %v301_v39  ;;  %v297_v46 = vmul.f32 %v289_v36, %v281_v43  ;;  %v294_v47 = vmul.f32 %v286_v37, %v278_v44 }
 0x100   : > { %v317_v52 = vmul.f32 1.442695, %v309_v45  ;;  %v305_v53 = vmin.f32 %v297_v46, 80.0  ;;  %v302_v54 = vmin.f32 %v294_v47, 80.0  ;;  %v263_v55 = vpop.permute.xlu1 %262  ;;  %v257_v56 = vpop.permute.xlu0 %256 }
 0x101   : > { %v282_v57 = vsel %vm276_vm3, %v263_v55, 1e+10  ;;  %v279_v58 = vsel %vm276_vm3, %v257_v56, 1e+10 }
 0x102   : > { %929 = vpow2.f32 %v317_v52  ;;  %v313_v61 = vsub.f32 0.0, %v305_v53  ;;  %v310_v62 = vsub.f32 0.0, %v302_v54  ;;  %v298_v63 = vmul.f32 %v290_v48, %v282_v57 }
 0x103   : > { %v295_v9 = vmul.f32 %v287_v51, %v279_v58 }
 0x104   : > { %v325_v10 = vmul.f32 1.442695, %v313_v61  ;;  %v319_v11 = vmul.f32 1.442695, %v310_v62  ;;  %v306_v12 = vmin.f32 %v298_v63, 80.0  ;;  %v265_v13 = vpop.permute.xlu1 %264  ;;  %v259_v14 = vpop.permute.xlu0 %258 }
 0x105   : > { %v303_v15 = vmin.f32 %v295_v9, 80.0  ;;  %v283_v16 = vsel %vm276_vm3, %v265_v13, 1e+10  ;;  %v280_v17 = vsel %vm276_vm3, %v259_v14, 1e+10 }
 0x106   : > { %931 = vpow2.f32 %v325_v10  ;;  %v314_v19 = vsub.f32 0.0, %v306_v12  ;;  %v299_v20 = vmul.f32 %v291_v59, %v283_v16  ;;  %v296_v21 = vmul.f32 %v288_v60, %v280_v17 }
 0x107   : > { %933 = vpow2.f32 %v319_v11  ;;  %v311_v22 = vsub.f32 0.0, %v303_v15 }
 0x108   : > { %v327_v23 = vmul.f32 1.442695, %v314_v19  ;;  %v307_v24 = vmin.f32 %v299_v20, 80.0  ;;  %v304_v25 = vmin.f32 %v296_v21, 80.0  ;;  %v267_v26 = vpop.permute.xlu1 %266 }
 0x109   : > { %v321_v27 = vmul.f32 1.442695, %v311_v22  ;;  %v284_v28 = vsel %vm276_vm3, %v267_v26, 1e+10 }
 0x10a   : > { %935 = vpow2.f32 %v327_v23  ;;  %v315_v29 = vsub.f32 0.0, %v307_v24  ;;  %v312_v30 = vsub.f32 0.0, %v304_v25  ;;  %v300_v31 = vmul.f32 %v292_v18, %v284_v28 }
 0x10b   : > { %937 = vpow2.f32 %v321_v27 }
 0x10c   : > { %v1089_v32 = vpop.eup %929  ;;  %v329_v33 = vmul.f32 1.442695, %v315_v29  ;;  %v323_v34 = vmul.f32 1.442695, %v312_v30  ;;  %v308_v35 = vmin.f32 %v300_v31, 80.0 }
 0x10d   : > { %v333_v36 = vsub.f32 1.0, %v1089_v32 }
 0x10e   : > { %939 = vpow2.f32 %v329_v33  ;;  %v316_v37 = vsub.f32 0.0, %v308_v35 }
 0x10f   : > { %941 = vpow2.f32 %v323_v34  ;;  %v341_v38 = vsub.f32 1.0, %v333_v36 }
 0x110   : > { %v1094_v39 = vpop.eup %931  ;;  %v331_v40 = vmul.f32 1.442695, %v316_v37 }
 0x111   : > { %v1096_v41 = vpop.eup %933  ;;  %v337_v42 = vsub.f32 1.0, %v1094_v39  ;;  %v349_v43 = vmax.f32 %v341_v38, 0.0 }
 0x112   : > { %v334_v44 = vsub.f32 1.0, %v1096_v41  ;;  %943 = vpow2.f32 %v331_v40 }
 0x113   : > { %v357_v45 = vadd.f32 1e-10, %v349_v43  ;;  %v345_v46 = vsub.f32 1.0, %v337_v42 }
 0x114   : > { %v1102_v47 = vpop.eup %935  ;;  %v342_v48 = vsub.f32 1.0, %v334_v44 }
 0x115   : > { %v1106_v49 = vpop.eup %937  ;;  %v338_v50 = vsub.f32 1.0, %v1102_v47  ;;  %945 = vlog2.f32 %v357_v45  ;;  %v353_v51 = vmax.f32 %v345_v46, 0.0 }
 0x116   : > { %v350_v52 = vmax.f32 %v342_v48, 0.0  ;;  %v335_v53 = vsub.f32 1.0, %v1106_v49 }
 0x117   : > { %v346_v54 = vsub.f32 1.0, %v338_v50  ;;  %v361_v55 = vadd.f32 1e-10, %v353_v51 }
 0x118   : > { %v1112_v56 = vpop.eup %939  ;;  %v358_v57 = vadd.f32 1e-10, %v350_v52  ;;  %v343_v58 = vsub.f32 1.0, %v335_v53 }
 0x119   : > { %v1116_v59 = vpop.eup %941  ;;  %v354_v60 = vmax.f32 %v346_v54, 0.0  ;;  %v339_v61 = vsub.f32 1.0, %v1112_v56  ;;  %947 = vlog2.f32 %v361_v55 }
 0x11a   : > { %949 = vlog2.f32 %v358_v57  ;;  %v336_v62 = vsub.f32 1.0, %v1116_v59  ;;  %v351_v63 = vmax.f32 %v343_v58, 0.0 }
 0x11b   : > { %v362_v8 = vadd.f32 1e-10, %v354_v60  ;;  %v347_v9 = vsub.f32 1.0, %v339_v61 }
 0x11c   : > { %v1122_v10 = vpop.eup %943  ;;  %v344_v11 = vsub.f32 1.0, %v336_v62  ;;  %v359_v12 = vadd.f32 1e-10, %v351_v63 }
 0x11d   : > { %951 = vlog2.f32 %v362_v8  ;;  %v355_v13 = vmax.f32 %v347_v9, 0.0  ;;  %v340_v14 = vsub.f32 1.0, %v1122_v10  ;;  %v170_v10 = vld [vmem:[%s1071_s20 + $0x30] sm:$0xff] }
 0x11e   : > { %v352_v15 = vmax.f32 %v344_v11, 0.0  ;;  %953 = vlog2.f32 %v359_v12 }
 0x11f   : > { %v946_v16 = vpop.eup %945  ;;  %v363_v17 = vadd.f32 1e-10, %v355_v13  ;;  %v348_v18 = vsub.f32 1.0, %v340_v14 }
 0x120   : > { %v360_v19 = vadd.f32 1e-10, %v352_v15  ;;  %v366_v20 = vmul.f32 0.6931472, %v946_v16 }
 0x121   : > { %955 = vlog2.f32 %v363_v17  ;;  %v356_v21 = vmax.f32 %v348_v18, 0.0 }
 0x122   : > { %957 = vlog2.f32 %v360_v19  ;;  %900 = vmatprep.mubr.msk.f32.mxu0 %vm392_vm4, %v366_v20  ;;  %v554_v22 = vsel %vm392_vm4, %v366_v20, 0.0 }
 0x123   : > { %v948_v23 = vpop.eup %947  ;;  %v364_v24 = vadd.f32 1e-10, %v356_v21  ;;  %555 = vadd.xlane.f32.xlu0 %v554_v22  ;;  %v165_v22 = vld [vmem:[%s1071_s20 + $0x8] sm:$0xff] }
 0x124   : > { %v950_v25 = vpop.eup %949  ;;  %v374_v26 = vmul.f32 0.6931472, %v948_v23 }
 0x125   : > { %959 = vlog2.f32 %v364_v24  ;;  %v368_v27 = vmul.f32 0.6931472, %v950_v25  ;;  %v164_v25 = vld [vmem:[%s1071_s20] sm:$0xff] }
 0x126   : > { %906 = vmatprep.mubr.msk.f32.mxu1 %vm392_vm4, %v374_v26  ;;  %v566_v35 = vsel %vm392_vm4, %v374_v26, 0.0 }
 0x127   : > { %v952_v28 = vpop.eup %951  ;;  %901 = vmatmul.mubr.msk.f32.vlgmr.msra.gmra.mrb[0].mxu0 %vm392_vm4, %v368_v27  ;;  %v557_v29 = vsel %vm392_vm4, %v368_v27, 0.0 }
 0x128   : > { %v954_v30 = vpop.eup %953  ;;  %558 = vadd.xlane.f32.xlu1 %v557_v29  ;;  %v376_v31 = vmul.f32 0.6931472, %v952_v28  ;;  %v169_v29 = vld [vmem:[%s1071_s20 + $0x28] sm:$0xff] }
 0x129   : > { %v370_v33 = vmul.f32 0.6931472, %v954_v30 }
 0x12a   : > { %907 = vmatmul.mubr.msk.f32.vlgmr.msra.gmra.mrb[0].mxu1 %vm392_vm4, %v376_v31  ;;  %v569_v52 = vsel %vm392_vm4, %v376_v31, 0.0 }
 0x12b   : > { %v956_v34 = vpop.eup %955  ;;  %v560_v37 = vsel %vm392_vm4, %v370_v33, 0.0  ;;  %903 = vmatprep.mubr.msk.f32.mxu0 %vm392_vm4, %v370_v33  ;;  %v168_v33 = vld [vmem:[%s1071_s20 + $0x20] sm:$0xff] }
 0x12c   : > { %v958_v38 = vpop.eup %957  ;;  %567 = vadd.xlane.f32.xlu1 %v566_v35  ;;  %561 = vadd.xlane.f32.xlu0 %v560_v37  ;;  %v378_v40 = vmul.f32 0.6931472, %v956_v34  ;;  %v173_v35 = vld [vmem:[%s1071_s20 + $0x48] sm:$0xff] }
 0x12d   : > { %v372_v43 = vmul.f32 0.6931472, %v958_v38 }
 0x12e   : > { %909 = vmatprep.mubr.msk.f32.mxu1 %vm392_vm4, %v378_v40  ;;  %v572_v45 = vsel %vm392_vm4, %v378_v40, 0.0 }
 0x12f   : > { %v960_v46 = vpop.eup %959  ;;  %904 = vmatmul.mubr.msk.f32.gmra.mrb[2].mxu0 %vm392_vm4, %v372_v43  ;;  %v563_v48 = vsel %vm392_vm4, %v372_v43, 0.0 }
 0x130   : > { %564 = vadd.xlane.f32.xlu0 %v563_v48  ;;  %v380_v51 = vmul.f32 0.6931472, %v960_v46  ;;  %573 = vadd.xlane.f32.xlu1 %v572_v45  ;;  %v177_v45 = vld [vmem:[%s1071_s20 + $0x68] sm:$0xff]  ;;  %v176_v46 = vld [vmem:[%s1071_s20 + $0x60] sm:$0xff] }
 0x132   : > { %910 = vmatmul.mubr.msk.f32.gmra.mrb[2].mxu1 %vm392_vm4, %v380_v51  ;;  %v575_v54 = vsel %vm392_vm4, %v380_v51, 0.0 }
 0x134   : > { %570 = vadd.xlane.f32.xlu0 %v569_v52 }
 0x138   : > { %576 = vadd.xlane.f32.xlu0 %v575_v54 }
 0x1fa   : > { %v902_v55 = vpop.f32.mrb[0].mxu0 }
 0x1fb   : > { %v523_v57 = vmin.f32 %v902_v55, 0.0  ;;  %v483_v58 = vpop.f32.mrb[1].mxu0 }
 0x1fc   : > { %v522_v60 = vmin.f32 %v483_v58, 0.0 }
 0x1fd   : > { %v532_v63 = vmul.f32 1.442695, %v523_v57  ;;  %v908_v8 = vpop.f32.mrb[0].mxu1 }
 0x1fe   : > { %v530_v9 = vmul.f32 1.442695, %v522_v60  ;;  %v527_v11 = vmin.f32 %v908_v8, 0.0  ;;  %v503_v12 = vpop.f32.mrb[1].mxu1  ;;  %v180_v8 = vld [vmem:[%s1071_s20 + $0x80] sm:$0xff] }
 0x1ff   : > { %961 = vpow2.f32 %v532_v63  ;;  %v526_v13 = vmin.f32 %v503_v12, 0.0  ;;  %v181_v63 = vld [vmem:[%s1071_s20 + $0x88] sm:$0xff] }
 0x200   : > { %963 = vpow2.f32 %v530_v9  ;;  %v540_v15 = vmul.f32 1.442695, %v527_v11 }
 0x201   : > { %v538_v16 = vmul.f32 1.442695, %v526_v13 }
 0x202   : > { %965 = vpow2.f32 %v540_v15  ;;  %v905_v17 = vpop.f32.mrb[2].mxu0 }
 0x203   : > { %967 = vpow2.f32 %v538_v16  ;;  %v493_v18 = vpop.f32.mrb[3].mxu0  ;;  %v525_v37 = vmin.f32 %v905_v17, 0.0  ;;  %v185_v17 = vld [vmem:[%s1071_s20 + $0xa8] sm:$0xff] }
 0x204   : > { %v524_v39 = vmin.f32 %v493_v18, 0.0  ;;  %v184_v18 = vld [vmem:[%s1071_s20 + $0xa0] sm:$0xff] }
 0x205   : > { %v911_v19 = vpop.f32.mrb[2].mxu1  ;;  %v536_v48 = vmul.f32 1.442695, %v525_v37  ;;  %v171_v37 = vld [vmem:[%s1071_s20 + $0x38] sm:$0xff] }
 0x206   : > { %v513_v20 = vpop.f32.mrb[3].mxu1  ;;  %v529_v51 = vmin.f32 %v911_v19, 0.0  ;;  %v534_v52 = vmul.f32 1.442695, %v524_v39 }
 0x207   : > { %v528_v54 = vmin.f32 %v513_v20, 0.0  ;;  %969 = vpow2.f32 %v536_v48  ;;  %v179_v48 = vld [vmem:[%s1071_s20 + $0x78] sm:$0xff] }
 0x208   : > { %v544_v9 = vmul.f32 1.442695, %v529_v51  ;;  %971 = vpow2.f32 %v534_v52  ;;  %v178_v51 = vld [vmem:[%s1071_s20 + $0x70] sm:$0xff] }
 0x209   : > { %v962_v21 = vpop.eup %961  ;;  %v542_v11 = vmul.f32 1.442695, %v528_v54 }
 0x20a   : > { %v964_v23 = vpop.eup %963  ;;  %v1148_v24 = vmul.f32 %v962_v21, %v334_v44  ;;  %973 = vpow2.f32 %v544_v9 }
 0x20b   : > { %v1153_v26 = vmul.f32 %v964_v23, %v333_v36  ;;  %975 = vpow2.f32 %v542_v11 }
 0x20c   : > { %v966_v27 = vpop.eup %965  ;;  %v603_v28 = vmul.f32 %v1148_v24, %v165_v22  ;;  %v635_v40 = vmul.f32 %v1148_v24, %v173_v35  ;;  %v667_v13 = vmul.f32 %v1148_v24, %v181_v63  ;;  %v166_v35 = vld [vmem:[%s1071_s20 + $0x10] sm:$0xff] }
 0x20d   : > { %v968_v30 = vpop.eup %967  ;;  %v1159_v31 = vmul.f32 %v966_v27, %v338_v50  ;;  %v602_v41 = vmul.f32 %v1153_v26, %v164_v25  ;;  %v172_v50 = vld [vmem:[%s1071_s20 + $0x40] sm:$0xff]  ;;  %v666_v16 = vmul.f32 %v1153_v26, %v180_v8  ;;  %v699_v25 = vmul.f32 %v1148_v24, %v1037_v1 }
 0x20e   : > { %v1165_v44 = vmul.f32 %v968_v30, %v337_v42  ;;  %v613_v32 = vsel %vm392_vm4, %v603_v28, 0.0  ;;  %v634_v43 = vmul.f32 %v1153_v26, %v172_v50  ;;  %v645_v55 = vsel %vm392_vm4, %v635_v40, 0.0 }
 0x20f   : > { %614 = vadd.xlane.f32.xlu0 %v613_v32  ;;  %v610_v36 = vsel %vm392_vm4, %v602_v41, 0.0  ;;  %v607_v34 = vmul.f32 %v1159_v31, %v169_v29  ;;  %v639_v57 = vmul.f32 %v1159_v31, %v177_v45  ;;  %v677_v19 = vsel %vm392_vm4, %v667_v13, 0.0  ;;  %v186_v13 = vld [vmem:[%s1071_s20 + $0xb0] sm:$0xff] }
 0x210   : > { %611 = vadd.xlane.f32.xlu1 %v610_v36  ;;  %v606_v47 = vmul.f32 %v1165_v44, %v168_v33  ;;  %v642_v58 = vsel %vm392_vm4, %v634_v43, 0.0  ;;  %v638_v60 = vmul.f32 %v1165_v44, %v176_v46  ;;  %v671_v20 = vmul.f32 %v1159_v31, %v185_v17 }
 0x211   : > { %v625_v38 = vsel %vm392_vm4, %v607_v34, 0.0  ;;  %v657_v12 = vsel %vm392_vm4, %v639_v57, 0.0  ;;  %v674_v21 = vsel %vm392_vm4, %v666_v16, 0.0  ;;  %v670_v22 = vmul.f32 %v1165_v44, %v184_v18  ;;  %v970_v27 = vpop.eup %969 }
 0x212   : > { %v622_v42 = vsel %vm392_vm4, %v606_v47, 0.0  ;;  %v654_v15 = vsel %vm392_vm4, %v638_v60, 0.0  ;;  %v689_v23 = vsel %vm392_vm4, %v671_v20, 0.0  ;;  %v698_v29 = vmul.f32 %v1153_v26, %v1035_v0  ;;  %v972_v30 = vpop.eup %971  ;;  %v182_v60 = vld [vmem:[%s1071_s20 + $0x90] sm:$0xff] }
 0x213   : > { %626 = vadd.xlane.f32.xlu0 %v625_v38  ;;  %v686_v28 = vsel %vm392_vm4, %v670_v22, 0.0  ;;  %v1203_v41 = vmul.f32 %v970_v27, %v336_v62  ;;  %v709_v33 = vsel %vm392_vm4, %v699_v25, 0.0  ;;  %v703_v32 = vmul.f32 %v1159_v31, %v1043_v3  ;;  %v167_v62 = vld [vmem:[%s1071_s20 + $0x18] sm:$0xff] }
 0x214   : > { %623 = vadd.xlane.f32.xlu1 %v622_v42  ;;  %v974_v1 = vpop.eup %973  ;;  %v1210_v36 = vmul.f32 %v972_v30, %v335_v53  ;;  %v706_v0 = vsel %vm392_vm4, %v698_v29, 0.0  ;;  %v702_v59 = vmul.f32 %v1165_v44, %v1041_v2  ;;  %v174_v42 = vld [vmem:[%s1071_s20 + $0x50] sm:$0xff] }
 0x215   : > { %v976_v34 = vpop.eup %975  ;;  %v1219_v3 = vmul.f32 %v974_v1, %v340_v14  ;;  %v721_v49 = vsel %vm392_vm4, %v703_v32, 0.0  ;;  %v605_v53 = vmul.f32 %v1203_v41, %v167_v62  ;;  %v701_v20 = vmul.f32 %v1203_v41, %v1053_v6  ;;  %v559_v32 = vpop.xlane.xlu1 %558 }
 0x216   : > { %v1225_v47 = vmul.f32 %v976_v34, %v339_v61  ;;  %v718_v2 = vsel %vm392_vm4, %v702_v59, 0.0  ;;  %v604_v50 = vmul.f32 %v1210_v36, %v166_v35  ;;  %v175_v61 = vld [vmem:[%s1071_s20 + $0x58] sm:$0xff]  ;;  %v636_v46 = vmul.f32 %v1210_v36, %v174_v42 }
 0x217   : > { %646 = vadd.xlane.f32.xlu0 %v645_v55  ;;  %v619_v14 = vsel %vm392_vm4, %v605_v53, 0.0  ;;  %v609_v38 = vmul.f32 %v1219_v3, %v171_v37  ;;  %v637_v43 = vmul.f32 %v1203_v41, %v175_v61  ;;  %v641_v54 = vmul.f32 %v1219_v3, %v179_v48 }
 0x218   : > { %643 = vadd.xlane.f32.xlu1 %v642_v58  ;;  %v616_v39 = vsel %vm392_vm4, %v604_v50, 0.0  ;;  %v608_v56 = vmul.f32 %v1225_v47, %v170_v10  ;;  %v648_v55 = vsel %vm392_vm4, %v636_v46, 0.0  ;;  %v640_v57 = vmul.f32 %v1225_v47, %v178_v51  ;;  %v183_v58 = vld [vmem:[%s1071_s20 + $0x98] sm:$0xff] }
 0x219   : > { %v631_v40 = vsel %vm392_vm4, %v609_v38, 0.0  ;;  %v651_v52 = vsel %vm392_vm4, %v637_v43, 0.0  ;;  %v663_v63 = vsel %vm392_vm4, %v641_v54, 0.0  ;;  %v669_v8 = vmul.f32 %v1203_v41, %v183_v58  ;;  %v568_v1 = vpop.xlane.xlu1 %567 }
 0x21a   : > { %v628_v45 = vsel %vm392_vm4, %v608_v56, 0.0  ;;  %v660_v9 = vsel %vm392_vm4, %v640_v57, 0.0  ;;  %v668_v11 = vmul.f32 %v1210_v36, %v182_v60  ;;  %v672_v18 = vmul.f32 %v1225_v47, %v186_v13 }
 0x21b   : > { %658 = vadd.xlane.f32.xlu0 %v657_v12  ;;  %v187_v12 = vld [vmem:[%s1071_s20 + $0xb8] sm:$0xff]  ;;  %v700_v22 = vmul.f32 %v1210_v36, %v1047_v4  ;;  %v705_v25 = vmul.f32 %v1219_v3, %v1055_v7  ;;  %v556_v4 = vpop.xlane.xlu0 %555  ;;  %v582_v38 = vmin.f32 %v568_v1, 0.0 }
 0x21c   : > { %655 = vadd.xlane.f32.xlu1 %v654_v15  ;;  %v683_v15 = vsel %vm392_vm4, %v669_v8, 0.0  ;;  %v673_v16 = vmul.f32 %v1219_v3, %v187_v12  ;;  %v680_v17 = vsel %vm392_vm4, %v668_v11, 0.0  ;;  %v578_v53 = vmin.f32 %v556_v4, 0.0 }
 0x21d   : > { %v712_v27 = vsel %vm392_vm4, %v700_v22, 0.0  ;;  %v727_v6 = vsel %vm392_vm4, %v705_v25, 0.0  ;;  %v1279_v59 = vpop.xlane.xlu1 %573  ;;  %v594_v42 = vmul.f32 1.442695, %v582_v38 }
 0x21f   : > { %678 = vadd.xlane.f32.xlu0 %v677_v19  ;;  %v695_v19 = vsel %vm392_vm4, %v673_v16, 0.0  ;;  %v1273_v30 = vpop.xlane.xlu0 %561 }
 0x220   : > { %675 = vadd.xlane.f32.xlu1 %v674_v21  ;;  %v692_v21 = vsel %vm392_vm4, %v672_v18, 0.0 }
 0x223   : > { %690 = vadd.xlane.f32.xlu0 %v689_v23  ;;  %v715_v23 = vsel %vm392_vm4, %v701_v20, 0.0 }
 0x224   : > { %687 = vadd.xlane.f32.xlu1 %v686_v28  ;;  %v704_v28 = vmul.f32 %v1225_v47, %v1049_v5 }
 0x226   : > { %v724_v29 = vsel %vm392_vm4, %v704_v28, 0.0 }
 0x227   : > { %710 = vadd.xlane.f32.xlu0 %v709_v33  ;;  %v1275_v33 = vpop.xlane.xlu0 %564 }
 0x228   : > { %707 = vadd.xlane.f32.xlu1 %v706_v0 }
 0x22b   : > { %722 = vadd.xlane.f32.xlu0 %v721_v49  ;;  %v571_v7 = vpop.xlane.xlu0 %570  ;;  %v579_v49 = vmin.f32 %v559_v32, 0.0 }
 0x22c   : > { %719 = vadd.xlane.f32.xlu1 %v718_v2  ;;  %v583_v10 = vmin.f32 %v571_v7, 0.0 }
 0x22d   : > { %v588_v37 = vmul.f32 1.442695, %v579_v49 }
 0x22e   : > { %v596_v61 = vmul.f32 1.442695, %v583_v10 }
 0x22f   : > { %620 = vadd.xlane.f32.xlu0 %v619_v14  ;;  %v1277_v0 = vpop.xlane.xlu0 %576  ;;  %v586_v14 = vmul.f32 1.442695, %v578_v53  ;;  %977 = vpow2.f32 %v588_v37 }
 0x230   : > { %617 = vadd.xlane.f32.xlu1 %v616_v39  ;;  %v585_v53 = vmin.f32 %v1277_v0, 0.0 }
 0x231   : > { %979 = vpow2.f32 %v586_v14 }
 0x232   : > { %981 = vpow2.f32 %v596_v61  ;;  %v600_v14 = vmul.f32 1.442695, %v585_v53 }
 0x233   : > { %632 = vadd.xlane.f32.xlu0 %v631_v40  ;;  %983 = vpow2.f32 %v594_v42 }
 0x234   : > { %629 = vadd.xlane.f32.xlu1 %v628_v45 }
 0x237   : > { %652 = vadd.xlane.f32.xlu0 %v651_v52 }
 0x238   : > { %649 = vadd.xlane.f32.xlu1 %v648_v55 }
 0x239   : > { %v978_v58 = vpop.eup %977 }
 0x23b   : > { %664 = vadd.xlane.f32.xlu0 %v663_v63  ;;  %v980_v63 = vpop.eup %979 }
 0x23c   : > { %661 = vadd.xlane.f32.xlu1 %v660_v9  ;;  %v982_v20 = vpop.eup %981 }
 0x23f   : > { %684 = vadd.xlane.f32.xlu0 %v683_v15 }
 0x240   : > { %681 = vadd.xlane.f32.xlu1 %v680_v17 }
 0x243   : > { %696 = vadd.xlane.f32.xlu0 %v695_v19 }
 0x244   : > { %693 = vadd.xlane.f32.xlu1 %v692_v21 }
 0x247   : > { %716 = vadd.xlane.f32.xlu0 %v715_v23  ;;  %v984_v23 = vpop.eup %983 }
 0x248   : > { %713 = vadd.xlane.f32.xlu1 %v712_v27 }
 0x24b   : > { %728 = vadd.xlane.f32.xlu0 %v727_v6 }
 0x24c   : > { %725 = vadd.xlane.f32.xlu1 %v724_v29 }
 0x29c   : > { %v615_v5 = vpop.xlane.xlu0 %614 }
 0x29d   : > { %v612_v62 = vpop.xlane.xlu1 %611  ;;  %v731_v48 = vsel %vm392_vm4, %v1148_v24, %v615_v5  ;;  %v581_v5 = vmin.f32 %v1275_v33, 0.0 }
 0x29e   : > { %v730_v51 = vsel %vm392_vm4, %v1153_v26, %v612_v62  ;;  %v580_v62 = vmin.f32 %v1273_v30, 0.0 }
 0x29f   : > { %v592_v49 = vmul.f32 1.442695, %v581_v5 }
 0x2a0   : > { %v627_v34 = vpop.xlane.xlu0 %626 }
 0x2a1   : > { %v624_v35 = vpop.xlane.xlu1 %623  ;;  %v735_v8 = vsel %vm392_vm4, %v1159_v31, %v627_v34  ;;  %985 = vpow2.f32 %v592_v49 }
 0x2a2   : > { %v734_v12 = vsel %vm392_vm4, %v1165_v44, %v624_v35 }
 0x2a4   : > { %v647_v2 = vpop.xlane.xlu0 %646 }
 0x2a5   : > { %v644_v50 = vpop.xlane.xlu1 %643  ;;  %v740_v52 = vsel %vm738_vm5, %v731_v48, %v647_v2  ;;  %v590_v2 = vmul.f32 1.442695, %v580_v62 }
 0x2a6   : > { %v739_v54 = vsel %vm738_vm5, %v730_v51, %v644_v50  ;;  %v584_v50 = vmin.f32 %v1279_v59, 0.0 }
 0x2a7   : > { %987 = vpow2.f32 %v590_v2 }
 0x2a8   : > { %v659_v39 = vpop.xlane.xlu0 %658  ;;  %v598_v38 = vmul.f32 1.442695, %v584_v50  ;;  %989 = vpow2.f32 %v600_v14 }
 0x2a9   : > { %v656_v56 = vpop.xlane.xlu1 %655  ;;  %v744_v13 = vsel %vm738_vm5, %v735_v8, %v659_v39 }
 0x2aa   : > { %v743_v17 = vsel %vm738_vm5, %v734_v12, %v656_v56  ;;  %991 = vpow2.f32 %v598_v38 }
 0x2ac   : > { %v679_v40 = vpop.xlane.xlu0 %678 }
 0x2ad   : > { %v676_v43 = vpop.xlane.xlu1 %675  ;;  %v749_v55 = vsel %vm747_vm6, %v740_v52, %v679_v40 }
 0x2ae   : > { %v748_v24 = vsel %vm747_vm6, %v739_v54, %v676_v43 }
 0x2b0   : > { %v691_v45 = vpop.xlane.xlu0 %690 }
 0x2b1   : > { %v688_v46 = vpop.xlane.xlu1 %687  ;;  %v753_v18 = vsel %vm747_vm6, %v744_v13, %v691_v45  ;;  %v986_v45 = vpop.eup %985 }
 0x2b2   : > { %v752_v21 = vsel %vm747_vm6, %v743_v17, %v688_v46  ;;  %v988_v52 = vpop.eup %987 }
 0x2b3   : > { %v990_v8 = vpop.eup %989 }
 0x2b4   : > { %v711_v57 = vpop.xlane.xlu0 %710  ;;  %v992_v12 = vpop.eup %991 }
 0x2b5   : > { %v758_v26 = vsel %vm756_vm7, %v749_v55, %v711_v57  ;;  %v708_v60 = vpop.xlane.xlu1 %707 }
 0x2b6   : > { %v767_v9 = vsel %vm765_vm8, %v758_v26, %v978_v58  ;;  %v757_v11 = vsel %vm756_vm7, %v748_v24, %v708_v60 }
 0x2b7   : > { %v776_v15 = vsel %vm774_vm9, %v767_v9, 0.0  ;;  %v766_v16 = vsel %vm765_vm8, %v757_v11, %v980_v63 }
 0x2b8   : > { %784 = vst [vmem:[%s1293_s23 + $0x8] sm:$0xff] %v776_v15  ;;  %v775_v31 = vsel %vm774_vm9, %v766_v16, 0.0  ;;  %v723_v19 = vpop.xlane.xlu0 %722 }
 0x2b9   : > { %783 = vst [vmem:[%s1293_s23] sm:$0xff] %v775_v31  ;;  %v762_v44 = vsel %vm756_vm7, %v753_v18, %v723_v19  ;;  %v720_v22 = vpop.xlane.xlu1 %719 }
 0x2ba   : > { %v771_v25 = vsel %vm765_vm8, %v762_v44, %v982_v20  ;;  %v761_v27 = vsel %vm756_vm7, %v752_v21, %v720_v22 }
 0x2bb   : > { %v780_v28 = vsel %vm774_vm9, %v771_v25, 0.0  ;;  %v770_v6 = vsel %vm765_vm8, %v761_v27, %v984_v23 }
 0x2bc   : > { %788 = vst [vmem:[%s1293_s23 + $0x28] sm:$0xff] %v780_v28  ;;  %v779_v29 = vsel %vm774_vm9, %v770_v6, 0.0  ;;  %v621_v4 = vpop.xlane.xlu0 %620 }
 0x2bd   : > { %787 = vst [vmem:[%s1293_s23 + $0x20] sm:$0xff] %v779_v29  ;;  %v618_v32 = vpop.xlane.xlu1 %617  ;;  %v733_v61 = vsel %vm392_vm4, %v1203_v41, %v621_v4 }
 0x2be   : > { %v732_v0 = vsel %vm392_vm4, %v1210_v36, %v618_v32 }
 0x2c0   : > { %v633_v7 = vpop.xlane.xlu0 %632 }
 0x2c1   : > { %v630_v1 = vpop.xlane.xlu1 %629  ;;  %v737_v41 = vsel %vm392_vm4, %v1219_v3, %v633_v7 }
 0x2c2   : > { %v736_v55 = vsel %vm392_vm4, %v1225_v47, %v630_v1 }
 0x2c4   : > { %v653_v34 = vpop.xlane.xlu0 %652 }
 0x2c5   : > { %v650_v35 = vpop.xlane.xlu1 %649  ;;  %v742_v59 = vsel %vm738_vm5, %v733_v61, %v653_v34 }
 0x2c6   : > { %v741_v42 = vsel %vm738_vm5, %v732_v0, %v650_v35 }
 0x2c8   : > { %v665_v37 = vpop.xlane.xlu0 %664 }
 0x2c9   : > { %v662_v10 = vpop.xlane.xlu1 %661  ;;  %v746_v57 = vsel %vm738_vm5, %v737_v41, %v665_v37 }
 0x2ca   : > { %v745_v26 = vsel %vm738_vm5, %v736_v55, %v662_v10 }
 0x2cc   : > { %v685_v39 = vpop.xlane.xlu0 %684 }
 0x2cd   : > { %v682_v56 = vpop.xlane.xlu1 %681  ;;  %v751_v40 = vsel %vm747_vm6, %v742_v59, %v685_v39 }
 0x2ce   : > { %v750_v46 = vsel %vm747_vm6, %v741_v42, %v682_v56 }
 0x2d0   : > { %v697_v33 = vpop.xlane.xlu0 %696 }
 0x2d1   : > { %v694_v30 = vpop.xlane.xlu1 %693  ;;  %v755_v60 = vsel %vm747_vm6, %v746_v57, %v697_v33 }
 0x2d2   : > { %v754_v9 = vsel %vm747_vm6, %v745_v26, %v694_v30 }
 0x2d4   : > { %v717_v43 = vpop.xlane.xlu0 %716 }
 0x2d5   : > { %v760_v48 = vsel %vm756_vm7, %v751_v40, %v717_v43  ;;  %v714_v51 = vpop.xlane.xlu1 %713 }
 0x2d6   : > { %v769_v36 = vsel %vm765_vm8, %v760_v48, %v986_v45  ;;  %v759_v54 = vsel %vm756_vm7, %v750_v46, %v714_v51 }
 0x2d7   : > { %v778_v58 = vsel %vm774_vm9, %v769_v36, 0.0  ;;  %v768_v24 = vsel %vm765_vm8, %v759_v54, %v988_v52 }
 0x2d8   : > { %786 = vst [vmem:[%s1293_s23 + $0x18] sm:$0xff] %v778_v58  ;;  %v777_v3 = vsel %vm774_vm9, %v768_v24, 0.0  ;;  %v729_v63 = vpop.xlane.xlu0 %728 }
 0x2d9   : > { %785 = vst [vmem:[%s1293_s23 + $0x10] sm:$0xff] %v777_v3  ;;  %v764_v47 = vsel %vm756_vm7, %v755_v60, %v729_v63  ;;  %v726_v11 = vpop.xlane.xlu1 %725 }
 0x2da   : > { %v773_v13 = vsel %vm765_vm8, %v764_v47, %v990_v8  ;;  %v763_v15 = vsel %vm756_vm7, %v754_v9, %v726_v11 }
 0x2db   : > { %v782_v16 = vsel %vm774_vm9, %v773_v13, 0.0  ;;  %v772_v17 = vsel %vm765_vm8, %v763_v15, %v992_v12 }
 0x2dc   : > { %790 = vst [vmem:[%s1293_s23 + $0x38] sm:$0xff] %v782_v16  ;;  %v781_v18 = vsel %vm774_vm9, %v772_v17, 0.0 }
 0x2dd   : > { %789 = vst [vmem:[%s1293_s23 + $0x30] sm:$0xff] %v781_v18 }
 0x2de PF: > { %s12_s9 = sadd.s32 1, %s999_s9  }
 0x2df   : > { %p9_p4 = scmp.ge.s32.totalorder %s12_s9, 4  }
 0x2e1   :  { %11 = sbr.rel (!%p9_p4) target bundleno = 1 (0x1), region = 61 }

</bundles_post_ra>
